<compile_context>
chip_gen: v5e
topology: v5e:2x2
jax: 0.10.0
libtpu: 0.0.40
codegen_flags: <defaults>
</compile_context>

<pallas_src>
import functools
import math

import jax
import jax.numpy as jnp
from jax.experimental import pallas as pl
from jax.experimental.pallas import tpu as pltpu


def _layernorm(x, gamma, beta, eps=1e-5):
    mu = jnp.mean(x, axis=-1, keepdims=True)
    xc = x - mu
    var = jnp.mean(xc * xc, axis=-1, keepdims=True)
    return xc * jax.lax.rsqrt(var + eps) * gamma + beta


def _encoder_kernel(x_ref,
                    ln1_g_ref, ln1_b_ref, wqkv_ref, bqkv_ref, wo_ref, bo_ref,
                    ln2_g_ref, ln2_b_ref, w1_ref, b1_ref, w2_ref, b2_ref,
                    out_ref, *, num_heads, head_dim):
    layer = pl.program_id(1)
    _, S, H = x_ref.shape

    # The output block index only depends on the batch grid axis, so out_ref
    # stays resident in VMEM across all layers: use it as the f32 residual
    # carry.  Initialize it from the input on the first layer.
    @pl.when(layer == 0)
    def _():
        out_ref[...] = x_ref[...].astype(jnp.float32)

    x = out_ref[...].reshape(S, H)                           # (S, H) f32

    # ---------------- attention sub-block ----------------
    xn = _layernorm(x, ln1_g_ref[0], ln1_b_ref[0])

    # One wide bf16 MXU matmul produces Q|K|V for all heads (f32 accumulate).
    qkv = jnp.dot(xn.astype(jnp.bfloat16), wqkv_ref[0],
                  preferred_element_type=jnp.float32) + bqkv_ref[0]
    qkv = qkv.astype(jnp.bfloat16)

    # Grouped layout -> lane-aligned 256-wide slices; 1/sqrt(d) is already
    # folded into the Q columns by the wrapper.
    q = qkv[:, 0 * H:1 * H].reshape(S, num_heads, head_dim)
    k = qkv[:, 1 * H:2 * H].reshape(S, num_heads, head_dim)
    v = qkv[:, 2 * H:3 * H].reshape(S, num_heads, head_dim)

    # All heads at once (batched over h), f32 softmax with exact division.
    s = jnp.einsum('qhd,khd->hqk', q, k,
                   preferred_element_type=jnp.float32)       # (h, S, S) f32
    m = jnp.max(s, axis=-1, keepdims=True)
    e = jnp.exp(s - m)
    p = e / jnp.sum(e, axis=-1, keepdims=True)
    # TODO(synk): attention-probs / hidden dropout are eval-mode identities.

    ho = jnp.einsum('hqk,khd->qhd', p.astype(jnp.bfloat16), v,
                    preferred_element_type=jnp.float32)      # (S, h, d) f32

    # concat over heads (lane-dense) + ONE K=256 output projection.
    attn = jnp.dot(ho.reshape(S, H).astype(jnp.bfloat16), wo_ref[0],
                   preferred_element_type=jnp.float32) + bo_ref[0]

    x = x + attn                                             # residual 1

    # ---------------- MLP sub-block ----------------
    xn2 = _layernorm(x, ln2_g_ref[0], ln2_b_ref[0])
    h1 = jnp.dot(xn2.astype(jnp.bfloat16), w1_ref[0],
                 preferred_element_type=jnp.float32) + b1_ref[0]
    act = h1 * jax.nn.sigmoid(1.702 * h1)                    # NewGELUActivation
    h2 = jnp.dot(act.astype(jnp.bfloat16), w2_ref[0],
                 preferred_element_type=jnp.float32) + b2_ref[0]

    x = x + h2                                               # residual 2
    out_ref[...] = x.reshape(1, S, H)                        # carry / final value


def encoder_forward(x, params, *, num_heads):
    """x: (B, S, H). params: per-layer-stacked f32 weights (leading L axis).

    Returns (output, None) mirroring Encoder.forward(..., output_attentions=False).
    """
    B, S, H = x.shape
    L = params['wq'].shape[0]
    head_dim = H // num_heads
    scale = 1.0 / math.sqrt(head_dim)

    # Wrapper-side weight prep: grouped Q|K|V layout, fold the attention
    # scale into the Q columns, cast the matmul weights to bf16.
    wqkv = jnp.concatenate(
        [params['wq'] * scale, params['wk'], params['wv']], axis=-1
    ).astype(jnp.bfloat16)                                   # (L, H, 3H)
    bqkv = jnp.concatenate(
        [params['bq'] * scale, params['bk'], params['bv']], axis=-1)  # f32
    wo = params['wo'].astype(jnp.bfloat16)
    w1 = params['w1'].astype(jnp.bfloat16)
    w2 = params['w2'].astype(jnp.bfloat16)

    args = [params['ln1_g'], params['ln1_b'], wqkv, bqkv, wo, params['bo'],
            params['ln2_g'], params['ln2_b'], w1, params['b1'], w2, params['b2']]

    def layer_spec(arr):
        return pl.BlockSpec((1,) + arr.shape[1:], lambda b, l: (l, 0, 0))

    x_spec = pl.BlockSpec((1, S, H), lambda b, l: (b, 0, 0))
    out_spec = pl.BlockSpec((1, S, H), lambda b, l: (b, 0, 0))

    kernel = functools.partial(_encoder_kernel, num_heads=num_heads,
                               head_dim=head_dim)

    out = pl.pallas_call(
        kernel,
        out_shape=jax.ShapeDtypeStruct((B, S, H), jnp.float32),
        grid=(B, L),
        in_specs=[x_spec] + [layer_spec(a) for a in args],
        out_specs=out_spec,
        compiler_params=pltpu.CompilerParams(
            # batch is independent (shards across TCs on v7x); layers are
            # sequential (residual carry).
            dimension_semantics=("parallel", "arbitrary"),
        ),
    )(x, *args)
    return out, None


def reference_encoder(x, params, *, num_heads):
    """Pure-JAX f32 reference matching the PyTorch Encoder forward (eval mode)."""
    H = x.shape[-1]
    d = H // num_heads
    L = params['wq'].shape[0]
    for l in range(L):
        xn = _layernorm(x, params['ln1_g'][l], params['ln1_b'][l])
        q_all = xn @ params['wq'][l] + params['bq'][l]
        k_all = xn @ params['wk'][l] + params['bk'][l]
        v_all = xn @ params['wv'][l] + params['bv'][l]
        heads = []
        for h in range(num_heads):
            sl = slice(h * d, (h + 1) * d)
            q, k, v = q_all[..., sl], k_all[..., sl], v_all[..., sl]
            s = jnp.einsum('bqd,bkd->bqk', q, k) / math.sqrt(d)
            p = jax.nn.softmax(s, axis=-1)
            heads.append(jnp.einsum('bqk,bkd->bqd', p, v))
        cat = jnp.concatenate(heads, axis=-1)
        x = x + (cat @ params['wo'][l] + params['bo'][l])
        xn2 = _layernorm(x, params['ln2_g'][l], params['ln2_b'][l])
        h1 = xn2 @ params['w1'][l] + params['b1'][l]
        act = h1 * jax.nn.sigmoid(1.702 * h1)
        x = x + (act @ params['w2'][l] + params['b2'][l])
    return x


if __name__ == "__main__":
    # Shapes implied by the config: hidden=256, 4 heads, intermediate=1024,
    # 12 layers; seq = (image_size/patch_size)^2 = 64; small batch=2.
    B, S, H = 2, 64, 256
    num_heads, L, I = 4, 12, 1024

    key = jax.random.PRNGKey(0)
    ks = jax.random.split(key, 17)
    init = 0.02
    params = {
        'ln1_g': 1.0 + init * jax.random.normal(ks[1], (L, 1, H), jnp.float32),
        'ln1_b': init * jax.random.normal(ks[2], (L, 1, H), jnp.float32),
        # per-head q/k/v Linears, stacked; columns grouped by head
        # (column h*head_dim + j  <->  head h, dim j).
        'wq': init * jax.random.normal(ks[3], (L, H, H), jnp.float32),
        'wk': init * jax.random.normal(ks[4], (L, H, H), jnp.float32),
        'wv': init * jax.random.normal(ks[5], (L, H, H), jnp.float32),
        'bq': init * jax.random.normal(ks[6], (L, 1, H), jnp.float32),
        'bk': init * jax.random.normal(ks[7], (L, 1, H), jnp.float32),
        'bv': init * jax.random.normal(ks[8], (L, 1, H), jnp.float32),
        'wo': init * jax.random.normal(ks[9], (L, H, H), jnp.float32),
        'bo': init * jax.random.normal(ks[10], (L, 1, H), jnp.float32),
        'ln2_g': 1.0 + init * jax.random.normal(ks[11], (L, 1, H), jnp.float32),
        'ln2_b': init * jax.random.normal(ks[12], (L, 1, H), jnp.float32),
        'w1': init * jax.random.normal(ks[13], (L, H, I), jnp.float32),
        'b1': init * jax.random.normal(ks[14], (L, 1, I), jnp.float32),
        'w2': init * jax.random.normal(ks[15], (L, I, H), jnp.float32),
        'b2': init * jax.random.normal(ks[16], (L, 1, H), jnp.float32),
    }
    x = jax.random.normal(ks[0], (B, S, H), jnp.float32)

    out, attn_maps = encoder_forward(x, params, num_heads=num_heads)
    jax.block_until_ready(out)

    ref = reference_encoder(x, params, num_heads=num_heads)
    err = float(jnp.max(jnp.abs(out - ref)))

    assert out.shape == (B, S, H)
    assert attn_maps is None
    # Tolerance accounts for bf16 weight/activation matmul operands
    # (f32 accumulation, f32 LayerNorm/softmax/residual) across 12 layers.
    assert err < 5e-2, f"max abs error {err}"
    print("KERNEL_OK")
</pallas_src>

<mosaic_0001>
module attributes {stable_mosaic.version = 11 : i64} {
  func.func @_encoder_kernel(%arg0: i32, %arg1: i32, %arg2: memref<1x64x256xf32, #tpu.memory_space<vmem>>, %arg3: memref<1x1x256xf32, #tpu.memory_space<vmem>>, %arg4: memref<1x1x256xf32, #tpu.memory_space<vmem>>, %arg5: memref<1x256x768xbf16, #tpu.memory_space<vmem>>, %arg6: memref<1x1x768xf32, #tpu.memory_space<vmem>>, %arg7: memref<1x256x256xbf16, #tpu.memory_space<vmem>>, %arg8: memref<1x1x256xf32, #tpu.memory_space<vmem>>, %arg9: memref<1x1x256xf32, #tpu.memory_space<vmem>>, %arg10: memref<1x1x256xf32, #tpu.memory_space<vmem>>, %arg11: memref<1x256x1024xbf16, #tpu.memory_space<vmem>>, %arg12: memref<1x1x1024xf32, #tpu.memory_space<vmem>>, %arg13: memref<1x1024x256xbf16, #tpu.memory_space<vmem>>, %arg14: memref<1x1x256xf32, #tpu.memory_space<vmem>>, %arg15: memref<1x64x256xf32, #tpu.memory_space<vmem>>) attributes {dimension_semantics = [#tpu.dimension_semantics<parallel>, #tpu.dimension_semantics<arbitrary>], iteration_bounds = array<i64: 2, 12>, scalar_prefetch = 0 : i64, scratch_operands = 0 : i64, tpu.core_type = #tpu.core_type<tc>, window_params = [{transform_indices = @transform_0, window_bounds = array<i64: 1, 64, 256>}, {transform_indices = @transform_1, window_bounds = array<i64: 1, 1, 256>}, {transform_indices = @transform_2, window_bounds = array<i64: 1, 1, 256>}, {transform_indices = @transform_3, window_bounds = array<i64: 1, 256, 768>}, {transform_indices = @transform_4, window_bounds = array<i64: 1, 1, 768>}, {transform_indices = @transform_5, window_bounds = array<i64: 1, 256, 256>}, {transform_indices = @transform_6, window_bounds = array<i64: 1, 1, 256>}, {transform_indices = @transform_7, window_bounds = array<i64: 1, 1, 256>}, {transform_indices = @transform_8, window_bounds = array<i64: 1, 1, 256>}, {transform_indices = @transform_9, window_bounds = array<i64: 1, 256, 1024>}, {transform_indices = @transform_10, window_bounds = array<i64: 1, 1, 1024>}, {transform_indices = @transform_11, window_bounds = array<i64: 1, 1024, 256>}, {transform_indices = @transform_12, window_bounds = array<i64: 1, 1, 256>}, {transform_indices = @transform_13, window_bounds = array<i64: 1, 64, 256>}]} {
    %c0_i32 = arith.constant 0 : i32
    %0 = arith.cmpi eq, %arg1, %c0_i32 : i32
    %1 = arith.extui %0 : i1 to i32
    %c0_i32_0 = arith.constant 0 : i32
    %2 = arith.cmpi ne, %1, %c0_i32_0 : i32
    scf.if %2 {
      %c0_61 = arith.constant 0 : index
      %c0_62 = arith.constant 0 : index
      %c0_63 = arith.constant 0 : index
      %118 = vector.load %arg2[%c0_61, %c0_62, %c0_63] : memref<1x64x256xf32, #tpu.memory_space<vmem>>, vector<1x64x256xf32>
      %c0_64 = arith.constant 0 : index
      %c0_65 = arith.constant 0 : index
      %c0_66 = arith.constant 0 : index
      %119 = vector.load %arg15[%c0_64, %c0_65, %c0_66] : memref<1x64x256xf32, #tpu.memory_space<vmem>>, vector<1x64x256xf32>
      tpu.vector_store %arg15[%c0_64, %c0_65, %c0_66], %118 {strides = array<i32>} : memref<1x64x256xf32, #tpu.memory_space<vmem>>, vector<1x64x256xf32>,
    } else {
    }
    %c0 = arith.constant 0 : index
    %c0_1 = arith.constant 0 : index
    %c0_2 = arith.constant 0 : index
    %3 = vector.load %arg15[%c0, %c0_1, %c0_2] : memref<1x64x256xf32, #tpu.memory_space<vmem>>, vector<1x64x256xf32>
    %4 = vector.shape_cast %3 : vector<1x64x256xf32> to vector<64x256xf32>
    %c0_3 = arith.constant 0 : index
    %c0_4 = arith.constant 0 : index
    %c0_5 = arith.constant 0 : index
    %5 = vector.load %arg3[%c0_3, %c0_4, %c0_5] : memref<1x1x256xf32, #tpu.memory_space<vmem>>, vector<1x1x256xf32>
    %6 = vector.shape_cast %5 : vector<1x1x256xf32> to vector<1x256xf32>
    %c0_6 = arith.constant 0 : index
    %c0_7 = arith.constant 0 : index
    %c0_8 = arith.constant 0 : index
    %7 = vector.load %arg4[%c0_6, %c0_7, %c0_8] : memref<1x1x256xf32, #tpu.memory_space<vmem>>, vector<1x1x256xf32>
    %8 = vector.shape_cast %7 : vector<1x1x256xf32> to vector<1x256xf32>
    %cst = arith.constant dense<0.000000e+00> : vector<64xf32>
    %9 = vector.multi_reduction <add>, %4, %cst [1] : vector<64x256xf32> to vector<64xf32>
    %10 = vector.shape_cast %9 : vector<64xf32> to vector<64x1xf32>
    %cst_9 = arith.constant 2.560000e+02 : f32
    %11 = vector.broadcast %cst_9 : f32 to vector<64x1xf32>
    %12 = arith.divf %10, %11 : vector<64x1xf32>
    %13 = vector.broadcast %12 : vector<64x1xf32> to vector<64x256xf32>
    %14 = arith.subf %4, %13 : vector<64x256xf32>
    %15 = arith.mulf %14, %14 : vector<64x256xf32>
    %cst_10 = arith.constant dense<0.000000e+00> : vector<64xf32>
    %16 = vector.multi_reduction <add>, %15, %cst_10 [1] : vector<64x256xf32> to vector<64xf32>
    %17 = vector.shape_cast %16 : vector<64xf32> to vector<64x1xf32>
    %cst_11 = arith.constant 2.560000e+02 : f32
    %18 = vector.broadcast %cst_11 : f32 to vector<64x1xf32>
    %19 = arith.divf %17, %18 : vector<64x1xf32>
    %cst_12 = arith.constant 9.99999974E-6 : f32
    %20 = vector.broadcast %cst_12 : f32 to vector<64x1xf32>
    %21 = arith.addf %19, %20 : vector<64x1xf32>
    %22 = math.rsqrt %21 : vector<64x1xf32>
    %23 = vector.broadcast %22 : vector<64x1xf32> to vector<64x256xf32>
    %24 = arith.mulf %14, %23 : vector<64x256xf32>
    %25 = vector.broadcast %6 : vector<1x256xf32> to vector<64x256xf32>
    %26 = arith.mulf %24, %25 : vector<64x256xf32>
    %27 = vector.broadcast %8 : vector<1x256xf32> to vector<64x256xf32>
    %28 = arith.addf %26, %27 : vector<64x256xf32>
    %29 = arith.truncf %28 : vector<64x256xf32> to vector<64x256xbf16>
    %c0_13 = arith.constant 0 : index
    %c0_14 = arith.constant 0 : index
    %c0_15 = arith.constant 0 : index
    %30 = vector.load %arg5[%c0_13, %c0_14, %c0_15] : memref<1x256x768xbf16, #tpu.memory_space<vmem>>, vector<1x256x768xbf16>
    %31 = vector.shape_cast %30 : vector<1x256x768xbf16> to vector<256x768xbf16>
    %cst_16 = arith.constant dense<0.000000e+00> : vector<64x768xf32>
    %32 = tpu.matmul %29, %31, %cst_16 {dimension_numbers = #tpu.dot_dimension_numbers<[1], [0], [0], [1], [0, 0, 1, 1], [], []>} : vector<64x256xbf16>, vector<256x768xbf16>, vector<64x768xf32> -> vector<64x768xf32>
    %c0_17 = arith.constant 0 : index
    %c0_18 = arith.constant 0 : index
    %c0_19 = arith.constant 0 : index
    %33 = vector.load %arg6[%c0_17, %c0_18, %c0_19] : memref<1x1x768xf32, #tpu.memory_space<vmem>>, vector<1x1x768xf32>
    %34 = vector.shape_cast %33 : vector<1x1x768xf32> to vector<1x768xf32>
    %35 = vector.broadcast %34 : vector<1x768xf32> to vector<64x768xf32>
    %36 = arith.addf %32, %35 : vector<64x768xf32>
    %37 = arith.truncf %36 : vector<64x768xf32> to vector<64x768xbf16>
    %38 = vector.extract_strided_slice %37 {offsets = [0, 0], sizes = [64, 256], strides = [1, 1]} : vector<64x768xbf16> to vector<64x256xbf16>
    %39 = vector.shape_cast %38 : vector<64x256xbf16> to vector<64x4x64xbf16>
    %40 = vector.extract_strided_slice %37 {offsets = [0, 256], sizes = [64, 256], strides = [1, 1]} : vector<64x768xbf16> to vector<64x256xbf16>
    %41 = vector.shape_cast %40 : vector<64x256xbf16> to vector<64x4x64xbf16>
    %42 = vector.extract_strided_slice %37 {offsets = [0, 512], sizes = [64, 256], strides = [1, 1]} : vector<64x768xbf16> to vector<64x256xbf16>
    %43 = vector.shape_cast %42 : vector<64x256xbf16> to vector<64x4x64xbf16>
    "tpu.trace_start"() <{level = 10 : i32, message = "qhd,khd->hqk"}> : () -> ()
    %cst_20 = arith.constant dense<0.000000e+00> : vector<4x64x64xf32>
    %44 = tpu.matmul %39, %41, %cst_20 {dimension_numbers = #tpu.dot_dimension_numbers<[2], [2], [0], [0], [0, 1, 0, 0, 1, 0], [1], [1]>} : vector<64x4x64xbf16>, vector<64x4x64xbf16>, vector<4x64x64xf32> -> vector<4x64x64xf32>
    "tpu.trace_stop"() : () -> ()
    %cst_21 = arith.constant dense<0xFF800000> : vector<4x64xf32>
    %45 = vector.multi_reduction <maximumf>, %44, %cst_21 [2] : vector<4x64x64xf32> to vector<4x64xf32>
    %46 = vector.shape_cast %45 : vector<4x64xf32> to vector<4x64x1xf32>
    %47 = vector.broadcast %46 : vector<4x64x1xf32> to vector<4x64x64xf32>
    %48 = arith.subf %44, %47 : vector<4x64x64xf32>
    %49 = math.exp %48 : vector<4x64x64xf32>
    %cst_22 = arith.constant dense<0.000000e+00> : vector<4x64xf32>
    %50 = vector.multi_reduction <add>, %49, %cst_22 [2] : vector<4x64x64xf32> to vector<4x64xf32>
    %51 = vector.shape_cast %50 : vector<4x64xf32> to vector<4x64x1xf32>
    %52 = vector.broadcast %51 : vector<4x64x1xf32> to vector<4x64x64xf32>
    %53 = arith.divf %49, %52 : vector<4x64x64xf32>
    %54 = arith.truncf %53 : vector<4x64x64xf32> to vector<4x64x64xbf16>
    "tpu.trace_start"() <{level = 10 : i32, message = "hqk,khd->qhd"}> : () -> ()
    %cst_23 = arith.constant dense<0.000000e+00> : vector<4x64x64xf32>
    %55 = tpu.matmul %43, %54, %cst_23 {dimension_numbers = #tpu.dot_dimension_numbers<[0], [2], [2], [1], [0, 1, 0, 2, 1, 1], [1], [0]>} : vector<64x4x64xbf16>, vector<4x64x64xbf16>, vector<4x64x64xf32> -> vector<4x64x64xf32>
    %56 = tpu.transpose %55, [2, 0, 1] : vector<4x64x64xf32> -> vector<64x4x64xf32>
    "tpu.trace_stop"() : () -> ()
    %57 = vector.shape_cast %56 : vector<64x4x64xf32> to vector<64x256xf32>
    %58 = arith.truncf %57 : vector<64x256xf32> to vector<64x256xbf16>
    %c0_24 = arith.constant 0 : index
    %c0_25 = arith.constant 0 : index
    %c0_26 = arith.constant 0 : index
    %59 = vector.load %arg7[%c0_24, %c0_25, %c0_26] : memref<1x256x256xbf16, #tpu.memory_space<vmem>>, vector<1x256x256xbf16>
    %60 = vector.shape_cast %59 : vector<1x256x256xbf16> to vector<256x256xbf16>
    %cst_27 = arith.constant dense<0.000000e+00> : vector<64x256xf32>
    %61 = tpu.matmul %58, %60, %cst_27 {dimension_numbers = #tpu.dot_dimension_numbers<[1], [0], [0], [1], [0, 0, 1, 1], [], []>} : vector<64x256xbf16>, vector<256x256xbf16>, vector<64x256xf32> -> vector<64x256xf32>
    %c0_28 = arith.constant 0 : index
    %c0_29 = arith.constant 0 : index
    %c0_30 = arith.constant 0 : index
    %62 = vector.load %arg8[%c0_28, %c0_29, %c0_30] : memref<1x1x256xf32, #tpu.memory_space<vmem>>, vector<1x1x256xf32>
    %63 = vector.shape_cast %62 : vector<1x1x256xf32> to vector<1x256xf32>
    %64 = vector.broadcast %63 : vector<1x256xf32> to vector<64x256xf32>
    %65 = arith.addf %61, %64 : vector<64x256xf32>
    %66 = arith.addf %4, %65 : vector<64x256xf32>
    %c0_31 = arith.constant 0 : index
    %c0_32 = arith.constant 0 : index
    %c0_33 = arith.constant 0 : index
    %67 = vector.load %arg9[%c0_31, %c0_32, %c0_33] : memref<1x1x256xf32, #tpu.memory_space<vmem>>, vector<1x1x256xf32>
    %68 = vector.shape_cast %67 : vector<1x1x256xf32> to vector<1x256xf32>
    %c0_34 = arith.constant 0 : index
    %c0_35 = arith.constant 0 : index
    %c0_36 = arith.constant 0 : index
    %69 = vector.load %arg10[%c0_34, %c0_35, %c0_36] : memref<1x1x256xf32, #tpu.memory_space<vmem>>, vector<1x1x256xf32>
    %70 = vector.shape_cast %69 : vector<1x1x256xf32> to vector<1x256xf32>
    %cst_37 = arith.constant dense<0.000000e+00> : vector<64xf32>
    %71 = vector.multi_reduction <add>, %66, %cst_37 [1] : vector<64x256xf32> to vector<64xf32>
    %72 = vector.shape_cast %71 : vector<64xf32> to vector<64x1xf32>
    %cst_38 = arith.constant 2.560000e+02 : f32
    %73 = vector.broadcast %cst_38 : f32 to vector<64x1xf32>
    %74 = arith.divf %72, %73 : vector<64x1xf32>
    %75 = vector.broadcast %74 : vector<64x1xf32> to vector<64x256xf32>
    %76 = arith.subf %66, %75 : vector<64x256xf32>
    %77 = arith.mulf %76, %76 : vector<64x256xf32>
    %cst_39 = arith.constant dense<0.000000e+00> : vector<64xf32>
    %78 = vector.multi_reduction <add>, %77, %cst_39 [1] : vector<64x256xf32> to vector<64xf32>
    %79 = vector.shape_cast %78 : vector<64xf32> to vector<64x1xf32>
    %cst_40 = arith.constant 2.560000e+02 : f32
    %80 = vector.broadcast %cst_40 : f32 to vector<64x1xf32>
    %81 = arith.divf %79, %80 : vector<64x1xf32>
    %cst_41 = arith.constant 9.99999974E-6 : f32
    %82 = vector.broadcast %cst_41 : f32 to vector<64x1xf32>
    %83 = arith.addf %81, %82 : vector<64x1xf32>
    %84 = math.rsqrt %83 : vector<64x1xf32>
    %85 = vector.broadcast %84 : vector<64x1xf32> to vector<64x256xf32>
    %86 = arith.mulf %76, %85 : vector<64x256xf32>
    %87 = vector.broadcast %68 : vector<1x256xf32> to vector<64x256xf32>
    %88 = arith.mulf %86, %87 : vector<64x256xf32>
    %89 = vector.broadcast %70 : vector<1x256xf32> to vector<64x256xf32>
    %90 = arith.addf %88, %89 : vector<64x256xf32>
    %91 = arith.truncf %90 : vector<64x256xf32> to vector<64x256xbf16>
    %c0_42 = arith.constant 0 : index
    %c0_43 = arith.constant 0 : index
    %c0_44 = arith.constant 0 : index
    %92 = vector.load %arg11[%c0_42, %c0_43, %c0_44] : memref<1x256x1024xbf16, #tpu.memory_space<vmem>>, vector<1x256x1024xbf16>
    %93 = vector.shape_cast %92 : vector<1x256x1024xbf16> to vector<256x1024xbf16>
    %cst_45 = arith.constant dense<0.000000e+00> : vector<64x1024xf32>
    %94 = tpu.matmul %91, %93, %cst_45 {dimension_numbers = #tpu.dot_dimension_numbers<[1], [0], [0], [1], [0, 0, 1, 1], [], []>} : vector<64x256xbf16>, vector<256x1024xbf16>, vector<64x1024xf32> -> vector<64x1024xf32>
    %c0_46 = arith.constant 0 : index
    %c0_47 = arith.constant 0 : index
    %c0_48 = arith.constant 0 : index
    %95 = vector.load %arg12[%c0_46, %c0_47, %c0_48] : memref<1x1x1024xf32, #tpu.memory_space<vmem>>, vector<1x1x1024xf32>
    %96 = vector.shape_cast %95 : vector<1x1x1024xf32> to vector<1x1024xf32>
    %97 = vector.broadcast %96 : vector<1x1024xf32> to vector<64x1024xf32>
    %98 = arith.addf %94, %97 : vector<64x1024xf32>
    %cst_49 = arith.constant 1.702000e+00 : f32
    %99 = vector.broadcast %cst_49 : f32 to vector<64x1024xf32>
    %100 = arith.mulf %99, %98 : vector<64x1024xf32>
    %101 = arith.negf %100 : vector<64x1024xf32>
    %102 = math.exp %101 : vector<64x1024xf32>
    %cst_50 = arith.constant 1.000000e+00 : f32
    %103 = vector.broadcast %cst_50 : f32 to vector<64x1024xf32>
    %104 = arith.addf %103, %102 : vector<64x1024xf32>
    %105 = arith.divf %103, %104 : vector<64x1024xf32>
    %106 = arith.mulf %98, %105 : vector<64x1024xf32>
    %107 = arith.truncf %106 : vector<64x1024xf32> to vector<64x1024xbf16>
    %c0_51 = arith.constant 0 : index
    %c0_52 = arith.constant 0 : index
    %c0_53 = arith.constant 0 : index
    %108 = vector.load %arg13[%c0_51, %c0_52, %c0_53] : memref<1x1024x256xbf16, #tpu.memory_space<vmem>>, vector<1x1024x256xbf16>
    %109 = vector.shape_cast %108 : vector<1x1024x256xbf16> to vector<1024x256xbf16>
    %cst_54 = arith.constant dense<0.000000e+00> : vector<64x256xf32>
    %110 = tpu.matmul %107, %109, %cst_54 {dimension_numbers = #tpu.dot_dimension_numbers<[1], [0], [0], [1], [0, 0, 1, 1], [], []>} : vector<64x1024xbf16>, vector<1024x256xbf16>, vector<64x256xf32> -> vector<64x256xf32>
    %c0_55 = arith.constant 0 : index
    %c0_56 = arith.constant 0 : index
    %c0_57 = arith.constant 0 : index
    %111 = vector.load %arg14[%c0_55, %c0_56, %c0_57] : memref<1x1x256xf32, #tpu.memory_space<vmem>>, vector<1x1x256xf32>
    %112 = vector.shape_cast %111 : vector<1x1x256xf32> to vector<1x256xf32>
    %113 = vector.broadcast %112 : vector<1x256xf32> to vector<64x256xf32>
    %114 = arith.addf %110, %113 : vector<64x256xf32>
    %115 = arith.addf %66, %114 : vector<64x256xf32>
    %116 = vector.shape_cast %115 : vector<64x256xf32> to vector<1x64x256xf32>
    %c0_58 = arith.constant 0 : index
    %c0_59 = arith.constant 0 : index
    %c0_60 = arith.constant 0 : index
    %117 = vector.load %arg15[%c0_58, %c0_59, %c0_60] : memref<1x64x256xf32, #tpu.memory_space<vmem>>, vector<1x64x256xf32>
    tpu.vector_store %arg15[%c0_58, %c0_59, %c0_60], %116 {strides = array<i32>} : memref<1x64x256xf32, #tpu.memory_space<vmem>>, vector<1x64x256xf32>,
    return
  }
  func.func @transform_0(%arg0: i32, %arg1: i32) -> (i32, i32, i32) {
    %c0_i32 = arith.constant 0 : i32
    %c0_i32_0 = arith.constant 0 : i32
    %c0_i32_1 = arith.constant 0 : i32
    return %arg0, %c0_i32, %c0_i32_0 : i32, i32, i32
  }
  func.func @transform_1(%arg0: i32, %arg1: i32) -> (i32, i32, i32) {
    %c0_i32 = arith.constant 0 : i32
    %c0_i32_0 = arith.constant 0 : i32
    %c0_i32_1 = arith.constant 0 : i32
    return %arg1, %c0_i32, %c0_i32_0 : i32, i32, i32
  }
  func.func @transform_2(%arg0: i32, %arg1: i32) -> (i32, i32, i32) {
    %c0_i32 = arith.constant 0 : i32
    %c0_i32_0 = arith.constant 0 : i32
    %c0_i32_1 = arith.constant 0 : i32
    return %arg1, %c0_i32, %c0_i32_0 : i32, i32, i32
  }
  func.func @transform_3(%arg0: i32, %arg1: i32) -> (i32, i32, i32) {
    %c0_i32 = arith.constant 0 : i32
    %c0_i32_0 = arith.constant 0 : i32
    %c0_i32_1 = arith.constant 0 : i32
    return %arg1, %c0_i32, %c0_i32_0 : i32, i32, i32
  }
  func.func @transform_4(%arg0: i32, %arg1: i32) -> (i32, i32, i32) {
    %c0_i32 = arith.constant 0 : i32
    %c0_i32_0 = arith.constant 0 : i32
    %c0_i32_1 = arith.constant 0 : i32
    return %arg1, %c0_i32, %c0_i32_0 : i32, i32, i32
  }
  func.func @transform_5(%arg0: i32, %arg1: i32) -> (i32, i32, i32) {
    %c0_i32 = arith.constant 0 : i32
    %c0_i32_0 = arith.constant 0 : i32
    %c0_i32_1 = arith.constant 0 : i32
    return %arg1, %c0_i32, %c0_i32_0 : i32, i32, i32
  }
  func.func @transform_6(%arg0: i32, %arg1: i32) -> (i32, i32, i32) {
    %c0_i32 = arith.constant 0 : i32
    %c0_i32_0 = arith.constant 0 : i32
    %c0_i32_1 = arith.constant 0 : i32
    return %arg1, %c0_i32, %c0_i32_0 : i32, i32, i32
  }
  func.func @transform_7(%arg0: i32, %arg1: i32) -> (i32, i32, i32) {
    %c0_i32 = arith.constant 0 : i32
    %c0_i32_0 = arith.constant 0 : i32
    %c0_i32_1 = arith.constant 0 : i32
    return %arg1, %c0_i32, %c0_i32_0 : i32, i32, i32
  }
  func.func @transform_8(%arg0: i32, %arg1: i32) -> (i32, i32, i32) {
    %c0_i32 = arith.constant 0 : i32
    %c0_i32_0 = arith.constant 0 : i32
    %c0_i32_1 = arith.constant 0 : i32
    return %arg1, %c0_i32, %c0_i32_0 : i32, i32, i32
  }
  func.func @transform_9(%arg0: i32, %arg1: i32) -> (i32, i32, i32) {
    %c0_i32 = arith.constant 0 : i32
    %c0_i32_0 = arith.constant 0 : i32
    %c0_i32_1 = arith.constant 0 : i32
    return %arg1, %c0_i32, %c0_i32_0 : i32, i32, i32
  }
  func.func @transform_10(%arg0: i32, %arg1: i32) -> (i32, i32, i32) {
    %c0_i32 = arith.constant 0 : i32
    %c0_i32_0 = arith.constant 0 : i32
    %c0_i32_1 = arith.constant 0 : i32
    return %arg1, %c0_i32, %c0_i32_0 : i32, i32, i32
  }
  func.func @transform_11(%arg0: i32, %arg1: i32) -> (i32, i32, i32) {
    %c0_i32 = arith.constant 0 : i32
    %c0_i32_0 = arith.constant 0 : i32
    %c0_i32_1 = arith.constant 0 : i32
    return %arg1, %c0_i32, %c0_i32_0 : i32, i32, i32
  }
  func.func @transform_12(%arg0: i32, %arg1: i32) -> (i32, i32, i32) {
    %c0_i32 = arith.constant 0 : i32
    %c0_i32_0 = arith.constant 0 : i32
    %c0_i32_1 = arith.constant 0 : i32
    return %arg1, %c0_i32, %c0_i32_0 : i32, i32, i32
  }
  func.func @transform_13(%arg0: i32, %arg1: i32) -> (i32, i32, i32) {
    %c0_i32 = arith.constant 0 : i32
    %c0_i32_0 = arith.constant 0 : i32
    %c0_i32_1 = arith.constant 0 : i32
    return %arg0, %c0_i32, %c0_i32_0 : i32, i32, i32
  }
}

</mosaic_0001>

<bundles_post_ra>
// kernel: tpu_custom_call.1
= control target key start
LH: loop header
LB: loop body
LE: loop exit
PB: predicated region body
PF: predicated region fallthrough
CT: control target
= control target key end

     0   :  { %s19988_s0 = inlined_call_operand.hbm [shape: f32[2,64,256], index: 0, kind: input, shape index: {}]   ;;  %s19989_s1 = inlined_call_operand.hbm [shape: f32[12,1,256], index: 1, kind: input, shape index: {}]   ;;  %s19990_s2 = inlined_call_operand.hbm [shape: f32[12,1,256], index: 2, kind: input, shape index: {}]   ;;  %s19991_s3 = inlined_call_operand.hbm [shape: bf16[12,256,768], index: 3, kind: input, shape index: {}]   ;;  %s19992_s4 = inlined_call_operand.hbm [shape: f32[12,1,768], index: 4, kind: input, shape index: {}]   ;;  %s19993_s5 = inlined_call_operand.hbm [shape: bf16[12,256,256], index: 5, kind: input, shape index: {}]   ;;  %s19994_s6 = inlined_call_operand.hbm [shape: f32[12,1,256], index: 6, kind: input, shape index: {}]   ;;  %s19995_s7 = inlined_call_operand.hbm [shape: f32[12,1,256], index: 7, kind: input, shape index: {}]   ;;  %s19996_s8 = inlined_call_operand.hbm [shape: f32[12,1,256], index: 8, kind: input, shape index: {}]   ;;  %s19997_s9 = inlined_call_operand.hbm [shape: bf16[12,256,1024], index: 9, kind: input, shape index: {}]   ;;  %s19998_s10 = inlined_call_operand.hbm [shape: f32[12,1,1024], index: 10, kind: input, shape index: {}]   ;;  %s19999_s11 = inlined_call_operand.hbm [shape: bf16[12,1024,256], index: 11, kind: input, shape index: {}]   ;;  %s20000_s12 = inlined_call_operand.hbm [shape: f32[12,1,256], index: 12, kind: input, shape index: {}]   ;;  %s20001_s13 = inlined_call_operand.hbm [shape: f32[2,64,256], index: 13, kind: output, shape index: {}]  }
   0x1   :  { %20100 = sst [smem:[#allocation88_spill]] %s19989_s1 }
   0x2   :  { %20101 = sst [smem:[#allocation89_spill]] %s19991_s3 }
   0x3   :  { %20102 = sst [smem:[#allocation90_spill]] %s19992_s4 }
   0x4   :  { %20103 = sst [smem:[#allocation91_spill]] %s19994_s6 }
   0x5   :  { %20104 = sst [smem:[#allocation92_spill]] %s19996_s8 }
   0x6   :  { %20105 = sst [smem:[#allocation93_spill]] %s19998_s10 }
   0x7   :  { %20106 = sst [smem:[#allocation94_spill]] %s20000_s12 }
   0x8   :  { %20107 = sst [smem:[#allocation95_spill]] %s20001_s13 }
   0x9   :  { %18 = vsyncpa [#allocation3], 0 }
   0xa   :  { %20 = vsyncpa [#allocation3 + $0x1], 0 }
   0xb   :  { %21 = vsyncpa [#allocation6], 0 }
   0xc   :  { %23 = vsyncpa [#allocation6 + $0x1], 0 }
   0xd   :  { %24 = vsyncpa [#allocation9], 0 }
   0xe   :  { %26 = vsyncpa [#allocation9 + $0x1], 0 }
   0xf   :  { %27 = vsyncpa [#allocation12], 0 }
  0x10   :  { %29 = vsyncpa [#allocation12 + $0x1], 0 }
  0x11   :  { %30 = vsyncpa [#allocation15], 0 }
  0x12   :  { %32 = vsyncpa [#allocation15 + $0x1], 0 }
  0x13   :  { %33 = vsyncpa [#allocation18], 0 }
  0x14   :  { %35 = vsyncpa [#allocation18 + $0x1], 0 }
  0x15   :  { %36 = vsyncpa [#allocation21], 0 }
  0x16   :  { %38 = vsyncpa [#allocation21 + $0x1], 0 }
  0x17   :  { %39 = vsyncpa [#allocation4], 0 }
  0x18   :  { %41 = vsyncpa [#allocation4 + $0x1], 0  ;;  %s13268_s25 = smov 0   ;;  %s13270_s26 = smov 0  }
  0x19   :  { %s13272_s27 = smov 0   ;;  %s13274_s28 = smov 0  }
  0x1a   :  { %s13276_s29 = smov 0   ;;  %s13278_s30 = smov 0  }
  0x1b   :  { %s13280_s14 = smov 0   ;;  %s13282_s15 = smov 0  }
  0x1c   :  { %s13284_s16 = smov 0   ;;  %s13286_s17 = smov 0  }
  0x1d   :  { %s13288_s18 = smov 0  }
  0x1e LB: > { %20108 = sst [smem:[#allocation32_spill]] %s13146_s26  ;;  %s13324_s19 = sadd.s32 4294967295, %s13182_s18   ;;  %s13182_s18 = sphi %s13288_s18, %s47_s18   ;;  %s13178_s17 = sphi %s13286_s17, %s20616_s17   ;;  %s13174_s16 = sphi %s13284_s16, %s20615_s16   ;;  %s13170_s15 = sphi %s13282_s15, %s20614_s15   ;;  %s13166_s14 = sphi %s13280_s14, %s20613_s14   ;;  %s13162_s30 = sphi %s13278_s30, %s20612_s30   ;;  %s13158_s29 = sphi %s13276_s29, %s20611_s29   ;;  %s13154_s28 = sphi %s13274_s28, %s20607_s28   ;;  %s13150_s27 = sphi %s13272_s27, %s20606_s27   ;;  %s13146_s26 = sphi %s13270_s26, %s20605_s26   ;;  %s13142_s25 = sphi %s13268_s25, %s20604_s25  }
  0x1f   : > { %20109 = sst [smem:[#allocation33_spill]] %s13150_s27  ;;  %s9824_s20 = sadd.s32 4294967294, %s13182_s18  }
  0x20   : > { %20110 = sst [smem:[#allocation34_spill]] %s13154_s28  ;;  %s56_s21 = sadd.s32 1, %s13174_s16 }
  0x21   : > { %20111 = sst [smem:[#allocation35_spill]] %s13158_s29  ;;  %s59_s22 = sadd.s32 1, %s13178_s17 }
  0x22   : > { %20112 = sst [smem:[#allocation36_spill]] %s13166_s14  ;;  %p57_p0 = scmp.ge.s32.totalorder %s56_s21, 12 }
  0x23   : > { %20113 = sst [smem:[#allocation37_spill]] %s13170_s15  ;;  %s66_s23 = sadd.s32 1, %s13162_s30 }
  0x24   : > { %20114 = sst [smem:[#allocation38_spill]] %s13182_s18  ;;  %p73_p1 = scmp.ne.s32.totalorder %s13162_s30, %s13158_s29 }
  0x25   : > { %20115 = sst [smem:[#allocation39_spill]] %s13324_s19  ;;  %p74_p2 = scmp.eq.s32.totalorder %s13182_s18, 0 }
  0x26   : > { %s20618_s21 = smov (%p57_p0, %s56_s21), 0  ;;  %s20620_s22 = smov (!%p57_p0, %s59_s22), %s13178_s17 }
  0x27   : > { %20116 = sst [smem:[#allocation40_spill]] %s20618_s21  ;;  %p13341_p3 = por %p74_p2, %p73_p1 }
  0x28   : > { %p20004_p4 = scmp.ne.s32.totalorder %s13158_s29, %s13154_s28  ;;  %p61_p5 = scmp.ge.s32.totalorder %s20620_s22, 2 }
  0x29   : > { %p80_p6 = scmp.eq.s32.totalorder %s13324_s19, 0  ;;  %s89_s13 = ssub.s32 %s13174_s16, %s20618_s21 }
  0x2a   : > { %s92_s15 = sadd.s32 1, %s13150_s27  ;;  %s20622_s22 = smov (%p61_p5, %s20620_s22), 0 }
  0x2b   : > { %20118 = sst [smem:[#allocation41_spill]] %s20622_s22  ;;  %p13358_p7 = por %p80_p6, %p20004_p4 }
  0x2c   : > { %p90_p8 = scmp.eq.s32.totalorder %s89_s13, 0  ;;  %s63_s12 = ssub.s32 %s13178_s17, %s20622_s22 }
  0x2d   : > { %s20119_s14 = scalar_select %p13358_p7, 1, 0 }
  0x2e   : > { %p99_p9 = scmp.ne.s32.totalorder %s13150_s27, %s13146_s26  ;;  %p64_p10 = scmp.eq.s32.totalorder %s63_s12, 0 }
  0x2f   : > { %20120 = sst [smem:[#allocation42_spill]] %s20119_s14  ;;  %p105_p11 = scmp.ne.s32.totalorder %s13146_s26, %s13142_s25 }
  0x30   : > { %s13369_s10 = scalar_select %p90_p8, %s13150_s27, %s92_s15  }
  0x31   : > { %s13372_s21 = scalar_select %p64_p10, %s13162_s30, %s66_s23  }
  0x32   : > { %20121 = sst [smem:[#allocation43_spill]] %s13369_s10  ;;  %p13376_p12 = por %p99_p9, %p74_p2 }
  0x33   : > { %20122 = sst [smem:[#allocation44_spill]] %s13372_s21  ;;  %p13382_p13 = por %p105_p11, %p80_p6 }
  0x34   : > { %p415_p0 = scmp.eq.s32.totalorder %s13324_s19, 23  ;;  %p421_p5 = scmp.eq.s32.totalorder %s9824_s20, 23 }
  0x35   : > { %s20124_s4 = scalar_select %p13382_p13, 1, 0 }
  0x36   : > { %p13390_p4 = por %p415_p0, %p73_p1  ;;  %p20128_p8 = scmp.ne.s32.totalorder %s13158_s29, %s13154_s28 }
  0x37   : > { %20125 = sst [smem:[#allocation45_spill]] %s20124_s4  ;;  %p9826_p2 = scmp.ge.s32.totalorder %s13182_s18, 24 }
  0x38   : > { %s20126_s12 = scalar_select %p13390_p4, 1, 0 }
  0x39   : > { %p13397_p10 = por %p421_p5, %p20128_p8  ;;  %437 = sbr.rel (%p9826_p2) target bundleno = 124 (0x7c), region = 16 }
  0x3a   : > { %20127 = sst [smem:[#allocation46_spill]] %s20126_s12  ;;  %s13403_s25 = sand.u32 (!%p9826_p2), 1, %s13182_s18  }
  0x3b   : > { %s20129_s13 = scalar_select %p13397_p10, 1, 0 }
  0x3c   : > { %s13406_s15 = sand.u32 (!%p9826_p2), 1, %s13150_s27   ;;  %s13412_s23 = sshll.u32 (!%p9826_p2), %s13174_s16, 1 }
  0x3d   : > { %20130 = sst [smem:[#allocation47_spill]] %s20129_s13  ;;  %s13409_s20 = sshll.u32 (!%p9826_p2), %s13406_s15, 1 }
  0x3e   : > { %s20131_s1 = sld [smem:[#allocation88_spill]]  ;;  %s467_s13 = scalar_lea.vmem [#allocation5], %s13409_s20 }
  0x3f   : > { %s475_s28 = sshll.u32 %s467_s13, 4  ;;  %s20021_s27 = scalar_lea.sflag [#allocation6], %s13403_s25  ;;  %s476_s28 = int_to_ptr.vmem [resolvable:$true] %s475_s28 }
  0x40   : > { %s11894_s4 = smul.u32 768, %s13406_s15  ;;  %s20132_s3 = sld [smem:[#allocation89_spill]] }
  0x41   : > { %s11895_s26 = smul.u32 768, %s13174_s16  ;;  %s20023_s29 = scalar_lea.sflag [#allocation9], %s13403_s25 }
  0x42   : > { %s505_s22 = scalar_lea.vmem [#allocation8], %s11894_s4  ;;  %s13184_s18 = smov 384  }
  0x43   : > { %s13187_s6 = smov 8   ;;  %s20024_s14 = scalar_lea.sflag [#allocation15], %s13403_s25 }
  0x44   : > { %s471_s10 = scalar_lea.hbm %s20131_s1, %s13412_s23  ;;  %s513_s1 = sshll.u32 %s505_s22, 4  ;;  %s514_s1 = int_to_ptr.vmem [resolvable:$true] %s513_s1 }
  0x45   : > { %s473_s12 = sshll.u32 %s471_s10, 4  ;;  %s9835_s10 = sshll.u32 %s13406_s15, 8  ;;  %s474_s12 = int_to_ptr.hbm [resolvable:$true] %s473_s12 }
  0x46   : > { %11901 = dma.hbm_to_vmem [thread:$0]  (%p13376_p12), %s474_s12, 32, %s476_s28, %s20021_s27  }
  0x47   : > { %s510_s21 = scalar_lea.hbm %s20132_s3, %s11895_s26  ;;  %s13185_s28 = smov 24  }
  0x48   : > { %s511_s13 = sshll.u32 %s510_s21, 4  ;;  %s11506_s12 = sshll.u32 %s13174_s16, 8  ;;  %s512_s13 = int_to_ptr.hbm [resolvable:$true] %s511_s13 }
  0x49   : > { %11903 = dma.hbm_to_vmem [thread:$0]  (%p13376_p12), %s512_s13, 12288, %s514_s1, %s20023_s29, %s13184_s18, %s13184_s18, %s13185_s28  }
  0x4a   : > { %s551_s4 = scalar_lea.hbm %s19993_s5, %s11506_s12  ;;  %s546_s19 = scalar_lea.vmem [#allocation11], %s9835_s10 }
  0x4b   : > { %s554_s21 = sshll.u32 %s546_s19, 4  ;;  %s552_s22 = sshll.u32 %s551_s4, 4  ;;  %s555_s21 = int_to_ptr.vmem [resolvable:$true] %s554_s21  ;;  %s553_s22 = int_to_ptr.hbm [resolvable:$true] %s552_s22 }
  0x4c   : > { %s20022_s27 = scalar_lea.sflag [#allocation12], %s13403_s25  ;;  %s20025_s3 = smov 128  }
  0x4d   : > { %11905 = dma.hbm_to_vmem [thread:$0]  (%p13376_p12), %s553_s22, 4096, %s555_s21, %s20022_s27, %s20025_s3, %s20025_s3, %s13187_s6  }
  0x4e   : > { %s591_s13 = scalar_lea.hbm %s19995_s7, %s13412_s23  ;;  %s587_s28 = scalar_lea.vmem [#allocation14], %s13409_s20 }
  0x4f   : > { %s593_s10 = sshll.u32 %s591_s13, 4  ;;  %s595_s12 = sshll.u32 %s587_s28, 4  ;;  %s594_s10 = int_to_ptr.hbm [resolvable:$true] %s593_s10  ;;  %s596_s12 = int_to_ptr.vmem [resolvable:$true] %s595_s12 }
  0x50   : > { %11907 = dma.hbm_to_vmem [thread:$0]  (%p13376_p12), %s594_s10, 32, %s596_s12, %s20024_s14  }
  0x51   : > { %s9844_s26 = sshll.u32 %s13406_s15, 10  ;;  %s11507_s4 = sshll.u32 %s13174_s16, 10 }
  0x52   : > { %s630_s22 = scalar_lea.hbm %s19997_s9, %s11507_s4  ;;  %s625_s1 = scalar_lea.vmem [#allocation17], %s9844_s26 }
  0x53   : > { %s633_s18 = sshll.u32 %s625_s1, 4  ;;  %s631_s13 = sshll.u32 %s630_s22, 4  ;;  %s634_s18 = int_to_ptr.vmem [resolvable:$true] %s633_s18  ;;  %s632_s13 = int_to_ptr.hbm [resolvable:$true] %s631_s13 }
  0x54   : > { %s622_s28 = scalar_lea.sflag [#allocation18], %s13403_s25  ;;  %s13188_s27 = smov 512  }
  0x55   : > { %s13189_s29 = smov 32   ;;  %s671_s19 = scalar_lea.hbm %s19999_s11, %s11507_s4 }
  0x56   : > { %11909 = dma.hbm_to_vmem [thread:$0]  (%p13376_p12), %s632_s13, 16384, %s634_s18, %s622_s28, %s13188_s27, %s13188_s27, %s13189_s29  }
  0x57   : > { %s672_s21 = sshll.u32 %s671_s19, 4  ;;  %s666_s14 = scalar_lea.vmem [#allocation20], %s9844_s26  ;;  %s673_s21 = int_to_ptr.hbm [resolvable:$true] %s672_s21 }
  0x58   : > { %s674_s3 = sshll.u32 %s666_s14, 4  ;;  %s20026_s22 = scalar_lea.sflag [#allocation21], %s13403_s25  ;;  %s675_s3 = int_to_ptr.vmem [resolvable:$true] %s674_s3 }
  0x59   : > { %s20133_s1 = smov 128   ;;  %s441_s27 = sand.u32 1, %s13162_s30  }
  0x5a   : > { %11911 = dma.hbm_to_vmem [thread:$0]  (%p13376_p12), %s673_s21, 16384, %s675_s3, %s20026_s22, %s20133_s1, %s20133_s1, %s13187_s6  }
  0x5b   : > { %s11505_s29 = sshll.u32 %s13178_s17, 7  ;;  %s9827_s18 = sshll.u32 %s441_s27, 7 }
  0x5c   : > { %s450_s26 = scalar_lea.hbm %s19988_s0, %s11505_s29  ;;  %s445_s10 = scalar_lea.vmem [#allocation2], %s9827_s18 }
  0x5d   : > { %s451_s14 = sshll.u32 %s450_s26, 4  ;;  %s453_s12 = sshll.u32 %s445_s10, 4  ;;  %s452_s14 = int_to_ptr.hbm [resolvable:$true] %s451_s14  ;;  %s454_s12 = int_to_ptr.vmem [resolvable:$true] %s453_s12 }
  0x5e   : > { %s442_s19 = scalar_lea.sflag [#allocation3], %s441_s27  ;;  %s13190_s3 = smov 256  }
  0x5f   : > { %s13191_s6 = smov 16   ;;  %s490_s13 = scalar_lea.hbm %s19990_s2, %s13412_s23 }
  0x60   : > { %11900 = dma.hbm_to_vmem [thread:$0]  (%p13341_p3), %s452_s14, 2048, %s454_s12, %s442_s19, %s13190_s3, %s13190_s3, %s13191_s6  }
  0x61   : > { %s492_s29 = sshll.u32 %s490_s13, 4  ;;  %s486_s4 = scalar_lea.vmem [#allocation7], %s13409_s20  ;;  %s493_s29 = int_to_ptr.hbm [resolvable:$true] %s492_s29 }
  0x62   : > { %s494_s26 = sshll.u32 %s486_s4, 4  ;;  %s20134_s18 = scalar_lea.sflag [#allocation6], %s13403_s25  ;;  %s495_s26 = int_to_ptr.vmem [resolvable:$true] %s494_s26 }
  0x63   : > { %11902 = dma.hbm_to_vmem [thread:$0]  (%p13376_p12), %s493_s29, 32, %s495_s26, %s20134_s18  }
  0x64   : > { %s11896_s27 = smul.u32 6, %s13406_s15  ;;  %s20135_s12 = sld [smem:[#allocation91_spill]] }
  0x65   : > { %s11897_s24 = smul.u32 6, %s13174_s16  ;;  %s20136_s1 = sld [smem:[#allocation90_spill]] }
  0x66   : > { %s527_s4 = scalar_lea.vmem [#allocation10], %s11896_s27  ;;  %s20137_s26 = scalar_lea.sflag [#allocation9], %s13403_s25 }
  0x67   : > { %s535_s22 = sshll.u32 %s527_s4, 4  ;;  %s568_s18 = scalar_lea.vmem [#allocation13], %s13409_s20  ;;  %s536_s22 = int_to_ptr.vmem [resolvable:$true] %s535_s22 }
  0x68   : > { %s576_s14 = sshll.u32 %s568_s18, 4  ;;  %s20139_s27 = scalar_lea.sflag [#allocation12], %s13403_s25  ;;  %s577_s14 = int_to_ptr.vmem [resolvable:$true] %s576_s14 }
  0x69   : > { %s606_s21 = scalar_lea.vmem [#allocation16], %s13409_s20  ;;  %s9848_s4 = sshll.u32 %s13174_s16, 3 }
  0x6a   : > { %s572_s19 = scalar_lea.hbm %s20135_s12, %s13412_s23  ;;  %s20141_s18 = sld [smem:[#allocation93_spill]] }
  0x6b   : > { %s574_s3 = sshll.u32 %s572_s19, 4  ;;  %s531_s13 = scalar_lea.hbm %s20136_s1, %s11897_s24  ;;  %s575_s3 = int_to_ptr.hbm [resolvable:$true] %s574_s3 }
  0x6c   : > { %s533_s29 = sshll.u32 %s531_s13, 4  ;;  %s20138_s19 = sld [smem:[#allocation92_spill]]  ;;  %s534_s29 = int_to_ptr.hbm [resolvable:$true] %s533_s29 }
  0x6d   : > { %11904 = dma.hbm_to_vmem [thread:$0]  (%p13376_p12), %s534_s29, 96, %s536_s22, %s20137_s26  }
  0x6e   : > { %11906 = dma.hbm_to_vmem [thread:$0]  (%p13376_p12), %s575_s3, 32, %s577_s14, %s20139_s27  }
  0x6f   : > { %s614_s1 = sshll.u32 %s606_s21, 4  ;;  %s20140_s22 = scalar_lea.sflag [#allocation15], %s13403_s25  ;;  %s615_s1 = int_to_ptr.vmem [resolvable:$true] %s614_s1 }
  0x70   : > { %s9847_s13 = sshll.u32 %s13406_s15, 3  ;;  %s651_s10 = scalar_lea.hbm %s20141_s18, %s9848_s4 }
  0x71   : > { %s653_s12 = sshll.u32 %s651_s10, 4  ;;  %s647_s3 = scalar_lea.vmem [#allocation19], %s9847_s13  ;;  %s654_s12 = int_to_ptr.hbm [resolvable:$true] %s653_s12 }
  0x72   : > { %s610_s24 = scalar_lea.hbm %s20138_s19, %s13412_s23  ;;  %s655_s14 = sshll.u32 %s647_s3, 4  ;;  %s656_s14 = int_to_ptr.vmem [resolvable:$true] %s655_s14 }
  0x73   : > { %s612_s6 = sshll.u32 %s610_s24, 4  ;;  %s20142_s27 = sld [smem:[#allocation94_spill]]  ;;  %s613_s6 = int_to_ptr.hbm [resolvable:$true] %s612_s6 }
  0x74   : > { %11908 = dma.hbm_to_vmem [thread:$0]  (%p13376_p12), %s613_s6, 32, %s615_s1, %s20140_s22  }
  0x75   : > { %11910 = dma.hbm_to_vmem [thread:$0]  (%p13376_p12), %s654_s12, 128, %s656_s14, %s622_s28  }
  0x76   : > { %s688_s1 = scalar_lea.vmem [#allocation22], %s13409_s20  ;;  %s20143_s22 = scalar_lea.sflag [#allocation21], %s13403_s25 }
  0x77   : > { %s696_s15 = sshll.u32 %s688_s1, 4  ;;  %s697_s15 = int_to_ptr.vmem [resolvable:$true] %s696_s15 }
  0x79   : > { %s692_s6 = scalar_lea.hbm %s20142_s27, %s13412_s23 }
  0x7a   : > { %s694_s21 = sshll.u32 %s692_s6, 4  ;;  %s695_s21 = int_to_ptr.hbm [resolvable:$true] %s694_s21 }
  0x7b   : > { %11912 = dma.hbm_to_vmem [thread:$0]  (%p13376_p12), %s695_s21, 32, %s697_s15, %s20143_s22  }
  0x7c PF: > { %s20144_s13 = sld [smem:[#allocation38_spill]] }
  0x82   : > { %p9854_p1 = scmp.ge.s32.totalorder %s20144_s13, 1  ;;  %p701_p3 = scmp.lt.s32.totalorder %s20144_s13, 25 }
  0x84   : > { %p702_p6 = pnand %p9854_p1, %p701_p3 }
  0x86   : > { %705 = sbr.rel (%p702_p6) target bundleno = 3523 (0xdc3), region = 72 }
  0x8b   : > { %s20145_s28 = sld [smem:[#allocation35_spill]] }
  0x91   : > { %s13542_s29 = sand.u32 1, %s20145_s28  }
  0x92   : > { %s9855_s20 = sshll.u32 %s13542_s29, 7  ;;  %s708_s23 = scalar_lea.sflag [#allocation3], %s13542_s29 }
  0x93   : > { %s13548_s8 = scalar_lea.vmem [#allocation2], %s9855_s20 }
  0x94   : > { %13109 = dma.done.wait (%p13358_p7), %s708_s23, 2048  }
  0x95   : > { %13111 = vsyncadd (%p13358_p7), %s708_s23, 4294965248  ;;  %s20147_s25 = sld [smem:[#allocation39_spill]] }
  0x96   : > { %s20148_s26 = sld [smem:[#allocation32_spill]] }
  0x9b   : > { %s13555_s10 = sand.u32 1, %s20147_s25  }
  0x9c   : > { %s13558_s12 = sand.u32 1, %s20148_s26   ;;  %s718_s14 = scalar_lea.sflag [#allocation6], %s13555_s10 }
  0x9d   : > { %s13561_s3 = sshll.u32 %s13558_s12, 1 }
  0x9e   : > { %s721_s19 = scalar_lea.vmem [#allocation5], %s13561_s3 }
  0x9f   : > { %13113 = dma.done.wait (%p13382_p13), %s718_s14, 64  }
  0xa0   : > { %13115 = vsyncadd (%p13382_p13), %s718_s14, 4294967232  ;;  %s11898_s24 = smul.u32 768, %s13558_s12  ;;  %s731_s27 = scalar_lea.vmem [#allocation7], %s13561_s3 }
  0xa1   : > { %s738_s6 = scalar_lea.sflag [#allocation9], %s13555_s10 }
  0xa2   : > { %s13572_s21 = scalar_lea.vmem [#allocation8], %s11898_s24 }
  0xa3   : > { %13117 = dma.done.wait (%p13382_p13), %s738_s6, 12384  }
  0xa4   : > { %13119 = vsyncadd (%p13382_p13), %s738_s6, 4294954912  ;;  %s11899_s1 = smul.u32 6, %s13558_s12  ;;  %s9858_s15 = sshll.u32 %s13558_s12, 8 }
  0xa5   : > { %s758_s13 = scalar_lea.sflag [#allocation12], %s13555_s10  ;;  %s13583_s28 = scalar_lea.vmem [#allocation11], %s9858_s15 }
  0xa6   : > { %s13580_s22 = scalar_lea.vmem [#allocation10], %s11899_s1 }
  0xa7   : > { %13121 = dma.done.wait (%p13382_p13), %s758_s13, 4128  }
  0xa8   : > { %13123 = vsyncadd (%p13382_p13), %s758_s13, 4294963168  ;;  %s771_s4 = scalar_lea.vmem [#allocation13], %s13561_s3  ;;  %s778_s23 = scalar_lea.sflag [#allocation15], %s13555_s10 }
  0xa9   : > { %13125 = dma.done.wait (%p13382_p13), %s778_s23, 64  }
  0xaa   : > { %13127 = vsyncadd (%p13382_p13), %s778_s23, 4294967232  ;;  %s9862_s26 = sshll.u32 %s13558_s12, 10  ;;  %s798_s24 = scalar_lea.sflag [#allocation18], %s13555_s10 }
  0xab   : > { %s13599_s6 = scalar_lea.vmem [#allocation17], %s9862_s26 }
  0xac   : > { %13129 = dma.done.wait (%p13382_p13), %s798_s24, 16512  }
  0xad   : > { %13131 = vsyncadd (%p13382_p13), %s798_s24, 4294950784  ;;  %s9863_s1 = sshll.u32 %s13558_s12, 3  ;;  %s818_s13 = scalar_lea.sflag [#allocation21], %s13555_s10 }
  0xae   : > { %s13606_s15 = scalar_lea.vmem [#allocation19], %s9863_s1  ;;  %s13609_s23 = scalar_lea.vmem [#allocation20], %s9862_s26 }
  0xaf   : > { %13133 = dma.done.wait (%p13382_p13), %s818_s13, 16416  }
  0xb0   : > { %13135 = vsyncadd (%p13382_p13), %s818_s13, 4294950880  ;;  %s831_s14 = scalar_lea.vmem [#allocation22], %s13561_s3  ;;  %s13618_s25 = scalar_lea.vmem [#allocation23], %s9855_s20 }
  0xb1   : > { %s20150_s24 = sld [smem:[#allocation36_spill]] }
  0xb7   : > { %p9867_p7 = scmp.ne.s32.totalorder %s20150_s24, 0 }
  0xb9   : > { %939 = sbr.rel (%p9867_p7) target bundleno = 207 (0xcf), region = 128 }
  0xbe   : > { %v940_v0 = vld [vmem:[%s13548_s8] sm:$0xff]  ;;  %v941_v1 = vld [vmem:[%s13548_s8 + $0x8] sm:$0xff]  ;;  %v942_v2 = vld [vmem:[%s13548_s8 + $0x10] sm:$0xff] }
  0xbf   : > { %956 = vst [vmem:[%s13618_s25] sm:$0xff] %v940_v0  ;;  %v943_v3 = vld [vmem:[%s13548_s8 + $0x18] sm:$0xff]  ;;  %v944_v4 = vld [vmem:[%s13548_s8 + $0x20] sm:$0xff]  ;;  %v945_v5 = vld [vmem:[%s13548_s8 + $0x28] sm:$0xff] }
  0xc0   : > { %957 = vst [vmem:[%s13618_s25 + $0x8] sm:$0xff] %v941_v1  ;;  %v946_v6 = vld [vmem:[%s13548_s8 + $0x30] sm:$0xff]  ;;  %v947_v7 = vld [vmem:[%s13548_s8 + $0x38] sm:$0xff]  ;;  %v948_v8 = vld [vmem:[%s13548_s8 + $0x40] sm:$0xff] }
  0xc1   : > { %958 = vst [vmem:[%s13618_s25 + $0x10] sm:$0xff] %v942_v2  ;;  %v949_v9 = vld [vmem:[%s13548_s8 + $0x48] sm:$0xff]  ;;  %v950_v10 = vld [vmem:[%s13548_s8 + $0x50] sm:$0xff]  ;;  %v951_v11 = vld [vmem:[%s13548_s8 + $0x58] sm:$0xff] }
  0xc2   : > { %959 = vst [vmem:[%s13618_s25 + $0x18] sm:$0xff] %v943_v3  ;;  %v952_v12 = vld [vmem:[%s13548_s8 + $0x60] sm:$0xff]  ;;  %v953_v13 = vld [vmem:[%s13548_s8 + $0x68] sm:$0xff]  ;;  %v954_v14 = vld [vmem:[%s13548_s8 + $0x70] sm:$0xff] }
  0xc3   : > { %960 = vst [vmem:[%s13618_s25 + $0x20] sm:$0xff] %v944_v4  ;;  %v955_v15 = vld [vmem:[%s13548_s8 + $0x78] sm:$0xff] }
  0xc4   : > { %961 = vst [vmem:[%s13618_s25 + $0x28] sm:$0xff] %v945_v5 }
  0xc5   : > { %962 = vst [vmem:[%s13618_s25 + $0x30] sm:$0xff] %v946_v6 }
  0xc6   : > { %963 = vst [vmem:[%s13618_s25 + $0x38] sm:$0xff] %v947_v7 }
  0xc7   : > { %964 = vst [vmem:[%s13618_s25 + $0x40] sm:$0xff] %v948_v8 }
  0xc8   : > { %965 = vst [vmem:[%s13618_s25 + $0x48] sm:$0xff] %v949_v9 }
  0xc9   : > { %966 = vst [vmem:[%s13618_s25 + $0x50] sm:$0xff] %v950_v10 }
  0xca   : > { %967 = vst [vmem:[%s13618_s25 + $0x58] sm:$0xff] %v951_v11 }
  0xcb   : > { %968 = vst [vmem:[%s13618_s25 + $0x60] sm:$0xff] %v952_v12 }
  0xcc   : > { %969 = vst [vmem:[%s13618_s25 + $0x68] sm:$0xff] %v953_v13 }
  0xcd   : > { %970 = vst [vmem:[%s13618_s25 + $0x70] sm:$0xff] %v954_v14 }
  0xce   : > { %971 = vst [vmem:[%s13618_s25 + $0x78] sm:$0xff] %v955_v15 }
  0xcf PF: > { %v13654_v16 = vld [vmem:[%s13618_s25 + $0x40] sm:$0xff]  ;;  %v13657_v17 = vld [vmem:[%s13618_s25 + $0x48] sm:$0xff]  ;;  %v978_v27 = vld [vmem:[%s13618_s25 + $0x30] sm:$0xff]  ;;  %v13192_v40 = vmov 256.0   ;;  %s13193_s20 = smov 64   ;;  %s20263_s8 = scalar_lea.vmem [#allocation14], %s13561_s3 }
  0xd0   : > { %v976_v18 = vld [vmem:[%s13618_s25 + $0x20] sm:$0xff]  ;;  %v1002_v19 = vadd.f32 %v13657_v17, %v13654_v16  ;;  %v977_v20 = vld [vmem:[%s13618_s25 + $0x28] sm:$0xff]  ;;  %v982_v25 = vld [vmem:[%s13618_s25 + $0x50] sm:$0xff]  ;;  %12237 = vrcp.f32 %v13192_v40  ;;  %s20264_s18 = scalar_lea.vmem [#allocation16], %s13561_s3  ;;  %s20594_s10 = sld [smem:[#allocation37_spill]] }
  0xd1   : > { %v972_v21 = vld [vmem:[%s13618_s25] sm:$0xff]  ;;  %v973_v22 = vld [vmem:[%s13618_s25 + $0x8] sm:$0xff]  ;;  %v996_v23 = vadd.f32 %v977_v20, %v976_v18  ;;  %v983_v26 = vld [vmem:[%s13618_s25 + $0x58] sm:$0xff] }
  0xd2   : > { %v990_v24 = vadd.f32 %v973_v22, %v972_v21  ;;  %1003 = vadd.xlane.f32.xlu2 %v1002_v19  ;;  %v979_v28 = vld [vmem:[%s13618_s25 + $0x38] sm:$0xff]  ;;  %v974_v29 = vld [vmem:[%s13618_s25 + $0x10] sm:$0xff]  ;;  %v1005_v31 = vadd.f32 %v983_v26, %v982_v25  ;;  %v13672_v34 = vld [vmem:[%s13618_s25 + $0x60] sm:$0xff] }
  0xd3   : > { %997 = vadd.xlane.f32.xlu1 %v996_v23  ;;  %v975_v30 = vld [vmem:[%s13618_s25 + $0x18] sm:$0xff]  ;;  %v999_v32 = vadd.f32 %v979_v28, %v978_v27  ;;  %v13675_v35 = vld [vmem:[%s13618_s25 + $0x68] sm:$0xff] }
  0xd4   : > { %991 = vadd.xlane.f32.xlu0 %v990_v24  ;;  %v993_v33 = vadd.f32 %v975_v30, %v974_v29  ;;  %v13678_v36 = vld [vmem:[%s13618_s25 + $0x70] sm:$0xff]  ;;  %v1008_v38 = vadd.f32 %v13675_v35, %v13672_v34 }
  0xd5   : > { %v13681_v37 = vld [vmem:[%s13618_s25 + $0x78] sm:$0xff] }
  0xd6   : > { %v1011_v39 = vadd.f32 %v13681_v37, %v13678_v36  ;;  %v12238_v41 = vpop.eup %12237  ;;  %s11893_s12 = sshll.u32 %s20594_s10, 7 }
  0xd7   : > { %v1015_v42 = vmul.f32 256.0, %v12238_v41  ;;  %vm1019_vm0 = vweird.f32 %v12238_v41 }
  0xd9   : > { %v1016_v43 = vsub.f32 1.0, %v1015_v42 }
  0xda   : > { %1006 = vadd.xlane.f32.xlu2 %v1005_v31 }
  0xdb   : > { %1000 = vadd.xlane.f32.xlu1 %v999_v32  ;;  %v1017_v44 = vmul.f32 %v12238_v41, %v1016_v43  ;;  %v11602_v43 = vld [vmem:[%s13572_s21 + $0x2e4] sm:$0xf0] }
  0xdc   : > { %994 = vadd.xlane.f32.xlu0 %v993_v33 }
  0xdd   : > { %v1018_v45 = vadd.f32 %v12238_v41, %v1017_v44  ;;  %v11551_v44 = vld [vmem:[%s13572_s21 + $0x154] sm:$0xf] }
  0xdf   : > { %v13687_v46 = vsel %vm1019_vm0, %v12238_v41, %v1018_v45  ;;  %v11554_v41 = vld [vmem:[%s13572_s21 + $0x164] sm:$0xf0]  ;;  %v10040_v45 = vld [vmem:[%s13572_s21 + $0x168] sm:$0xf0] }
  0xe0   : > { %20151 = vst [vmem:[#allocation48_spill] sm:$0xff] %v13687_v46 }
  0xe3   : > { %1012 = vadd.xlane.f32.xlu1 %v1011_v39 }
  0xe4   : > { %1009 = vadd.xlane.f32.xlu0 %v1008_v38 }
 0x145   : > { %v1004_v47 = vpop.xlane.xlu2 %1003 }
 0x146   : > { %v998_v48 = vpop.xlane.xlu1 %997  ;;  %v1025_v4 = vmul.f32 %v13687_v46, %v1004_v47 }
 0x147   : > { %v992_v49 = vpop.xlane.xlu0 %991  ;;  %v1023_v50 = vmul.f32 %v13687_v46, %v998_v48  ;;  %v10043_v48 = vor.u32 %v11551_v44, %v10040_v45  ;;  %v11578_v44 = vld [vmem:[%s13572_s21 + $0x224] sm:$0xf0]  ;;  %v11527_v45 = vld [vmem:[%s13572_s21 + $0x94] sm:$0xf] }
 0x148   : > { %v1021_v51 = vmul.f32 %v13687_v46, %v992_v49  ;;  %v13736_v19 = vsub.f32 %v13654_v16, %v1025_v4  ;;  %v11599_v49 = vld [vmem:[%s13572_s21 + $0x2d4] sm:$0xf] }
 0x149   : > { %v13691_v52 = vsub.f32 %v976_v18, %v1023_v50  ;;  %v13693_v53 = vsub.f32 %v977_v20, %v1023_v50  ;;  %v13739_v20 = vsub.f32 %v13657_v17, %v1025_v4  ;;  %v10232_v50 = vld [vmem:[%s13572_s21 + $0x2e8] sm:$0xf0]  ;;  %1895 = vmatpush.bf16.msra.mxu2 %v10043_v48  ;;  %v9990_v4 = vld [vmem:[%s13572_s21 + $0xf0] sm:$0xf] }
 0x14a   : > { %v13695_v54 = vsub.f32 %v972_v21, %v1021_v51  ;;  %v13697_v55 = vsub.f32 %v973_v22, %v1021_v51  ;;  %v10235_v51 = vor.u32 %v11599_v49, %v10232_v50  ;;  %v11575_v50 = vld [vmem:[%s13572_s21 + $0x214] sm:$0xf] }
 0x14b   : > { %v1049_v56 = vmul.f32 %v13691_v52, %v13691_v52  ;;  %v1050_v57 = vmul.f32 %v13693_v53, %v13693_v53  ;;  %v1054_v16 = vmul.f32 %v13739_v20, %v13739_v20 }
 0x14c   : > { %v1045_v58 = vmul.f32 %v13695_v54, %v13695_v54  ;;  %v1046_v59 = vmul.f32 %v13697_v55, %v13697_v55  ;;  %1924 = vmatpush.bf16.msra.mxu3 %v10235_v51  ;;  %v10136_v51 = vld [vmem:[%s13572_s21 + $0x228] sm:$0xf0] }
 0x14d   : > { %v1007_v60 = vpop.xlane.xlu2 %1006  ;;  %v1067_v61 = vadd.f32 %v1050_v57, %v1049_v56  ;;  %v10014_v56 = vld [vmem:[%s13572_s21 + $0x120] sm:$0xf]  ;;  %v11548_v57 = vld [vmem:[%s13572_s21 + $0x134] sm:$0xf0] }
 0x14e   : > { %v1061_v62 = vadd.f32 %v1046_v59, %v1045_v58  ;;  %v1026_v63 = vmul.f32 %v13687_v46, %v1007_v60  ;;  %v1001_v0 = vpop.xlane.xlu1 %1000  ;;  %v10206_v58 = vld [vmem:[%s13572_s21 + $0x2a0] sm:$0xf]  ;;  %v10015_v59 = vor.u32 %v11548_v57, %v10014_v56  ;;  %v11596_v60 = vld [vmem:[%s13572_s21 + $0x2b4] sm:$0xf0]  ;;  %v10139_v56 = vor.u32 %v11575_v50, %v10136_v51 }
 0x14f   : > { %v995_v1 = vpop.xlane.xlu0 %994  ;;  %v1024_v2 = vmul.f32 %v13687_v46, %v1001_v0  ;;  %1068 = vadd.xlane.f32.xlu1 %v1067_v61  ;;  %v11545_v61 = vld [vmem:[%s13572_s21 + $0x124] sm:$0xf] }
 0x150   : > { %v1022_v3 = vmul.f32 %v13687_v46, %v995_v1  ;;  %1062 = vadd.xlane.f32.xlu2 %v1061_v62  ;;  %v13711_v5 = vsub.f32 %v982_v25, %v1026_v63  ;;  %v13713_v6 = vsub.f32 %v983_v26, %v1026_v63  ;;  %v10016_v62 = vld [vmem:[%s13572_s21 + $0x138] sm:$0xf0]  ;;  %v10207_v63 = vor.u32 %v11596_v60, %v10206_v58  ;;  %v11593_v1 = vld [vmem:[%s13572_s21 + $0x2a4] sm:$0xf] }
 0x151   : > { %v13715_v7 = vsub.f32 %v978_v27, %v1024_v2  ;;  %v13717_v8 = vsub.f32 %v979_v28, %v1024_v2  ;;  %v1053_v28 = vmul.f32 %v13736_v19, %v13736_v19  ;;  %v10019_v0 = vor.u32 %v11545_v61, %v10016_v62  ;;  %v10208_v2 = vld [vmem:[%s13572_s21 + $0x2b8] sm:$0xf0]  ;;  %v9918_v61 = vld [vmem:[%s13572_s21 + $0x60] sm:$0xf]  ;;  %v11524_v62 = vld [vmem:[%s13572_s21 + $0x74] sm:$0xf0] }
 0x152   : > { %v13719_v9 = vsub.f32 %v974_v29, %v1022_v3  ;;  %v13721_v10 = vsub.f32 %v975_v30, %v1022_v3  ;;  %v1055_v11 = vmul.f32 %v13711_v5, %v13711_v5  ;;  %v1056_v12 = vmul.f32 %v13713_v6, %v13713_v6 }
 0x153   : > { %v1051_v13 = vmul.f32 %v13715_v7, %v13715_v7  ;;  %v1052_v14 = vmul.f32 %v13717_v8, %v13717_v8  ;;  %v10211_v3 = vor.u32 %v11593_v1, %v10208_v2  ;;  %1896 = vmatpush.bf16.msra.mxu2 %v10019_v0  ;;  %v9919_v0 = vor.u32 %v11524_v62, %v9918_v61  ;;  %v11572_v1 = vld [vmem:[%s13572_s21 + $0x1f4] sm:$0xf0]  ;;  %v11521_v2 = vld [vmem:[%s13572_s21 + $0x64] sm:$0xf] }
 0x154   : > { %v1047_v15 = vmul.f32 %v13719_v9, %v13719_v9  ;;  %v1048_v18 = vmul.f32 %v13721_v10, %v13721_v10  ;;  %v1076_v21 = vadd.f32 %v1056_v12, %v1055_v11  ;;  %v11542_v11 = vld [vmem:[%s13572_s21 + $0x104] sm:$0xf0]  ;;  %v10182_v12 = vld [vmem:[%s13572_s21 + $0x270] sm:$0xf] }
 0x155   : > { %v1070_v22 = vadd.f32 %v1052_v14, %v1051_v13  ;;  %1925 = vmatpush.bf16.msra.mxu3 %v10211_v3  ;;  %v9991_v13 = vor.u32 %v11542_v11, %v9990_v4  ;;  %v11590_v14 = vld [vmem:[%s13572_s21 + $0x284] sm:$0xf0]  ;;  %v9920_v3 = vld [vmem:[%s13572_s21 + $0x78] sm:$0xf0] }
 0x156   : > { %v1064_v23 = vadd.f32 %v1048_v18, %v1047_v15  ;;  %v1013_v25 = vpop.xlane.xlu1 %1012  ;;  %v11539_v15 = vld [vmem:[%s13572_s21 + $0xf4] sm:$0xf]  ;;  %v9992_v18 = vld [vmem:[%s13572_s21 + $0x108] sm:$0xf0] }
 0x157   : > { %v1010_v24 = vpop.xlane.xlu0 %1009  ;;  %1077 = vadd.xlane.f32.xlu1 %v1076_v21  ;;  %v1028_v27 = vmul.f32 %v13687_v46, %v1013_v25  ;;  %v10183_v21 = vor.u32 %v11590_v14, %v10182_v12  ;;  %v9923_v12 = vor.u32 %v11521_v2, %v9920_v3 }
 0x158   : > { %v1027_v26 = vmul.f32 %v13687_v46, %v1010_v24  ;;  %1071 = vadd.xlane.f32.xlu2 %v1070_v22  ;;  %1065 = vadd.xlane.f32.xlu0 %v1064_v23  ;;  %v9995_v22 = vor.u32 %v11539_v15, %v9992_v18  ;;  %v11587_v23 = vld [vmem:[%s13572_s21 + $0x274] sm:$0xf]  ;;  %v10184_v24 = vld [vmem:[%s13572_s21 + $0x288] sm:$0xf0]  ;;  %v10112_v15 = vld [vmem:[%s13572_s21 + $0x1f8] sm:$0xf0] }
 0x159   : > { %v13758_v32 = vsub.f32 %v13678_v36, %v1028_v27  ;;  %v13761_v33 = vsub.f32 %v13681_v37, %v1028_v27  ;;  %v10038_v36 = vld [vmem:[%s13572_s21 + $0x150] sm:$0xf]  ;;  %v10187_v25 = vor.u32 %v11587_v23, %v10184_v24  ;;  %v11536_v27 = vld [vmem:[%s13572_s21 + $0xd4] sm:$0xf0] }
 0x15a   : > { %v13748_v17 = vsub.f32 %v13672_v34, %v1027_v26  ;;  %v13751_v29 = vsub.f32 %v13675_v35, %v1027_v26  ;;  %v1073_v34 = vadd.f32 %v1054_v16, %v1053_v28  ;;  %v10230_v37 = vld [vmem:[%s13572_s21 + $0x2d0] sm:$0xf]  ;;  %v10039_v42 = vor.u32 %v11554_v41, %v10038_v36  ;;  %1897 = vmatpush.bf16.msra.mxu2 %v9995_v22  ;;  %v9966_v26 = vld [vmem:[%s13572_s21 + $0xc0] sm:$0xf]  ;;  %v11518_v22 = vld [vmem:[%s13572_s21 + $0x44] sm:$0xf0] }
 0x15b   : > { %v1059_v35 = vmul.f32 %v13758_v32, %v13758_v32  ;;  %v1060_v39 = vmul.f32 %v13761_v33, %v13761_v33  ;;  %v10231_v47 = vor.u32 %v11602_v43, %v10230_v37  ;;  %1926 = vmatpush.bf16.msra.mxu3 %v10187_v25  ;;  %v10158_v28 = vld [vmem:[%s13572_s21 + $0x240] sm:$0xf]  ;;  %v9967_v16 = vor.u32 %v11536_v27, %v9966_v26  ;;  %v9942_v41 = vld [vmem:[%s13572_s21 + $0x90] sm:$0xf]  ;;  %v11530_v37 = vld [vmem:[%s13572_s21 + $0xa4] sm:$0xf0] }
 0x15c   : > { %v1057_v30 = vmul.f32 %v13748_v17, %v13748_v17  ;;  %v1058_v31 = vmul.f32 %v13751_v29, %v13751_v29  ;;  %1837 = vmatpush.bf16.msra.mxu0 %v10039_v42  ;;  %v10134_v42 = vld [vmem:[%s13572_s21 + $0x210] sm:$0xf]  ;;  %v9943_v43 = vor.u32 %v11530_v37, %v9942_v41  ;;  %v11566_v25 = vld [vmem:[%s13572_s21 + $0x1c4] sm:$0xf0]  ;;  %v11515_v26 = vld [vmem:[%s13572_s21 + $0x34] sm:$0xf] }
 0x15d   : > { %v1082_v40 = vadd.f32 %v1060_v39, %v1059_v35  ;;  %1866 = vmatpush.bf16.msra.mxu1 %v10231_v47  ;;  %v11581_v39 = vld [vmem:[%s13572_s21 + $0x244] sm:$0xf]  ;;  %v9944_v47 = vld [vmem:[%s13572_s21 + $0xa8] sm:$0xf0]  ;;  %v10135_v48 = vor.u32 %v11578_v44, %v10134_v42  ;;  %v10086_v23 = vld [vmem:[%s13572_s21 + $0x1b0] sm:$0xf] }
 0x15e   : > { %v1079_v38 = vadd.f32 %v1058_v31, %v1057_v30  ;;  %v11584_v30 = vld [vmem:[%s13572_s21 + $0x254] sm:$0xf0]  ;;  %v11533_v31 = vld [vmem:[%s13572_s21 + $0xc4] sm:$0xf]  ;;  %v9947_v49 = vor.u32 %v11527_v45, %v9944_v47  ;;  %v9896_v27 = vld [vmem:[%s13572_s21 + $0x48] sm:$0xf0] }
 0x15f   : > { %v10062_v41 = vld [vmem:[%s13572_s21 + $0x180] sm:$0xf]  ;;  %v11509_v44 = vld [vmem:[%s13572_s21 + $0x4] sm:$0xf]  ;;  %v9872_v45 = vld [vmem:[%s13572_s21 + $0x18] sm:$0xf0] }
 0x160   : > { %1080 = vadd.xlane.f32.xlu2 %v1079_v38  ;;  %1074 = vadd.xlane.f32.xlu0 %v1073_v34  ;;  %v9968_v34 = vld [vmem:[%s13572_s21 + $0xd8] sm:$0xf0]  ;;  %v10159_v38 = vor.u32 %v11584_v30, %v10158_v28  ;;  %v10087_v28 = vor.u32 %v11566_v25, %v10086_v23  ;;  %v11563_v30 = vld [vmem:[%s13572_s21 + $0x1b4] sm:$0xf]  ;;  %v988_v23 = vld [vmem:[%s721_s19] sm:$0x3] }
 0x161   : > { %1838 = vmatpush.bf16.msra.mxu0 %v10015_v59  ;;  %1867 = vmatpush.bf16.msra.mxu1 %v10207_v63  ;;  %v9971_v35 = vor.u32 %v11533_v31, %v9968_v34  ;;  %v10110_v63 = vld [vmem:[%s13572_s21 + $0x1e0] sm:$0xf]  ;;  %v10088_v31 = vld [vmem:[%s13572_s21 + $0x1c8] sm:$0xf0] }
 0x162   : > { %v10111_v11 = vor.u32 %v11572_v1, %v10110_v63 }
 0x163   : > { %1898 = vmatpush.bf16.msra.mxu2 %v9971_v35 }
 0x165   : > { %1839 = vmatpush.bf16.msra.mxu0 %v9991_v13  ;;  %1868 = vmatpush.bf16.msra.mxu1 %v10183_v21  ;;  %v11569_v13 = vld [vmem:[%s13572_s21 + $0x1e4] sm:$0xf]  ;;  %v9894_v21 = vld [vmem:[%s13572_s21 + $0x30] sm:$0xf] }
 0x166   : > { %v10115_v18 = vor.u32 %v11569_v13, %v10112_v15  ;;  %v9895_v24 = vor.u32 %v11518_v22, %v9894_v21 }
 0x167   : > { %1899 = vmatpush.bf16.msra.mxu2 %v9947_v49  ;;  %v9875_v49 = vor.u32 %v11509_v44, %v9872_v45 }
 0x168   : > { %1083 = vadd.xlane.f32.xlu0 %v1082_v40  ;;  %v10160_v40 = vld [vmem:[%s13572_s21 + $0x258] sm:$0xf0] }
 0x169   : > { %1840 = vmatpush.bf16.msra.mxu0 %v9967_v16  ;;  %v10163_v36 = vor.u32 %v11581_v39, %v10160_v40  ;;  %1869 = vmatpush.bf16.msra.mxu1 %v10159_v38  ;;  %v9899_v16 = vor.u32 %v11515_v26, %v9896_v27  ;;  %v10091_v38 = vor.u32 %v11563_v30, %v10088_v31  ;;  %v9870_v40 = vld [vmem:[%s13572_s21] sm:$0xf]  ;;  %v13867_v30 = vperm.slane %v988_v23, 0 }
 0x16b   : > { %1927 = vmatpush.bf16.msra.mxu3 %v10163_v36  ;;  %1900 = vmatpush.bf16.msra.mxu2 %v9923_v12  ;;  %v11512_v36 = vld [vmem:[%s13572_s21 + $0x14] sm:$0xf0] }
 0x16c   : > { %v9871_v42 = vor.u32 %v11512_v36, %v9870_v40 }
 0x16d   : > { %1841 = vmatpush.bf16.msra.mxu0 %v9943_v43  ;;  %1870 = vmatpush.bf16.msra.mxu1 %v10135_v48  ;;  %v11560_v43 = vld [vmem:[%s13572_s21 + $0x194] sm:$0xf0] }
 0x16e   : > { %v10063_v48 = vor.u32 %v11560_v43, %v10062_v41 }
 0x16f   : > { %1928 = vmatpush.bf16.msra.mxu3 %v10139_v56  ;;  %1901 = vmatpush.bf16.msra.mxu2 %v9899_v16  ;;  %v989_v16 = vld [vmem:[%s731_s27] sm:$0x3]  ;;  %s20597_s27 = sld [smem:[#allocation95_spill]] }
 0x170   : > { %v13878_v43 = vperm.slane %v989_v16, 1 }
 0x171   : > { %1842 = vmatpush.bf16.msra.mxu0 %v9919_v0  ;;  %1871 = vmatpush.bf16.msra.mxu1 %v10111_v11 }
 0x173   : > { %1929 = vmatpush.bf16.msra.mxu3 %v10115_v18  ;;  %1902 = vmatpush.bf16.msra.mxu2 %v9875_v49 }
 0x175   : > { %1843 = vmatpush.bf16.msra.mxu0 %v9895_v24  ;;  %1872 = vmatpush.bf16.msra.mxu1 %v10087_v28 }
 0x177   : > { %1930 = vmatpush.bf16.msra.mxu3 %v10091_v38 }
 0x179   : > { %1844 = vmatpush.bf16.msra.mxu0 %v9871_v42  ;;  %1873 = vmatpush.bf16.msra.mxu1 %v10063_v48  ;;  %v13876_v42 = vperm.slane %v989_v16, 0 }
 0x1c2   : > { %v1069_v57 = vpop.xlane.xlu1 %1068 }
 0x1c3   : > { %v1063_v58 = vpop.xlane.xlu2 %1062  ;;  %v1087_v59 = vmul.f32 %v1069_v57, %v13687_v46  ;;  %v11557_v57 = vld [vmem:[%s13572_s21 + $0x184] sm:$0xf] }
 0x1c4   : > { %v1085_v60 = vmul.f32 %v1063_v58, %v13687_v46  ;;  %v10064_v58 = vld [vmem:[%s13572_s21 + $0x198] sm:$0xf0] }
 0x1c5   : > { %v13818_v14 = vadd.f32 1e-05, %v1087_v59  ;;  %v10067_v62 = vor.u32 %v11557_v57, %v10064_v58 }
 0x1c6   : > { %v13815_v4 = vadd.f32 1e-05, %v1085_v60 }
 0x1c7   : > { %1931 = vmatpush.bf16.msra.mxu3 %v10067_v62  ;;  %vm1127_vm9 = vweird.f32 %v13818_v14 }
 0x1c8   : > { %12239 = vrsqrt.f32 %v13815_v4  ;;  %vm1107_vm2 = vweird.f32 %v13815_v4 }
 0x1c9   : > { %12241 = vrsqrt.f32 %v13818_v14 }
 0x1ca   : > { %v1078_v51 = vpop.xlane.xlu1 %1077 }
 0x1cb   : > { %v1072_v34 = vpop.xlane.xlu2 %1071  ;;  %v1066_v39 = vpop.xlane.xlu0 %1065  ;;  %v1090_v61 = vmul.f32 %v1078_v51, %v13687_v46 }
 0x1cc   : > { %v1088_v35 = vmul.f32 %v1072_v34, %v13687_v46  ;;  %v1086_v37 = vmul.f32 %v1066_v39, %v13687_v46 }
 0x1cd   : > { %v13850_v11 = vadd.f32 1e-05, %v1090_v61 }
 0x1ce   : > { %v13839_v47 = vadd.f32 1e-05, %v1088_v35  ;;  %v12240_v50 = vpop.eup %12239  ;;  %v1094_v56 = vadd.f32 1e-05, %v1086_v37 }
 0x1cf   : > { %v1102_v59 = vmul.f32 %v12240_v50, %v13815_v4  ;;  %v13846_v63 = vpop.eup %12241  ;;  %vm1108_vm1 = vweird.f32 %v12240_v50  ;;  %v13869_v4 = vperm.slane %v988_v23, 1  ;;  %vm1157_vm13 = vweird.f32 %v13850_v11 }
 0x1d0   : > { %12243 = vrsqrt.f32 %v13839_v47  ;;  %v1122_v2 = vmul.f32 %v13846_v63, %v13818_v14  ;;  %vm1109_vm3 = vmor %vm1107_vm2, %vm1108_vm1  ;;  %vm1117_vm5 = vweird.f32 %v1094_v56  ;;  %vm1137_vm6 = vweird.f32 %v13839_v47 }
 0x1d1   : > { %v1103_v60 = vmul.f32 %v12240_v50, %v1102_v59  ;;  %12245 = vrsqrt.f32 %v1094_v56  ;;  %vm1128_vm10 = vweird.f32 %v13846_v63 }
 0x1d2   : > { %v1123_v24 = vmul.f32 %v13846_v63, %v1122_v2  ;;  %12247 = vrsqrt.f32 %v13850_v11  ;;  %vm1129_vm12 = vmor %vm1127_vm9, %vm1128_vm10  ;;  %vm2469_vm9 = vcmask 523264  }
 0x1d3   : > { %v1104_v0 = vmul.f32 0.5, %v1103_v60  ;;  %v1075_v1 = vpop.xlane.xlu0 %1074  ;;  %v1081_v41 = vpop.xlane.xlu2 %1080 }
 0x1d4   : > { %v1089_v12 = vmul.f32 %v1075_v1, %v13687_v46  ;;  %v1124_v34 = vmul.f32 0.5, %v1123_v24 }
 0x1d5   : > { %v1105_v3 = vsub.f32 1.5, %v1104_v0 }
 0x1d6   : > { %v13853_v13 = vpop.eup %12243  ;;  %v13863_v26 = vadd.f32 1e-05, %v1089_v12  ;;  %v1125_v48 = vsub.f32 1.5, %v1124_v34 }
 0x1d7   : > { %v12246_v15 = vpop.eup %12245  ;;  %v1106_v18 = vmul.f32 %v12240_v50, %v1105_v3  ;;  %v1132_v21 = vmul.f32 %v13853_v13, %v13839_v47  ;;  %vm1138_vm8 = vweird.f32 %v13853_v13 }
 0x1d8   : > { %v1112_v22 = vmul.f32 %v12246_v15, %v1094_v56  ;;  %12249 = vrsqrt.f32 %v13863_v26  ;;  %vm1118_vm4 = vweird.f32 %v12246_v15  ;;  %v13874_v37 = vpop.eup %12247  ;;  %vm1139_vm11 = vmor %vm1137_vm6, %vm1138_vm8  ;;  %vm1147_vm15 = vweird.f32 %v13863_v26 }
 0x1d9   : > { %v1133_v25 = vmul.f32 %v13853_v13, %v1132_v21  ;;  %v1110_v28 = vsel %vm1109_vm3, %v12240_v50, %v1106_v18  ;;  %vm1119_vm7 = vmor %vm1117_vm5, %vm1118_vm4  ;;  %v1152_v51 = vmul.f32 %v13874_v37, %v13850_v11  ;;  %vm1158_vm14 = vweird.f32 %v13874_v37  ;;  %v9928_v11 = vld [vmem:[%s13572_s21 + $0x80] sm:$0xf0] }
 0x1da   : > { %v1113_v27 = vmul.f32 %v12246_v15, %v1112_v22  ;;  %v1181_v39 = vmul.f32 %v1110_v28, %v13695_v54  ;;  %v1182_v40 = vmul.f32 %v1110_v28, %v13697_v55  ;;  %v1091_v54 = vmul.f32 %v1081_v41, %v13687_v46  ;;  %v10238_v28 = vld [vmem:[%s13572_s21 + $0x2d8] sm:$0xf]  ;;  %v11600_v41 = vld [vmem:[%s13572_s21 + $0x2dc] sm:$0xf]  ;;  %vm13977_vm1 = vmor %vm1157_vm13, %vm1158_vm14 }
 0x1db   : > { %v1134_v38 = vmul.f32 0.5, %v1133_v25  ;;  %v1084_v35 = vpop.xlane.xlu0 %1083  ;;  %v1153_v14 = vmul.f32 %v13874_v37, %v1152_v51 }
 0x1dc   : > { %v1114_v31 = vmul.f32 0.5, %v1113_v27  ;;  %v1092_v45 = vmul.f32 %v1084_v35, %v13687_v46  ;;  %v1202_v55 = vmul.f32 %v13867_v30, %v1181_v39  ;;  %v1203_v50 = vmul.f32 %v13869_v4, %v1182_v40  ;;  %v11555_v27 = vld [vmem:[%s13572_s21 + $0x16c] sm:$0xf0]  ;;  %v11552_v35 = vld [vmem:[%s13572_s21 + $0x15c] sm:$0xf] }
 0x1dd   : > { %v1135_v49 = vsub.f32 1.5, %v1134_v38  ;;  %v13901_v2 = vadd.f32 1e-05, %v1091_v54  ;;  %v1154_v24 = vmul.f32 0.5, %v1153_v14  ;;  %v10048_v39 = vld [vmem:[%s13572_s21 + $0x170] sm:$0xf0] }
 0x1de   : > { %v1115_v36 = vsub.f32 1.5, %v1114_v31  ;;  %v13887_v58 = vpop.eup %12249  ;;  %v13892_v60 = vadd.f32 1e-05, %v1092_v45  ;;  %v1224_v3 = vadd.f32 %v13878_v43, %v1203_v50  ;;  %v10022_v45 = vld [vmem:[%s13572_s21 + $0x128] sm:$0xf]  ;;  %v10051_v51 = vor.u32 %v11552_v35, %v10048_v39 }
 0x1df   : > { %v1142_v61 = vmul.f32 %v13887_v58, %v13863_v26  ;;  %v1136_v62 = vmul.f32 %v13853_v13, %v1135_v49  ;;  %v11549_v49 = vld [vmem:[%s13572_s21 + $0x13c] sm:$0xf0]  ;;  %v10214_v54 = vld [vmem:[%s13572_s21 + $0x2a8] sm:$0xf]  ;;  %v9998_v14 = vld [vmem:[%s13572_s21 + $0xf8] sm:$0xf]  ;;  %vm1148_vm0 = vweird.f32 %v13887_v58  ;;  %vm1167_vm5 = vweird.f32 %v13901_v2 }
 0x1e0   : > { %v1116_v44 = vmul.f32 %v12246_v15, %v1115_v36  ;;  %12251 = vrsqrt.f32 %v13892_v60  ;;  %2011 = vmatpush.bf16.msrb.mxu2 %v10051_v51  ;;  %v10192_v35 = vld [vmem:[%s13572_s21 + $0x290] sm:$0xf0]  ;;  %vm13990_vm2 = vmor %vm1147_vm15, %vm1148_vm0  ;;  %v11534_v26 = vld [vmem:[%s13572_s21 + $0xcc] sm:$0xf]  ;;  %vm1177_vm3 = vweird.f32 %v13892_v60 }
 0x1e1   : > { %v1143_v18 = vmul.f32 %v13887_v58, %v1142_v61  ;;  %v1140_v21 = vsel %vm1139_vm11, %v13853_v13, %v1136_v62  ;;  %12253 = vrsqrt.f32 %v13901_v2  ;;  %v10024_v61 = vld [vmem:[%s13572_s21 + $0x140] sm:$0xf0] }
 0x1e2   : > { %v1120_v57 = vsel %vm1119_vm7, %v12246_v15, %v1116_v44  ;;  %v1187_v13 = vmul.f32 %v1140_v21, %v13715_v7  ;;  %v1188_v34 = vmul.f32 %v1140_v21, %v13717_v8  ;;  %v11603_v7 = vld [vmem:[%s13572_s21 + $0x2ec] sm:$0xf0]  ;;  %v10240_v44 = vld [vmem:[%s13572_s21 + $0x2f0] sm:$0xf0]  ;;  %v1155_v8 = vsub.f32 1.5, %v1154_v24 }
 0x1e3   : > { %v1183_v56 = vmul.f32 %v1120_v57, %v13719_v9  ;;  %v1184_v59 = vmul.f32 %v1120_v57, %v13721_v10  ;;  %v1126_v9 = vmul.f32 %v13846_v63, %v1125_v48  ;;  %v1223_v10 = vadd.f32 %v13876_v42, %v1202_v55  ;;  %v10190_v21 = vld [vmem:[%s13572_s21 + $0x278] sm:$0xf]  ;;  %v9976_v51 = vld [vmem:[%s13572_s21 + $0xe0] sm:$0xf0] }
 0x1e4   : > { %v13922_v25 = vmul.f32 0.5, %v1143_v18  ;;  %v10239_v36 = vor.u32 %v11603_v7, %v10238_v28  ;;  %v1208_v50 = vmul.f32 %v13867_v30, %v1187_v13  ;;  %v10243_v57 = vor.u32 %v11600_v41, %v10240_v44  ;;  %v11543_v18 = vld [vmem:[%s13572_s21 + $0x10c] sm:$0xf0]  ;;  %v11588_v7 = vld [vmem:[%s13572_s21 + $0x27c] sm:$0xf] }
 0x1e5   : > { %v1204_v0 = vmul.f32 %v13867_v30, %v1183_v56  ;;  %v1205_v1 = vmul.f32 %v13869_v4, %v1184_v59  ;;  %v1130_v47 = vsel %vm1129_vm12, %v13846_v63, %v1126_v9  ;;  %v10046_v63 = vld [vmem:[%s13572_s21 + $0x158] sm:$0xf]  ;;  %v10023_v56 = vor.u32 %v11549_v49, %v10022_v45  ;;  %v11546_v59 = vld [vmem:[%s13572_s21 + $0x12c] sm:$0xf]  ;;  %v11591_v13 = vld [vmem:[%s13572_s21 + $0x28c] sm:$0xf0] }
 0x1e6   : > { %v13932_v16 = vpop.eup %12251  ;;  %v1185_v31 = vmul.f32 %v1130_v47, %v13691_v52  ;;  %v10047_v38 = vor.u32 %v11555_v27, %v10046_v63  ;;  %v1186_v52 = vmul.f32 %v1130_v47, %v13693_v53  ;;  %v1145_v48 = vsub.f32 1.5, %v13922_v25  ;;  %1982 = vmatpush.bf16.msrb.mxu1 %v10239_v36  ;;  %v11597_v53 = vld [vmem:[%s13572_s21 + $0x2bc] sm:$0xf0]  ;;  %2040 = vmatpush.bf16.msrb.mxu3 %v10243_v57  ;;  %v11540_v63 = vld [vmem:[%s13572_s21 + $0xfc] sm:$0xf] }
 0x1e7   : > { %v1225_v12 = vadd.f32 %v13876_v42, %v1204_v0  ;;  %v1226_v15 = vadd.f32 %v13878_v43, %v1205_v1  ;;  %v1172_v40 = vmul.f32 %v13932_v16, %v13892_v60  ;;  %v13950_v55 = vpop.eup %12253  ;;  %v1209_v0 = vmul.f32 %v13869_v4, %v1188_v34  ;;  %v10000_v27 = vld [vmem:[%s13572_s21 + $0x110] sm:$0xf0]  ;;  %v9974_v41 = vld [vmem:[%s13572_s21 + $0xc8] sm:$0xf]  ;;  %v11537_v44 = vld [vmem:[%s13572_s21 + $0xdc] sm:$0xf0] }
 0x1e8   : > { %1953 = vmatpush.bf16.msrb.mxu0 %v10047_v38  ;;  %v1206_v62 = vmul.f32 %v13867_v30, %v1185_v31  ;;  %v10215_v9 = vor.u32 %v11597_v53, %v10214_v54  ;;  %v1207_v47 = vmul.f32 %v13869_v4, %v1186_v52  ;;  %v1162_v24 = vmul.f32 %v13950_v55, %v13901_v2  ;;  %v11585_v49 = vld [vmem:[%s13572_s21 + $0x25c] sm:$0xf0]  ;;  %v11582_v57 = vld [vmem:[%s13572_s21 + $0x24c] sm:$0xf] }
 0x1e9   : > { %v13916_v22 = vpack.c.bf16 %v1225_v12, %v1223_v10  ;;  %v13918_v23 = vpack.c.bf16 %v1226_v15, %v1224_v3  ;;  %v1173_v1 = vmul.f32 %v13932_v16, %v1172_v40  ;;  %v11594_v10 = vld [vmem:[%s13572_s21 + $0x2ac] sm:$0xf]  ;;  %v10216_v3 = vld [vmem:[%s13572_s21 + $0x2c0] sm:$0xf0]  ;;  %v10027_v12 = vor.u32 %v11546_v59, %v10024_v61 }
 0x1ea   : > { %v10219_v15 = vor.u32 %v11594_v10, %v10216_v3  ;;  %v9999_v25 = vor.u32 %v11543_v18, %v9998_v14  ;;  %v1156_v28 = vmul.f32 %v13874_v37, %v1155_v8  ;;  %v1229_v34 = vadd.f32 %v13876_v42, %v1208_v50  ;;  %1983 = vmatpush.bf16.msrb.mxu1 %v10215_v9  ;;  %v10142_v18 = vld [vmem:[%s13572_s21 + $0x218] sm:$0xf] }
 0x1eb   : > { %1845 = vmatmul.bf16.vlgmr.msra.gmra.mxu0 %v13916_v22  ;;  %1874 = vmatmul.bf16.vlgmr.msra.gmra.mxu1 %v13918_v23  ;;  %v10191_v38 = vor.u32 %v11591_v13, %v10190_v21  ;;  %v1230_v39 = vadd.f32 %v13878_v43, %v1209_v0  ;;  %v1146_v40 = vmul.f32 %v13887_v58, %v1145_v48  ;;  %v13994_v36 = vmul.f32 0.5, %v1173_v1  ;;  %v10166_v48 = vld [vmem:[%s13572_s21 + $0x248] sm:$0xf] }
 0x1ec   : > { %1903 = vmatmul.bf16.vlgmr.msra.gmra.mxu2 %v13916_v22  ;;  %1932 = vmatmul.bf16.vlgmr.msra.gmra.mxu3 %v13918_v23  ;;  %v1227_v45 = vadd.f32 %v13876_v42, %v1206_v62  ;;  %v10003_v52 = vor.u32 %v11540_v63, %v10000_v27  ;;  %v10195_v8 = vor.u32 %v11588_v7, %v10192_v35  ;;  %v11576_v63 = vld [vmem:[%s13572_s21 + $0x21c] sm:$0xf]  ;;  %v10144_v27 = vld [vmem:[%s13572_s21 + $0x230] sm:$0xf0]  ;;  %v11573_v7 = vld [vmem:[%s13572_s21 + $0x1fc] sm:$0xf0]  ;;  %vm1178_vm4 = vweird.f32 %v13932_v16 }
 0x1ed   : > { %1954 = vmatpush.bf16.msrb.mxu0 %v10023_v56  ;;  %2012 = vmatpush.bf16.msrb.mxu2 %v10027_v12  ;;  %v1228_v54 = vadd.f32 %v13878_v43, %v1207_v47  ;;  %v1163_v50 = vmul.f32 %v13950_v55, %v1162_v24  ;;  %v10168_v56 = vld [vmem:[%s13572_s21 + $0x260] sm:$0xf0]  ;;  %v1160_v53 = vsel %vm13977_vm1, %v13874_v37, %v1156_v28  ;;  %v1175_v3 = vsub.f32 1.5, %v13994_v36  ;;  %v9950_v12 = vld [vmem:[%s13572_s21 + $0x98] sm:$0xf]  ;;  %vm14067_vm6 = vmor %vm1177_vm3, %vm1178_vm4 }
 0x1ee   : > { %2041 = vmatpush.bf16.msrb.mxu3 %v10219_v15  ;;  %v14010_v59 = vpack.c.bf16 %v1229_v34, %v1227_v45  ;;  %1984 = vmatpush.bf16.msrb.mxu1 %v10191_v38  ;;  %v1150_v62 = vsel %vm13990_vm2, %v13887_v58, %v1146_v40  ;;  %v9975_v0 = vor.u32 %v11537_v44, %v9974_v41  ;;  %v11531_v15 = vld [vmem:[%s13572_s21 + $0xac] sm:$0xf0]  ;;  %v9952_v24 = vld [vmem:[%s13572_s21 + $0xb0] sm:$0xf0]  ;;  %v9926_v28 = vld [vmem:[%s13572_s21 + $0x68] sm:$0xf]  ;;  %vm1168_vm7 = vweird.f32 %v13950_v55 }
 0x1ef   : > { %v14012_v61 = vpack.c.bf16 %v1230_v39, %v1228_v54  ;;  %v10167_v1 = vor.u32 %v11585_v49, %v10166_v48  ;;  %v9979_v9 = vor.u32 %v11534_v26, %v9976_v51  ;;  %v10171_v10 = vor.u32 %v11582_v57, %v10168_v56  ;;  %v11579_v47 = vld [vmem:[%s13572_s21 + $0x22c] sm:$0xf0]  ;;  %v11525_v34 = vld [vmem:[%s13572_s21 + $0x7c] sm:$0xf0]  ;;  %v10118_v38 = vld [vmem:[%s13572_s21 + $0x1e8] sm:$0xf] }
 0x1f0   : > { %v14017_v37 = vmul.f32 0.5, %v1163_v50  ;;  %v1191_v58 = vmul.f32 %v1160_v53, %v13711_v5  ;;  %v1189_v14 = vmul.f32 %v1150_v62, %v13736_v19  ;;  %v1190_v21 = vmul.f32 %v1150_v62, %v13739_v20  ;;  %v11528_v19 = vld [vmem:[%s13572_s21 + $0x9c] sm:$0xf]  ;;  %v11522_v40 = vld [vmem:[%s13572_s21 + $0x6c] sm:$0xf]  ;;  %vm1169_vm8 = vmor %vm1167_vm5, %vm1168_vm7 }
 0x1f1   : > { %1955 = vmatpush.bf16.msrb.mxu0 %v9999_v25  ;;  %2013 = vmatpush.bf16.msrb.mxu2 %v10003_v52  ;;  %v9951_v5 = vor.u32 %v11531_v15, %v9950_v12  ;;  %v10143_v25 = vor.u32 %v11579_v47, %v10142_v18  ;;  %v9955_v13 = vor.u32 %v11528_v19, %v9952_v24  ;;  %v11570_v41 = vld [vmem:[%s13572_s21 + $0x1ec] sm:$0xf]  ;;  %v10120_v52 = vld [vmem:[%s13572_s21 + $0x200] sm:$0xf0]  ;;  %v11519_v48 = vld [vmem:[%s13572_s21 + $0x4c] sm:$0xf0] }
 0x1f2   : > { %2042 = vmatpush.bf16.msrb.mxu3 %v10195_v8  ;;  %1985 = vmatpush.bf16.msrb.mxu1 %v10167_v1  ;;  %v1192_v20 = vmul.f32 %v1160_v53, %v13713_v6  ;;  %v10147_v31 = vor.u32 %v11576_v63, %v10144_v27  ;;  %v1212_v35 = vmul.f32 %v13867_v30, %v1191_v58  ;;  %v9902_v8 = vld [vmem:[%s13572_s21 + $0x38] sm:$0xf]  ;;  %v11567_v50 = vld [vmem:[%s13572_s21 + $0x1cc] sm:$0xf0]  ;;  %v11516_v51 = vld [vmem:[%s13572_s21 + $0x3c] sm:$0xf] }
 0x1f3   : > { %v1210_v39 = vmul.f32 %v13867_v30, %v1189_v14  ;;  %v1211_v44 = vmul.f32 %v13869_v4, %v1190_v21  ;;  %v9927_v6 = vor.u32 %v11525_v34, %v9926_v28  ;;  %v10119_v45 = vor.u32 %v11573_v7, %v10118_v38  ;;  %v10094_v54 = vld [vmem:[%s13572_s21 + $0x1b8] sm:$0xf]  ;;  %v9904_v56 = vld [vmem:[%s13572_s21 + $0x50] sm:$0xf0]  ;;  %v11564_v53 = vld [vmem:[%s13572_s21 + $0x1bc] sm:$0xf] }
 0x1f4   : > { %v9931_v49 = vor.u32 %v11522_v40, %v9928_v11  ;;  %v10123_v26 = vor.u32 %v11570_v41, %v10120_v52  ;;  %v1213_v57 = vmul.f32 %v13869_v4, %v1192_v20  ;;  %v10096_v62 = vld [vmem:[%s13572_s21 + $0x1d0] sm:$0xf0]  ;;  %v1165_v1 = vsub.f32 1.5, %v14017_v37  ;;  %v9878_v12 = vld [vmem:[%s13572_s21 + $0x8] sm:$0xf] }
 0x1f5   : > { %1956 = vmatpush.bf16.msrb.mxu0 %v9975_v0  ;;  %2014 = vmatpush.bf16.msrb.mxu2 %v9979_v9  ;;  %v1233_v0 = vadd.f32 %v13876_v42, %v1212_v35  ;;  %v1231_v9 = vadd.f32 %v13876_v42, %v1210_v39  ;;  %v9903_v37 = vor.u32 %v11519_v48, %v9902_v8  ;;  %v11513_v15 = vld [vmem:[%s13572_s21 + $0x1c] sm:$0xf0]  ;;  %v11510_v19 = vld [vmem:[%s13572_s21 + $0xc] sm:$0xf]  ;;  %v10072_v63 = vld [vmem:[%s13572_s21 + $0x1a0] sm:$0xf0] }
 0x1f6   : > { %2043 = vmatpush.bf16.msrb.mxu3 %v10171_v10  ;;  %1986 = vmatpush.bf16.msrb.mxu1 %v10143_v25  ;;  %v1232_v10 = vadd.f32 %v13878_v43, %v1211_v44  ;;  %v10095_v14 = vor.u32 %v11567_v50, %v10094_v54  ;;  %v1176_v60 = vmul.f32 %v13932_v16, %v1175_v3  ;;  %v11561_v47 = vld [vmem:[%s13572_s21 + $0x19c] sm:$0xf0]  ;;  %v9880_v25 = vld [vmem:[%s13572_s21 + $0x20] sm:$0xf0]  ;;  %v10056_v8 = vld [vmem:[%s13572_s21 + $0x178] sm:$0xf0] }
 0x1f7   : > { %v9907_v18 = vor.u32 %v11516_v51, %v9904_v56  ;;  %v10099_v21 = vor.u32 %v11564_v53, %v10096_v62  ;;  %v1234_v24 = vadd.f32 %v13878_v43, %v1213_v57  ;;  %v1166_v27 = vmul.f32 %v13950_v55, %v1165_v1  ;;  %v11553_v52 = vld [vmem:[%s13572_s21 + $0x164] sm:$0xf]  ;;  %v10248_v54 = vld [vmem:[%s13572_s21 + $0x2f8] sm:$0xf0]  ;;  %v10030_v50 = vld [vmem:[%s13572_s21 + $0x130] sm:$0xf] }
 0x1f8   : > { %v14085_v28 = vpack.c.bf16 %v1233_v0, %v1231_v9  ;;  %v9879_v3 = vor.u32 %v11513_v15, %v9878_v12  ;;  %v9883_v34 = vor.u32 %v11510_v19, %v9880_v25  ;;  %v11550_v57 = vld [vmem:[%s13572_s21 + $0x144] sm:$0xf0]  ;;  %v10222_v56 = vld [vmem:[%s13572_s21 + $0x2b0] sm:$0xf]  ;;  %v11547_v1 = vld [vmem:[%s13572_s21 + $0x134] sm:$0xf] }
 0x1f9   : > { %1957 = vmatpush.bf16.msrb.mxu0 %v9951_v5  ;;  %2015 = vmatpush.bf16.msrb.mxu2 %v9955_v13  ;;  %v10070_v5 = vld [vmem:[%s13572_s21 + $0x188] sm:$0xf]  ;;  %v11558_v13 = vld [vmem:[%s13572_s21 + $0x18c] sm:$0xf]  ;;  %v14091_v36 = vpack.c.bf16 %v1234_v24, %v1232_v10  ;;  %v1170_v2 = vsel %vm1169_vm8, %v13950_v55, %v1166_v27  ;;  %v10031_v62 = vor.u32 %v11550_v57, %v10030_v50  ;;  %v11595_v10 = vld [vmem:[%s13572_s21 + $0x2b4] sm:$0xf] }
 0x1fa   : > { %2044 = vmatpush.bf16.msrb.mxu3 %v10147_v31  ;;  %1987 = vmatpush.bf16.msrb.mxu1 %v10119_v45  ;;  %v10071_v20 = vor.u32 %v11561_v47, %v10070_v5  ;;  %v1180_v31 = vsel %vm14067_vm6, %v13932_v16, %v1176_v60  ;;  %v10075_v38 = vor.u32 %v11558_v13, %v10072_v63  ;;  %v11604_v45 = vld [vmem:[%s13572_s21 + $0x2f4] sm:$0xf0]  ;;  %v11598_v53 = vld [vmem:[%s13572_s21 + $0x2c4] sm:$0xf0]  ;;  %v10032_v9 = vld [vmem:[%s13572_s21 + $0x148] sm:$0xf0] }
 0x1fb   : > { %1850 = vmatmul.bf16.gmra.mxu0 %v14010_v59  ;;  %1879 = vmatmul.bf16.gmra.mxu1 %v14012_v61  ;;  %v1195_v7 = vmul.f32 %v1180_v31, %v13758_v32  ;;  %v1196_v35 = vmul.f32 %v1180_v31, %v13761_v33  ;;  %v1193_v16 = vmul.f32 %v1170_v2, %v13748_v17  ;;  %v11544_v12 = vld [vmem:[%s13572_s21 + $0x114] sm:$0xf0]  ;;  %v10198_v60 = vld [vmem:[%s13572_s21 + $0x280] sm:$0xf]  ;;  %v10008_v47 = vld [vmem:[%s13572_s21 + $0x118] sm:$0xf0] }
 0x1fc   : > { %1908 = vmatmul.bf16.gmra.mxu2 %v14010_v59  ;;  %1937 = vmatmul.bf16.gmra.mxu3 %v14012_v61  ;;  %v1194_v39 = vmul.f32 %v1170_v2, %v13751_v29  ;;  %v10223_v0 = vor.u32 %v11598_v53, %v10222_v56  ;;  %v10035_v58 = vor.u32 %v11547_v1, %v10032_v9  ;;  %v11589_v19 = vld [vmem:[%s13572_s21 + $0x284] sm:$0xf]  ;;  %v10200_v24 = vld [vmem:[%s13572_s21 + $0x298] sm:$0xf0]  ;;  %v9982_v27 = vld [vmem:[%s13572_s21 + $0xd0] sm:$0xf] }
 0x1fd   : > { %1958 = vmatpush.bf16.msrb.mxu0 %v9927_v6  ;;  %2016 = vmatpush.bf16.msrb.mxu2 %v9931_v49  ;;  %v1216_v40 = vmul.f32 %v13867_v30, %v1195_v7  ;;  %v1217_v55 = vmul.f32 %v13869_v4, %v1196_v35  ;;  %v1214_v11 = vmul.f32 %v13867_v30, %v1193_v16  ;;  %v10054_v30 = vld [vmem:[%s13572_s21 + $0x160] sm:$0xf]  ;;  %v11586_v31 = vld [vmem:[%s13572_s21 + $0x264] sm:$0xf0]  ;;  %v11583_v2 = vld [vmem:[%s13572_s21 + $0x254] sm:$0xf] }
 0x1fe   : > { %2045 = vmatpush.bf16.msrb.mxu3 %v10123_v26  ;;  %1988 = vmatpush.bf16.msrb.mxu1 %v10095_v14  ;;  %v1215_v41 = vmul.f32 %v13869_v4, %v1194_v39  ;;  %v11556_v4 = vld [vmem:[%s13572_s21 + $0x174] sm:$0xf0]  ;;  %v10059_v49 = vor.u32 %v11553_v52, %v10056_v8  ;;  %v11601_v26 = vld [vmem:[%s13572_s21 + $0x2e4] sm:$0xf]  ;;  %v10006_v14 = vld [vmem:[%s13572_s21 + $0x100] sm:$0xf]  ;;  %v10203_v63 = vor.u32 %v11589_v19, %v10200_v24 }
 0x1ff   : > { %v1237_v32 = vadd.f32 %v13876_v42, %v1216_v40  ;;  %v1238_v33 = vadd.f32 %v13878_v43, %v1217_v55  ;;  %v1235_v44 = vadd.f32 %v13876_v42, %v1214_v11  ;;  %v10246_v42 = vld [vmem:[%s13572_s21 + $0x2e0] sm:$0xf]  ;;  %v10251_v51 = vor.u32 %v11601_v26, %v10248_v54  ;;  %v10176_v7 = vld [vmem:[%s13572_s21 + $0x268] sm:$0xf0]  ;;  %v11532_v11 = vld [vmem:[%s13572_s21 + $0xb4] sm:$0xf0] }
 0x200   : > { %v1236_v17 = vadd.f32 %v13878_v43, %v1215_v41  ;;  %v10055_v43 = vor.u32 %v11556_v4, %v10054_v30  ;;  %v10247_v48 = vor.u32 %v11604_v45, %v10246_v42  ;;  %v10007_v5 = vor.u32 %v11544_v12, %v10006_v14  ;;  %v9958_v55 = vld [vmem:[%s13572_s21 + $0xa0] sm:$0xf]  ;;  %v11577_v42 = vld [vmem:[%s13572_s21 + $0x224] sm:$0xf]  ;;  %v9934_v45 = vld [vmem:[%s13572_s21 + $0x70] sm:$0xf] }
 0x201   : > { %1959 = vmatpush.bf16.msrb.mxu0 %v9903_v37  ;;  %2017 = vmatpush.bf16.msrb.mxu2 %v9907_v18  ;;  %v14113_v29 = vpack.c.bf16 %v1237_v32, %v1235_v44  ;;  %v10224_v37 = vld [vmem:[%s13572_s21 + $0x2c8] sm:$0xf0]  ;;  %v11592_v18 = vld [vmem:[%s13572_s21 + $0x294] sm:$0xf0]  ;;  %v10179_v40 = vor.u32 %v11583_v2, %v10176_v7  ;;  %v10150_v41 = vld [vmem:[%s13572_s21 + $0x220] sm:$0xf]  ;;  %v9959_v32 = vor.u32 %v11532_v11, %v9958_v55 }
 0x202   : > { %2046 = vmatpush.bf16.msrb.mxu3 %v10099_v21  ;;  %1989 = vmatpush.bf16.msrb.mxu1 %v10071_v20  ;;  %v14115_v6 = vpack.c.bf16 %v1238_v33, %v1236_v17  ;;  %v10227_v15 = vor.u32 %v11595_v10, %v10224_v37  ;;  %v11541_v21 = vld [vmem:[%s13572_s21 + $0x104] sm:$0xf]  ;;  %v10199_v25 = vor.u32 %v11592_v18, %v10198_v60  ;;  %v10174_v20 = vld [vmem:[%s13572_s21 + $0x250] sm:$0xf]  ;;  %v11580_v33 = vld [vmem:[%s13572_s21 + $0x234] sm:$0xf0] }
 0x203   : > { %v10011_v13 = vor.u32 %v11541_v21, %v10008_v47  ;;  %v10175_v16 = vor.u32 %v11586_v31, %v10174_v20  ;;  %v11529_v44 = vld [vmem:[%s13572_s21 + $0xa4] sm:$0xf]  ;;  %v9960_v17 = vld [vmem:[%s13572_s21 + $0xb8] sm:$0xf0]  ;;  %v10151_v30 = vor.u32 %v11580_v33, %v10150_v41  ;;  %v11526_v8 = vld [vmem:[%s13572_s21 + $0x84] sm:$0xf0] }
 0x204   : > { %v9963_v4 = vor.u32 %v11529_v44, %v9960_v17  ;;  %v11523_v26 = vld [vmem:[%s13572_s21 + $0x74] sm:$0xf]  ;;  %v9936_v54 = vld [vmem:[%s13572_s21 + $0x88] sm:$0xf0]  ;;  %v9910_v53 = vld [vmem:[%s13572_s21 + $0x40] sm:$0xf] }
 0x205   : > { %1960 = vmatpush.bf16.msrb.mxu0 %v9879_v3  ;;  %2018 = vmatpush.bf16.msrb.mxu2 %v9883_v34  ;;  %v11538_v3 = vld [vmem:[%s13572_s21 + $0xe4] sm:$0xf0]  ;;  %v11535_v34 = vld [vmem:[%s13572_s21 + $0xd4] sm:$0xf]  ;;  %v10128_v56 = vld [vmem:[%s13572_s21 + $0x208] sm:$0xf0] }
 0x206   : > { %2047 = vmatpush.bf16.msrb.mxu3 %v10075_v38  ;;  %2098 = vmatpush.bf16.msra.mxu1 %v10247_v48  ;;  %v9984_v38 = vld [vmem:[%s13572_s21 + $0xe8] sm:$0xf0]  ;;  %v9983_v35 = vor.u32 %v11538_v3, %v9982_v27  ;;  %v10126_v48 = vld [vmem:[%s13572_s21 + $0x1f0] sm:$0xf]  ;;  %v11571_v50 = vld [vmem:[%s13572_s21 + $0x1f4] sm:$0xf] }
 0x207   : > { %v9987_v39 = vor.u32 %v11535_v34, %v9984_v38  ;;  %v10131_v1 = vor.u32 %v11571_v50, %v10128_v56  ;;  %v10102_v9 = vld [vmem:[%s13572_s21 + $0x1c0] sm:$0xf]  ;;  %v11568_v10 = vld [vmem:[%s13572_s21 + $0x1d4] sm:$0xf0]  ;;  %v9912_v37 = vld [vmem:[%s13572_s21 + $0x58] sm:$0xf0] }
 0x208   : > { %v11565_v14 = vld [vmem:[%s13572_s21 + $0x1c4] sm:$0xf]  ;;  %v10104_v12 = vld [vmem:[%s13572_s21 + $0x1d8] sm:$0xf0]  ;;  %v10103_v60 = vor.u32 %v11568_v10, %v10102_v9  ;;  %v11514_v47 = vld [vmem:[%s13572_s21 + $0x24] sm:$0xf0] }
 0x209   : > { %2069 = vmatpush.bf16.msra.mxu0 %v10055_v43  ;;  %2127 = vmatpush.bf16.msra.mxu2 %v10059_v49  ;;  %v10152_v43 = vld [vmem:[%s13572_s21 + $0x238] sm:$0xf0]  ;;  %v11574_v49 = vld [vmem:[%s13572_s21 + $0x204] sm:$0xf0]  ;;  %v10107_v21 = vor.u32 %v11565_v14, %v10104_v12  ;;  %v10078_v19 = vld [vmem:[%s13572_s21 + $0x190] sm:$0xf] }
 0x20a   : > { %2156 = vmatpush.bf16.msra.mxu3 %v10251_v51  ;;  %2099 = vmatpush.bf16.msra.mxu1 %v10223_v0  ;;  %v10155_v52 = vor.u32 %v11577_v42, %v10152_v43  ;;  %v9935_v51 = vor.u32 %v11526_v8, %v9934_v45  ;;  %v10127_v57 = vor.u32 %v11574_v49, %v10126_v48  ;;  %v11559_v20 = vld [vmem:[%s13572_s21 + $0x194] sm:$0xf]  ;;  %v10080_v31 = vld [vmem:[%s13572_s21 + $0x1a8] sm:$0xf0]  ;;  %v14202_v38 = vld [vmem:[%s13580_s22] sm:$0x3f]  ;;  %s9477_s22 = scalar_lea.hbm %s20597_s27, %s11893_s12 }
 0x20b   : > { %1855 = vmatmul.bf16.gmra.mxu0 %v14085_v28  ;;  %1884 = vmatmul.bf16.gmra.mxu1 %v14091_v36  ;;  %v9939_v0 = vor.u32 %v11523_v26, %v9936_v54  ;;  %v10083_v34 = vor.u32 %v11559_v20, %v10080_v31  ;;  %s9480_s26 = sshll.u32 %s9477_s22, 4  ;;  %s9481_s26 = int_to_ptr.hbm [resolvable:$true] %s9480_s26 }
 0x20c   : > { %1913 = vmatmul.bf16.gmra.mxu2 %v14085_v28  ;;  %1942 = vmatmul.bf16.gmra.mxu3 %v14091_v36 }
 0x20d   : > { %2070 = vmatpush.bf16.msra.mxu0 %v10031_v62  ;;  %2128 = vmatpush.bf16.msra.mxu2 %v10035_v58  ;;  %v11520_v62 = vld [vmem:[%s13572_s21 + $0x54] sm:$0xf0]  ;;  %v11517_v58 = vld [vmem:[%s13572_s21 + $0x44] sm:$0xf] }
 0x20e   : > { %2157 = vmatpush.bf16.msra.mxu3 %v10227_v15  ;;  %2100 = vmatpush.bf16.msra.mxu1 %v10199_v25  ;;  %v9911_v15 = vor.u32 %v11520_v62, %v9910_v53  ;;  %v9915_v18 = vor.u32 %v11517_v58, %v9912_v37  ;;  %v11562_v25 = vld [vmem:[%s13572_s21 + $0x1a4] sm:$0xf0] }
 0x20f   : > { %v10079_v27 = vor.u32 %v11562_v25, %v10078_v19 }
 0x211   : > { %2071 = vmatpush.bf16.msra.mxu0 %v10007_v5  ;;  %2129 = vmatpush.bf16.msra.mxu2 %v10011_v13  ;;  %v9886_v5 = vld [vmem:[%s13572_s21 + $0x10] sm:$0xf]  ;;  %v11511_v13 = vld [vmem:[%s13572_s21 + $0x14] sm:$0xf] }
 0x212   : > { %2158 = vmatpush.bf16.msra.mxu3 %v10203_v63  ;;  %2101 = vmatpush.bf16.msra.mxu1 %v10175_v16  ;;  %v9887_v24 = vor.u32 %v11514_v47, %v9886_v5  ;;  %v9888_v63 = vld [vmem:[%s13572_s21 + $0x28] sm:$0xf0]  ;;  %v14212_v16 = vperm.slane %v14202_v38, 1  ;;  %s20598_s21 = smov %s20597_s27 }
 0x213   : > { %v9891_v3 = vor.u32 %v11511_v13, %v9888_v63 }
 0x215   : > { %2072 = vmatpush.bf16.msra.mxu0 %v9983_v35  ;;  %2130 = vmatpush.bf16.msra.mxu2 %v9987_v39  ;;  %v14205_v35 = vperm.slane %v14202_v38, 0 }
 0x216   : > { %2159 = vmatpush.bf16.msra.mxu3 %v10179_v40  ;;  %2102 = vmatpush.bf16.msra.mxu1 %v10151_v30 }
 0x219   : > { %2073 = vmatpush.bf16.msra.mxu0 %v9959_v32  ;;  %2131 = vmatpush.bf16.msra.mxu2 %v9963_v4 }
 0x21a   : > { %2160 = vmatpush.bf16.msra.mxu3 %v10155_v52  ;;  %2103 = vmatpush.bf16.msra.mxu1 %v10127_v57 }
 0x21b   : > { %1860 = vmatmul.bf16.gmra.mxu0 %v14113_v29  ;;  %1889 = vmatmul.bf16.gmra.mxu1 %v14115_v6 }
 0x21c   : > { %1918 = vmatmul.bf16.gmra.mxu2 %v14113_v29  ;;  %1947 = vmatmul.bf16.gmra.mxu3 %v14115_v6 }
 0x21d   : > { %2074 = vmatpush.bf16.msra.mxu0 %v9935_v51  ;;  %2132 = vmatpush.bf16.msra.mxu2 %v9939_v0 }
 0x21e   : > { %2161 = vmatpush.bf16.msra.mxu3 %v10131_v1  ;;  %2104 = vmatpush.bf16.msra.mxu1 %v10103_v60 }
 0x221   : > { %2075 = vmatpush.bf16.msra.mxu0 %v9911_v15  ;;  %2133 = vmatpush.bf16.msra.mxu2 %v9915_v18 }
 0x222   : > { %2162 = vmatpush.bf16.msra.mxu3 %v10107_v21  ;;  %2105 = vmatpush.bf16.msra.mxu1 %v10079_v27 }
 0x225   : > { %2076 = vmatpush.bf16.msra.mxu0 %v9887_v24  ;;  %2134 = vmatpush.bf16.msra.mxu2 %v9891_v3 }
 0x226   : > { %2163 = vmatpush.bf16.msra.mxu3 %v10083_v34 }
 0x22b   : > { %1961 = vmatmul.bf16.vlgmr.msrb.gmra.mxu0 %v13916_v22  ;;  %1990 = vmatmul.bf16.vlgmr.msrb.gmra.mxu1 %v13918_v23 }
 0x22c   : > { %2019 = vmatmul.bf16.vlgmr.msrb.gmra.mxu2 %v13916_v22  ;;  %2048 = vmatmul.bf16.vlgmr.msrb.gmra.mxu3 %v13918_v23 }
 0x23b   : > { %1966 = vmatmul.bf16.gmra.mxu0 %v14010_v59  ;;  %1995 = vmatmul.bf16.gmra.mxu1 %v14012_v61 }
 0x23c   : > { %2024 = vmatmul.bf16.gmra.mxu2 %v14010_v59  ;;  %2053 = vmatmul.bf16.gmra.mxu3 %v14012_v61 }
 0x24b   : > { %1971 = vmatmul.bf16.gmra.mxu0 %v14085_v28  ;;  %2000 = vmatmul.bf16.gmra.mxu1 %v14091_v36 }
 0x24c   : > { %2029 = vmatmul.bf16.gmra.mxu2 %v14085_v28  ;;  %2058 = vmatmul.bf16.gmra.mxu3 %v14091_v36 }
 0x25b   : > { %1976 = vmatmul.bf16.gmra.mxu0 %v14113_v29  ;;  %2005 = vmatmul.bf16.gmra.mxu1 %v14115_v6 }
 0x25c   : > { %2034 = vmatmul.bf16.gmra.mxu2 %v14113_v29  ;;  %2063 = vmatmul.bf16.gmra.mxu3 %v14115_v6 }
 0x268   : > { %v1846_v2 = vpop.f32.mrf.mxu0  ;;  %v1875_v7 = vpop.f32.mrf.mxu1 }
 0x269   : > { %v1847_v39 = vadd.f32 %v1846_v2, %v14205_v35 }
 0x26b   : > { %2077 = vmatmul.bf16.vlgmr.msra.gmra.mxu0 %v13916_v22  ;;  %2106 = vmatmul.bf16.vlgmr.msra.gmra.mxu1 %v13918_v23  ;;  %v1876_v33 = vadd.f32 %v1875_v7, %v1847_v39 }
 0x26c   : > { %2135 = vmatmul.bf16.vlgmr.msra.gmra.mxu2 %v13916_v22  ;;  %2164 = vmatmul.bf16.vlgmr.msra.gmra.mxu3 %v13918_v23 }
 0x26f   : > { %v1904_v40 = vpop.f32.mrf.mxu2  ;;  %v1933_v55 = vpop.f32.mrf.mxu3 }
 0x270   : > { %v1905_v11 = vadd.f32 %v1904_v40, %v14212_v16  ;;  %v1848_v41 = vpop.f32.mrf.mxu0  ;;  %v1877_v32 = vpop.f32.mrf.mxu1 }
 0x271   : > { %v1849_v30 = vadd.f32 %v1848_v41, %v14205_v35 }
 0x272   : > { %v1934_v44 = vadd.f32 %v1933_v55, %v1905_v11 }
 0x273   : > { %v1878_v52 = vadd.f32 %v1877_v32, %v1849_v30 }
 0x274   : > { %v2185_v17 = vpack.c.bf16 %v1934_v44, %v1876_v33 }
 0x276   : > { %2225 = vrot.lane.b32.xlu2 %v2185_v17, %s13193_s20  ;;  %v2217_v49 = vrot.slane %v2185_v17, 4  ;;  %v2457_v54 = vunpack.c.l.b16 %v2185_v17 }
 0x277   : > { %v1906_v22 = vpop.f32.mrf.mxu2  ;;  %v1935_v23 = vpop.f32.mrf.mxu3 }
 0x278   : > { %v1907_v4 = vadd.f32 %v1906_v22, %v14212_v16  ;;  %v1851_v42 = vpop.f32.mrf.mxu0  ;;  %v1880_v43 = vpop.f32.mrf.mxu1  ;;  %v14225_v53 = vunpack.c.l.b16 %v2217_v49 }
 0x279   : > { %v1852_v45 = vadd.f32 %v1851_v42, %v14205_v35 }
 0x27a   : > { %v1936_v8 = vadd.f32 %v1935_v23, %v1907_v4 }
 0x27b   : > { %v1881_v48 = vadd.f32 %v1880_v43, %v1852_v45  ;;  %2082 = vmatmul.bf16.gmra.mxu0 %v14010_v59  ;;  %2111 = vmatmul.bf16.gmra.mxu1 %v14012_v61 }
 0x27c   : > { %v2188_v26 = vpack.c.bf16 %v1936_v8, %v1878_v52  ;;  %2140 = vmatmul.bf16.gmra.mxu2 %v14010_v59  ;;  %2169 = vmatmul.bf16.gmra.mxu3 %v14012_v61 }
 0x27e   : > { %v2218_v50 = vrot.slane %v2188_v26, 4  ;;  %v2458_v51 = vunpack.c.l.b16 %v2188_v26  ;;  %2227 = vrot.lane.b32.xlu1 %v2188_v26, %s13193_s20 }
 0x27f   : > { %v1909_v57 = vpop.f32.mrf.mxu2  ;;  %v1938_v56 = vpop.f32.mrf.mxu3 }
 0x280   : > { %v14227_v62 = vpack.c.b16 %v2458_v51, %v2457_v54  ;;  %v14229_v0 = vunpack.c.l.b16 %v2218_v50  ;;  %v1910_v1 = vadd.f32 %v1909_v57, %v14212_v16  ;;  %v1853_v9 = vpop.f32.mrf.mxu0  ;;  %v1882_v10 = vpop.f32.mrf.mxu1  ;;  %v14268_v54 = vperm.slane %v14202_v38, 3 }
 0x281   : > { %v1854_v37 = vadd.f32 %v1853_v9, %v14205_v35 }
 0x282   : > { %v2572_v59 = vpack.c.b16 %v14229_v0, %v14225_v53  ;;  %v1939_v61 = vadd.f32 %v1938_v56, %v1910_v1 }
 0x283   : > { %v1883_v5 = vadd.f32 %v1882_v10, %v1854_v37 }
 0x284   : > { %v14234_v58 = vpack.c.bf16 %v1939_v61, %v1881_v48 }
 0x287   : > { %v1911_v14 = vpop.f32.mrf.mxu2  ;;  %v1940_v12 = vpop.f32.mrf.mxu3 }
 0x288   : > { %v1912_v15 = vadd.f32 %v1911_v14, %v14212_v16  ;;  %v1856_v60 = vpop.f32.mrf.mxu0  ;;  %v1885_v18 = vpop.f32.mrf.mxu1 }
 0x289   : > { %v1857_v21 = vadd.f32 %v1856_v60, %v14205_v35 }
 0x28a   : > { %v1941_v47 = vadd.f32 %v1940_v12, %v1912_v15 }
 0x28b   : > { %v1886_v19 = vadd.f32 %v1885_v18, %v1857_v21  ;;  %2087 = vmatmul.bf16.gmra.mxu0 %v14085_v28  ;;  %2116 = vmatmul.bf16.gmra.mxu1 %v14091_v36 }
 0x28c   : > { %v14241_v24 = vpack.c.bf16 %v1941_v47, %v1883_v5  ;;  %2145 = vmatmul.bf16.gmra.mxu2 %v14085_v28  ;;  %2174 = vmatmul.bf16.gmra.mxu3 %v14091_v36 }
 0x28f   : > { %v1914_v25 = vpop.f32.mrf.mxu2  ;;  %v1943_v13 = vpop.f32.mrf.mxu3 }
 0x290   : > { %v1915_v63 = vadd.f32 %v1914_v25, %v14212_v16  ;;  %v1858_v27 = vpop.f32.mrf.mxu0  ;;  %v1887_v3 = vpop.f32.mrf.mxu1 }
 0x291   : > { %v1859_v34 = vadd.f32 %v1858_v27, %v14205_v35 }
 0x292   : > { %v1944_v20 = vadd.f32 %v1943_v13, %v1915_v63 }
 0x293   : > { %v1888_v36 = vadd.f32 %v1887_v3, %v1859_v34 }
 0x294   : > { %v14246_v31 = vpack.c.bf16 %v1944_v20, %v1886_v19 }
 0x297   : > { %v1916_v2 = vpop.f32.mrf.mxu2  ;;  %v1945_v7 = vpop.f32.mrf.mxu3 }
 0x298   : > { %v1917_v39 = vadd.f32 %v1916_v2, %v14212_v16  ;;  %v1861_v40 = vpop.f32.mrf.mxu0  ;;  %v1890_v55 = vpop.f32.mrf.mxu1 }
 0x299   : > { %v1862_v28 = vadd.f32 %v1861_v40, %v14205_v35 }
 0x29a   : > { %v1946_v11 = vadd.f32 %v1945_v7, %v1917_v39 }
 0x29b   : > { %v1891_v41 = vadd.f32 %v1890_v55, %v1862_v28  ;;  %2092 = vmatmul.bf16.gmra.mxu0 %v14113_v29  ;;  %2121 = vmatmul.bf16.gmra.mxu1 %v14115_v6 }
 0x29c   : > { %v14253_v32 = vpack.c.bf16 %v1946_v11, %v1888_v36  ;;  %2150 = vmatmul.bf16.gmra.mxu2 %v14113_v29  ;;  %2179 = vmatmul.bf16.gmra.mxu3 %v14115_v6  ;;  %v14263_v6 = vperm.slane %v14202_v38, 2 }
 0x29f   : > { %v1919_v33 = vpop.f32.mrf.mxu2  ;;  %v1948_v44 = vpop.f32.mrf.mxu3 }
 0x2a0   : > { %v1920_v17 = vadd.f32 %v1919_v33, %v14212_v16  ;;  %v1863_v30 = vpop.f32.mrf.mxu0  ;;  %v1892_v22 = vpop.f32.mrf.mxu1 }
 0x2a1   : > { %v1864_v42 = vadd.f32 %v1863_v30, %v14205_v35 }
 0x2a2   : > { %v1949_v23 = vadd.f32 %v1948_v44, %v1920_v17 }
 0x2a3   : > { %v1893_v29 = vadd.f32 %v1892_v22, %v1864_v42 }
 0x2a4   : > { %v14258_v4 = vpack.c.bf16 %v1949_v23, %v1891_v41 }
 0x2a7   : > { %v1921_v43 = vpop.f32.mrf.mxu2  ;;  %v1950_v45 = vpop.f32.mrf.mxu3 }
 0x2a8   : > { %v1922_v52 = vadd.f32 %v1921_v43, %v14212_v16  ;;  %v1962_v8 = vpop.f32.mrf.mxu0  ;;  %v1991_v48 = vpop.f32.mrf.mxu1 }
 0x2a9   : > { %v1963_v50 = vadd.f32 %v1962_v8, %v14263_v6 }
 0x2aa   : > { %v1951_v49 = vadd.f32 %v1950_v45, %v1922_v52 }
 0x2ab   : > { %v1992_v1 = vadd.f32 %v1991_v48, %v1963_v50 }
 0x2ac   : > { %v14265_v26 = vpack.c.bf16 %v1951_v49, %v1893_v29 }
 0x2af   : > { %v2020_v51 = vpop.f32.mrf.mxu2  ;;  %v2049_v35 = vpop.f32.mrf.mxu3 }
 0x2b0   : > { %v2021_v57 = vadd.f32 %v2020_v51, %v14268_v54  ;;  %v1964_v56 = vpop.f32.mrf.mxu0  ;;  %v1993_v16 = vpop.f32.mrf.mxu1 }
 0x2b1   : > { %v1965_v61 = vadd.f32 %v1964_v56, %v14263_v6 }
 0x2b2   : > { %v2050_v9 = vadd.f32 %v2049_v35, %v2021_v57 }
 0x2b3   : > { %v1994_v18 = vadd.f32 %v1993_v16, %v1965_v61 }
 0x2b4   : > { %v2186_v10 = vpack.c.bf16 %v2050_v9, %v1992_v1 }
 0x2b6   : > { %2265 = vrot.lane.b32.xlu1 %v2186_v10, %s13193_s20  ;;  %v2257_v47 = vrot.slane %v2186_v10, 4  ;;  %v2329_v25 = vunpack.c.l.b16 %v2186_v10 }
 0x2b7   : > { %v2022_v37 = vpop.f32.mrf.mxu2  ;;  %v2051_v14 = vpop.f32.mrf.mxu3 }
 0x2b8   : > { %v2023_v12 = vadd.f32 %v2022_v37, %v14268_v54  ;;  %v1967_v15 = vpop.f32.mrf.mxu0  ;;  %v1996_v60 = vpop.f32.mrf.mxu1  ;;  %v14280_v39 = vunpack.c.l.b16 %v2257_v47 }
 0x2b9   : > { %v1968_v19 = vadd.f32 %v1967_v15, %v14263_v6 }
 0x2ba   : > { %v2052_v21 = vadd.f32 %v2051_v14, %v2023_v12 }
 0x2bb   : > { %v1997_v55 = vadd.f32 %v1996_v60, %v1968_v19 }
 0x2bc   : > { %v2189_v5 = vpack.c.bf16 %v2052_v21, %v1994_v18 }
 0x2be   : > { %2267 = vrot.lane.b32.xlu2 %v2189_v5, %s13193_s20  ;;  %v2330_v13 = vunpack.c.l.b16 %v2189_v5  ;;  %v2258_v63 = vrot.slane %v2189_v5, 4 }
 0x2bf   : > { %v2025_v27 = vpop.f32.mrf.mxu2  ;;  %v2054_v3 = vpop.f32.mrf.mxu3 }
 0x2c0   : > { %v2026_v20 = vadd.f32 %v2025_v27, %v14268_v54  ;;  %v1969_v34 = vpop.f32.mrf.mxu0  ;;  %v1998_v2 = vpop.f32.mrf.mxu1  ;;  %v14278_v7 = vpack.c.b16 %v2330_v13, %v2329_v25  ;;  %v14282_v40 = vunpack.c.l.b16 %v2258_v63 }
 0x2c1   : > { %v1970_v41 = vadd.f32 %v1969_v34, %v14263_v6 }
 0x2c2   : > { %v2055_v28 = vadd.f32 %v2054_v3, %v2026_v20  ;;  %v2369_v36 = vpack.c.b16 %v14282_v40, %v14280_v39 }
 0x2c3   : > { %v1999_v23 = vadd.f32 %v1998_v2, %v1970_v41 }
 0x2c4   : > { %v2192_v11 = vpack.c.bf16 %v2055_v28, %v1997_v55 }
 0x2c6   : > { %2269 = vrot.lane.b32.xlu0 %v2192_v11, %s13193_s20  ;;  %v2259_v43 = vrot.slane %v2192_v11, 4  ;;  %v2331_v52 = vunpack.c.l.b16 %v2192_v11 }
 0x2c7   : > { %v2027_v33 = vpop.f32.mrf.mxu2  ;;  %v2056_v44 = vpop.f32.mrf.mxu3 }
 0x2c8   : > { %v2028_v17 = vadd.f32 %v2027_v33, %v14268_v54  ;;  %v1972_v30 = vpop.f32.mrf.mxu0  ;;  %v2001_v22 = vpop.f32.mrf.mxu1  ;;  %v14291_v51 = vunpack.c.l.b16 %v2259_v43 }
 0x2c9   : > { %v1973_v29 = vadd.f32 %v1972_v30, %v14263_v6 }
 0x2ca   : > { %v2057_v42 = vadd.f32 %v2056_v44, %v2028_v17 }
 0x2cb   : > { %v2002_v9 = vadd.f32 %v2001_v22, %v1973_v29 }
 0x2cc   : > { %v2195_v45 = vpack.c.bf16 %v2057_v42, %v1999_v23  ;;  %v14315_v23 = vperm.slane %v14202_v38, 4 }
 0x2ce   : > { %v2260_v8 = vrot.slane %v2195_v45, 4  ;;  %v2332_v48 = vunpack.c.l.b16 %v2195_v45  ;;  %2271 = vrot.lane.b32.xlu2 %v2195_v45, %s13193_s20 }
 0x2cf   : > { %v2030_v49 = vpop.f32.mrf.mxu2  ;;  %v2059_v50 = vpop.f32.mrf.mxu3 }
 0x2d0   : > { %v14293_v35 = vunpack.c.l.b16 %v2260_v8  ;;  %v2031_v57 = vadd.f32 %v2030_v49, %v14268_v54  ;;  %v1974_v56 = vpop.f32.mrf.mxu0  ;;  %v14296_v16 = vpack.c.b16 %v2332_v48, %v2331_v52  ;;  %v2003_v1 = vpop.f32.mrf.mxu1 }
 0x2d1   : > { %v1975_v14 = vadd.f32 %v1974_v56, %v14263_v6 }
 0x2d2   : > { %v2060_v10 = vadd.f32 %v2059_v50, %v2031_v57  ;;  %v2370_v61 = vpack.c.b16 %v14293_v35, %v14291_v51 }
 0x2d3   : > { %v2004_v5 = vadd.f32 %v2003_v1, %v1975_v14 }
 0x2d4   : > { %v2198_v37 = vpack.c.bf16 %v2060_v10, %v2002_v9  ;;  %v14322_v9 = vperm.slane %v14202_v38, 5 }
 0x2d6   : > { %2273 = vrot.lane.b32.xlu1 %v2198_v37, %s13193_s20  ;;  %v2261_v19 = vrot.slane %v2198_v37, 4  ;;  %v2333_v13 = vunpack.c.l.b16 %v2198_v37 }
 0x2d7   : > { %v2032_v12 = vpop.f32.mrf.mxu2  ;;  %v2061_v15 = vpop.f32.mrf.mxu3 }
 0x2d8   : > { %v2033_v60 = vadd.f32 %v2032_v12, %v14268_v54  ;;  %v1977_v18 = vpop.f32.mrf.mxu0  ;;  %v2006_v21 = vpop.f32.mrf.mxu1  ;;  %v14305_v2 = vunpack.c.l.b16 %v2261_v19 }
 0x2d9   : > { %v1978_v3 = vadd.f32 %v1977_v18, %v14263_v6 }
 0x2da   : > { %v2062_v47 = vadd.f32 %v2061_v15, %v2033_v60 }
 0x2db   : > { %v2007_v44 = vadd.f32 %v2006_v21, %v1978_v3 }
 0x2dc   : > { %v2201_v25 = vpack.c.bf16 %v2062_v47, %v2004_v5 }
 0x2de   : > { %v2262_v63 = vrot.slane %v2201_v25, 4  ;;  %v2334_v27 = vunpack.c.l.b16 %v2201_v25  ;;  %2275 = vrot.lane.b32.xlu0 %v2201_v25, %s13193_s20 }
 0x2df   : > { %v2035_v20 = vpop.f32.mrf.mxu2  ;;  %v2064_v34 = vpop.f32.mrf.mxu3 }
 0x2e0   : > { %v14307_v55 = vunpack.c.l.b16 %v2262_v63  ;;  %v2036_v28 = vadd.f32 %v2035_v20, %v14268_v54  ;;  %v1979_v11 = vpop.f32.mrf.mxu0  ;;  %v14310_v41 = vpack.c.b16 %v2334_v27, %v2333_v13  ;;  %v2008_v33 = vpop.f32.mrf.mxu1 }
 0x2e1   : > { %v1980_v42 = vadd.f32 %v1979_v11, %v14263_v6 }
 0x2e2   : > { %v2065_v17 = vadd.f32 %v2064_v34, %v2036_v28  ;;  %v2371_v30 = vpack.c.b16 %v14307_v55, %v14305_v2 }
 0x2e3   : > { %v2009_v49 = vadd.f32 %v2008_v33, %v1980_v42 }
 0x2e4   : > { %v2204_v22 = vpack.c.bf16 %v2065_v17, %v2007_v44 }
 0x2e6   : > { %2277 = vrot.lane.b32.xlu2 %v2204_v22, %s13193_s20  ;;  %v2263_v56 = vrot.slane %v2204_v22, 4  ;;  %v2335_v10 = vunpack.c.l.b16 %v2204_v22 }
 0x2e7   : > { %v2037_v43 = vpop.f32.mrf.mxu2  ;;  %v2066_v45 = vpop.f32.mrf.mxu3 }
 0x2e8   : > { %v2038_v52 = vadd.f32 %v2037_v43, %v14268_v54  ;;  %v2078_v8 = vpop.f32.mrf.mxu0  ;;  %v2107_v29 = vpop.f32.mrf.mxu1  ;;  %v14325_v54 = vunpack.c.l.b16 %v2263_v56 }
 0x2e9   : > { %v2079_v48 = vadd.f32 %v2078_v8, %v14315_v23 }
 0x2ea   : > { %v2067_v50 = vadd.f32 %v2066_v45, %v2038_v52 }
 0x2eb   : > { %v2108_v57 = vadd.f32 %v2107_v29, %v2079_v48 }
 0x2ec   : > { %v2207_v1 = vpack.c.bf16 %v2067_v50, %v2009_v49 }
 0x2ee   : > { %v2264_v6 = vrot.slane %v2207_v1, 4  ;;  %v2336_v37 = vunpack.c.l.b16 %v2207_v1  ;;  %2279 = vrot.lane.b32.xlu1 %v2207_v1, %s13193_s20 }
 0x2ef   : > { %v2136_v14 = vpop.f32.mrf.mxu2  ;;  %v2165_v12 = vpop.f32.mrf.mxu3 }
 0x2f0   : > { %v14327_v15 = vunpack.c.l.b16 %v2264_v6  ;;  %v2137_v60 = vadd.f32 %v2136_v14, %v14322_v9  ;;  %v2080_v18 = vpop.f32.mrf.mxu0  ;;  %v14330_v21 = vpack.c.b16 %v2336_v37, %v2335_v10  ;;  %v2109_v5 = vpop.f32.mrf.mxu1 }
 0x2f2   : > { %v2166_v47 = vadd.f32 %v2165_v12, %v2137_v60  ;;  %v2372_v38 = vpack.c.b16 %v14327_v15, %v14325_v54 }
 0x2f4   : > { %v14334_v19 = vpack.c.bf16 %v2166_v47, %v2108_v57 }
 0x2f6   : > { %2229 = vrot.lane.b32.xlu1 %v14234_v58, %s13193_s20 }
 0x2f7   : > { %v2138_v25 = vpop.f32.mrf.mxu2  ;;  %v2167_v13 = vpop.f32.mrf.mxu3 }
 0x2f8   : > { %v2083_v63 = vpop.f32.mrf.mxu0  ;;  %v2112_v27 = vpop.f32.mrf.mxu1 }
 0x2f9   : > { %v2084_v3 = vadd.f32 %v2083_v63, %v14315_v23 }
 0x2fb   : > { %v2113_v44 = vadd.f32 %v2112_v27, %v2084_v3 }
 0x2fe   : > { %2231 = vrot.lane.b32.xlu1 %v14241_v24, %s13193_s20 }
 0x2ff   : > { %v2141_v20 = vpop.f32.mrf.mxu2  ;;  %v2170_v34 = vpop.f32.mrf.mxu3 }
 0x300   : > { %v2142_v28 = vadd.f32 %v2141_v20, %v14322_v9  ;;  %v2085_v11 = vpop.f32.mrf.mxu0  ;;  %v2114_v33 = vpop.f32.mrf.mxu1 }
 0x301   : > { %v2086_v42 = vadd.f32 %v2085_v11, %v14315_v23  ;;  %v2139_v11 = vadd.f32 %v2138_v25, %v14322_v9 }
 0x302   : > { %v2171_v17 = vadd.f32 %v2170_v34, %v2142_v28  ;;  %v14361_v28 = vpop.permute.xlu2 %2225 }
 0x303   : > { %v2115_v49 = vadd.f32 %v2114_v33, %v2086_v42  ;;  %v2081_v33 = vadd.f32 %v2080_v18, %v14315_v23  ;;  %v14367_v42 = vpop.permute.xlu1 %2227 }
 0x304   : > { %v14342_v22 = vpack.c.bf16 %v2171_v17, %v2113_v44 }
 0x306   : > { %2309 = vrot.lane.b32.xlu0 %v14342_v22, %s13193_s20  ;;  %2233 = vrot.lane.b32.xlu1 %v14246_v31, %s13193_s20 }
 0x307   : > { %v2143_v43 = vpop.f32.mrf.mxu2  ;;  %v2172_v45 = vpop.f32.mrf.mxu3 }
 0x308   : > { %v2144_v52 = vadd.f32 %v2143_v43, %v14322_v9  ;;  %v2088_v8 = vpop.f32.mrf.mxu0  ;;  %v2117_v29 = vpop.f32.mrf.mxu1  ;;  %v2168_v43 = vadd.f32 %v2167_v13, %v2139_v11 }
 0x309   : > { %v2089_v48 = vadd.f32 %v2088_v8, %v14315_v23 }
 0x30a   : > { %v2173_v50 = vadd.f32 %v2172_v45, %v2144_v52  ;;  %v2110_v52 = vadd.f32 %v2109_v5, %v2081_v33 }
 0x30b   : > { %v2118_v57 = vadd.f32 %v2117_v29, %v2089_v48 }
 0x30c   : > { %v14351_v56 = vpack.c.bf16 %v2173_v50, %v2115_v49  ;;  %v14370_v29 = vpack.c.bf16 %v2168_v43, %v2110_v52 }
 0x30e   : > { %2235 = vrot.lane.b32.xlu1 %v14253_v32, %s13193_s20 }
 0x30f   : > { %v2146_v1 = vpop.f32.mrf.mxu2  ;;  %v2175_v10 = vpop.f32.mrf.mxu3 }
 0x310   : > { %v2147_v6 = vadd.f32 %v2146_v1, %v14322_v9  ;;  %v2090_v37 = vpop.f32.mrf.mxu0  ;;  %v2119_v14 = vpop.f32.mrf.mxu1 }
 0x311   : > { %v2091_v18 = vadd.f32 %v2090_v37, %v14315_v23 }
 0x312   : > { %v2176_v12 = vadd.f32 %v2175_v10, %v2147_v6 }
 0x314   : > { %v14356_v60 = vpack.c.bf16 %v2176_v12, %v2118_v57 }
 0x316   : > { %20158 = vst [vmem:[#allocation49_spill] sm:$0xff] %v14356_v60  ;;  %2237 = vrot.lane.b32.xlu1 %v14258_v4, %s13193_s20 }
 0x317   : > { %v2148_v47 = vpop.f32.mrf.mxu2  ;;  %v2177_v63 = vpop.f32.mrf.mxu3 }
 0x318   : > { %v2093_v27 = vpop.f32.mrf.mxu0  ;;  %v2122_v20 = vpop.f32.mrf.mxu1  ;;  %v2149_v49 = vadd.f32 %v2148_v47, %v14322_v9 }
 0x319   : > { %v2094_v3 = vadd.f32 %v2093_v27, %v14315_v23  ;;  %v2268_v25 = vpop.permute.xlu2 %2267 }
 0x31a   : > { %v2282_v13 = vrot.slane %v2268_v25, 4  ;;  %v2178_v10 = vadd.f32 %v2177_v63, %v2149_v49  ;;  %v2338_v12 = vunpack.c.l.b16 %v2268_v25 }
 0x31b   : > { %v2123_v34 = vadd.f32 %v2122_v20, %v2094_v3 }
 0x31c   : > { %v2354_v37 = vunpack.c.l.b16 %v2282_v13 }
 0x31e   : > { %2239 = vrot.lane.b32.xlu1 %v14265_v26, %s13193_s20 }
 0x31f   : > { %v2151_v44 = vpop.f32.mrf.mxu2  ;;  %v2180_v17 = vpop.f32.mrf.mxu3 }
 0x320   : > { %v2152_v45 = vadd.f32 %v2151_v44, %v14322_v9  ;;  %v2095_v48 = vpop.f32.mrf.mxu0  ;;  %v2124_v27 = vpop.f32.mrf.mxu1 }
 0x321   : > { %v2096_v57 = vadd.f32 %v2095_v48, %v14315_v23 }
 0x322   : > { %v2181_v8 = vadd.f32 %v2180_v17, %v2152_v45 }
 0x323   : > { %v2125_v11 = vadd.f32 %v2124_v27, %v2096_v57 }
 0x324   : > { %v14373_v50 = vpack.c.bf16 %v2181_v8, %v2123_v34  ;;  %v2120_v34 = vadd.f32 %v2119_v14, %v2091_v18 }
 0x326   : > { %2307 = vrot.lane.b32.xlu1 %v14370_v29, %s13193_s20  ;;  %v14380_v17 = vpack.c.bf16 %v2178_v10, %v2120_v34 }
 0x327   : > { %v2153_v1 = vpop.f32.mrf.mxu2  ;;  %v2182_v3 = vpop.f32.mrf.mxu3 }
 0x328   : > { %v2154_v5 = vadd.f32 %v2153_v1, %v14322_v9  ;;  %v2266_v6 = vpop.permute.xlu1 %2265  ;;  %20159 = vst [vmem:[#allocation50_spill] sm:$0xff] %v14380_v17  ;;  %v2272_v9 = vpop.permute.xlu2 %2271 }
 0x329   : > { %v2281_v47 = vrot.slane %v2266_v6, 4  ;;  %v2337_v20 = vunpack.c.l.b16 %v2266_v6  ;;  %v2284_v14 = vrot.slane %v2272_v9, 4  ;;  %v2340_v52 = vunpack.c.l.b16 %v2272_v9 }
 0x32a   : > { %v2183_v33 = vadd.f32 %v2182_v3, %v2154_v5 }
 0x32b   : > { %v2353_v44 = vunpack.c.l.b16 %v2281_v47  ;;  %v2365_v23 = vpack.c.b16 %v2338_v12, %v2337_v20  ;;  %v2356_v49 = vunpack.c.l.b16 %v2284_v14 }
 0x32c   : > { %v14382_v43 = vpack.c.bf16 %v2183_v33, %v2125_v11 }
 0x32d   : > { %12037 = vxpose.binary.xlu2.c.b16.start [1/8] (short) (narrow) %v2365_v23, %v14278_v7, 64  ;;  %v2373_v63 = vpack.c.b16 %v2354_v37, %v2353_v44 }
 0x32e   : > { %20160 = vst [vmem:[#allocation51_spill] sm:$0xff] %v14382_v43  ;;  %2315 = vrot.lane.b32.xlu1 %v14380_v17, %s13193_s20 }
 0x32f   : > { %12049 = vxpose.binary.xlu0.c.b16.start [1/8] (short) (narrow) %v2373_v63, %v2369_v36, 64 }
 0x338   : > { %v2270_v45 = vpop.permute.xlu0 %2269 }
 0x339   : > { %v2283_v8 = vrot.slane %v2270_v45, 4  ;;  %v2339_v48 = vunpack.c.l.b16 %v2270_v45 }
 0x33b   : > { %v2355_v25 = vunpack.c.l.b16 %v2283_v8  ;;  %v2366_v18 = vpack.c.b16 %v2340_v52, %v2339_v48  ;;  %v2512_v8 = vunpack.c.l.b16 %v14367_v42  ;;  %v2511_v48 = vunpack.c.l.b16 %v14361_v28 }
 0x33d   : > { %v2374_v57 = vpack.c.b16 %v2356_v49, %v2355_v25  ;;  %12038 = vxpose.binary.xlu2.c.b16.cont [2/8] (short) (narrow) %v2366_v18, %v14296_v16, 64  ;;  %v2519_v25 = vpack.c.b16 %v2512_v8, %v2511_v48  ;;  %v2223_v8 = vrot.slane %v14258_v4, 4 }
 0x33f   : > { %12050 = vxpose.binary.xlu0.c.b16.cont [2/8] (short) (narrow) %v2374_v57, %v2370_v61, 64  ;;  %v2460_v57 = vunpack.c.l.b16 %v14241_v24 }
 0x340   : > { %v2278_v16 = vpop.permute.xlu2 %2277 }
 0x341   : > { %v2287_v27 = vrot.slane %v2278_v16, 4  ;;  %v2343_v35 = vunpack.c.l.b16 %v2278_v16 }
 0x343   : > { %v2359_v47 = vunpack.c.l.b16 %v2287_v27 }
 0x348   : > { %v2274_v7 = vpop.permute.xlu1 %2273 }
 0x349   : > { %v2285_v13 = vrot.slane %v2274_v7, 4  ;;  %v2341_v40 = vunpack.c.l.b16 %v2274_v7  ;;  %v2459_v7 = vunpack.c.l.b16 %v14234_v58 }
 0x34b   : > { %v2357_v10 = vunpack.c.l.b16 %v2285_v13  ;;  %v2241_v13 = vrot.slane %v14361_v28, 4  ;;  %v2219_v28 = vrot.slane %v14234_v58, 4 }
 0x350   : > { %v2276_v39 = vpop.permute.xlu0 %2275 }
 0x351   : > { %v2286_v36 = vrot.slane %v2276_v39, 4  ;;  %v2342_v1 = vunpack.c.l.b16 %v2276_v39  ;;  %v2466_v39 = vpack.c.b16 %v2460_v57, %v2459_v7 }
 0x353   : > { %v2358_v5 = vunpack.c.l.b16 %v2286_v36  ;;  %v2367_v6 = vpack.c.b16 %v2342_v1, %v2341_v40  ;;  %v2617_v36 = vunpack.c.l.b16 %v2241_v13 }
 0x355   : > { %v2375_v12 = vpack.c.b16 %v2358_v5, %v2357_v10  ;;  %12039 = vxpose.binary.xlu2.c.b16.cont [3/8] (short) (narrow) %v2367_v6, %v14310_v41, 64 }
 0x357   : > { %12051 = vxpose.binary.xlu0.c.b16.cont [3/8] (short) (narrow) %v2375_v12, %v2371_v30, 64  ;;  %v2462_v12 = vunpack.c.l.b16 %v14253_v32 }
 0x360   : > { %v2280_v51 = vpop.permute.xlu1 %2279 }
 0x361   : > { %v2288_v61 = vrot.slane %v2280_v51, 4  ;;  %v2344_v3 = vunpack.c.l.b16 %v2280_v51 }
 0x363   : > { %v2360_v20 = vunpack.c.l.b16 %v2288_v61  ;;  %v2368_v34 = vpack.c.b16 %v2344_v3, %v2343_v35  ;;  %v2461_v35 = vunpack.c.l.b16 %v14246_v31 }
 0x365   : > { %v2376_v11 = vpack.c.b16 %v2360_v20, %v2359_v47  ;;  %12040 = vxpose.binary.xlu2.c.b16.end [4/8] (short) (narrow) %v2368_v34, %v14330_v21, 64  ;;  %v2222_v20 = vrot.slane %v14253_v32, 4 }
 0x367   : > { %12052 = vxpose.binary.xlu0.c.b16.end [4/8] (short) (narrow) %v2376_v11, %v2372_v38, 64 }
 0x368   : > { %v2230_v45 = vpop.permute.xlu1 %2229 }
 0x369   : > { %v2513_v6 = vunpack.c.l.b16 %v2230_v45  ;;  %v2243_v61 = vrot.slane %v2230_v45, 4 }
 0x36b   : > { %v2619_v58 = vunpack.c.l.b16 %v2243_v61 }
 0x370   : > { %v2232_v18 = vpop.permute.xlu1 %2231 }
 0x371   : > { %v2514_v10 = vunpack.c.l.b16 %v2232_v18  ;;  %v2244_v16 = vrot.slane %v2232_v18, 4 }
 0x373   : > { %v2520_v53 = vpack.c.b16 %v2514_v10, %v2513_v6  ;;  %v2620_v3 = vunpack.c.l.b16 %v2244_v16 }
 0x375   : > { %v2626_v34 = vpack.c.b16 %v2620_v3, %v2619_v58 }
 0x378   : > { %v14408_v55 = vpop.permute.xlu0 %2309  ;;  %v2234_v1 = vpop.permute.xlu1 %2233 }
 0x379   : > { %20161 = vst [vmem:[#allocation52_spill] sm:$0xff] %v14408_v55  ;;  %v2515_v11 = vunpack.c.l.b16 %v2234_v1 }
 0x380   : > { %v2236_v27 = vpop.permute.xlu1 %2235 }
 0x381   : > { %v2516_v47 = vunpack.c.l.b16 %v2236_v27 }
 0x3ce   : > { %2305 = vrot.lane.b32.xlu2 %v14334_v19, %s13193_s20 }
 0x3d5   : > { %2313 = vrot.lane.b32.xlu0 %v14356_v60, %s13193_s20 }
 0x3d6   : > { %2311 = vrot.lane.b32.xlu2 %v14351_v56, %s13193_s20  ;;  %v12041_v2 = vpop.trf.xlu2 }
 0x3de   : > { %v12042_v41 = vpop.trf.xlu2 }
 0x3e3   : > { %v12053_v30 = vpop.trf.xlu0 }
 0x3e6   : > { %v12043_v33 = vpop.trf.xlu2 }
 0x3eb   : > { %v12054_v21 = vpop.trf.xlu0 }
 0x3ee   : > { %v12044_v37 = vpop.trf.xlu2 }
 0x3f3   : > { %v12055_v44 = vpop.trf.xlu0 }
 0x3f6   : > { %v12045_v54 = vpop.trf.xlu2 }
 0x3fb   : > { %v12056_v15 = vpop.trf.xlu0 }
 0x3fe   : > { %v12046_v38 = vpop.trf.xlu2 }
 0x403   : > { %v12057_v23 = vpop.trf.xlu0 }
 0x406   : > { %v12047_v63 = vpop.trf.xlu2 }
 0x407   : > { %2486 = vmatpush.bf16.msrb.mxu0 %v12047_v63 }
 0x40b   : > { %2487 = vmatpush.bf16.msrb.mxu0 %v12045_v54  ;;  %v12058_v9 = vpop.trf.xlu0 }
 0x40e   : > { %v12048_v14 = vpop.trf.xlu2 }
 0x40f   : > { %2488 = vmatpush.bf16.msrb.mxu0 %v12043_v33  ;;  %2539 = vmatpush.bf16.msrb.mxu1 %v12048_v14  ;;  %v2569_v33 = vunpack.c.l.b16 %v2222_v20  ;;  %v2224_v14 = vrot.slane %v14265_v26, 4 }
 0x413   : > { %2489 = vmatpush.bf16.msrb.mxu0 %v12041_v2  ;;  %2540 = vmatpush.bf16.msrb.mxu1 %v12046_v38  ;;  %v12059_v52 = vpop.trf.xlu0  ;;  %v2221_v2 = vrot.slane %v14246_v31, 4  ;;  %v2245_v38 = vrot.slane %v2234_v1, 4 }
 0x414   : > { %2592 = vmatpush.bf16.msrb.mxu2 %v12059_v52 }
 0x415   : > { %v2621_v63 = vunpack.c.l.b16 %v2245_v38 }
 0x416   : > { %10252 = vmatmul.msk.bf16.vlgmr.msrb.gmra.mxu0 %vm2469_vm9, %v14227_v62  ;;  %v2242_v62 = vrot.slane %v14367_v42, 4  ;;  %v2220_v42 = vrot.slane %v14241_v24, 4  ;;  %v2467_v24 = vpack.c.b16 %v2462_v12, %v2461_v35 }
 0x417   : > { %2541 = vmatpush.bf16.msrb.mxu1 %v12044_v37  ;;  %v2464_v37 = vunpack.c.l.b16 %v14265_v26 }
 0x418   : > { %2593 = vmatpush.bf16.msrb.mxu2 %v12057_v23  ;;  %v2618_v40 = vunpack.c.l.b16 %v2242_v62  ;;  %v2567_v0 = vunpack.c.l.b16 %v2220_v42 }
 0x41a   : > { %v2625_v5 = vpack.c.b16 %v2618_v40, %v2617_v36 }
 0x41b   : > { %2542 = vmatpush.bf16.msrb.mxu1 %v12042_v41  ;;  %v12060_v49 = vpop.trf.xlu0  ;;  %v2238_v41 = vpop.permute.xlu1 %2237 }
 0x41c   : > { %2594 = vmatpush.bf16.msrb.mxu2 %v12055_v44  ;;  %2645 = vmatpush.bf16.msrb.mxu3 %v12060_v49  ;;  %v2246_v44 = vrot.slane %v2236_v27, 4  ;;  %v2517_v52 = vunpack.c.l.b16 %v2238_v41  ;;  %v2571_v49 = vunpack.c.l.b16 %v2224_v14  ;;  %v2247_v62 = vrot.slane %v2238_v41, 4 }
 0x41e   : > { %10256 = vmatmul.msk.bf16.vlgmr.msrb.gmra.mxu1 %vm2469_vm9, %v2519_v25  ;;  %v2622_v23 = vunpack.c.l.b16 %v2246_v44  ;;  %v2570_v25 = vunpack.c.l.b16 %v2223_v8  ;;  %v2623_v13 = vunpack.c.l.b16 %v2247_v62 }
 0x420   : > { %2595 = vmatpush.bf16.msrb.mxu2 %v12053_v30  ;;  %2646 = vmatpush.bf16.msrb.mxu3 %v12058_v9  ;;  %v2521_v30 = vpack.c.b16 %v2516_v47, %v2515_v11  ;;  %v2627_v45 = vpack.c.b16 %v2622_v23, %v2621_v63  ;;  %v2575_v57 = vpack.c.b16 %v2571_v49, %v2570_v25 }
 0x423   : > { %10260 = vmatmul.msk.bf16.vlgmr.msrb.gmra.mxu2 %vm2469_vm9, %v2572_v59  ;;  %v2566_v59 = vunpack.c.l.b16 %v2219_v28  ;;  %v2240_v31 = vpop.permute.xlu1 %2239 }
 0x424   : > { %2647 = vmatpush.bf16.msrb.mxu3 %v12056_v15  ;;  %v2463_v15 = vunpack.c.l.b16 %v14258_v4  ;;  %v2518_v9 = vunpack.c.l.b16 %v2240_v31  ;;  %v2248_v18 = vrot.slane %v2240_v31, 4 }
 0x425   : > { %v2573_v51 = vpack.c.b16 %v2567_v0, %v2566_v59 }
 0x426   : > { %10253 = vmatmul.msk.bf16.gmra.mxu0 %vm2469_vm9, %v2466_v39  ;;  %v2468_v32 = vpack.c.b16 %v2464_v37, %v2463_v15  ;;  %v2522_v48 = vpack.c.b16 %v2518_v9, %v2517_v52  ;;  %v2624_v7 = vunpack.c.l.b16 %v2248_v18 }
 0x428   : > { %2648 = vmatpush.bf16.msrb.mxu3 %v12054_v21  ;;  %v2568_v21 = vunpack.c.l.b16 %v2221_v2  ;;  %v2628_v39 = vpack.c.b16 %v2624_v7, %v2623_v13  ;;  %v14520_v23 = vpop.permute.xlu2 %2305 }
 0x42a   : > { %v2574_v54 = vpack.c.b16 %v2569_v33, %v2568_v21 }
 0x42b   : > { %10264 = vmatmul.msk.bf16.vlgmr.msrb.gmra.mxu3 %vm2469_vm9, %v2625_v5 }
 0x42e   : > { %10257 = vmatmul.msk.bf16.gmra.mxu1 %vm2469_vm9, %v2520_v53 }
 0x433   : > { %10261 = vmatmul.msk.bf16.gmra.mxu2 %vm2469_vm9, %v2573_v51 }
 0x436   : > { %10254 = vmatmul.msk.bf16.gmra.mxu0 %vm2469_vm9, %v2467_v24 }
 0x43b   : > { %10265 = vmatmul.msk.bf16.gmra.mxu3 %vm2469_vm9, %v2626_v34 }
 0x43e   : > { %10258 = vmatmul.msk.bf16.gmra.mxu1 %vm2469_vm9, %v2521_v30 }
 0x443   : > { %10262 = vmatmul.msk.bf16.gmra.mxu2 %vm2469_vm9, %v2574_v54 }
 0x446   : > { %10255 = vmatmul.msk.bf16.gmra.mxu0 %vm2469_vm9, %v2468_v32 }
 0x447   : > { %v14524_v63 = vpop.permute.xlu0 %2313 }
 0x448   : > { %20163 = vst [vmem:[#allocation54_spill] sm:$0xff] %v14524_v63 }
 0x44b   : > { %10266 = vmatmul.msk.bf16.gmra.mxu3 %vm2469_vm9, %v2627_v45  ;;  %v14530_v45 = vpop.permute.xlu2 %2311 }
 0x44e   : > { %10259 = vmatmul.msk.bf16.gmra.mxu1 %vm2469_vm9, %v2522_v48 }
 0x453   : > { %10263 = vmatmul.msk.bf16.gmra.mxu2 %vm2469_vm9, %v2575_v57 }
 0x45b   : > { %10267 = vmatmul.msk.bf16.gmra.mxu3 %vm2469_vm9, %v2628_v39  ;;  %v14542_v39 = vpop.permute.xlu1 %2307 }
 0x493   : > { %v14446_v26 = vpop.f32.mrf.mxu0 }
 0x494   : > { %v2670_v4 = vsel %vm2469_vm9, %v14446_v26, -inf }
 0x495   : > { %2671 = vmax.xlane.f32.xlu0 %v2670_v4 }
 0x49b   : > { %v14450_v40 = vpop.f32.mrf.mxu0  ;;  %v14498_v2 = vpop.f32.mrf.mxu1 }
 0x49c   : > { %v2673_v36 = vsel %vm2469_vm9, %v14450_v40, -inf  ;;  %v2694_v31 = vsel %vm2469_vm9, %v14498_v2, -inf }
 0x49d   : > { %2674 = vmax.xlane.f32.xlu2 %v2673_v36 }
 0x4a3   : > { %v14454_v1 = vpop.f32.mrf.mxu0  ;;  %v14508_v37 = vpop.f32.mrf.mxu1 }
 0x4a4   : > { %v2676_v10 = vsel %vm2469_vm9, %v14454_v1, -inf  ;;  %20162 = vst [vmem:[#allocation53_spill] sm:$0xff] %v14508_v37  ;;  %v2697_v54 = vsel %vm2469_vm9, %v14508_v37, -inf }
 0x4a5   : > { %2677 = vmax.xlane.f32.xlu2 %v2676_v10 }
 0x4a6   : > { %v14458_v42 = vpop.f32.mrf.mxu2 }
 0x4a7   : > { %v2718_v5 = vsel %vm2469_vm9, %v14458_v42, -inf }
 0x4a8   : > { %2719 = vmax.xlane.f32.xlu0 %v2718_v5 }
 0x4ab   : > { %v14474_v16 = vpop.f32.mrf.mxu0  ;;  %v14526_v9 = vpop.f32.mrf.mxu1 }
 0x4ac   : > { %v2679_v35 = vsel %vm2469_vm9, %v14474_v16, -inf  ;;  %v2700_v14 = vsel %vm2469_vm9, %v14526_v9, -inf }
 0x4ae   : > { %v14462_v6 = vpop.f32.mrf.mxu2  ;;  %v14466_v53 = vpop.f32.mrf.mxu3 }
 0x4af   : > { %v2721_v28 = vsel %vm2469_vm9, %v14462_v6, -inf  ;;  %v2742_v59 = vsel %vm2469_vm9, %v14466_v53, -inf }
 0x4b0   : > { %2722 = vmax.xlane.f32.xlu2 %v2721_v28 }
 0x4b3   : > { %v14482_v61 = vpop.f32.mrf.mxu0  ;;  %v14551_v28 = vpop.f32.mrf.mxu1 }
 0x4b4   : > { %v2682_v3 = vsel %vm2469_vm9, %v14482_v61, -inf }
 0x4b6   : > { %v14468_v0 = vpop.f32.mrf.mxu2  ;;  %v14533_v49 = vpop.f32.mrf.mxu3 }
 0x4b7   : > { %v2724_v12 = vsel %vm2469_vm9, %v14468_v0, -inf  ;;  %v2745_v25 = vsel %vm2469_vm9, %v14533_v49, -inf }
 0x4b8   : > { %2743 = vmax.xlane.f32.xlu2 %v2742_v59  ;;  %2725 = vmax.xlane.f32.xlu1 %v2724_v12  ;;  %v14553_v59 = vpop.permute.xlu1 %2315 }
 0x4b9   : > { %20164 = vst [vmem:[#allocation55_spill] sm:$0xff] %v14553_v59 }
 0x4bb   : > { %v14492_v20 = vpop.f32.mrf.mxu0 }
 0x4bc   : > { %v2685_v11 = vsel %vm2469_vm9, %v14492_v20, -inf }
 0x4be   : > { %v14476_v27 = vpop.f32.mrf.mxu2  ;;  %v14549_v5 = vpop.f32.mrf.mxu3 }
 0x4bf   : > { %v2727_v51 = vsel %vm2469_vm9, %v14476_v27, -inf }
 0x4c0   : > { %2728 = vmax.xlane.f32.xlu0 %v2727_v51  ;;  %2680 = vmax.xlane.f32.xlu1 %v2679_v35  ;;  %v2703_v51 = vsel %vm2469_vm9, %v14551_v28, -inf }
 0x4c3   : > { %v14500_v41 = vpop.f32.mrf.mxu0 }
 0x4c4   : > { %v2688_v33 = vsel %vm2469_vm9, %v14500_v41, -inf }
 0x4c6   : > { %v14484_v24 = vpop.f32.mrf.mxu2 }
 0x4c7   : > { %v2730_v47 = vsel %vm2469_vm9, %v14484_v24, -inf }
 0x4c8   : > { %2683 = vmax.xlane.f32.xlu1 %v2682_v3 }
 0x4cb   : > { %v14516_v38 = vpop.f32.mrf.mxu0 }
 0x4cc   : > { %v2691_v32 = vsel %vm2469_vm9, %v14516_v38, -inf }
 0x4ce   : > { %v14488_v58 = vpop.f32.mrf.mxu2 }
 0x4cf   : > { %v2733_v44 = vsel %vm2469_vm9, %v14488_v58, -inf }
 0x4d0   : > { %2731 = vmax.xlane.f32.xlu1 %v2730_v47  ;;  %v14562_v47 = vpop.f32.mrf.mxu3 }
 0x4d6   : > { %v14494_v34 = vpop.f32.mrf.mxu2 }
 0x4d7   : > { %v2736_v15 = vsel %vm2469_vm9, %v14494_v34, -inf }
 0x4d8   : > { %2686 = vmax.xlane.f32.xlu1 %v2685_v11 }
 0x4de   : > { %v14502_v30 = vpop.f32.mrf.mxu2 }
 0x4df   : > { %v2739_v21 = vsel %vm2469_vm9, %v14502_v30, -inf }
 0x4e0   : > { %2689 = vmax.xlane.f32.xlu1 %v2688_v33  ;;  %2740 = vmax.xlane.f32.xlu0 %v2739_v21 }
 0x4e8   : > { %2734 = vmax.xlane.f32.xlu1 %v2733_v44  ;;  %2698 = vmax.xlane.f32.xlu0 %v2697_v54  ;;  %v2751_v54 = vsel %vm2469_vm9, %v14562_v47, -inf }
 0x4f0   : > { %2737 = vmax.xlane.f32.xlu1 %v2736_v15 }
 0x4f8   : > { %2692 = vmax.xlane.f32.xlu1 %v2691_v32 }
 0x500   : > { %2695 = vmax.xlane.f32.xlu1 %v2694_v31 }
 0x508   : > { %v2672_v52 = vpop.xlane.xlu0 %2671  ;;  %2701 = vmax.xlane.f32.xlu1 %v2700_v14 }
 0x509   : > { %v2766_v8 = vsub.f32 %v14446_v26, %v2672_v52 }
 0x50b   : > { %v2798_v48 = vmul.f32 1.442695, %v2766_v8 }
 0x50d   : > { %12255 = vpow2.f32 %v2798_v48 }
 0x510   : > { %v2675_v18 = vpop.xlane.xlu2 %2674  ;;  %2746 = vmax.xlane.f32.xlu1 %v2745_v25 }
 0x511   : > { %v2767_v57 = vsub.f32 %v14450_v40, %v2675_v18 }
 0x513   : > { %v14538_v62 = vpop.eup %12255  ;;  %v2800_v7 = vmul.f32 1.442695, %v2767_v57 }
 0x514   : > { %v2862_v13 = vsel %vm2469_vm9, %v14538_v62, 0.0 }
 0x515   : > { %12257 = vpow2.f32 %v2800_v7  ;;  %2863 = vadd.xlane.f32.xlu2 %v2862_v13  ;;  %v14580_v13 = vpop.f32.mrf.mxu1 }
 0x518   : > { %v2678_v12 = vpop.xlane.xlu2 %2677 }
 0x51b   : > { %v14544_v26 = vpop.eup %12257  ;;  %v2720_v4 = vpop.xlane.xlu0 %2719 }
 0x51c   : > { %v2782_v36 = vsub.f32 %v14458_v42, %v2720_v4  ;;  %v2865_v10 = vsel %vm2469_vm9, %v14544_v26, 0.0  ;;  %v2768_v42 = vsub.f32 %v14454_v1, %v2678_v12  ;;  %v2748_v1 = vsel %vm2469_vm9, %v14549_v5, -inf }
 0x51d   : > { %2866 = vadd.xlane.f32.xlu0 %v2865_v10 }
 0x51e   : > { %v2830_v40 = vmul.f32 1.442695, %v2782_v36  ;;  %v2802_v11 = vmul.f32 1.442695, %v2768_v42 }
 0x520   : > { %12259 = vpow2.f32 %v2830_v40 }
 0x521   : > { %12261 = vpow2.f32 %v2802_v11 }
 0x523   : > { %v2723_v33 = vpop.xlane.xlu2 %2722 }
 0x524   : > { %v2783_v15 = vsub.f32 %v14462_v6, %v2723_v33 }
 0x525   : > { %2704 = vmax.xlane.f32.xlu0 %v2703_v51  ;;  %v14593_v51 = vpop.f32.mrf.mxu3 }
 0x526   : > { %v14557_v35 = vpop.eup %12259  ;;  %v2832_v31 = vmul.f32 1.442695, %v2783_v15 }
 0x527   : > { %v2910_v3 = vsel %vm2469_vm9, %v14557_v35, 0.0  ;;  %v14570_v8 = vpop.eup %12261 }
 0x528   : > { %2911 = vadd.xlane.f32.xlu1 %v2910_v3  ;;  %v2868_v6 = vsel %vm2469_vm9, %v14570_v8, 0.0 }
 0x52b   : > { %v2726_v21 = vpop.xlane.xlu1 %2725 }
 0x52c   : > { %v2784_v44 = vsub.f32 %v14468_v0, %v2726_v21  ;;  %v14598_v21 = vpop.f32.mrf.mxu1 }
 0x52d   : > { %2752 = vmax.xlane.f32.xlu0 %v2751_v54  ;;  %v2709_v54 = vsel %vm2469_vm9, %v14598_v21, -inf  ;;  %v14604_v15 = vpop.f32.mrf.mxu3 }
 0x52e   : > { %v2834_v32 = vmul.f32 1.442695, %v2784_v44  ;;  %v2706_v44 = vsel %vm2469_vm9, %v14580_v13, -inf }
 0x530   : > { %2749 = vmax.xlane.f32.xlu1 %v2748_v1  ;;  %12263 = vpow2.f32 %v2834_v32 }
 0x531   : > { %12265 = vpow2.f32 %v2832_v31 }
 0x533   : > { %v2729_v14 = vpop.xlane.xlu0 %2728  ;;  %v2681_v52 = vpop.xlane.xlu1 %2680 }
 0x534   : > { %v2785_v0 = vsub.f32 %v14476_v27, %v2729_v14  ;;  %v2769_v48 = vsub.f32 %v14474_v16, %v2681_v52 }
 0x536   : > { %v2836_v25 = vmul.f32 1.442695, %v2785_v0  ;;  %v2804_v18 = vmul.f32 1.442695, %v2769_v48  ;;  %v14574_v57 = vpop.eup %12263  ;;  %v2754_v0 = vsel %vm2469_vm9, %v14593_v51, -inf }
 0x537   : > { %v2916_v7 = vsel %vm2469_vm9, %v14574_v57, 0.0  ;;  %v14582_v4 = vpop.eup %12265 }
 0x538   : > { %12267 = vpow2.f32 %v2836_v25  ;;  %2869 = vadd.xlane.f32.xlu1 %v2868_v6  ;;  %2917 = vadd.xlane.f32.xlu0 %v2916_v7  ;;  %v2913_v12 = vsel %vm2469_vm9, %v14582_v4, 0.0 }
 0x539   : > { %12269 = vpow2.f32 %v2804_v18  ;;  %v14619_v18 = vpop.f32.mrf.mxu3 }
 0x53a   : > { %v2760_v7 = vsel %vm2469_vm9, %v14619_v18, -inf }
 0x53b   : > { %v2684_v27 = vpop.xlane.xlu1 %2683 }
 0x53c   : > { %v2770_v10 = vsub.f32 %v14482_v61, %v2684_v27 }
 0x53e   : > { %v14584_v16 = vpop.eup %12267  ;;  %v2806_v3 = vmul.f32 1.442695, %v2770_v10 }
 0x53f   : > { %v14586_v36 = vpop.eup %12269  ;;  %v2919_v40 = vsel %vm2469_vm9, %v14584_v16, 0.0 }
 0x540   : > { %2920 = vadd.xlane.f32.xlu2 %v2919_v40  ;;  %2914 = vadd.xlane.f32.xlu1 %v2913_v12  ;;  %v2871_v42 = vsel %vm2469_vm9, %v14586_v36, 0.0  ;;  %12271 = vpow2.f32 %v2806_v3 }
 0x541   : > { %2872 = vadd.xlane.f32.xlu0 %v2871_v42  ;;  %v2757_v42 = vsel %vm2469_vm9, %v14604_v15, -inf }
 0x543   : > { %v2732_v11 = vpop.xlane.xlu1 %2731 }
 0x544   : > { %v2786_v33 = vsub.f32 %v14484_v24, %v2732_v11 }
 0x546   : > { %v2838_v61 = vmul.f32 1.442695, %v2786_v33  ;;  %v14607_v31 = vpop.eup %12271 }
 0x547   : > { %v2874_v48 = vsel %vm2469_vm9, %v14607_v31, 0.0 }
 0x548   : > { %12273 = vpow2.f32 %v2838_v61  ;;  %2707 = vmax.xlane.f32.xlu1 %v2706_v44 }
 0x549   : > { %2710 = vmax.xlane.f32.xlu0 %v2709_v54 }
 0x54b   : > { %v2687_v32 = vpop.xlane.xlu1 %2686 }
 0x54c   : > { %v2771_v1 = vsub.f32 %v14492_v20, %v2687_v32  ;;  %v14617_v20 = vpop.f32.mrf.mxu1 }
 0x54d   : > { %v2712_v27 = vsel %vm2469_vm9, %v14617_v20, -inf }
 0x54e   : > { %v14609_v24 = vpop.eup %12273  ;;  %v2808_v14 = vmul.f32 1.442695, %v2771_v1 }
 0x54f   : > { %v2922_v52 = vsel %vm2469_vm9, %v14609_v24, 0.0 }
 0x550   : > { %12275 = vpow2.f32 %v2808_v14  ;;  %2923 = vadd.xlane.f32.xlu2 %v2922_v52  ;;  %2755 = vmax.xlane.f32.xlu1 %v2754_v0 }
 0x551   : > { %2875 = vadd.xlane.f32.xlu0 %v2874_v48 }
 0x553   : > { %v2690_v25 = vpop.xlane.xlu1 %2689 }
 0x554   : > { %v2772_v12 = vsub.f32 %v14500_v41, %v2690_v25  ;;  %v14632_v33 = vpop.f32.mrf.mxu1  ;;  %v2741_v25 = vpop.xlane.xlu0 %2740 }
 0x555   : > { %v2715_v32 = vsel %vm2469_vm9, %v14632_v33, -inf }
 0x556   : > { %v14621_v6 = vpop.eup %12275  ;;  %v2810_v3 = vmul.f32 1.442695, %v2772_v12 }
 0x557   : > { %v2877_v10 = vsel %vm2469_vm9, %v14621_v6, 0.0 }
 0x558   : > { %2761 = vmax.xlane.f32.xlu2 %v2760_v7  ;;  %2713 = vmax.xlane.f32.xlu1 %v2712_v27  ;;  %12277 = vpow2.f32 %v2810_v3  ;;  %v2744_v3 = vpop.xlane.xlu2 %2743 }
 0x559   : > { %2878 = vadd.xlane.f32.xlu0 %v2877_v10 }
 0x55b   : > { %v2735_v40 = vpop.xlane.xlu1 %2734 }
 0x55c   : > { %v2787_v44 = vsub.f32 %v14488_v58, %v2735_v40 }
 0x55e   : > { %v2840_v41 = vmul.f32 1.442695, %v2787_v44  ;;  %v14638_v14 = vpop.eup %12277 }
 0x560   : > { %2758 = vmax.xlane.f32.xlu1 %v2757_v42 }
 0x563   : > { %v2738_v11 = vpop.xlane.xlu1 %2737 }
 0x564   : > { %v2788_v61 = vsub.f32 %v14494_v34, %v2738_v11  ;;  %v2880_v34 = vsel %vm2469_vm9, %v14638_v14, 0.0 }
 0x566   : > { %v2842_v54 = vmul.f32 1.442695, %v2788_v61  ;;  %v14658_v61 = vpop.f32.mrf.mxu3 }
 0x568   : > { %12279 = vpow2.f32 %v2842_v54  ;;  %2716 = vmax.xlane.f32.xlu1 %v2715_v32  ;;  %v2790_v54 = vsub.f32 %v14466_v53, %v2744_v3 }
 0x569   : > { %12281 = vpow2.f32 %v2840_v41 }
 0x56a   : > { %v2846_v41 = vmul.f32 1.442695, %v2790_v54 }
 0x56b   : > { %v2693_v1 = vpop.xlane.xlu1 %2692 }
 0x56c   : > { %v2773_v52 = vsub.f32 %v14516_v38, %v2693_v1  ;;  %v2789_v38 = vsub.f32 %v14502_v30, %v2741_v25  ;;  %v2763_v30 = vsel %vm2469_vm9, %v14658_v61, -inf }
 0x56e   : > { %v14641_v0 = vpop.eup %12279  ;;  %v2812_v48 = vmul.f32 1.442695, %v2773_v52  ;;  %v2844_v42 = vmul.f32 1.442695, %v2789_v38 }
 0x56f   : > { %v2928_v58 = vsel %vm2469_vm9, %v14641_v0, 0.0  ;;  %v14649_v27 = vpop.eup %12281 }
 0x570   : > { %12283 = vpow2.f32 %v2812_v48  ;;  %2881 = vadd.xlane.f32.xlu1 %v2880_v34  ;;  %2929 = vadd.xlane.f32.xlu2 %v2928_v58  ;;  %v2925_v40 = vsel %vm2469_vm9, %v14649_v27, 0.0  ;;  %v14673_v58 = vpop.xlane.xlu0 %2698 }
 0x571   : > { %12285 = vpow2.f32 %v2844_v42  ;;  %20166 = vst [vmem:[#allocation57_spill] sm:$0xff] %v14673_v58 }
 0x573   : > { %v14647_v7 = vpop.xlane.xlu1 %2695 }
 0x576   : > { %v14651_v10 = vpop.eup %12283 }
 0x577   : > { %v2883_v12 = vsel %vm2469_vm9, %v14651_v10, 0.0  ;;  %v14664_v52 = vpop.eup %12285 }
 0x578   : > { %2926 = vadd.xlane.f32.xlu1 %v2925_v40  ;;  %2884 = vadd.xlane.f32.xlu0 %v2883_v12  ;;  %v2931_v53 = vsel %vm2469_vm9, %v14664_v52, 0.0 }
 0x57b   : > { %v2702_v11 = vpop.xlane.xlu1 %2701 }
 0x57c   : > { %v2776_v44 = vsub.f32 %v14526_v9, %v2702_v11 }
 0x57e   : > { %v2818_v32 = vmul.f32 1.442695, %v2776_v44 }
 0x580   : > { %12287 = vpow2.f32 %v2818_v32  ;;  %2764 = vmax.xlane.f32.xlu1 %v2763_v30 }
 0x581   : > { %12289 = vpow2.f32 %v2846_v41 }
 0x583   : > { %v2747_v1 = vpop.xlane.xlu1 %2746 }
 0x584   : > { %v2791_v34 = vsub.f32 %v14533_v49, %v2747_v1 }
 0x586   : > { %v14666_v48 = vpop.eup %12287  ;;  %v2848_v38 = vmul.f32 1.442695, %v2791_v34 }
 0x587   : > { %20165 = vst [vmem:[#allocation56_spill] sm:$0xff] %v14666_v48  ;;  %v2892_v9 = vsel %vm2469_vm9, %v14666_v48, 0.0  ;;  %v14675_v40 = vpop.eup %12289 }
 0x588   : > { %v2864_v25 = vpop.xlane.xlu2 %2863  ;;  %2893 = vadd.xlane.f32.xlu2 %v2892_v9  ;;  %2932 = vadd.xlane.f32.xlu1 %v2931_v53  ;;  %v2934_v49 = vsel %vm2469_vm9, %v14675_v40, 0.0 }
 0x589   : > { %12291 = vrcp.f32 %v2864_v25  ;;  %v2969_v32 = vand.u32 2147483648, %v2864_v25  ;;  %vm2963_vm11 = vweird.f32 %v2864_v25  ;;  %v2967_v41 = vand.u32 2147483647, %v2864_v25 }
 0x58a   : > { %12293 = vpow2.f32 %v2848_v38 }
 0x58b   : > { %vm2968_vm13 = vcmp.eq.f32.partialorder %v2967_v41, 8.507059e+37 }
 0x58f   : > { %v12292_v12 = vpop.eup %12291 }
 0x590   : > { %v2959_v42 = vmul.f32 %v12292_v12, %v2864_v25  ;;  %2935 = vadd.xlane.f32.xlu1 %v2934_v49  ;;  %v2867_v3 = vpop.xlane.xlu0 %2866  ;;  %v14679_v44 = vpop.eup %12293  ;;  %vm2964_vm10 = vweird.f32 %v12292_v12  ;;  %v2970_v49 = vor.u32 1.1754944e-38, %v2969_v32 }
 0x591   : > { %12295 = vrcp.f32 %v2867_v3  ;;  %20167 = vst [vmem:[#allocation58_spill] sm:$0xff] %v14679_v44  ;;  %vm2965_vm12 = vmor %vm2963_vm11, %vm2964_vm10  ;;  %v2937_v34 = vsel %vm2469_vm9, %v14679_v44, 0.0  ;;  %v2982_v58 = vand.u32 2147483647, %v2867_v3  ;;  %vm2978_vm15 = vweird.f32 %v2867_v3 }
 0x592   : > { %v2960_v11 = vsub.f32 1.0, %v2959_v42 }
 0x593   : > { %vm2983_vm1 = vcmp.eq.f32.partialorder %v2982_v58, 8.507059e+37 }
 0x594   : > { %v2961_v54 = vmul.f32 %v12292_v12, %v2960_v11  ;;  %v2984_v11 = vand.u32 2147483648, %v2867_v3 }
 0x596   : > { %v2962_v30 = vadd.f32 %v12292_v12, %v2961_v54 }
 0x597   : > { %v12296_v1 = vpop.eup %12295 }
 0x598   : > { %v2974_v9 = vmul.f32 %v12296_v1, %v2867_v3  ;;  %2938 = vadd.xlane.f32.xlu1 %v2937_v34  ;;  %v2705_v53 = vpop.xlane.xlu0 %2704  ;;  %v2966_v38 = vsel %vm2965_vm12, %v12292_v12, %v2962_v30  ;;  %vm2979_vm14 = vweird.f32 %v12296_v1  ;;  %v2985_v12 = vor.u32 1.1754944e-38, %v2984_v11 }
 0x599   : > { %v2777_v42 = vsub.f32 %v14551_v28, %v2705_v53  ;;  %v2971_v54 = vsel %vm2968_vm13, %v2970_v49, %v2966_v38  ;;  %vm2980_vm0 = vmor %vm2978_vm15, %vm2979_vm14 }
 0x59a   : > { %v2975_v46 = vsub.f32 1.0, %v2974_v9  ;;  %v2972_v34 = vmul.f32 %v14538_v62, %v2971_v54 }
 0x59b   : > { %v2820_v48 = vmul.f32 1.442695, %v2777_v42  ;;  %v14684_v37 = vpop.xlane.xlu1 %2911 }
 0x59c   : > { %v2976_v25 = vmul.f32 %v12296_v1, %v2975_v46  ;;  %v3438_v41 = vpack.c.bf16 %v2972_v34, %v2972_v34  ;;  %vm3203_vm3 = vweird.f32 %v14684_v37 }
 0x59d   : > { %12297 = vpow2.f32 %v2820_v48 }
 0x59e   : > { %v2977_v59 = vadd.f32 %v12296_v1, %v2976_v25  ;;  %12299 = vrcp.f32 %v14684_v37 }
 0x5a0   : > { %v2981_v28 = vsel %vm2980_vm0, %v12296_v1, %v2977_v59  ;;  %v2753_v46 = vpop.xlane.xlu0 %2752  ;;  %v14695_v59 = vunpack.c.l.b16 %v3438_v41 }
 0x5a1   : > { %v2986_v32 = vsel %vm2983_vm1, %v2985_v12, %v2981_v28  ;;  %v2793_v49 = vsub.f32 %v14562_v47, %v2753_v46 }
 0x5a2   : > { %v2987_v30 = vmul.f32 %v14544_v26, %v2986_v32  ;;  %20169 = vst [vmem:[#allocation60_spill] sm:$0xff] %v14695_v59 }
 0x5a3   : > { %v14689_v9 = vpop.eup %12297  ;;  %v2750_v53 = vpop.xlane.xlu1 %2749 }
 0x5a4   : > { %20168 = vst [vmem:[#allocation59_spill] sm:$0xff] %v14689_v9  ;;  %v2792_v48 = vsub.f32 %v14549_v5, %v2750_v53  ;;  %v2895_v3 = vsel %vm2469_vm9, %v14689_v9, 0.0  ;;  %v3439_v62 = vpack.c.bf16 %v2987_v30, %v2987_v30  ;;  %v12300_v38 = vpop.eup %12299  ;;  %v2852_v5 = vmul.f32 1.442695, %v2793_v49 }
 0x5a5   : > { %2896 = vadd.xlane.f32.xlu1 %v2895_v3  ;;  %v3199_v26 = vmul.f32 %v12300_v38, %v14684_v37  ;;  %vm3204_vm2 = vweird.f32 %v12300_v38  ;;  %v3209_v49 = vand.u32 2147483648, %v14684_v37 }
 0x5a6   : > { %v2850_v58 = vmul.f32 1.442695, %v2792_v48  ;;  %v14697_v1 = vunpack.c.l.b16 %v3439_v62  ;;  %vm14734_vm4 = vmor %vm3203_vm3, %vm3204_vm2 }
 0x5a7   : > { %v3200_v54 = vsub.f32 1.0, %v3199_v26  ;;  %v3207_v26 = vand.u32 2147483647, %v14684_v37  ;;  %v3210_v9 = vor.u32 1.1754944e-38, %v3209_v49 }
 0x5a8   : > { %20170 = vst [vmem:[#allocation61_spill] sm:$0xff] %v14697_v1  ;;  %12301 = vpow2.f32 %v2850_v58 }
 0x5a9   : > { %v3201_v12 = vmul.f32 %v12300_v38, %v3200_v54  ;;  %vm3208_vm5 = vcmp.eq.f32.partialorder %v3207_v26, 8.507059e+37 }
 0x5ab   : > { %v14702_v11 = vpop.xlane.xlu1 %2869  ;;  %v14705_v25 = vpop.xlane.xlu0 %2917  ;;  %v3202_v48 = vadd.f32 %v12300_v38, %v3201_v12 }
 0x5ac   : > { %12303 = vrcp.f32 %v14702_v11  ;;  %v3239_v42 = vand.u32 2147483648, %v14705_v25  ;;  %v3237_v60 = vand.u32 2147483647, %v14705_v25  ;;  %vm2993_vm6 = vweird.f32 %v14702_v11 }
 0x5ad   : > { %12305 = vrcp.f32 %v14705_v25  ;;  %v3206_v37 = vsel %vm14734_vm4, %v12300_v38, %v3202_v48  ;;  %vm3233_vm7 = vweird.f32 %v14705_v25 }
 0x5ae   : > { %v14708_v47 = vpop.eup %12301  ;;  %12307 = vpow2.f32 %v2852_v5  ;;  %v2997_v5 = vand.u32 2147483647, %v14702_v11  ;;  %v3240_v26 = vor.u32 1.1754944e-38, %v3239_v42  ;;  %vm14768_vm12 = vcmp.eq.f32.partialorder %v3237_v60, 8.507059e+37 }
 0x5af   : > { %20171 = vst [vmem:[#allocation62_spill] sm:$0xff] %v14708_v47  ;;  %v2940_v34 = vsel %vm2469_vm9, %v14708_v47, 0.0 }
 0x5b0   : > { %2941 = vadd.xlane.f32.xlu0 %v2940_v34  ;;  %v2999_v34 = vand.u32 2147483648, %v14702_v11  ;;  %vm14753_vm8 = vcmp.eq.f32.partialorder %v2997_v5, 8.507059e+37 }
 0x5b2   : > { %v14712_v28 = vpop.eup %12303  ;;  %v3000_v54 = vor.u32 1.1754944e-38, %v2999_v34 }
 0x5b3   : > { %v14714_v32 = vpop.eup %12305  ;;  %v2989_v30 = vmul.f32 %v14712_v28, %v14702_v11  ;;  %v14718_v41 = vpop.xlane.xlu2 %2920  ;;  %vm2994_vm10 = vweird.f32 %v14712_v28 }
 0x5b4   : > { %v14720_v46 = vpop.xlane.xlu1 %2914  ;;  %v14722_v53 = vpop.eup %12307  ;;  %v3229_v3 = vmul.f32 %v14714_v32, %v14705_v25  ;;  %12309 = vrcp.f32 %v14718_v41  ;;  %vm3234_vm11 = vweird.f32 %v14714_v32  ;;  %vm3248_vm13 = vweird.f32 %v14718_v41  ;;  %vm14782_vm14 = vmor %vm2993_vm6, %vm2994_vm10 }
 0x5b5   : > { %20172 = vst [vmem:[#allocation63_spill] sm:$0xff] %v14722_v53  ;;  %v14727_v62 = vpop.xlane.xlu0 %2872  ;;  %v2990_v58 = vsub.f32 1.0, %v2989_v30  ;;  %12311 = vrcp.f32 %v14720_v46  ;;  %v2943_v30 = vsel %vm2469_vm9, %v14722_v53, 0.0  ;;  %vm14797_vm0 = vmor %vm3233_vm7, %vm3234_vm11  ;;  %vm3218_vm2 = vweird.f32 %v14720_v46 }
 0x5b6   : > { %v3230_v12 = vsub.f32 1.0, %v3229_v3  ;;  %12313 = vrcp.f32 %v14727_v62  ;;  %vm3008_vm4 = vweird.f32 %v14727_v62 }
 0x5b7   : > { %v2991_v47 = vmul.f32 %v14712_v28, %v2990_v58  ;;  %v14760_v58 = vsel %vm3208_vm5, %v3210_v9, %v3206_v37 }
 0x5b8   : > { %2944 = vadd.xlane.f32.xlu0 %v2943_v30  ;;  %v3231_v38 = vmul.f32 %v14714_v32, %v3230_v12 }
 0x5b9   : > { %v2992_v34 = vadd.f32 %v14712_v28, %v2991_v47  ;;  %v3252_v47 = vand.u32 2147483647, %v14718_v41 }
 0x5ba   : > { %v14747_v63 = vpop.eup %12309 }
 0x5bb   : > { %v14751_v3 = vpop.eup %12311  ;;  %v3244_v48 = vmul.f32 %v14747_v63, %v14718_v41  ;;  %vm3249_vm15 = vweird.f32 %v14747_v63 }
 0x5bc   : > { %v2708_v49 = vpop.xlane.xlu1 %2707  ;;  %v3214_v30 = vmul.f32 %v14751_v3, %v14720_v46  ;;  %v12314_v59 = vpop.eup %12313  ;;  %vm14811_vm3 = vmor %vm3248_vm13, %vm3249_vm15  ;;  %vm3219_vm5 = vweird.f32 %v14751_v3 }
 0x5bd   : > { %v2778_v5 = vsub.f32 %v14580_v13, %v2708_v49  ;;  %v2711_v17 = vpop.xlane.xlu0 %2710  ;;  %v3245_v9 = vsub.f32 1.0, %v3244_v48  ;;  %v3004_v1 = vmul.f32 %v12314_v59, %v14727_v62  ;;  %v3232_v13 = vadd.f32 %v14714_v32, %v3231_v38  ;;  %vm14837_vm10 = vmor %vm3218_vm2, %vm3219_vm5 }
 0x5be   : > { %v2779_v37 = vsub.f32 %v14598_v21, %v2711_v17  ;;  %v3215_v42 = vsub.f32 1.0, %v3214_v30  ;;  %v3254_v17 = vand.u32 2147483648, %v14718_v41  ;;  %v3014_v48 = vand.u32 2147483648, %v14727_v62 }
 0x5bf   : > { %v2822_v44 = vmul.f32 1.442695, %v2778_v5  ;;  %v3246_v49 = vmul.f32 %v14747_v63, %v3245_v9  ;;  %v3005_v21 = vsub.f32 1.0, %v3004_v1  ;;  %v2996_v30 = vsel %vm14782_vm14, %v14712_v28, %v2992_v34 }
 0x5c0   : > { %v2824_v55 = vmul.f32 1.442695, %v2779_v37  ;;  %v3216_v38 = vmul.f32 %v14751_v3, %v3215_v42  ;;  %vm3009_vm1 = vweird.f32 %v12314_v59  ;;  %v3012_v5 = vand.u32 2147483647, %v14727_v62 }
 0x5c1   : > { %12315 = vpow2.f32 %v2822_v44  ;;  %v3247_v1 = vadd.f32 %v14747_v63, %v3246_v49  ;;  %v3006_v44 = vmul.f32 %v12314_v59, %v3005_v21  ;;  %v3224_v28 = vand.u32 2147483648, %v14720_v46  ;;  %vm3010_vm6 = vmor %vm3008_vm4, %vm3009_vm1 }
 0x5c2   : > { %12317 = vpow2.f32 %v2824_v55  ;;  %v3222_v55 = vand.u32 2147483647, %v14720_v46  ;;  %v3236_v25 = vsel %vm14797_vm0, %v14714_v32, %v3232_v13  ;;  %v3255_v37 = vor.u32 1.1754944e-38, %v3254_v17 }
 0x5c3   : > { %v3007_v42 = vadd.f32 %v12314_v59, %v3006_v44  ;;  %v3001_v49 = vsel %vm14753_vm8, %v3000_v54, %v2996_v30  ;;  %v3217_v60 = vadd.f32 %v14751_v3, %v3216_v38  ;;  %v3015_v21 = vor.u32 1.1754944e-38, %v3014_v48  ;;  %v14848_v30 = vpop.xlane.xlu2 %2923 }
 0x5c4   : > { %v2756_v34 = vpop.xlane.xlu1 %2755  ;;  %vm3013_vm7 = vcmp.eq.f32.partialorder %v3012_v5, 8.507059e+37  ;;  %v3241_v17 = vsel %vm14768_vm12, %v3240_v26, %v3236_v25  ;;  %v3251_v53 = vsel %vm14811_vm3, %v14747_v63, %v3247_v1  ;;  %v3002_v48 = vmul.f32 %v14570_v8, %v3001_v49 }
 0x5c5   : > { %v2794_v32 = vsub.f32 %v14593_v51, %v2756_v34  ;;  %v3011_v13 = vsel %vm3010_vm6, %v12314_v59, %v3007_v42  ;;  %vm3253_vm8 = vcmp.eq.f32.partialorder %v3252_v47, 8.507059e+37  ;;  %v3225_v26 = vor.u32 1.1754944e-38, %v3224_v28 }
 0x5c6   : > { %v3016_v51 = vsel %vm3013_vm7, %v3015_v21, %v3011_v13  ;;  %v3242_v8 = vmul.f32 %v14574_v57, %v3241_v17  ;;  %v3256_v47 = vsel %vm3253_vm8, %v3255_v37, %v3251_v53  ;;  %v3221_v46 = vsel %vm14837_vm10, %v14751_v3, %v3217_v60  ;;  %v14863_v60 = vpop.xlane.xlu0 %2875 }
 0x5c7   : > { %v14821_v41 = vpop.eup %12315  ;;  %v2854_v54 = vmul.f32 1.442695, %v2794_v32  ;;  %v3017_v12 = vmul.f32 %v14586_v36, %v3016_v51  ;;  %vm3223_vm11 = vcmp.eq.f32.partialorder %v3222_v55, 8.507059e+37  ;;  %v3440_v1 = vpack.c.bf16 %v3002_v48, %v3002_v48 }
 0x5c8   : > { %v14828_v62 = vpop.eup %12317  ;;  %v2898_v38 = vsel %vm2469_vm9, %v14821_v41, 0.0  ;;  %v3257_v5 = vmul.f32 %v14584_v16, %v3256_v47  ;;  %v3226_v28 = vsel %vm3223_vm11, %v3225_v26, %v3221_v46  ;;  %v3212_v34 = vmul.f32 %v14557_v35, %v14760_v58 }
 0x5c9   : > { %20185 = vst [vmem:[#allocation64_spill] sm:$0xff] %v14828_v62  ;;  %2899 = vadd.xlane.f32.xlu1 %v2898_v38  ;;  %v2901_v63 = vsel %vm2469_vm9, %v14828_v62, 0.0  ;;  %12319 = vpow2.f32 %v2854_v54  ;;  %v3441_v44 = vpack.c.bf16 %v3017_v12, %v3017_v12  ;;  %v3456_v57 = vpack.c.bf16 %v3242_v8, %v3242_v8 }
 0x5ca   : > { %2902 = vadd.xlane.f32.xlu0 %v2901_v63  ;;  %v3227_v9 = vmul.f32 %v14582_v4, %v3226_v28  ;;  %v14857_v3 = vunpack.c.l.b16 %v3440_v1  ;;  %v3457_v42 = vpack.c.bf16 %v3257_v5, %v3257_v5  ;;  %v3454_v49 = vpack.c.bf16 %v3212_v34, %v3212_v34 }
 0x5cb   : > { %v14859_v55 = vunpack.c.l.b16 %v3441_v44  ;;  %v2762_v13 = vpop.xlane.xlu2 %2761  ;;  %vm3023_vm12 = vweird.f32 %v14863_v60 }
 0x5cc   : > { %v2714_v11 = vpop.xlane.xlu1 %2713  ;;  %v14869_v4 = vunpack.c.l.b16 %v3457_v42  ;;  %v3455_v58 = vpack.c.bf16 %v3227_v9, %v3227_v9  ;;  %v14874_v53 = vunpack.c.l.b16 %v3454_v49  ;;  %v2796_v51 = vsub.f32 %v14619_v18, %v2762_v13 }
 0x5cd   : > { %v2780_v36 = vsub.f32 %v14617_v20, %v2714_v11  ;;  %v14867_v20 = vunpack.c.l.b16 %v3456_v57 }
 0x5ce   : > { %v14876_v54 = vunpack.c.l.b16 %v3455_v58  ;;  %v2858_v63 = vmul.f32 1.442695, %v2796_v51  ;;  %v14885_v12 = vpop.xlane.xlu0 %2878  ;;  %v2297_v58 = vrot.slane %v14334_v19, 4  ;;  %v3029_v51 = vand.u32 2147483648, %v14863_v60 }
 0x5cf   : > { %v2826_v25 = vmul.f32 1.442695, %v2780_v36  ;;  %v14855_v37 = vpop.eup %12319  ;;  %vm3038_vm2 = vweird.f32 %v14885_v12 }
 0x5d0   : > { %20188 = vst [vmem:[#allocation65_spill] sm:$0xff] %v14855_v37  ;;  %v2946_v16 = vsel %vm2469_vm9, %v14855_v37, 0.0 }
 0x5d1   : > { %12321 = vpow2.f32 %v2826_v25  ;;  %2947 = vadd.xlane.f32.xlu1 %v2946_v16 }
 0x5d4   : > { %v2759_v21 = vpop.xlane.xlu1 %2758 }
 0x5d5   : > { %v2795_v17 = vsub.f32 %v14604_v15, %v2759_v21  ;;  %v2298_v21 = vrot.slane %v14370_v29, 4 }
 0x5d7   : > { %v2856_v38 = vmul.f32 1.442695, %v2795_v17  ;;  %v14878_v48 = vpop.eup %12321  ;;  %v2774_v17 = vsub.f32 %v14498_v2, %v14647_v7  ;;  %v2321_v2 = vrot.slane %v14520_v23, 4 }
 0x5d8   : > { %v2904_v26 = vsel %vm2469_vm9, %v14878_v48, 0.0 }
 0x5d9   : > { %12323 = vpow2.f32 %v2856_v38  ;;  %2905 = vadd.xlane.f32.xlu0 %v2904_v26  ;;  %v2814_v7 = vmul.f32 1.442695, %v2774_v17 }
 0x5da   : > { %12325 = vrcp.f32 %v14863_v60 }
 0x5db   : > { %12327 = vrcp.f32 %v14885_v12 }
 0x5dc   : > { %v2717_v15 = vpop.xlane.xlu1 %2716  ;;  %12329 = vpow2.f32 %v2858_v63 }
 0x5dd   : > { %v2781_v8 = vsub.f32 %v14632_v33, %v2717_v15 }
 0x5df   : > { %v14889_v47 = vpop.eup %12323  ;;  %v2828_v18 = vmul.f32 1.442695, %v2781_v8  ;;  %v14937_v8 = vunpack.c.l.b16 %v2297_v58 }
 0x5e0   : > { %20189 = vst [vmem:[#allocation66_spill] sm:$0xff] %v14889_v47  ;;  %v2949_v46 = vsel %vm2469_vm9, %v14889_v47, 0.0  ;;  %v14894_v11 = vpop.eup %12325 }
 0x5e1   : > { %12331 = vpow2.f32 %v2828_v18  ;;  %2950 = vadd.xlane.f32.xlu0 %v2949_v46  ;;  %v14898_v44 = vpop.eup %12327  ;;  %v3019_v28 = vmul.f32 %v14894_v11, %v14863_v60  ;;  %v14939_v18 = vunpack.c.l.b16 %v2298_v21  ;;  %vm3024_vm13 = vweird.f32 %v14894_v11 }
 0x5e2   : > { %v14900_v33 = vpop.eup %12329  ;;  %v3034_v57 = vmul.f32 %v14898_v44, %v14885_v12  ;;  %vm3039_vm15 = vweird.f32 %v14898_v44  ;;  %vm14963_vm0 = vmor %vm3023_vm12, %vm3024_vm13  ;;  %vm3263_vm13 = vweird.f32 %v14848_v30 }
 0x5e3   : > { %20190 = vst [vmem:[#allocation67_spill] sm:$0xff] %v14900_v33  ;;  %v2952_v34 = vsel %vm2469_vm9, %v14900_v33, 0.0  ;;  %v14914_v25 = vpop.xlane.xlu2 %2929  ;;  %v3020_v42 = vsub.f32 1.0, %v3019_v28  ;;  %v3042_v33 = vand.u32 2147483647, %v14885_v12  ;;  %vm14986_vm4 = vmor %vm3038_vm2, %vm3039_vm15 }
 0x5e4   : > { %v14896_v1 = vpop.xlane.xlu1 %2881  ;;  %v3035_v38 = vsub.f32 1.0, %v3034_v57  ;;  %v3027_v57 = vand.u32 2147483647, %v14863_v60 }
 0x5e5   : > { %12333 = vrcp.f32 %v14896_v1  ;;  %v3021_v15 = vmul.f32 %v14894_v11, %v3020_v42  ;;  %v3030_v42 = vor.u32 1.1754944e-38, %v3029_v51  ;;  %vm3053_vm1 = vweird.f32 %v14896_v1 }
 0x5e6   : > { %12335 = vrcp.f32 %v14848_v30  ;;  %v3036_v28 = vmul.f32 %v14898_v44, %v3035_v38  ;;  %v3057_v37 = vand.u32 2147483647, %v14896_v1  ;;  %v14998_v51 = vunpack.c.l.b16 %v2321_v2 }
 0x5e7   : > { %v14903_v5 = vpop.eup %12331  ;;  %12337 = vrcp.f32 %v14914_v25  ;;  %v3022_v21 = vadd.f32 %v14894_v11, %v3021_v15  ;;  %vm3028_vm7 = vcmp.eq.f32.partialorder %v3027_v57, 8.507059e+37  ;;  %vm3043_vm8 = vcmp.eq.f32.partialorder %v3042_v33, 8.507059e+37 }
 0x5e8   : > { %v2907_v36 = vsel %vm2469_vm9, %v14903_v5, 0.0  ;;  %v3037_v15 = vadd.f32 %v14898_v44, %v3036_v28  ;;  %vm3058_vm5 = vcmp.eq.f32.partialorder %v3057_v37, 8.507059e+37 }
 0x5e9   : > { %2908 = vadd.xlane.f32.xlu2 %v2907_v36  ;;  %2953 = vadd.xlane.f32.xlu0 %v2952_v34 }
 0x5ea   : > { %2319 = vrot.lane.b32.xlu1 %v14382_v43, %s13193_s20 }
 0x5eb   : > { %v14918_v9 = vpop.eup %12333  ;;  %v14922_v49 = vpop.xlane.xlu0 %2884 }
 0x5ec   : > { %v14920_v16 = vpop.xlane.xlu1 %2926  ;;  %v3049_v13 = vmul.f32 %v14918_v9, %v14896_v1  ;;  %12339 = vrcp.f32 %v14922_v49  ;;  %v14933_v63 = vpop.eup %12335  ;;  %vm3054_vm14 = vweird.f32 %v14918_v9  ;;  %vm3068_vm10 = vweird.f32 %v14922_v49 }
 0x5ed   : > { %12341 = vrcp.f32 %v14920_v16  ;;  %v14945_v36 = vpop.eup %12337  ;;  %v3259_v34 = vmul.f32 %v14933_v63, %v14848_v30  ;;  %vm14973_vm3 = vmor %vm3053_vm1, %vm3054_vm14  ;;  %vm3264_vm15 = vweird.f32 %v14933_v63 }
 0x5ee   : > { %v3050_v26 = vsub.f32 1.0, %v3049_v13  ;;  %v3044_v13 = vand.u32 2147483648, %v14885_v12  ;;  %vm3294_vm14 = vweird.f32 %v14945_v36 }
 0x5ef   : > { %v3260_v47 = vsub.f32 1.0, %v3259_v34 }
 0x5f0   : > { %v3051_v46 = vmul.f32 %v14918_v9, %v3050_v26  ;;  %v3059_v26 = vand.u32 2147483648, %v14896_v1  ;;  %v3045_v43 = vor.u32 1.1754944e-38, %v3044_v13  ;;  %v3026_v1 = vsel %vm14963_vm0, %v14894_v11, %v3022_v21 }
 0x5f1   : > { %v3041_v11 = vsel %vm14986_vm4, %v14898_v44, %v3037_v15  ;;  %v3072_v13 = vand.u32 2147483647, %v14922_v49  ;;  %v3261_v33 = vmul.f32 %v14933_v63, %v3260_v47  ;;  %v3269_v47 = vand.u32 2147483648, %v14848_v30 }
 0x5f2   : > { %v12340_v58 = vpop.eup %12339  ;;  %v3052_v17 = vadd.f32 %v14918_v9, %v3051_v46  ;;  %v3289_v46 = vmul.f32 %v14945_v36, %v14914_v25  ;;  %v3060_v62 = vor.u32 1.1754944e-38, %v3059_v26  ;;  %v2322_v26 = vrot.slane %v14542_v39, 4 }
 0x5f3   : > { %v3064_v59 = vmul.f32 %v12340_v58, %v14922_v49  ;;  %v14959_v35 = vpop.eup %12341  ;;  %vm3069_vm6 = vweird.f32 %v12340_v58  ;;  %vm3073_vm12 = vcmp.eq.f32.partialorder %v3072_v13, 8.507059e+37  ;;  %vm3293_vm0 = vweird.f32 %v14914_v25 }
 0x5f4   : > { %v2765_v38 = vpop.xlane.xlu1 %2764  ;;  %v3056_v28 = vsel %vm14973_vm3, %v14918_v9, %v3052_v17  ;;  %v3290_v12 = vsub.f32 1.0, %v3289_v46  ;;  %v3074_v9 = vand.u32 2147483648, %v14922_v49  ;;  %v3031_v46 = vsel %vm3028_vm7, %v3030_v42, %v3026_v1  ;;  %vm3070_vm11 = vmor %vm3068_vm10, %vm3069_vm6 }
 0x5f5   : > { %v2797_v32 = vsub.f32 %v14658_v61, %v2765_v38  ;;  %v3065_v60 = vsub.f32 1.0, %v3064_v59  ;;  %v3061_v17 = vsel %vm3058_vm5, %v3060_v62, %v3056_v28  ;;  %v3267_v28 = vand.u32 2147483647, %v14848_v30  ;;  %vm15029_vm1 = vmor %vm3293_vm0, %vm3294_vm14 }
 0x5f6   : > { %v3291_v44 = vmul.f32 %v14945_v36, %v3290_v12  ;;  %v3075_v15 = vor.u32 1.1754944e-38, %v3074_v9  ;;  %v3062_v62 = vmul.f32 %v14638_v14, %v3061_v17  ;;  %vm3279_vm2 = vweird.f32 %v14959_v35  ;;  %vm15055_vm6 = vmor %vm3263_vm13, %vm3264_vm15 }
 0x5f7   : > { %v2860_v38 = vmul.f32 1.442695, %v2797_v32  ;;  %v3274_v32 = vmul.f32 %v14959_v35, %v14920_v16  ;;  %v3066_v59 = vmul.f32 %v12340_v58, %v3065_v60  ;;  %v3046_v60 = vsel %vm3043_vm8, %v3045_v43, %v3041_v11 }
 0x5f8   : > { %v3032_v43 = vmul.f32 %v14607_v31, %v3031_v46  ;;  %v3047_v42 = vmul.f32 %v14621_v6, %v3046_v60  ;;  %v3444_v1 = vpack.c.bf16 %v3062_v62, %v3062_v62  ;;  %v3262_v31 = vadd.f32 %v14933_v63, %v3261_v33 }
 0x5f9   : > { %12343 = vpow2.f32 %v2860_v38  ;;  %v3067_v21 = vadd.f32 %v12340_v58, %v3066_v59  ;;  %v3275_v37 = vsub.f32 1.0, %v3274_v32  ;;  %v3299_v6 = vand.u32 2147483648, %v14914_v25 }
 0x5fa   : > { %v3297_v59 = vand.u32 2147483647, %v14914_v25  ;;  %v3442_v12 = vpack.c.bf16 %v3032_v43, %v3032_v43  ;;  %v3443_v9 = vpack.c.bf16 %v3047_v42, %v3047_v42  ;;  %v3284_v25 = vand.u32 2147483648, %v14920_v16 }
 0x5fb   : > { %v3071_v2 = vsel %vm3070_vm11, %v12340_v58, %v3067_v21  ;;  %v3276_v14 = vmul.f32 %v14959_v35, %v3275_v37  ;;  %v3292_v58 = vadd.f32 %v14945_v36, %v3291_v44  ;;  %v3612_v37 = vunpack.c.l.b16 %v3444_v1 }
 0x5fc   : > { %v15000_v61 = vpop.xlane.xlu1 %2932  ;;  %v3076_v57 = vsel %vm3073_vm12, %v3075_v15, %v3071_v2  ;;  %v3300_v44 = vor.u32 1.1754944e-38, %v3299_v6  ;;  %vm3278_vm3 = vweird.f32 %v14920_v16  ;;  %v3282_v15 = vand.u32 2147483647, %v14920_v16 }
 0x5fd   : > { %12345 = vrcp.f32 %v15000_v61  ;;  %v3277_v13 = vadd.f32 %v14959_v35, %v3276_v14  ;;  %v3296_v60 = vsel %vm15029_vm1, %v14945_v36, %v3292_v58  ;;  %v3270_v33 = vor.u32 1.1754944e-38, %v3269_v47  ;;  %vm15043_vm5 = vmor %vm3278_vm3, %vm3279_vm2 }
 0x5fe   : > { %12347 = vpow2.f32 %v2814_v7  ;;  %v3077_v7 = vmul.f32 %v14651_v10, %v3076_v57  ;;  %vm3298_vm4 = vcmp.eq.f32.partialorder %v3297_v59, 8.507059e+37  ;;  %v3611_v57 = vunpack.c.l.b16 %v3443_v9 }
 0x5ff   : > { %v15006_v38 = vpop.eup %12343  ;;  %v3314_v42 = vand.u32 2147483648, %v15000_v61  ;;  %v3301_v14 = vsel %vm3298_vm4, %v3300_v44, %v3296_v60  ;;  %v3281_v36 = vsel %vm15043_vm5, %v14959_v35, %v3277_v13  ;;  %v3312_v47 = vand.u32 2147483647, %v15000_v61 }
 0x600   : > { %v2955_v49 = vsel %vm2469_vm9, %v15006_v38, 0.0  ;;  %v3445_v34 = vpack.c.bf16 %v3077_v7, %v3077_v7  ;;  %v3285_v7 = vor.u32 1.1754944e-38, %v3284_v25  ;;  %vm3283_vm8 = vcmp.eq.f32.partialorder %v3282_v15, 8.507059e+37 }
 0x601   : > { %2956 = vadd.xlane.f32.xlu2 %v2955_v49  ;;  %v3266_v35 = vsel %vm15055_vm6, %v14933_v63, %v3262_v31  ;;  %vm3308_vm10 = vweird.f32 %v15000_v61  ;;  %v3302_v9 = vmul.f32 %v14641_v0, %v3301_v14  ;;  %vm3268_vm11 = vcmp.eq.f32.partialorder %v3267_v28, 8.507059e+37 }
 0x602   : > { %v3613_v46 = vunpack.c.l.b16 %v3445_v34  ;;  %v3610_v34 = vunpack.c.l.b16 %v3442_v12  ;;  %v3286_v21 = vsel %vm3283_vm8, %v3285_v7, %v3281_v36  ;;  %v3315_v13 = vor.u32 1.1754944e-38, %v3314_v42 }
 0x603   : > { %v12346_v32 = vpop.eup %12345  ;;  %vm3313_vm13 = vcmp.eq.f32.partialorder %v3312_v47, 8.507059e+37  ;;  %v3271_v63 = vsel %vm3268_vm11, %v3270_v33, %v3266_v35  ;;  %v3510_v31 = vpack.c.b16 %v14939_v18, %v14937_v8  ;;  %v3287_v0 = vmul.f32 %v14649_v27, %v3286_v21 }
 0x604   : > { %v15025_v10 = vpop.xlane.xlu1 %2935  ;;  %v15027_v11 = vpop.eup %12347  ;;  %v3304_v17 = vmul.f32 %v12346_v32, %v15000_v61  ;;  %v3617_v49 = vpack.c.b16 %v3613_v46, %v3612_v37  ;;  %vm3309_vm7 = vweird.f32 %v12346_v32  ;;  %v3616_v12 = vpack.c.b16 %v3611_v57, %v3610_v34 }
 0x605   : > { %12349 = vrcp.f32 %v15025_v10  ;;  %vm3310_vm12 = vmor %vm3308_vm10, %vm3309_vm7  ;;  %v3495_v61 = vunpack.c.l.b16 %v2322_v26  ;;  %v3460_v60 = vpack.c.bf16 %v3302_v9, %v3302_v9  ;;  %v3329_v15 = vand.u32 2147483648, %v15025_v10 }
 0x606   : > { %v3305_v62 = vsub.f32 1.0, %v3304_v17  ;;  %v3640_v58 = vsel %vm2469_vm9, %v3617_v49, 0  ;;  %vm3323_vm15 = vweird.f32 %v15025_v10  ;;  %v3327_v8 = vand.u32 2147483647, %v15025_v10 }
 0x607   : > { %3646 = vmatpush.bf16.xpose.msra.mxu0 %v3640_v58  ;;  %v3514_v44 = vpack.c.b16 %v3495_v61, %v14998_v51  ;;  %v3459_v51 = vpack.c.bf16 %v3287_v0, %v3287_v0  ;;  %v2300_v34 = vrot.slane %v14351_v56, 4  ;;  %v20205_v35 = vpack.c.b16 %v14859_v55, %v14857_v3  ;;  %v20207_v0 = vld [vmem:[#allocation58_spill] sm:$0xff] }
 0x608   : > { %v3306_v43 = vmul.f32 %v12346_v32, %v3305_v62  ;;  %v3272_v62 = vmul.f32 %v14609_v24, %v3271_v63  ;;  %v3758_v24 = vunpack.c.l.b16 %v3460_v60  ;;  %vm3328_vm1 = vcmp.eq.f32.partialorder %v3327_v8, 8.507059e+37 }
 0x609   : > { %v3757_v16 = vunpack.c.l.b16 %v3459_v51  ;;  %v3489_v61 = vunpack.c.l.b16 %v2300_v34 }
 0x60a   : > { %v3307_v6 = vadd.f32 %v12346_v32, %v3306_v43  ;;  %v3458_v14 = vpack.c.bf16 %v3272_v62, %v3272_v62  ;;  %v20208_v62 = vld [vmem:[#allocation61_spill] sm:$0xff] }
 0x60b   : > { %v12350_v1 = vpop.eup %12349 }
 0x60c   : > { %v3319_v30 = vmul.f32 %v12350_v1, %v15025_v10  ;;  %v15066_v59 = vpop.xlane.xlu1 %2938  ;;  %v3311_v25 = vsel %vm3310_vm12, %v12346_v32, %v3307_v6  ;;  %vm3324_vm14 = vweird.f32 %v12350_v1  ;;  %v3637_v32 = vsel %vm2469_vm9, %v3616_v12, 0 }
 0x60d   : > { %12351 = vrcp.f32 %v15066_v59  ;;  %v3316_v37 = vsel %vm3313_vm13, %v3315_v13, %v3311_v25  ;;  %vm15083_vm0 = vmor %vm3323_vm15, %vm3324_vm14  ;;  %v3330_v10 = vor.u32 1.1754944e-38, %v3329_v15  ;;  %v3344_v36 = vand.u32 2147483648, %v15066_v59  ;;  %v20206_v25 = vld [vmem:[#allocation52_spill] sm:$0xff] }
 0x60e   : > { %v3320_v17 = vsub.f32 1.0, %v3319_v30  ;;  %v3317_v46 = vmul.f32 %v14664_v52, %v3316_v37  ;;  %v2886_v52 = vsel %vm2469_vm9, %v15027_v11, 0.0  ;;  %v3342_v58 = vand.u32 2147483647, %v15066_v59 }
 0x60f   : > { %3647 = vmatpush.bf16.xpose.msra.mxu0 %v3637_v32  ;;  %v3634_v30 = vsel %vm2469_vm9, %v20205_v35, 0  ;;  %vm3338_vm3 = vweird.f32 %v15066_v59  ;;  %v3756_v21 = vunpack.c.l.b16 %v3458_v14  ;;  %v2299_v12 = vrot.slane %v14342_v22, 4  ;;  %v20214_v14 = vld [vmem:[#allocation49_spill] sm:$0xff] }
 0x610   : > { %v3321_v28 = vmul.f32 %v12350_v1, %v3320_v17  ;;  %v3461_v18 = vpack.c.bf16 %v3317_v46, %v3317_v46  ;;  %v3345_v17 = vor.u32 1.1754944e-38, %v3344_v36  ;;  %v2323_v63 = vrot.slane %v20206_v25, 4 }
 0x611   : > { %vm3343_vm5 = vcmp.eq.f32.partialorder %v3342_v58, 8.507059e+37  ;;  %v3762_v3 = vpack.c.b16 %v3757_v16, %v3756_v21  ;;  %v2301_v36 = vrot.slane %v20214_v14, 4  ;;  %v20215_v16 = vld [vmem:[#allocation55_spill] sm:$0xff] }
 0x612   : > { %v3322_v26 = vadd.f32 %v12350_v1, %v3321_v28  ;;  %12061 = vxpose.binary.xlu0.c.b16.start [1/8] (short) (narrow) %v3514_v44, %v3510_v31, 64  ;;  %v3759_v49 = vunpack.c.l.b16 %v3461_v18  ;;  %v3496_v60 = vunpack.c.l.b16 %v2323_v63 }
 0x613   : > { %v12352_v27 = vpop.eup %12351  ;;  %v3490_v35 = vunpack.c.l.b16 %v2301_v36 }
 0x614   : > { %v3334_v2 = vmul.f32 %v12352_v27, %v15066_v59  ;;  %v3326_v57 = vsel %vm15083_vm0, %v12350_v1, %v3322_v26  ;;  %2887 = vadd.xlane.f32.xlu1 %v2886_v52  ;;  %v3763_v42 = vpack.c.b16 %v3759_v49, %v3758_v24  ;;  %vm3339_vm2 = vweird.f32 %v12352_v27  ;;  %v20209_v26 = vld [vmem:[#allocation60_spill] sm:$0xff]  ;;  %v20212_v49 = vld [vmem:[#allocation50_spill] sm:$0xff] }
 0x615   : > { %v3331_v7 = vsel %vm3328_vm1, %v3330_v10, %v3326_v57  ;;  %v2324_v1 = vrot.slane %v14530_v45, 4  ;;  %vm3340_vm4 = vmor %vm3338_vm3, %vm3339_vm2  ;;  %v3488_v59 = vunpack.c.l.b16 %v2299_v12  ;;  %v20210_v8 = vpack.c.b16 %v20208_v62, %v20209_v26  ;;  %v20213_v10 = vld [vmem:[#allocation54_spill] sm:$0xff] }
 0x616   : > { %v3335_v43 = vsub.f32 1.0, %v3334_v2  ;;  %v3786_v6 = vsel %vm2469_vm9, %v3763_v42, 0  ;;  %v3332_v13 = vmul.f32 %v14675_v40, %v3331_v7  ;;  %v3783_v40 = vsel %vm2469_vm9, %v3762_v3, 0  ;;  %v20219_v62 = vld [vmem:[#allocation62_spill] sm:$0xff] }
 0x617   : > { %3792 = vmatpush.bf16.xpose.msra.mxu2 %v3786_v6  ;;  %3648 = vmatpush.bf16.xpose.msra.mxu0 %v3634_v30  ;;  %v3497_v37 = vunpack.c.l.b16 %v2324_v1  ;;  %v3511_v15 = vpack.c.b16 %v3489_v61, %v3488_v59  ;;  %v3631_v18 = vsel %vm2469_vm9, %v20210_v8, 0  ;;  %v20211_v2 = vpack.c.b16 %v14869_v4, %v14867_v20  ;;  %v20216_v4 = vld [vmem:[#allocation57_spill] sm:$0xff] }
 0x618   : > { %v3336_v47 = vmul.f32 %v12352_v27, %v3335_v43  ;;  %v3462_v46 = vpack.c.bf16 %v3332_v13, %v3332_v13  ;;  %v2302_v57 = vrot.slane %v20212_v49, 4  ;;  %v2325_v43 = vrot.slane %v20213_v10, 4  ;;  %v20217_v30 = vld [vmem:[#allocation53_spill] sm:$0xff] }
 0x619   : > { %2317 = vrot.lane.b32.xlu2 %v14373_v50, %s13193_s20  ;;  %v3515_v32 = vpack.c.b16 %v3497_v37, %v3496_v60  ;;  %v3780_v24 = vsel %vm2469_vm9, %v20211_v2, 0  ;;  %v2326_v7 = vrot.slane %v20215_v16, 4  ;;  %v20218_v13 = vpack.c.b16 %v14876_v54, %v14874_v53  ;;  %v20220_v2 = vld [vmem:[#allocation63_spill] sm:$0xff] }
 0x61a   : > { %v3337_v9 = vadd.f32 %v12352_v27, %v3336_v47  ;;  %v3491_v6 = vunpack.c.l.b16 %v2302_v57  ;;  %v3498_v34 = vunpack.c.l.b16 %v2325_v43 }
 0x61b   : > { %v3499_v20 = vunpack.c.l.b16 %v2326_v7  ;;  %v3777_v12 = vsel %vm2469_vm9, %v20218_v13, 0 }
 0x61c   : > { %v3341_v55 = vsel %vm3340_vm4, %v12352_v27, %v3337_v9  ;;  %v15113_v27 = vunpack.c.l.b16 %v3462_v46  ;;  %v2775_v9 = vsub.f32 %v20217_v30, %v20216_v4  ;;  %v3470_v4 = vunpack.c.l.b16 %v14334_v19 }
 0x61d   : > { %v3346_v31 = vsel %vm3343_vm5, %v3345_v17, %v3341_v55  ;;  %v3512_v17 = vpack.c.b16 %v3491_v6, %v3490_v35  ;;  %v3516_v63 = vpack.c.b16 %v3499_v20, %v3498_v34  ;;  %v3478_v35 = vunpack.c.l.b16 %v14520_v23 }
 0x61e   : > { %v3347_v28 = vmul.f32 %v20207_v0, %v3346_v31  ;;  %v2816_v61 = vmul.f32 1.442695, %v2775_v9  ;;  %v3479_v30 = vunpack.c.l.b16 %v14542_v39 }
 0x61f   : > { %3793 = vmatpush.bf16.xpose.msra.mxu2 %v3783_v40  ;;  %3649 = vmatpush.bf16.xpose.msra.mxu0 %v3631_v18 }
 0x620   : > { %v3463_v44 = vpack.c.bf16 %v3347_v28, %v3347_v28 }
 0x622   : > { %v15115_v33 = vunpack.c.l.b16 %v3463_v44  ;;  %12062 = vxpose.binary.xlu0.c.b16.cont [2/8] (short) (narrow) %v3515_v32, %v3511_v15, 64 }
 0x623   : > { %v2942_v52 = vpop.xlane.xlu0 %2941 }
 0x624   : > { %v3833_v51 = vpack.c.b16 %v15115_v33, %v15113_v27  ;;  %12353 = vrcp.f32 %v2942_v52  ;;  %v3359_v31 = vand.u32 2147483648, %v2942_v52  ;;  %vm3353_vm7 = vweird.f32 %v2942_v52 }
 0x625   : > { %v3357_v0 = vand.u32 2147483647, %v2942_v52 }
 0x626   : > { %v3360_v59 = vor.u32 1.1754944e-38, %v3359_v31  ;;  %v3473_v31 = vunpack.c.l.b16 %v14351_v56 }
 0x627   : > { %3794 = vmatpush.bf16.xpose.msra.mxu2 %v3780_v24  ;;  %vm3358_vm11 = vcmp.eq.f32.partialorder %v3357_v0, 8.507059e+37 }
 0x62a   : > { %v12354_v42 = vpop.eup %12353 }
 0x62b   : > { %v3349_v47 = vmul.f32 %v12354_v42, %v2942_v52  ;;  %v2945_v58 = vpop.xlane.xlu0 %2944  ;;  %vm3354_vm6 = vweird.f32 %v12354_v42  ;;  %v2894_v52 = vpop.xlane.xlu2 %2893 }
 0x62c   : > { %12355 = vrcp.f32 %v2945_v58  ;;  %vm3355_vm8 = vmor %vm3353_vm7, %vm3354_vm6  ;;  %v3374_v54 = vand.u32 2147483648, %v2945_v58  ;;  %vm3368_vm12 = vweird.f32 %v2945_v58  ;;  %v3372_v40 = vand.u32 2147483647, %v2945_v58 }
 0x62d   : > { %v3350_v1 = vsub.f32 1.0, %v3349_v47  ;;  %12357 = vpow2.f32 %v2816_v61  ;;  %vm3113_vm0 = vweird.f32 %v2894_v52 }
 0x62e   : > { %v3375_v32 = vor.u32 1.1754944e-38, %v3374_v54  ;;  %vm3373_vm14 = vcmp.eq.f32.partialorder %v3372_v40, 8.507059e+37  ;;  %12359 = vrcp.f32 %v2894_v52  ;;  %v3472_v54 = vunpack.c.l.b16 %v14342_v22 }
 0x62f   : > { %v3351_v21 = vmul.f32 %v12354_v42, %v3350_v1  ;;  %3795 = vmatpush.bf16.xpose.msra.mxu2 %v3777_v12  ;;  %v3471_v1 = vunpack.c.l.b16 %v14370_v29 }
 0x631   : > { %v3352_v55 = vadd.f32 %v12354_v42, %v3351_v21  ;;  %v3506_v21 = vpack.c.b16 %v3479_v30, %v3478_v35  ;;  %v3502_v12 = vpack.c.b16 %v3471_v1, %v3470_v4 }
 0x632   : > { %v12356_v3 = vpop.eup %12355  ;;  %12063 = vxpose.binary.xlu0.c.b16.cont [3/8] (short) (narrow) %v3516_v63, %v3512_v17, 64 }
 0x633   : > { %v3364_v37 = vmul.f32 %v12356_v3, %v2945_v58  ;;  %v3356_v46 = vsel %vm3355_vm8, %v12354_v42, %v3352_v55  ;;  %vm3369_vm10 = vweird.f32 %v12356_v3  ;;  %v15134_v8 = vpop.eup %12357  ;;  %v15139_v42 = vpop.xlane.xlu1 %2896 }
 0x634   : > { %v3361_v44 = vsel %vm3358_vm11, %v3360_v59, %v3356_v46  ;;  %vm3370_vm13 = vmor %vm3368_vm12, %vm3369_vm10  ;;  %v2889_v57 = vsel %vm2469_vm9, %v15134_v8, 0.0  ;;  %v12360_v34 = vpop.eup %12359  ;;  %12361 = vrcp.f32 %v15139_v42  ;;  %v3481_v59 = vunpack.c.l.b16 %v14530_v45 }
 0x635   : > { %v3365_v28 = vsub.f32 1.0, %v3364_v37  ;;  %v3362_v26 = vmul.f32 %v20219_v62, %v3361_v44  ;;  %v3109_v9 = vmul.f32 %v12360_v34, %v2894_v52  ;;  %vm3114_vm15 = vweird.f32 %v12360_v34 }
 0x636   : > { %v3480_v44 = vunpack.c.l.b16 %v20206_v25  ;;  %vm15183_vm1 = vmor %vm3113_vm0, %vm3114_vm15  ;;  %v3474_v25 = vunpack.c.l.b16 %v20214_v14  ;;  %vm3128_vm3 = vweird.f32 %v15139_v42 }
 0x637   : > { %v3366_v53 = vmul.f32 %v12356_v3, %v3365_v28  ;;  %v3464_v43 = vpack.c.bf16 %v3362_v26, %v3362_v26  ;;  %v3110_v29 = vsub.f32 1.0, %v3109_v9  ;;  %v3132_v9 = vand.u32 2147483647, %v15139_v42 }
 0x638   : > { %v3507_v22 = vpack.c.b16 %v3481_v59, %v3480_v44 }
 0x639   : > { %v3367_v60 = vadd.f32 %v12356_v3, %v3366_v53  ;;  %v15145_v58 = vunpack.c.l.b16 %v3464_v43  ;;  %v3111_v17 = vmul.f32 %v12360_v34, %v3110_v29  ;;  %v3119_v53 = vand.u32 2147483648, %v2894_v52 }
 0x63a   : > { %v15161_v23 = vpop.eup %12361  ;;  %v3483_v43 = vunpack.c.l.b16 %v20215_v16  ;;  %v20233_v16 = vld [vmem:[#allocation56_spill] sm:$0xff] }
 0x63b   : > { %v3371_v15 = vsel %vm3370_vm13, %v12356_v3, %v3367_v60  ;;  %v3124_v55 = vmul.f32 %v15161_v23, %v15139_v42  ;;  %v3112_v0 = vadd.f32 %v12360_v34, %v3111_v17  ;;  %v3117_v60 = vand.u32 2147483647, %v2894_v52 }
 0x63c   : > { %v3376_v18 = vsel %vm3373_vm14, %v3375_v32, %v3371_v15  ;;  %v15151_v20 = vpop.xlane.xlu1 %2899  ;;  %v3134_v52 = vand.u32 2147483648, %v15139_v42  ;;  %vm3129_vm5 = vweird.f32 %v15161_v23 }
 0x63d   : > { %v3377_v24 = vmul.f32 %v20220_v2, %v3376_v18  ;;  %v15143_v47 = vpop.xlane.xlu0 %2902  ;;  %12363 = vrcp.f32 %v15151_v20  ;;  %v3125_v40 = vsub.f32 1.0, %v3124_v55  ;;  %v3503_v18 = vpack.c.b16 %v3473_v31, %v3472_v54  ;;  %vm15257_vm0 = vmor %vm3128_vm3, %vm3129_vm5 }
 0x63e   : > { %v3116_v45 = vsel %vm15183_vm1, %v12360_v34, %v3112_v0  ;;  %v3120_v2 = vor.u32 1.1754944e-38, %v3119_v53  ;;  %vm3118_vm2 = vcmp.eq.f32.partialorder %v3117_v60, 8.507059e+37  ;;  %vm3143_vm6 = vweird.f32 %v15151_v20  ;;  %v20232_v0 = vld [vmem:[#allocation51_spill] sm:$0xff] }
 0x63f   : > { %v3465_v36 = vpack.c.bf16 %v3377_v24, %v3377_v24  ;;  %v3475_v24 = vunpack.c.l.b16 %v20212_v49  ;;  %v3147_v31 = vand.u32 2147483647, %v15151_v20  ;;  %v3149_v59 = vand.u32 2147483648, %v15151_v20 }
 0x640   : > { %v15200_v34 = vsel %vm3118_vm2, %v3120_v2, %v3116_v45  ;;  %vm3158_vm12 = vweird.f32 %v15143_v47  ;;  %v3164_v53 = vand.u32 2147483648, %v15143_v47  ;;  %vm3133_vm5 = vcmp.eq.f32.partialorder %v3132_v9, 8.507059e+37 }
 0x641   : > { %v15141_v7 = vunpack.c.l.b16 %v3465_v36  ;;  %v3482_v36 = vunpack.c.l.b16 %v20213_v10  ;;  %vm3148_vm2 = vcmp.eq.f32.partialorder %v3147_v31, 8.507059e+37  ;;  %v3122_v14 = vmul.f32 %v20233_v16, %v15200_v34 }
 0x642   : > { %2890 = vadd.xlane.f32.xlu2 %v2889_v57  ;;  %v3126_v57 = vmul.f32 %v15161_v23, %v3125_v40  ;;  %v3162_v40 = vand.u32 2147483647, %v15143_v47 }
 0x643   : > { %v3834_v6 = vpack.c.b16 %v15141_v7, %v15145_v58  ;;  %v15163_v19 = vpop.eup %12363 }
 0x644   : > { %v3139_v37 = vmul.f32 %v15163_v19, %v15151_v20  ;;  %v3127_v29 = vadd.f32 %v15161_v23, %v3126_v57  ;;  %vm3144_vm8 = vweird.f32 %v15163_v19  ;;  %vm3163_vm3 = vcmp.eq.f32.partialorder %v3162_v40, 8.507059e+37 }
 0x645   : > { %vm15238_vm13 = vmor %vm3143_vm6, %vm3144_vm8  ;;  %v3448_v40 = vpack.c.bf16 %v3122_v14, %v3122_v14 }
 0x646   : > { %v3140_v15 = vsub.f32 1.0, %v3139_v37  ;;  %v15218_v37 = vpop.xlane.xlu1 %2947  ;;  %v3131_v42 = vsel %vm15257_vm0, %v15161_v23, %v3127_v29 }
 0x647   : > { %vm3383_vm8 = vweird.f32 %v15218_v37 }
 0x648   : > { %v3141_v1 = vmul.f32 %v15163_v19, %v3140_v15 }
 0x64a   : > { %v3142_v55 = vadd.f32 %v15163_v19, %v3141_v1 }
 0x64c   : > { %v15157_v13 = vpop.xlane.xlu0 %2905  ;;  %v3146_v20 = vsel %vm15238_vm13, %v15163_v19, %v3142_v55  ;;  %v3150_v19 = vor.u32 1.1754944e-38, %v3149_v59 }
 0x64d   : > { %12365 = vrcp.f32 %v15157_v13  ;;  %vm3173_vm7 = vweird.f32 %v15157_v13  ;;  %v3177_v17 = vand.u32 2147483647, %v15157_v13 }
 0x64e   : > { %12367 = vrcp.f32 %v15143_v47  ;;  %12073 = vxpose.binary.xlu1.c.b16.start [1/8] (short) (narrow) %v3506_v21, %v3502_v12, 64  ;;  %v3135_v21 = vor.u32 1.1754944e-38, %v3134_v52  ;;  %v3179_v12 = vand.u32 2147483648, %v15157_v13  ;;  %v3151_v1 = vsel %vm3148_vm2, %v3150_v19, %v3146_v20 }
 0x64f   : > { %vm3178_vm14 = vcmp.eq.f32.partialorder %v3177_v17, 8.507059e+37  ;;  %v3152_v31 = vmul.f32 %v14821_v41, %v3151_v1  ;;  %v2303_v41 = vrot.slane %v14373_v50, 4 }
 0x650   : > { %v3180_v54 = vor.u32 1.1754944e-38, %v3179_v12  ;;  %v3136_v17 = vsel %vm3133_vm5, %v3135_v21, %v3131_v42 }
 0x651   : > { %v3450_v59 = vpack.c.bf16 %v3152_v31, %v3152_v31 }
 0x653   : > { %v15165_v39 = vpop.eup %12365 }
 0x654   : > { %v15167_v63 = vpop.eup %12367  ;;  %v3169_v3 = vmul.f32 %v15165_v39, %v15157_v13  ;;  %v15173_v61 = vpop.xlane.xlu0 %2950  ;;  %vm3174_vm4 = vweird.f32 %v15165_v39 }
 0x655   : > { %v3154_v28 = vmul.f32 %v15167_v63, %v15143_v47  ;;  %vm15222_vm10 = vmor %vm3173_vm7, %vm3174_vm4  ;;  %vm3159_vm11 = vweird.f32 %v15167_v63  ;;  %v15305_v47 = vunpack.c.l.b16 %v2303_v41  ;;  %vm3398_vm13 = vweird.f32 %v15173_v61 }
 0x656   : > { %v3170_v46 = vsub.f32 1.0, %v3169_v3  ;;  %vm15244_vm15 = vmor %vm3158_vm12, %vm3159_vm11  ;;  %v3404_v31 = vand.u32 2147483648, %v15173_v61 }
 0x657   : > { %v3155_v32 = vsub.f32 1.0, %v3154_v28 }
 0x658   : > { %v3171_v62 = vmul.f32 %v15165_v39, %v3170_v46 }
 0x659   : > { %v3156_v35 = vmul.f32 %v15167_v63, %v3155_v32 }
 0x65a   : > { %v3172_v4 = vadd.f32 %v15165_v39, %v3171_v62 }
 0x65b   : > { %v3157_v28 = vadd.f32 %v15167_v63, %v3156_v35 }
 0x65c   : > { %v15188_v26 = vpop.xlane.xlu2 %2908  ;;  %v15206_v30 = vpop.xlane.xlu0 %2953  ;;  %v3176_v46 = vsel %vm15222_vm10, %v15165_v39, %v3172_v4 }
 0x65d   : > { %12369 = vrcp.f32 %v15188_v26  ;;  %v3194_v56 = vand.u32 2147483648, %v15188_v26  ;;  %v3181_v15 = vsel %vm3178_vm14, %v3180_v54, %v3176_v46  ;;  %v3192_v62 = vand.u32 2147483647, %v15188_v26  ;;  %v2320_v42 = vpop.permute.xlu1 %2319 }
 0x65e   : > { %12074 = vxpose.binary.xlu1.c.b16.cont [2/8] (short) (narrow) %v3507_v22, %v3503_v18, 64  ;;  %12371 = vrcp.f32 %v15206_v30  ;;  %v3161_v18 = vsel %vm15244_vm15, %v15167_v63, %v3157_v28  ;;  %v3165_v22 = vor.u32 1.1754944e-38, %v3164_v53  ;;  %vm3188_vm4 = vweird.f32 %v15188_v26 }
 0x65f   : > { %12373 = vrcp.f32 %v15218_v37  ;;  %v3182_v52 = vmul.f32 %v14878_v48, %v3181_v15  ;;  %v3195_v57 = vor.u32 1.1754944e-38, %v3194_v56  ;;  %vm3193_vm7 = vcmp.eq.f32.partialorder %v3192_v62, 8.507059e+37 }
 0x660   : > { %12375 = vrcp.f32 %v15173_v61  ;;  %v3166_v63 = vsel %vm3163_vm3, %v3165_v22, %v3161_v18  ;;  %v3508_v48 = vpack.c.b16 %v3483_v43, %v3482_v36  ;;  %v2304_v28 = vrot.slane %v20232_v0, 4  ;;  %v20234_v43 = vld [vmem:[#allocation59_spill] sm:$0xff] }
 0x661   : > { %v3452_v55 = vpack.c.bf16 %v3182_v52, %v3182_v52  ;;  %v3137_v49 = vmul.f32 %v20234_v43, %v3136_v17  ;;  %v3477_v36 = vunpack.c.l.b16 %v20232_v0  ;;  %v3683_v62 = vunpack.c.l.b16 %v3450_v59 }
 0x662   : > { %v15299_v54 = vunpack.c.l.b16 %v2304_v28  ;;  %v2328_v17 = vrot.slane %v2320_v42, 4  ;;  %vm3413_vm12 = vweird.f32 %v15206_v30 }
 0x663   : > { %v12370_v3 = vpop.eup %12369  ;;  %v3449_v34 = vpack.c.bf16 %v3137_v49, %v3137_v49 }
 0x664   : > { %v3184_v13 = vmul.f32 %v12370_v3, %v15188_v26  ;;  %vm3189_vm1 = vweird.f32 %v12370_v3  ;;  %v15265_v45 = vpop.eup %12371  ;;  %v3504_v26 = vpack.c.b16 %v3475_v24, %v3474_v25  ;;  %v3513_v22 = vpack.c.b16 %v15299_v54, %v15305_v47 }
 0x665   : > { %vm3190_vm6 = vmor %vm3188_vm4, %vm3189_vm1  ;;  %v15272_v35 = vpop.eup %12373  ;;  %v3409_v4 = vmul.f32 %v15265_v45, %v15206_v30  ;;  %v15314_v52 = vunpack.c.l.b16 %v3449_v34  ;;  %vm3414_vm10 = vweird.f32 %v15265_v45  ;;  %v3501_v49 = vunpack.c.l.b16 %v2328_v17 }
 0x666   : > { %v3185_v44 = vsub.f32 1.0, %v3184_v13  ;;  %v15276_v23 = vpop.eup %12375  ;;  %v3379_v10 = vmul.f32 %v15272_v35, %v15218_v37  ;;  %v3685_v13 = vunpack.c.l.b16 %v3452_v55  ;;  %vm3384_vm11 = vweird.f32 %v15272_v35  ;;  %vm15330_vm14 = vmor %vm3413_vm12, %vm3414_vm10 }
 0x667   : > { %v3394_v25 = vmul.f32 %v15276_v23, %v15173_v61  ;;  %v3402_v55 = vand.u32 2147483647, %v15173_v61  ;;  %vm3399_vm15 = vweird.f32 %v15276_v23  ;;  %vm15352_vm2 = vmor %vm3383_vm8, %vm3384_vm11  ;;  %v3405_v54 = vor.u32 1.1754944e-38, %v3404_v31 }
 0x668   : > { %v3186_v32 = vmul.f32 %v12370_v3, %v3185_v44  ;;  %v3380_v60 = vsub.f32 1.0, %v3379_v10  ;;  %v3476_v44 = vunpack.c.l.b16 %v14373_v50  ;;  %v3485_v10 = vunpack.c.l.b16 %v2320_v42  ;;  %vm15343_vm1 = vmor %vm3398_vm13, %vm3399_vm15 }
 0x669   : > { %v3395_v39 = vsub.f32 1.0, %v3394_v25  ;;  %vm3403_vm4 = vcmp.eq.f32.partialorder %v3402_v55, 8.507059e+37  ;;  %v3850_v55 = vsel %vm2469_vm9, %v3833_v51, 0 }
 0x66a   : > { %v3187_v2 = vadd.f32 %v12370_v3, %v3186_v32  ;;  %v3505_v19 = vpack.c.b16 %v3477_v36, %v3476_v44  ;;  %v3381_v50 = vmul.f32 %v15272_v35, %v3380_v60  ;;  %v20241_v44 = vld [vmem:[#allocation67_spill] sm:$0xff] }
 0x66c   : > { %v3191_v12 = vsel %vm3190_vm6, %v12370_v3, %v3187_v2  ;;  %v20231_v3 = vld [vmem:[#allocation64_spill] sm:$0xff]  ;;  %v15312_v2 = vunpack.c.l.b16 %v3448_v40 }
 0x66d   : > { %v3196_v9 = vsel %vm3193_vm7, %v3195_v57, %v3191_v12  ;;  %v3167_v21 = vmul.f32 %v20231_v3, %v3166_v63  ;;  %v3396_v57 = vmul.f32 %v15276_v23, %v3395_v39  ;;  %v3387_v63 = vand.u32 2147483647, %v15218_v37 }
 0x66e   : > { %v3197_v29 = vmul.f32 %v14903_v5, %v3196_v9  ;;  %12075 = vxpose.binary.xlu1.c.b16.cont [3/8] (short) (narrow) %v3508_v48, %v3504_v26, 64  ;;  %v3410_v5 = vsub.f32 1.0, %v3409_v4  ;;  %v3389_v4 = vand.u32 2147483648, %v15218_v37  ;;  %v3419_v12 = vand.u32 2147483648, %v15206_v30 }
 0x66f   : > { %v3451_v53 = vpack.c.bf16 %v3167_v21, %v3167_v21  ;;  %v3417_v48 = vand.u32 2147483647, %v15206_v30  ;;  %v3397_v21 = vadd.f32 %v15276_v23, %v3396_v57  ;;  %v3688_v40 = vpack.c.b16 %v15314_v52, %v15312_v2  ;;  %v20243_v2 = vld [vmem:[#allocation65_spill] sm:$0xff] }
 0x670   : > { %v3453_v24 = vpack.c.bf16 %v3197_v29, %v3197_v29  ;;  %v3411_v56 = vmul.f32 %v15265_v45, %v3410_v5  ;;  %v3382_v29 = vadd.f32 %v15272_v35, %v3381_v50  ;;  %v3420_v16 = vor.u32 1.1754944e-38, %v3419_v12  ;;  %v20242_v50 = vld [vmem:[#allocation66_spill] sm:$0xff] }
 0x671   : > { %v3684_v18 = vunpack.c.l.b16 %v3451_v53  ;;  %vm3418_vm0 = vcmp.eq.f32.partialorder %v3417_v48, 8.507059e+37  ;;  %v3401_v53 = vsel %vm15343_vm1, %v15276_v23, %v3397_v21  ;;  %vm3388_vm7 = vcmp.eq.f32.partialorder %v3387_v63, 8.507059e+37 }
 0x672   : > { %v3686_v46 = vunpack.c.l.b16 %v3453_v24  ;;  %v3412_v1 = vadd.f32 %v15265_v45, %v3411_v56  ;;  %v3386_v37 = vsel %vm15352_vm2, %v15272_v35, %v3382_v29  ;;  %v3390_v56 = vor.u32 1.1754944e-38, %v3389_v4 }
 0x673   : > { %v3689_v26 = vpack.c.b16 %v3684_v18, %v3683_v62  ;;  %v3406_v23 = vsel %vm3403_vm4, %v3405_v54, %v3401_v53  ;;  %v3707_v18 = vsel %vm2469_vm9, %v3688_v40, 0  ;;  %vm4019_vm2 = vcmask 1047556  }
 0x674   : > { %v15303_v15 = vpop.xlane.xlu2 %2956  ;;  %v3690_v20 = vpack.c.b16 %v3686_v46, %v3685_v13  ;;  %v3416_v28 = vsel %vm15330_vm14, %v15265_v45, %v3412_v1  ;;  %v3391_v62 = vsel %vm3388_vm7, %v3390_v56, %v3386_v37  ;;  %v3407_v42 = vmul.f32 %v20242_v50, %v3406_v23 }
 0x675   : > { %12377 = vrcp.f32 %v15303_v15  ;;  %v3710_v5 = vsel %vm2469_vm9, %v3689_v26, 0  ;;  %v3434_v41 = vand.u32 2147483648, %v15303_v15  ;;  %v3421_v45 = vsel %vm3418_vm0, %v3420_v16, %v3416_v28 }
 0x676   : > { %v3713_v32 = vsel %vm2469_vm9, %v3690_v20, 0  ;;  %v3432_v61 = vand.u32 2147483647, %v15303_v15  ;;  %vm3428_vm5 = vweird.f32 %v15303_v15  ;;  %v3422_v39 = vmul.f32 %v20241_v44, %v3421_v45 }
 0x677   : > { %3719 = vmatpush.bf16.xpose.msra.mxu1 %v3713_v32  ;;  %v3435_v20 = vor.u32 1.1754944e-38, %v3434_v41  ;;  %v3392_v52 = vmul.f32 %v20243_v2, %v3391_v62 }
 0x678   : > { %vm3433_vm8 = vcmp.eq.f32.partialorder %v3432_v61, 8.507059e+37 }
 0x679   : > { %v3466_v63 = vpack.c.bf16 %v3392_v52, %v3392_v52 }
 0x67b   : > { %v12378_v9 = vpop.eup %12377  ;;  %v3829_v48 = vunpack.c.l.b16 %v3466_v63 }
 0x67c   : > { %v3424_v30 = vmul.f32 %v12378_v9, %v15303_v15  ;;  %v2318_v0 = vpop.permute.xlu2 %2317  ;;  %vm3429_vm3 = vweird.f32 %v12378_v9 }
 0x67d   : > { %v2327_v14 = vrot.slane %v2318_v0, 4  ;;  %v3484_v43 = vunpack.c.l.b16 %v2318_v0  ;;  %vm3430_vm6 = vmor %vm3428_vm5, %vm3429_vm3 }
 0x67e   : > { %v3425_v25 = vsub.f32 1.0, %v3424_v30 }
 0x67f   : > { %v3500_v36 = vunpack.c.l.b16 %v2327_v14  ;;  %v3509_v13 = vpack.c.b16 %v3485_v10, %v3484_v43  ;;  %3720 = vmatpush.bf16.xpose.msra.mxu1 %v3710_v5 }
 0x680   : > { %v3426_v59 = vmul.f32 %v12378_v9, %v3425_v25 }
 0x681   : > { %v3517_v60 = vpack.c.b16 %v3501_v49, %v3500_v36  ;;  %12076 = vxpose.binary.xlu1.c.b16.end [4/8] (short) (narrow) %v3509_v13, %v3505_v19, 64  ;;  %v3468_v19 = vpack.c.bf16 %v3422_v39, %v3422_v39 }
 0x682   : > { %v3427_v34 = vadd.f32 %v12378_v9, %v3426_v59 }
 0x683   : > { %12064 = vxpose.binary.xlu0.c.b16.end [4/8] (short) (narrow) %v3517_v60, %v3513_v22, 64  ;;  %v3831_v57 = vunpack.c.l.b16 %v3468_v19  ;;  %v3467_v22 = vpack.c.bf16 %v3407_v42, %v3407_v42 }
 0x684   : > { %v3431_v47 = vsel %vm3430_vm6, %v12378_v9, %v3427_v34  ;;  %v3853_v9 = vsel %vm2469_vm9, %v3834_v6, 0 }
 0x685   : > { %v3436_v32 = vsel %vm3433_vm8, %v3435_v20, %v3431_v47  ;;  %v3830_v17 = vunpack.c.l.b16 %v3467_v22 }
 0x686   : > { %v3437_v35 = vmul.f32 %v15006_v38, %v3436_v32 }
 0x687   : > { %3721 = vmatpush.bf16.xpose.msra.mxu1 %v3707_v18  ;;  %v3835_v26 = vpack.c.b16 %v3830_v17, %v3829_v48  ;;  %v2888_v29 = vpop.xlane.xlu1 %2887 }
 0x688   : > { %v3469_v15 = vpack.c.bf16 %v3437_v35, %v3437_v35  ;;  %12379 = vrcp.f32 %v2888_v29  ;;  %v3089_v7 = vand.u32 2147483648, %v2888_v29  ;;  %vm3083_vm11 = vweird.f32 %v2888_v29 }
 0x689   : > { %v3856_v38 = vsel %vm2469_vm9, %v3835_v26, 0  ;;  %v3087_v58 = vand.u32 2147483647, %v2888_v29 }
 0x68a   : > { %v3832_v1 = vunpack.c.l.b16 %v3469_v15  ;;  %v3090_v14 = vor.u32 1.1754944e-38, %v3089_v7 }
 0x68b   : > { %vm3088_vm13 = vcmp.eq.f32.partialorder %v3087_v58, 8.507059e+37 }
 0x68c   : > { %v3836_v4 = vpack.c.b16 %v3832_v1, %v3831_v57 }
 0x68e   : > { %v3859_v12 = vsel %vm2469_vm9, %v3836_v4, 0  ;;  %v12380_v31 = vpop.eup %12379 }
 0x68f   : > { %3865 = vmatpush.bf16.xpose.msra.mxu3 %v3859_v12  ;;  %v3079_v3 = vmul.f32 %v12380_v31, %v2888_v29  ;;  %vm3084_vm10 = vweird.f32 %v12380_v31 }
 0x690   : > { %vm3085_vm12 = vmor %vm3083_vm11, %vm3084_vm10 }
 0x691   : > { %v3080_v21 = vsub.f32 1.0, %v3079_v3 }
 0x693   : > { %v3081_v30 = vmul.f32 %v12380_v31, %v3080_v21 }
 0x695   : > { %v3082_v28 = vadd.f32 %v12380_v31, %v3081_v30 }
 0x697   : > { %3866 = vmatpush.bf16.xpose.msra.mxu3 %v3856_v38  ;;  %v3086_v16 = vsel %vm3085_vm12, %v12380_v31, %v3082_v28 }
 0x698   : > { %v3091_v51 = vsel %vm3088_vm13, %v3090_v14, %v3086_v16 }
 0x699   : > { %v3092_v5 = vmul.f32 %v15027_v11, %v3091_v51 }
 0x69b   : > { %v3446_v45 = vpack.c.bf16 %v3092_v5, %v3092_v5 }
 0x69d   : > { %v3679_v59 = vunpack.c.l.b16 %v3446_v45 }
 0x69f   : > { %3867 = vmatpush.bf16.xpose.msra.mxu3 %v3853_v9 }
 0x6a7   : > { %3868 = vmatpush.bf16.xpose.msra.mxu3 %v3850_v55 }
 0x6b5   : > { %v2891_v0 = vpop.xlane.xlu2 %2890 }
 0x6b6   : > { %12381 = vrcp.f32 %v2891_v0  ;;  %v3104_v33 = vand.u32 2147483648, %v2891_v0  ;;  %v3102_v49 = vand.u32 2147483647, %v2891_v0  ;;  %vm3098_vm15 = vweird.f32 %v2891_v0 }
 0x6b8   : > { %v3105_v24 = vor.u32 1.1754944e-38, %v3104_v33  ;;  %vm3103_vm1 = vcmp.eq.f32.partialorder %v3102_v49, 8.507059e+37 }
 0x6bc   : > { %v12382_v6 = vpop.eup %12381 }
 0x6bd   : > { %v3094_v10 = vmul.f32 %v12382_v6, %v2891_v0  ;;  %vm3099_vm14 = vweird.f32 %v12382_v6 }
 0x6be   : > { %vm3100_vm0 = vmor %vm3098_vm15, %vm3099_vm14 }
 0x6bf   : > { %v3095_v27 = vsub.f32 1.0, %v3094_v10 }
 0x6c1   : > { %v3096_v43 = vmul.f32 %v12382_v6, %v3095_v27 }
 0x6c3   : > { %v3097_v25 = vadd.f32 %v12382_v6, %v3096_v43 }
 0x6c5   : > { %v3101_v41 = vsel %vm3100_vm0, %v12382_v6, %v3097_v25 }
 0x6c6   : > { %v3106_v36 = vsel %vm3103_vm1, %v3105_v24, %v3101_v41 }
 0x6c7   : > { %v3107_v13 = vmul.f32 %v15134_v8, %v3106_v36 }
 0x6c9   : > { %v3447_v46 = vpack.c.bf16 %v3107_v13, %v3107_v13 }
 0x6cb   : > { %v3680_v61 = vunpack.c.l.b16 %v3447_v46 }
 0x6cd   : > { %v3687_v53 = vpack.c.b16 %v3680_v61, %v3679_v59 }
 0x6cf   : > { %v3704_v54 = vsel %vm2469_vm9, %v3687_v53, 0 }
 0x6d0   : > { %3722 = vmatpush.bf16.xpose.msra.mxu1 %v3704_v54 }
 0x6fd   : > { %v12077_v60 = vpop.trf.xlu1 }
 0x6fe   : > { %10268 = vmatmul.msk.bf16.vlgmr.msra.gmra.mxu0 %vm2469_vm9, %v12077_v60 }
 0x6ff   : > { %v12065_v40 = vpop.trf.xlu0 }
 0x700   : > { %10276 = vmatmul.msk.bf16.vlgmr.msra.gmra.mxu2 %vm2469_vm9, %v12065_v40 }
 0x705   : > { %v12078_v11 = vpop.trf.xlu1 }
 0x706   : > { %10272 = vmatmul.msk.bf16.vlgmr.msra.gmra.mxu1 %vm2469_vm9, %v12078_v11 }
 0x707   : > { %v12066_v37 = vpop.trf.xlu0 }
 0x708   : > { %10280 = vmatmul.msk.bf16.vlgmr.msra.gmra.mxu3 %vm2469_vm9, %v12066_v37 }
 0x70d   : > { %v12079_v8 = vpop.trf.xlu1 }
 0x70e   : > { %10269 = vmatmul.msk.bf16.gmra.mxu0 %vm2469_vm9, %v12079_v8  ;;  %v13194_v8 = vmov 1983009808  }
 0x70f   : > { %v12067_v34 = vpop.trf.xlu0 }
 0x710   : > { %10277 = vmatmul.msk.bf16.gmra.mxu2 %vm2469_vm9, %v12067_v34  ;;  %v4024_v34 = vunpack.c.l.s4 %v13194_v8 }
 0x715   : > { %v12080_v44 = vpop.trf.xlu1 }
 0x716   : > { %10273 = vmatmul.msk.bf16.gmra.mxu1 %vm2469_vm9, %v12080_v44 }
 0x717   : > { %v12068_v39 = vpop.trf.xlu0 }
 0x718   : > { %10281 = vmatmul.msk.bf16.gmra.mxu3 %vm2469_vm9, %v12068_v39 }
 0x71d   : > { %v12081_v56 = vpop.trf.xlu1 }
 0x71e   : > { %10270 = vmatmul.msk.bf16.gmra.mxu0 %vm2469_vm9, %v12081_v56 }
 0x71f   : > { %v12069_v20 = vpop.trf.xlu0 }
 0x720   : > { %10278 = vmatmul.msk.bf16.gmra.mxu2 %vm2469_vm9, %v12069_v20 }
 0x725   : > { %v12082_v23 = vpop.trf.xlu1 }
 0x726   : > { %10274 = vmatmul.msk.bf16.gmra.mxu1 %vm2469_vm9, %v12082_v23  ;;  %v15400_v23 = vunpack.c.0.s8 %v4024_v34 }
 0x727   : > { %v12070_v47 = vpop.trf.xlu0 }
 0x728   : > { %10282 = vmatmul.msk.bf16.gmra.mxu3 %vm2469_vm9, %v12070_v47 }
 0x72d   : > { %v12083_v32 = vpop.trf.xlu1 }
 0x72e   : > { %10271 = vmatmul.msk.bf16.gmra.mxu0 %vm2469_vm9, %v12083_v32 }
 0x72f   : > { %v12071_v62 = vpop.trf.xlu0 }
 0x730   : > { %10279 = vmatmul.msk.bf16.gmra.mxu2 %vm2469_vm9, %v12071_v62 }
 0x735   : > { %v12084_v18 = vpop.trf.xlu1 }
 0x736   : > { %10275 = vmatmul.msk.bf16.gmra.mxu1 %vm2469_vm9, %v12084_v18 }
 0x737   : > { %v12072_v35 = vpop.trf.xlu0 }
 0x738   : > { %10283 = vmatmul.msk.bf16.gmra.mxu3 %vm2469_vm9, %v12072_v35 }
 0x77b   : > { %v3651_v19 = vpop.f32.mrf.mxu0 }
 0x783   : > { %v3724_v50 = vpop.f32.mrf.mxu1  ;;  %v3797_v42 = vpop.f32.mrf.mxu2 }
 0x784   : > { %v12085_v15 = vpack.i.bf16 %v3651_v19, %v3797_v42  ;;  %v3653_v2 = vpop.f32.mrf.mxu0 }
 0x786   : > { %12086 = vxpose.xlu2.b32.start [1/8] (short) (narrow) %v12085_v15, 64 }
 0x78b   : > { %v3870_v52 = vpop.f32.mrf.mxu3  ;;  %v3726_v57 = vpop.f32.mrf.mxu1 }
 0x78c   : > { %v12141_v1 = vpack.i.bf16 %v3724_v50, %v3870_v52  ;;  %v3799_v22 = vpop.f32.mrf.mxu2  ;;  %v3656_v4 = vpop.f32.mrf.mxu0 }
 0x78d   : > { %v12087_v63 = vpack.i.bf16 %v3653_v2, %v3799_v22  ;;  %v13195_v2 = vmov 1934713408  }
 0x78e   : > { %12142 = vxpose.xlu0.b32.start [1/8] (short) (narrow) %v12141_v1, 64  ;;  %v4048_v52 = vunpack.c.l.s4 %v13195_v2 }
 0x78f   : > { %12088 = vxpose.xlu2.b32.cont [2/8] (short) (narrow) %v12087_v63, 64 }
 0x793   : > { %v3872_v12 = vpop.f32.mrf.mxu3  ;;  %v3729_v17 = vpop.f32.mrf.mxu1 }
 0x794   : > { %v12143_v48 = vpack.i.bf16 %v3726_v57, %v3872_v12  ;;  %v3802_v26 = vpop.f32.mrf.mxu2  ;;  %v3658_v38 = vpop.f32.mrf.mxu0 }
 0x795   : > { %v12089_v9 = vpack.i.bf16 %v3656_v4, %v3802_v26 }
 0x796   : > { %12144 = vxpose.xlu0.b32.cont [2/8] (short) (narrow) %v12143_v48, 64 }
 0x797   : > { %12090 = vxpose.xlu2.b32.cont [3/8] (short) (narrow) %v12089_v9, 64 }
 0x79b   : > { %v3875_v29 = vpop.f32.mrf.mxu3  ;;  %v3731_v55 = vpop.f32.mrf.mxu1 }
 0x79c   : > { %v12145_v31 = vpack.i.bf16 %v3729_v17, %v3875_v29  ;;  %v3804_v3 = vpop.f32.mrf.mxu2  ;;  %v3661_v30 = vpop.f32.mrf.mxu0 }
 0x79d   : > { %v12091_v21 = vpack.i.bf16 %v3658_v38, %v3804_v3  ;;  %v15408_v38 = vunpack.c.0.s8 %v4048_v52 }
 0x79e   : > { %12146 = vxpose.xlu0.b32.cont [3/8] (short) (narrow) %v12145_v31, 64 }
 0x79f   : > { %12092 = vxpose.xlu2.b32.cont [4/8] (short) (narrow) %v12091_v21, 64 }
 0x7a3   : > { %v3877_v0 = vpop.f32.mrf.mxu3  ;;  %v3734_v58 = vpop.f32.mrf.mxu1 }
 0x7a4   : > { %v12147_v28 = vpack.i.bf16 %v3731_v55, %v3877_v0  ;;  %v3807_v7 = vpop.f32.mrf.mxu2  ;;  %v3663_v10 = vpop.f32.mrf.mxu0 }
 0x7a5   : > { %v12093_v6 = vpack.i.bf16 %v3661_v30, %v3807_v7 }
 0x7a6   : > { %12148 = vxpose.xlu0.b32.cont [4/8] (short) (narrow) %v12147_v28, 64 }
 0x7a7   : > { %12094 = vxpose.xlu2.b32.cont [5/8] (short) (narrow) %v12093_v6, 64 }
 0x7ab   : > { %v3880_v16 = vpop.f32.mrf.mxu3  ;;  %v3736_v51 = vpop.f32.mrf.mxu1 }
 0x7ac   : > { %v12149_v14 = vpack.i.bf16 %v3734_v58, %v3880_v16  ;;  %v3809_v27 = vpop.f32.mrf.mxu2  ;;  %v3666_v43 = vpop.f32.mrf.mxu0 }
 0x7ad   : > { %v12095_v33 = vpack.i.bf16 %v3663_v10, %v3809_v27 }
 0x7ae   : > { %12150 = vxpose.xlu0.b32.cont [5/8] (short) (narrow) %v12149_v14, 64 }
 0x7af   : > { %12096 = vxpose.xlu2.b32.cont [6/8] (short) (narrow) %v12095_v33, 64 }
 0x7b3   : > { %v3882_v49 = vpop.f32.mrf.mxu3  ;;  %v3739_v41 = vpop.f32.mrf.mxu1 }
 0x7b4   : > { %v12151_v25 = vpack.i.bf16 %v3736_v51, %v3882_v49  ;;  %v3812_v5 = vpop.f32.mrf.mxu2  ;;  %v3668_v45 = vpop.f32.mrf.mxu0 }
 0x7b5   : > { %v12097_v24 = vpack.i.bf16 %v3666_v43, %v3812_v5 }
 0x7b6   : > { %12152 = vxpose.xlu0.b32.cont [6/8] (short) (narrow) %v12151_v25, 64 }
 0x7b7   : > { %12098 = vxpose.xlu2.b32.cont [7/8] (short) (narrow) %v12097_v24, 64 }
 0x7bb   : > { %v3885_v36 = vpop.f32.mrf.mxu3  ;;  %v3741_v61 = vpop.f32.mrf.mxu1 }
 0x7bc   : > { %v12153_v13 = vpack.i.bf16 %v3739_v41, %v3885_v36  ;;  %v3814_v46 = vpop.f32.mrf.mxu2 }
 0x7bd   : > { %v12099_v59 = vpack.i.bf16 %v3668_v45, %v3814_v46 }
 0x7be   : > { %12154 = vxpose.xlu0.b32.cont [7/8] (short) (narrow) %v12153_v13, 64 }
 0x7bf   : > { %12100 = vxpose.xlu2.b32.end [8/8] (short) (narrow) %v12099_v59, 64 }
 0x7c3   : > { %v3887_v53 = vpop.f32.mrf.mxu3 }
 0x7c4   : > { %v12155_v54 = vpack.i.bf16 %v3741_v61, %v3887_v53 }
 0x7c6   : > { %12156 = vxpose.xlu0.b32.end [8/8] (short) (narrow) %v12155_v54, 64 }
 0x820   : > { %v12101_v60 = vpop.trf.xlu2 }
 0x821   : > { %v12105_v40 = vunpack.i.h.bf16 %v12101_v60  ;;  %v12102_v11 = vunpack.i.l.bf16 %v12101_v60 }
 0x823   : > { %v4021_v44 = vrot.slane %v12105_v40, 4  ;;  %v4018_v39 = vrot.slane %v12102_v11, 4 }
 0x825   : > { %v4020_v47 = vsel %vm4019_vm2, %v4018_v39, %v12105_v40  ;;  %v4022_v32 = vsel %vm4019_vm2, %v12102_v11, %v4021_v44 }
 0x826   : > { %v4026_v42 = vperm.slane %v4020_v47, %v15400_v23  ;;  %v4030_v15 = vperm.slane %v4022_v32, %v15400_v23 }
 0x828   : > { %v12106_v37 = vpop.trf.xlu2  ;;  %v4045_v55 = vrot.slane %v4026_v42, 4  ;;  %v4057_v31 = vrot.slane %v4030_v15, 4 }
 0x829   : > { %v12110_v56 = vunpack.i.h.bf16 %v12106_v37  ;;  %v12107_v20 = vunpack.i.l.bf16 %v12106_v37 }
 0x82b   : > { %v4077_v62 = vrot.slane %v12110_v56, 4  ;;  %v4075_v18 = vrot.slane %v12107_v20, 4 }
 0x82d   : > { %v4076_v48 = vsel %vm4019_vm2, %v4075_v18, %v12110_v56  ;;  %v4078_v26 = vsel %vm4019_vm2, %v12107_v20, %v4077_v62 }
 0x82e   : > { %v4082_v28 = vperm.slane %v4076_v48, %v15400_v23  ;;  %v4086_v7 = vperm.slane %v4078_v26, %v15400_v23 }
 0x830   : > { %v12111_v35 = vpop.trf.xlu2  ;;  %v4101_v41 = vrot.slane %v4082_v28, 4  ;;  %v4113_v59 = vrot.slane %v4086_v7, 4 }
 0x831   : > { %v12115_v19 = vunpack.i.h.bf16 %v12111_v35  ;;  %v12112_v50 = vunpack.i.l.bf16 %v12111_v35 }
 0x832   : > { %v12157_v57 = vpop.trf.xlu0 }
 0x833   : > { %v12161_v1 = vunpack.i.h.bf16 %v12157_v57  ;;  %v12158_v22 = vunpack.i.l.bf16 %v12157_v57  ;;  %v4133_v4 = vrot.slane %v12115_v19, 4  ;;  %v4131_v63 = vrot.slane %v12112_v50, 4 }
 0x835   : > { %v4033_v12 = vrot.slane %v12161_v1, 4  ;;  %v4031_v17 = vrot.slane %v12158_v22, 4  ;;  %v4132_v9 = vsel %vm4019_vm2, %v4131_v63, %v12115_v19  ;;  %v4134_v29 = vsel %vm4019_vm2, %v12112_v50, %v4133_v4 }
 0x836   : > { %v15419_v6 = vperm.slane %v4132_v9, %v15400_v23  ;;  %v15422_v10 = vperm.slane %v4134_v29, %v15400_v23 }
 0x837   : > { %v4032_v3 = vsel %vm4019_vm2, %v4031_v17, %v12161_v1  ;;  %v4034_v21 = vsel %vm4019_vm2, %v12158_v22, %v4033_v12 }
 0x838   : > { %v4038_v30 = vperm.slane %v4032_v3, %v15400_v23  ;;  %v4042_v0 = vperm.slane %v4034_v21, %v15400_v23  ;;  %v12116_v58 = vpop.trf.xlu2  ;;  %v4157_v40 = vrot.slane %v15419_v6, 4  ;;  %v4169_v11 = vrot.slane %v15422_v10, 4 }
 0x839   : > { %v12120_v16 = vunpack.i.h.bf16 %v12116_v58  ;;  %v12117_v37 = vunpack.i.l.bf16 %v12116_v58 }
 0x83a   : > { %v4043_v14 = vrot.slane %v4038_v30, 4  ;;  %v4046_v27 = vsel %vm4019_vm2, %v4038_v30, %v4045_v55  ;;  %v4055_v33 = vrot.slane %v4042_v0, 4  ;;  %v4058_v51 = vsel %vm4019_vm2, %v4042_v0, %v4057_v31  ;;  %v12162_v43 = vpop.trf.xlu0 }
 0x83b   : > { %v4054_v49 = vperm.slane %v4046_v27, %v15408_v38  ;;  %v4066_v25 = vperm.slane %v4058_v51, %v15408_v38  ;;  %v12166_v5 = vunpack.i.h.bf16 %v12162_v43  ;;  %v12163_v36 = vunpack.i.l.bf16 %v12162_v43 }
 0x83c   : > { %v4044_v24 = vsel %vm4019_vm2, %v4043_v14, %v4026_v42  ;;  %v4056_v13 = vsel %vm4019_vm2, %v4055_v33, %v4030_v15  ;;  %v4189_v54 = vrot.slane %v12120_v16, 4  ;;  %v4187_v35 = vrot.slane %v12117_v37, 4 }
 0x83d   : > { %v15430_v45 = vrot.slane %v4054_v49, 4  ;;  %v15432_v46 = vrot.slane %v4066_v25, 4  ;;  %v4089_v61 = vrot.slane %v12166_v5, 4  ;;  %v4087_v53 = vrot.slane %v12163_v36, 4 }
 0x83e   : > { %v15435_v60 = vperm.slane %v4044_v24, %v15408_v38  ;;  %v15440_v8 = vperm.slane %v4056_v13, %v15408_v38  ;;  %v4190_v32 = vsel %vm4019_vm2, %v12117_v37, %v4189_v54  ;;  %v4188_v31 = vsel %vm4019_vm2, %v4187_v35, %v12120_v16 }
 0x83f   : > { %v15444_v34 = vsel %vm4019_vm2, 0.0, %v15430_v45  ;;  %v4088_v44 = vsel %vm4019_vm2, %v4087_v53, %v12166_v5  ;;  %v4090_v39 = vsel %vm4019_vm2, %v12163_v36, %v4089_v61  ;;  %v15450_v56 = vsel %vm4019_vm2, 0.0, %v15432_v46 }
 0x840   : > { %v4094_v20 = vperm.slane %v4088_v44, %v15400_v23  ;;  %v4098_v47 = vperm.slane %v4090_v39, %v15400_v23  ;;  %v15455_v62 = vpop.trf.xlu2  ;;  %v15458_v19 = vperm.slane %v4190_v32, %v15400_v23  ;;  %v4067_v12 = vrot.slane %v15435_v60, 4 }
 0x841   : > { %v4472_v9 = vrot.slane %v15444_v34, 4  ;;  %v4483_v3 = vrot.slane %v15450_v56, 4  ;;  %v12125_v0 = vunpack.i.h.bf16 %v15455_v62  ;;  %v4194_v51 = vperm.slane %v4188_v31, %v15400_v23 }
 0x842   : > { %v12167_v18 = vpop.trf.xlu0  ;;  %v4099_v50 = vrot.slane %v4094_v20, 4  ;;  %v4102_v42 = vsel %vm4019_vm2, %v4094_v20, %v4101_v41  ;;  %v4111_v15 = vrot.slane %v4098_v47, 4  ;;  %v4114_v2 = vsel %vm4019_vm2, %v4098_v47, %v4113_v59 }
 0x843   : > { %v4110_v52 = vperm.slane %v4102_v42, %v15408_v38  ;;  %v4122_v57 = vperm.slane %v4114_v2, %v15408_v38  ;;  %v12171_v1 = vunpack.i.h.bf16 %v12167_v18  ;;  %v12168_v63 = vunpack.i.l.bf16 %v12167_v18 }
 0x844   : > { %v4100_v22 = vsel %vm4019_vm2, %v4099_v50, %v4082_v28  ;;  %v4112_v4 = vsel %vm4019_vm2, %v4111_v15, %v4086_v7  ;;  %v4225_v30 = vrot.slane %v15458_v19, 4  ;;  %v4245_v44 = vrot.slane %v12125_v0, 4 }
 0x845   : > { %v15468_v17 = vperm.slane %v4100_v22, %v15408_v38  ;;  %v15470_v48 = vrot.slane %v4110_v52, 4  ;;  %v15472_v26 = vrot.slane %v4122_v57, 4  ;;  %v4145_v29 = vrot.slane %v12171_v1, 4 }
 0x846   : > { %v4143_v55 = vrot.slane %v12168_v63, 4  ;;  %v15478_v21 = vperm.slane %v4112_v4, %v15408_v38  ;;  %v12122_v39 = vunpack.i.l.bf16 %v15455_v62  ;;  %v4213_v62 = vrot.slane %v4194_v51, 4 }
 0x847   : > { %v4123_v28 = vrot.slane %v15468_v17, 4  ;;  %v15485_v7 = vsel %vm4019_vm2, 0.0, %v15470_v48  ;;  %v4146_v14 = vsel %vm4019_vm2, %v12168_v63, %v4145_v29  ;;  %v15491_v16 = vsel %vm4019_vm2, 0.0, %v15472_v26 }
 0x848   : > { %v4144_v58 = vsel %vm4019_vm2, %v4143_v55, %v12171_v1  ;;  %v4154_v33 = vperm.slane %v4146_v14, %v15400_v23  ;;  %v4526_v32 = vrot.slane %v15485_v7, 4  ;;  %v4243_v35 = vrot.slane %v12122_v39, 4  ;;  %v12126_v7 = vpop.trf.xlu2 }
 0x849   : > { %v4150_v27 = vperm.slane %v4144_v58, %v15400_v23  ;;  %v4068_v42 = vsel %vm4019_vm2, 0.0, %v4067_v12  ;;  %v4246_v57 = vsel %vm4019_vm2, %v12122_v39, %v4245_v44  ;;  %v4127_v34 = vrot.slane %v15478_v21, 4 }
 0x84a   : > { %v12172_v43 = vpop.trf.xlu0  ;;  %v4167_v41 = vrot.slane %v4154_v33, 4  ;;  %v4170_v36 = vsel %vm4019_vm2, %v4154_v33, %v4169_v11  ;;  %v4244_v29 = vsel %vm4019_vm2, %v4243_v35, %v12125_v0 }
 0x84b   : > { %v12176_v49 = vunpack.i.h.bf16 %v12172_v43  ;;  %v12173_v25 = vunpack.i.l.bf16 %v12172_v43  ;;  %v4155_v5 = vrot.slane %v4150_v27, 4  ;;  %v4158_v24 = vsel %vm4019_vm2, %v4150_v27, %v4157_v40 }
 0x84c   : > { %v4166_v13 = vperm.slane %v4158_v24, %v15408_v38  ;;  %v4178_v59 = vperm.slane %v4170_v36, %v15408_v38  ;;  %v4168_v37 = vsel %vm4019_vm2, %v4167_v41, %v15422_v10  ;;  %v4537_v10 = vrot.slane %v15491_v16, 4 }
 0x84d   : > { %v4201_v61 = vrot.slane %v12176_v49, 4  ;;  %v4199_v53 = vrot.slane %v12173_v25, 4  ;;  %v4156_v54 = vsel %vm4019_vm2, %v4155_v5, %v15419_v6  ;;  %v15507_v20 = vperm.slane %v4168_v37, %v15408_v38 }
 0x84e   : > { %v4162_v40 = vperm.slane %v4156_v54, %v15408_v38  ;;  %v4181_v11 = vrot.slane %v4166_v13, 4  ;;  %v15509_v47 = vrot.slane %v4178_v59, 4  ;;  %v4254_v43 = vperm.slane %v4246_v57, %v15400_v23 }
 0x84f   : > { %v4200_v18 = vsel %vm4019_vm2, %v4199_v53, %v12176_v49  ;;  %v4202_v6 = vsel %vm4019_vm2, %v12173_v25, %v4201_v61  ;;  %v4183_v2 = vrot.slane %v15507_v20, 4  ;;  %v4250_v5 = vperm.slane %v4244_v29, %v15400_v23 }
 0x850   : > { %v15516_v50 = vsel %vm4019_vm2, 0.0, %v4181_v11  ;;  %v4179_v15 = vrot.slane %v4162_v40, 4  ;;  %v4206_v52 = vperm.slane %v4200_v18, %v15400_v23  ;;  %v15524_v22 = vsel %vm4019_vm2, 0.0, %v15509_v47 }
 0x851   : > { %v15527_v4 = vsel %vm4019_vm2, %v4181_v11, %v4162_v40  ;;  %v4210_v63 = vperm.slane %v4202_v6, %v15400_v23  ;;  %v4580_v12 = vrot.slane %v15516_v50, 4  ;;  %v4071_v54 = vrot.slane %v15440_v8, 4 }
 0x852   : > { %v12177_v1 = vpop.trf.xlu0  ;;  %v4211_v55 = vrot.slane %v4206_v52, 4  ;;  %v4214_v31 = vsel %vm4019_vm2, %v4206_v52, %v4213_v62  ;;  %v15548_v61 = vsel %vm4019_vm2, 0.0, %v4179_v15  ;;  %v4269_v44 = vrot.slane %v4250_v5, 4 }
 0x853   : > { %v12181_v58 = vunpack.i.h.bf16 %v12177_v1  ;;  %v4222_v14 = vperm.slane %v4214_v31, %v15408_v38  ;;  %v4223_v27 = vrot.slane %v4210_v63, 4  ;;  %v4226_v33 = vsel %vm4019_vm2, %v4210_v63, %v4225_v30 }
 0x854   : > { %v4212_v49 = vsel %vm4019_vm2, %v4211_v55, %v4194_v51  ;;  %v4234_v25 = vperm.slane %v4226_v33, %v15408_v38  ;;  %v12178_v30 = vunpack.i.l.bf16 %v12177_v1  ;;  %v4591_v51 = vrot.slane %v15524_v22, 4 }
 0x855   : > { %v4257_v0 = vrot.slane %v12181_v58, 4  ;;  %v4218_v24 = vperm.slane %v4212_v49, %v15408_v38  ;;  %v4224_v41 = vsel %vm4019_vm2, %v4223_v27, %v15458_v19  ;;  %v4237_v36 = vrot.slane %v4222_v14, 4 }
 0x856   : > { %v15543_v13 = vperm.slane %v4224_v41, %v15408_v38  ;;  %v15545_v59 = vrot.slane %v4234_v25, 4  ;;  %v4281_v19 = vrot.slane %v4254_v43, 4  ;;  %v4255_v39 = vrot.slane %v12178_v30, 4 }
 0x857   : > { %v15552_v53 = vsel %vm4019_vm2, 0.0, %v4237_v36  ;;  %v4235_v37 = vrot.slane %v4218_v24, 4  ;;  %v15561_v18 = vsel %vm4019_vm2, %v4237_v36, %v4218_v24  ;;  %v4258_v6 = vsel %vm4019_vm2, %v12178_v30, %v4257_v0 }
 0x858   : > { %v4239_v40 = vrot.slane %v15543_v13, 4  ;;  %v15558_v11 = vsel %vm4019_vm2, 0.0, %v15545_v59  ;;  %v4634_v35 = vrot.slane %v15552_v53, 4  ;;  %v4256_v62 = vsel %vm4019_vm2, %v4255_v39, %v12181_v58 }
 0x859   : > { %v4266_v15 = vperm.slane %v4258_v6, %v15400_v23  ;;  %v4072_v52 = vsel %vm4019_vm2, 0.0, %v4071_v54  ;;  %v4262_v57 = vperm.slane %v4256_v62, %v15400_v23  ;;  %v4467_v1 = vsel %vm4019_vm2, %v15430_v45, %v15435_v60 }
 0x85a   : > { %v4473_v63 = vsel %vm4019_vm2, %v4472_v9, %v4068_v42  ;;  %v4478_v29 = vsel %vm4019_vm2, %v15432_v46, %v15440_v8  ;;  %v4124_v58 = vsel %vm4019_vm2, 0.0, %v4123_v28  ;;  %v4471_v14 = vperm.slane %v4467_v1, %v15400_v23 }
 0x85b   : > { %v4279_v55 = vrot.slane %v4266_v15, 4  ;;  %v4282_v31 = vsel %vm4019_vm2, %v4266_v15, %v4281_v19  ;;  %v4267_v27 = vrot.slane %v4262_v57, 4  ;;  %v4270_v45 = vsel %vm4019_vm2, %v4262_v57, %v4269_v44 }
 0x85c   : > { %v4290_v60 = vperm.slane %v4282_v31, %v15408_v38  ;;  %v4278_v9 = vperm.slane %v4270_v45, %v15408_v38  ;;  %v4477_v46 = vperm.slane %v4473_v63, %v15400_v23  ;;  %v4482_v8 = vperm.slane %v4478_v29, %v15400_v23  ;;  %v12182_v29 = vpop.trf.xlu0 }
 0x85d   : > { %v4484_v42 = vsel %vm4019_vm2, %v4483_v3, %v4072_v52  ;;  %v4268_v28 = vsel %vm4019_vm2, %v4267_v27, %v4250_v5  ;;  %v4280_v33 = vsel %vm4019_vm2, %v4279_v55, %v4254_v43  ;;  %v15598_v0 = vsel %vm4019_vm2, 0.0, %v4235_v37 }
 0x85e   : > { %v15594_v49 = vrot.slane %v4290_v60, 4  ;;  %v4488_v25 = vperm.slane %v4484_v42, %v15400_v23  ;;  %v15601_v24 = vperm.slane %v4268_v28, %v15408_v38  ;;  %v4491_v41 = vrot.slane %v4471_v14, 4 }
 0x85f   : > { %v4503_v36 = vrot.slane %v4482_v8, 4  ;;  %v15603_v30 = vrot.slane %v4278_v9, 4  ;;  %v4128_v56 = vsel %vm4019_vm2, 0.0, %v4127_v34  ;;  %v4521_v3 = vsel %vm4019_vm2, %v15470_v48, %v15468_v17 }
 0x860   : > { %v4527_v43 = vsel %vm4019_vm2, %v4526_v32, %v4124_v58  ;;  %v4645_v5 = vrot.slane %v15558_v11, 4  ;;  %v15614_v54 = vperm.slane %v4280_v33, %v15408_v38  ;;  %v4492_v37 = vsel %vm4019_vm2, %v4477_v46, %v4491_v41 }
 0x861   : > { %v4501_v44 = vrot.slane %v4488_v25, 4  ;;  %v15619_v19 = vsel %vm4019_vm2, 0.0, %v15594_v49  ;;  %v15622_v39 = vperm.slane %v4492_v37, %v15408_v38  ;;  %v4504_v17 = vsel %vm4019_vm2, %v4488_v25, %v4503_v36 }
 0x862   : > { %v4525_v48 = vperm.slane %v4521_v3, %v15400_v23  ;;  %v4291_v32 = vrot.slane %v15601_v24, 4  ;;  %v4531_v6 = vperm.slane %v4527_v43, %v15400_v23  ;;  %v4532_v62 = vsel %vm4019_vm2, %v15472_v26, %v15478_v21 }
 0x863   : > { %v4538_v15 = vsel %vm4019_vm2, %v4537_v10, %v4128_v56  ;;  %v15636_v52 = vsel %vm4019_vm2, 0.0, %v15603_v30  ;;  %v4536_v57 = vperm.slane %v4532_v62, %v15400_v23  ;;  %v15641_v55 = vperm.slane %v4504_v17, %v15408_v38 }
 0x864   : > { %v4542_v1 = vperm.slane %v4538_v15, %v15400_v23  ;;  %v4545_v63 = vrot.slane %v4525_v48, 4  ;;  %v4543_v31 = vrot.slane %v4531_v6, 4  ;;  %v4489_v58 = vrot.slane %v4477_v46, 4  ;;  %v12131_v15 = vpop.trf.xlu2 }
 0x865   : > { %v4502_v26 = vsel %vm4019_vm2, %v4501_v44, %v4482_v8  ;;  %v4519_v21 = vrot.slane %v15622_v39, 4  ;;  %v4557_v27 = vrot.slane %v4536_v57, 4  ;;  %v12130_v41 = vunpack.i.h.bf16 %v12126_v7 }
 0x866   : > { %v4546_v16 = vsel %vm4019_vm2, %v4531_v6, %v4545_v63  ;;  %v4555_v10 = vrot.slane %v4542_v1, 4  ;;  %v4490_v60 = vsel %vm4019_vm2, %v4489_v58, %v4471_v14  ;;  %v15651_v34 = vperm.slane %v4502_v26, %v15408_v38 }
 0x867   : > { %v15647_v45 = vperm.slane %v4546_v16, %v15408_v38  ;;  %v4544_v9 = vsel %vm4019_vm2, %v4543_v31, %v4525_v48  ;;  %v4558_v46 = vsel %vm4019_vm2, %v4542_v1, %v4557_v27  ;;  %v15656_v8 = vperm.slane %v4490_v60, %v15408_v38 }
 0x868   : > { %v15659_v42 = vperm.slane %v4544_v9, %v15408_v38  ;;  %v4556_v28 = vsel %vm4019_vm2, %v4555_v10, %v4536_v57  ;;  %v15663_v33 = vperm.slane %v4558_v46, %v15408_v38  ;;  %v4520_v3 = vsel %vm4019_vm2, %v15641_v55, %v4519_v21 }
 0x869   : > { %v4573_v14 = vrot.slane %v15647_v45, 4  ;;  %v15667_v25 = vperm.slane %v4556_v28, %v15408_v38  ;;  %v4515_v36 = vrot.slane %v15656_v8, 4  ;;  %v4301_v37 = vrot.slane %v12130_v41, 4 }
 0x86a   : > { %v4569_v56 = vrot.slane %v15659_v42, 4  ;;  %v12127_v44 = vunpack.i.l.bf16 %v12126_v7  ;;  %v12186_v62 = vunpack.i.h.bf16 %v12182_v29  ;;  %v12183_v26 = vunpack.i.l.bf16 %v12182_v29  ;;  %v12187_v7 = vpop.trf.xlu0 }
 0x86b   : > { %v4574_v43 = vsel %vm4019_vm2, %v15663_v33, %v4573_v14  ;;  %v4516_v48 = vsel %vm4019_vm2, %v15651_v34, %v4515_v36  ;;  %v12135_v16 = vunpack.i.h.bf16 %v12131_v15  ;;  %v12132_v14 = vunpack.i.l.bf16 %v12131_v15 }
 0x86c   : > { %v12202_v17 = vpack.i.bf16 %v4574_v43, %v4520_v3  ;;  %v4570_v6 = vsel %vm4019_vm2, %v15667_v25, %v4569_v56  ;;  %v4299_v1 = vrot.slane %v12127_v44, 4  ;;  %v4302_v63 = vsel %vm4019_vm2, %v12127_v44, %v4301_v37 }
 0x86d   : > { %v12197_v57 = vpack.i.bf16 %v4570_v6, %v4516_v48  ;;  %v4310_v31 = vperm.slane %v4302_v63, %v15400_v23  ;;  %v4313_v58 = vrot.slane %v12186_v62, 4  ;;  %v4311_v60 = vrot.slane %v12183_v26, 4 }
 0x86e   : > { %12203 = vrot.lane.b32.xlu2 %v12202_v17, %s13193_s20  ;;  %v4300_v21 = vsel %vm4019_vm2, %v4299_v1, %v12130_v41  ;;  %v4357_v28 = vrot.slane %v12135_v16, 4  ;;  %v12191_v36 = vunpack.i.h.bf16 %v12187_v7  ;;  %v4355_v37 = vrot.slane %v12132_v14, 4 }
 0x86f   : > { %12198 = vrot.lane.b32.xlu1 %v12197_v57, %s13193_s20  ;;  %v4306_v10 = vperm.slane %v4300_v21, %v15400_v23  ;;  %v4337_v27 = vrot.slane %v4310_v31, 4  ;;  %v4314_v9 = vsel %vm4019_vm2, %v12183_v26, %v4313_v58  ;;  %v4312_v29 = vsel %vm4019_vm2, %v4311_v60, %v12186_v62 }
 0x870   : > { %v4322_v46 = vperm.slane %v4314_v9, %v15400_v23  ;;  %v4318_v3 = vperm.slane %v4312_v29, %v15400_v23  ;;  %v4358_v17 = vsel %vm4019_vm2, %v12132_v14, %v4357_v28  ;;  %v4369_v48 = vrot.slane %v12191_v36, 4 }
 0x871   : > { %v4325_v56 = vrot.slane %v4306_v10, 4  ;;  %v12188_v6 = vunpack.i.l.bf16 %v12187_v7  ;;  %v4699_v57 = vrot.slane %v15619_v19, 4  ;;  %v4356_v63 = vsel %vm4019_vm2, %v4355_v37, %v12135_v16 }
 0x872   : > { %v4335_v43 = vrot.slane %v4322_v46, 4  ;;  %v4338_v41 = vsel %vm4019_vm2, %v4322_v46, %v4337_v27  ;;  %v4323_v1 = vrot.slane %v4318_v3, 4  ;;  %v4362_v21 = vperm.slane %v4356_v63, %v15400_v23 }
 0x873   : > { %v4346_v44 = vperm.slane %v4338_v41, %v15408_v38  ;;  %v4326_v15 = vsel %vm4019_vm2, %v4318_v3, %v4325_v56  ;;  %v4366_v60 = vperm.slane %v4358_v17, %v15400_v23  ;;  %v4367_v7 = vrot.slane %v12188_v6, 4 }
 0x874   : > { %v4334_v62 = vperm.slane %v4326_v15, %v15408_v38  ;;  %v4336_v58 = vsel %vm4019_vm2, %v4335_v43, %v4310_v31  ;;  %v4324_v27 = vsel %vm4019_vm2, %v4323_v1, %v4306_v10  ;;  %v4370_v9 = vsel %vm4019_vm2, %v12188_v6, %v4369_v48 }
 0x875   : > { %v15697_v26 = vrot.slane %v4346_v44, 4  ;;  %v4688_v46 = vrot.slane %v15636_v52, 4  ;;  %v15705_v28 = vperm.slane %v4324_v27, %v15408_v38  ;;  %v15714_v14 = vperm.slane %v4336_v58, %v15408_v38 }
 0x876   : > { %v15707_v16 = vrot.slane %v4334_v62, 4  ;;  %v4393_v10 = vrot.slane %v4366_v60, 4  ;;  %v4368_v56 = vsel %vm4019_vm2, %v4367_v7, %v12191_v36  ;;  %v4378_v29 = vperm.slane %v4370_v9, %v15400_v23 }
 0x877   : > { %v15711_v31 = vsel %vm4019_vm2, 0.0, %v15697_v26  ;;  %v4381_v41 = vrot.slane %v4362_v21, 4  ;;  %v4374_v37 = vperm.slane %v4368_v56, %v15400_v23  ;;  %v4347_v44 = vrot.slane %v15705_v28, 4 }
 0x878   : > { %v15720_v3 = vsel %vm4019_vm2, 0.0, %v15707_v16  ;;  %v4753_v43 = vrot.slane %v15711_v31, 4  ;;  %v4391_v17 = vrot.slane %v4378_v29, 4  ;;  %v4394_v48 = vsel %vm4019_vm2, %v4378_v29, %v4393_v10 }
 0x879   : > { %v4184_v36 = vsel %vm4019_vm2, 0.0, %v4183_v2  ;;  %v4379_v6 = vrot.slane %v4374_v37, 4  ;;  %v4382_v1 = vsel %vm4019_vm2, %v4374_v37, %v4381_v41  ;;  %v4402_v15 = vperm.slane %v4394_v48, %v15408_v38 }
 0x87a   : > { %v4579_v63 = vperm.slane %v15527_v4, %v15400_v23  ;;  %v4742_v62 = vrot.slane %v15720_v3, 4  ;;  %v4390_v58 = vperm.slane %v4382_v1, %v15408_v38  ;;  %v4581_v27 = vsel %vm4019_vm2, %v4580_v12, %v15548_v61 }
 0x87b   : > { %v4586_v2 = vsel %vm4019_vm2, %v15509_v47, %v15507_v20  ;;  %v4380_v7 = vsel %vm4019_vm2, %v4379_v6, %v4362_v21  ;;  %v4392_v9 = vsel %vm4019_vm2, %v4391_v17, %v4366_v60  ;;  %v15744_v10 = vrot.slane %v4402_v15, 4  ;;  %v12136_v15 = vpop.trf.xlu2 }
 0x87c   : > { %v4585_v4 = vperm.slane %v4581_v27, %v15400_v23  ;;  %v15748_v56 = vperm.slane %v4380_v7, %v15408_v38  ;;  %v15750_v29 = vrot.slane %v4390_v58, 4  ;;  %v4590_v50 = vperm.slane %v4586_v2, %v15400_v23 }
 0x87d   : > { %v4592_v12 = vsel %vm4019_vm2, %v4591_v51, %v4184_v36  ;;  %v4240_v20 = vsel %vm4019_vm2, 0.0, %v4239_v40  ;;  %v4599_v61 = vrot.slane %v4579_v63, 4  ;;  %v4633_v21 = vperm.slane %v15561_v18, %v15400_v23 }
 0x87e   : > { %v4596_v47 = vperm.slane %v4592_v12, %v15400_v23  ;;  %v15763_v60 = vperm.slane %v4392_v9, %v15408_v38  ;;  %v4403_v41 = vrot.slane %v15748_v56, 4  ;;  %v15768_v22 = vsel %vm4019_vm2, 0.0, %v15744_v10 }
 0x87f   : > { %v4611_v51 = vrot.slane %v4590_v50, 4  ;;  %v15772_v37 = vsel %vm4019_vm2, 0.0, %v15750_v29  ;;  %v4600_v40 = vsel %vm4019_vm2, %v4585_v4, %v4599_v61  ;;  %v4635_v18 = vsel %vm4019_vm2, %v4634_v35, %v15598_v0 }
 0x880   : > { %v4640_v17 = vsel %vm4019_vm2, %v15545_v59, %v15543_v13  ;;  %v15783_v48 = vperm.slane %v4600_v40, %v15408_v38  ;;  %v4639_v6 = vperm.slane %v4635_v18, %v15400_v23  ;;  %v4646_v53 = vsel %vm4019_vm2, %v4645_v5, %v4240_v20 }
 0x881   : > { %v4612_v36 = vsel %vm4019_vm2, %v4596_v47, %v4611_v51  ;;  %v4644_v1 = vperm.slane %v4640_v17, %v15400_v23  ;;  %v4653_v35 = vrot.slane %v4633_v21, 4  ;;  %v4597_v0 = vrot.slane %v4585_v4, 4 }
 0x882   : > { %v15789_v58 = vperm.slane %v4612_v36, %v15408_v38  ;;  %v4627_v13 = vrot.slane %v15783_v48, 4  ;;  %v4650_v59 = vperm.slane %v4646_v53, %v15400_v23  ;;  %v4609_v2 = vrot.slane %v4596_v47, 4  ;;  %v12192_v53 = vpop.trf.xlu0 }
 0x883   : > { %v4665_v27 = vrot.slane %v4644_v1, 4  ;;  %v4654_v7 = vsel %vm4019_vm2, %v4639_v6, %v4653_v35  ;;  %v4598_v9 = vsel %vm4019_vm2, %v4597_v0, %v4579_v63  ;;  %v4651_v12 = vrot.slane %v4639_v6, 4 }
 0x884   : > { %v12140_v61 = vunpack.i.h.bf16 %v12136_v15  ;;  %v4807_v51 = vrot.slane %v15768_v22, 4  ;;  %v15800_v11 = vperm.slane %v4654_v7, %v15408_v38  ;;  %v15804_v4 = vperm.slane %v4598_v9, %v15408_v38 }
 0x885   : > { %v4666_v5 = vsel %vm4019_vm2, %v4650_v59, %v4665_v27  ;;  %v4628_v20 = vsel %vm4019_vm2, %v15789_v58, %v4627_v13  ;;  %v4610_v47 = vsel %vm4019_vm2, %v4609_v2, %v4590_v50  ;;  %v4652_v40 = vsel %vm4019_vm2, %v4651_v12, %v4633_v21 }
 0x886   : > { %v4663_v63 = vrot.slane %v4650_v59, 4  ;;  %v15811_v18 = vperm.slane %v4666_v5, %v15408_v38  ;;  %v4681_v17 = vrot.slane %v15800_v11, 4  ;;  %v4623_v36 = vrot.slane %v15804_v4, 4 }
 0x887   : > { %v15816_v6 = vperm.slane %v4652_v40, %v15408_v38  ;;  %v4413_v0 = vrot.slane %v12140_v61, 4  ;;  %v15822_v21 = vperm.slane %v4610_v47, %v15408_v38  ;;  %v12137_v2 = vunpack.i.l.bf16 %v12136_v15 }
 0x888   : > { %v4664_v35 = vsel %vm4019_vm2, %v4663_v63, %v4644_v1  ;;  %v4682_v50 = vsel %vm4019_vm2, %v15811_v18, %v4681_v17  ;;  %v12196_v7 = vunpack.i.h.bf16 %v12192_v53  ;;  %v12193_v12 = vunpack.i.l.bf16 %v12192_v53 }
 0x889   : > { %v15825_v13 = vperm.slane %v4664_v35, %v15408_v38  ;;  %v4677_v59 = vrot.slane %v15816_v6, 4  ;;  %v12212_v27 = vpack.i.bf16 %v4682_v50, %v4628_v20  ;;  %v4624_v9 = vsel %vm4019_vm2, %v15822_v21, %v4623_v36 }
 0x88a   : > { %v4411_v47 = vrot.slane %v12137_v2, 4  ;;  %v4414_v40 = vsel %vm4019_vm2, %v12137_v2, %v4413_v0  ;;  %v4425_v63 = vrot.slane %v12196_v7, 4  ;;  %v4796_v17 = vrot.slane %v15772_v37, 4 }
 0x88b   : > { %v4678_v1 = vsel %vm4019_vm2, %v15825_v13, %v4677_v59  ;;  %12213 = vrot.lane.b32.xlu1 %v12212_v27, %s13193_s20  ;;  %v4422_v20 = vperm.slane %v4414_v40, %v15400_v23  ;;  %v4423_v15 = vrot.slane %v12193_v12, 4  ;;  %v4295_v35 = vrot.slane %v15614_v54, 4 }
 0x88c   : > { %v12207_v5 = vpack.i.bf16 %v4678_v1, %v4624_v9  ;;  %v4412_v36 = vsel %vm4019_vm2, %v4411_v47, %v12140_v61  ;;  %v4426_v53 = vsel %vm4019_vm2, %v12193_v12, %v4425_v63  ;;  %v4292_v50 = vsel %vm4019_vm2, 0.0, %v4291_v32 }
 0x88d   : > { %v4683_v0 = vsel %vm4019_vm2, %v15603_v30, %v15601_v24  ;;  %v4418_v59 = vperm.slane %v4412_v36, %v15400_v23  ;;  %v4449_v27 = vrot.slane %v4422_v20, 4  ;;  %v4424_v2 = vsel %vm4019_vm2, %v4423_v15, %v12196_v7 }
 0x88e   : > { %12208 = vrot.lane.b32.xlu0 %v12207_v5, %s13193_s20  ;;  %v4434_v9 = vperm.slane %v4426_v53, %v15400_v23  ;;  %v4430_v1 = vperm.slane %v4424_v2, %v15400_v23  ;;  %v4296_v61 = vsel %vm4019_vm2, 0.0, %v4295_v35  ;;  %v4348_v12 = vsel %vm4019_vm2, 0.0, %v4347_v44 }
 0x88f   : > { %v4687_v32 = vperm.slane %v4683_v0, %v15400_v23  ;;  %v4437_v5 = vrot.slane %v4418_v59, 4  ;;  %v4689_v30 = vsel %vm4019_vm2, %v4688_v46, %v4292_v50  ;;  %v4351_v63 = vrot.slane %v15714_v14, 4 }
 0x890   : > { %v4447_v47 = vrot.slane %v4434_v9, 4  ;;  %v4450_v24 = vsel %vm4019_vm2, %v4434_v9, %v4449_v27  ;;  %v4435_v7 = vrot.slane %v4430_v1, 4  ;;  %v4694_v15 = vsel %vm4019_vm2, %v15594_v49, %v15614_v54 }
 0x891   : > { %v4458_v40 = vperm.slane %v4450_v24, %v15408_v38  ;;  %v4438_v44 = vsel %vm4019_vm2, %v4430_v1, %v4437_v5  ;;  %v4693_v35 = vperm.slane %v4689_v30, %v15400_v23  ;;  %v4698_v36 = vperm.slane %v4694_v15, %v15400_v23 }
 0x892   : > { %v4700_v52 = vsel %vm4019_vm2, %v4699_v57, %v4296_v61  ;;  %v4436_v46 = vsel %vm4019_vm2, %v4435_v7, %v4418_v59  ;;  %v4446_v53 = vperm.slane %v4438_v44, %v15408_v38  ;;  %v4448_v50 = vsel %vm4019_vm2, %v4447_v47, %v4422_v20 }
 0x893   : > { %v15873_v0 = vrot.slane %v4458_v40, 4  ;;  %v15876_v49 = vperm.slane %v4436_v46, %v15408_v38  ;;  %v4704_v54 = vperm.slane %v4700_v52, %v15400_v23  ;;  %v4707_v27 = vrot.slane %v4687_v32, 4 }
 0x894   : > { %v4719_v2 = vrot.slane %v4698_v36, 4  ;;  %v15879_v9 = vrot.slane %v4446_v53, 4  ;;  %v4737_v57 = vsel %vm4019_vm2, %v15707_v16, %v15705_v28  ;;  %v4743_v20 = vsel %vm4019_vm2, %v4742_v62, %v4348_v12 }
 0x895   : > { %v15883_v19 = vsel %vm4019_vm2, 0.0, %v15873_v0  ;;  %v15892_v59 = vperm.slane %v4448_v50, %v15408_v38  ;;  %v4459_v1 = vrot.slane %v15876_v49, 4  ;;  %v4352_v61 = vsel %vm4019_vm2, 0.0, %v4351_v63 }
 0x896   : > { %v4708_v5 = vsel %vm4019_vm2, %v4693_v35, %v4707_v27  ;;  %v4717_v24 = vrot.slane %v4704_v54, 4  ;;  %v4720_v30 = vsel %vm4019_vm2, %v4704_v54, %v4719_v2  ;;  %v4741_v28 = vperm.slane %v4737_v57, %v15400_v23 }
 0x897   : > { %v15898_v47 = vperm.slane %v4708_v5, %v15408_v38  ;;  %v4462_v16 = vsel %vm4019_vm2, 0.0, %v15879_v9  ;;  %v4861_v3 = vrot.slane %v15883_v19, 4  ;;  %v4747_v62 = vperm.slane %v4743_v20, %v15400_v23 }
 0x898   : > { %v4748_v12 = vsel %vm4019_vm2, %v15697_v26, %v15714_v14  ;;  %v4754_v63 = vsel %vm4019_vm2, %v4753_v43, %v4352_v61  ;;  %v4761_v15 = vrot.slane %v4741_v28, 4  ;;  %v15915_v44 = vperm.slane %v4720_v30, %v15408_v38 }
 0x899   : > { %v4735_v7 = vrot.slane %v15898_v47, 4  ;;  %v4752_v40 = vperm.slane %v4748_v12, %v15400_v23  ;;  %v4758_v52 = vperm.slane %v4754_v63, %v15400_v23  ;;  %v4759_v46 = vrot.slane %v4747_v62, 4 }
 0x89a   : > { %v4705_v53 = vrot.slane %v4693_v35, 4  ;;  %v4850_v50 = vrot.slane %v4462_v16, 4  ;;  %v4762_v54 = vsel %vm4019_vm2, %v4747_v62, %v4761_v15  ;;  %v4718_v14 = vsel %vm4019_vm2, %v4717_v24, %v4698_v36 }
 0x89b   : > { %v4773_v26 = vrot.slane %v4752_v40, 4  ;;  %v4736_v27 = vsel %vm4019_vm2, %v15915_v44, %v4735_v7  ;;  %v15923_v31 = vperm.slane %v4762_v54, %v15408_v38  ;;  %v4771_v43 = vrot.slane %v4758_v52, 4 }
 0x89c   : > { %v4706_v2 = vsel %vm4019_vm2, %v4705_v53, %v4687_v32  ;;  %v15931_v35 = vperm.slane %v4718_v14, %v15408_v38  ;;  %v4760_v20 = vsel %vm4019_vm2, %v4759_v46, %v4741_v28  ;;  %v4404_v16 = vsel %vm4019_vm2, 0.0, %v4403_v41 }
 0x89d   : > { %v4774_v19 = vsel %vm4019_vm2, %v4758_v52, %v4773_v26  ;;  %v15928_v57 = vperm.slane %v4706_v2, %v15408_v38  ;;  %v4789_v61 = vrot.slane %v15923_v31, 4  ;;  %v15939_v5 = vperm.slane %v4760_v20, %v15408_v38 }
 0x89e   : > { %v15935_v36 = vperm.slane %v4774_v19, %v15408_v38  ;;  %v4772_v32 = vsel %vm4019_vm2, %v4771_v43, %v4752_v40  ;;  %v4407_v28 = vrot.slane %v15763_v60, 4  ;;  %v4460_v7 = vsel %vm4019_vm2, 0.0, %v4459_v1 }
 0x89f   : > { %v4731_v24 = vrot.slane %v15928_v57, 4  ;;  %v15944_v30 = vperm.slane %v4772_v32, %v15408_v38  ;;  %v4785_v12 = vrot.slane %v15939_v5, 4  ;;  %v4463_v40 = vrot.slane %v15892_v59, 4 }
 0x8a0   : > { %v4790_v62 = vsel %vm4019_vm2, %v15935_v36, %v4789_v61  ;;  %v4408_v52 = vsel %vm4019_vm2, 0.0, %v4407_v28  ;;  %v4791_v41 = vsel %vm4019_vm2, %v15750_v29, %v15748_v56  ;;  %v4797_v1 = vsel %vm4019_vm2, %v4796_v17, %v4404_v16 }
 0x8a1   : > { %v12222_v63 = vpack.i.bf16 %v4790_v62, %v4736_v27  ;;  %v4732_v15 = vsel %vm4019_vm2, %v15931_v35, %v4731_v24  ;;  %v4786_v46 = vsel %vm4019_vm2, %v15944_v30, %v4785_v12  ;;  %v4464_v53 = vsel %vm4019_vm2, 0.0, %v4463_v40 }
 0x8a2   : > { %v4795_v54 = vperm.slane %v4791_v41, %v15400_v23  ;;  %v12217_v26 = vpack.i.bf16 %v4786_v46, %v4732_v15  ;;  %v4801_v14 = vperm.slane %v4797_v1, %v15400_v23  ;;  %v4802_v56 = vsel %vm4019_vm2, %v15744_v10, %v15763_v60  ;;  %v11635_v41 = vld [vmem:[%s13583_s28 + $0xf4] sm:$0xf]  ;;  %v10408_v46 = vld [vmem:[%s13583_s28 + $0xf8] sm:$0xf0] }
 0x8a3   : > { %12223 = vrot.lane.b32.xlu2 %v12222_v63, %s13193_s20  ;;  %v4808_v29 = vsel %vm4019_vm2, %v4807_v51, %v4408_v52  ;;  %v4806_v27 = vperm.slane %v4802_v56, %v15400_v23  ;;  %v4845_v17 = vsel %vm4019_vm2, %v15879_v9, %v15876_v49  ;;  %v4851_v19 = vsel %vm4019_vm2, %v4850_v50, %v4460_v7  ;;  %v10406_v7 = vld [vmem:[%s13583_s28 + $0xf0] sm:$0xf]  ;;  %v11634_v56 = vld [vmem:[%s13583_s28 + $0xe4] sm:$0xf0] }
 0x8a4   : > { %v4812_v43 = vperm.slane %v4808_v29, %v15400_v23  ;;  %v4815_v37 = vrot.slane %v4795_v54, 4  ;;  %12218 = vrot.lane.b32.xlu1 %v12217_v26, %s13193_s20  ;;  %v4849_v2 = vperm.slane %v4845_v17, %v15400_v23  ;;  %v4856_v10 = vsel %vm4019_vm2, %v15873_v0, %v15892_v59  ;;  %v11633_v17 = vld [vmem:[%s13583_s28 + $0xe4] sm:$0xf] }
 0x8a5   : > { %v4862_v60 = vsel %vm4019_vm2, %v4861_v3, %v4464_v53  ;;  %v4827_v20 = vrot.slane %v4806_v27, 4  ;;  %v4855_v49 = vperm.slane %v4851_v19, %v15400_v23  ;;  %v4860_v61 = vperm.slane %v4856_v10, %v15400_v23 }
 0x8a6   : > { %v4816_v22 = vsel %vm4019_vm2, %v4801_v14, %v4815_v37  ;;  %v4825_v51 = vrot.slane %v4812_v43, 4  ;;  %v4866_v50 = vperm.slane %v4862_v60, %v15400_v23  ;;  %v4869_v32 = vrot.slane %v4849_v2, 4  ;;  %v11636_v23 = vld [vmem:[%s13583_s28 + $0xf4] sm:$0xf0] }
 0x8a7   : > { %v15991_v9 = vperm.slane %v4816_v22, %v15408_v38  ;;  %v4867_v0 = vrot.slane %v4855_v49, 4  ;;  %v4813_v59 = vrot.slane %v4801_v14, 4  ;;  %v4828_v16 = vsel %vm4019_vm2, %v4812_v43, %v4827_v20  ;;  %v10398_v14 = vld [vmem:[%s13583_s28 + $0xe0] sm:$0xf] }
 0x8a8   : > { %v4870_v3 = vsel %vm4019_vm2, %v4855_v49, %v4869_v32  ;;  %v4879_v24 = vrot.slane %v4866_v50, 4  ;;  %v4881_v62 = vrot.slane %v4860_v61, 4  ;;  %v4826_v15 = vsel %vm4019_vm2, %v4825_v51, %v4806_v27 }
 0x8a9   : > { %v15998_v28 = vperm.slane %v4870_v3, %v15408_v38  ;;  %v4814_v12 = vsel %vm4019_vm2, %v4813_v59, %v4795_v54  ;;  %v4843_v40 = vrot.slane %v15991_v9, 4  ;;  %v4868_v52 = vsel %vm4019_vm2, %v4867_v0, %v4849_v2  ;;  %v10400_v2 = vld [vmem:[%s13583_s28 + $0xe8] sm:$0xf0]  ;;  %v11631_v3 = vld [vmem:[%s13583_s28 + $0xd4] sm:$0xf] }
 0x8aa   : > { %v16005_v63 = vperm.slane %v4814_v12, %v15408_v38  ;;  %v4882_v53 = vsel %vm4019_vm2, %v4866_v50, %v4881_v62  ;;  %v16014_v54 = vperm.slane %v4868_v52, %v15408_v38  ;;  %v4880_v26 = vsel %vm4019_vm2, %v4879_v24, %v4860_v61  ;;  %v10390_v61 = vld [vmem:[%s13583_s28 + $0xd0] sm:$0xf]  ;;  %v10392_v12 = vld [vmem:[%s13583_s28 + $0xd8] sm:$0xf0] }
 0x8ab   : > { %v4897_v1 = vrot.slane %v15998_v28, 4  ;;  %v16020_v29 = vperm.slane %v4828_v16, %v15408_v38  ;;  %v16023_v27 = vperm.slane %v4882_v53, %v15408_v38  ;;  %v10407_v37 = vor.u32 %v11636_v23, %v10406_v7  ;;  %v10342_v24 = vld [vmem:[%s13583_s28 + $0x70] sm:$0xf]  ;;  %v11620_v16 = vld [vmem:[%s13583_s28 + $0x74] sm:$0xf0] }
 0x8ac   : > { %v4839_v43 = vrot.slane %v16005_v63, 4  ;;  %v16029_v19 = vperm.slane %v4826_v15, %v15408_v38  ;;  %v16032_v10 = vperm.slane %v4880_v26, %v15408_v38  ;;  %v4893_v60 = vrot.slane %v16014_v54, 4  ;;  %v11632_v38 = vld [vmem:[%s13583_s28 + $0xd4] sm:$0xf0]  ;;  %v11619_v7 = vld [vmem:[%s13583_s28 + $0x74] sm:$0xf] }
 0x8ad   : > { %v10411_v22 = vor.u32 %v11635_v41, %v10408_v46  ;;  %v4844_v51 = vsel %vm4019_vm2, %v16020_v29, %v4843_v40  ;;  %v4898_v20 = vsel %vm4019_vm2, %v16023_v27, %v4897_v1  ;;  %5214 = vmatpush.bf16.msrb.mxu1 %v10407_v37  ;;  %v10399_v49 = vor.u32 %v11634_v56, %v10398_v14  ;;  %v10344_v23 = vld [vmem:[%s13583_s28 + $0x78] sm:$0xf0]  ;;  %v10334_v40 = vld [vmem:[%s13583_s28 + $0x60] sm:$0xf]  ;;  %v11618_v15 = vld [vmem:[%s13583_s28 + $0x64] sm:$0xf0] }
 0x8ae   : > { %v12232_v50 = vpack.i.bf16 %v4898_v20, %v4844_v51  ;;  %v4840_v32 = vsel %vm4019_vm2, %v16029_v19, %v4839_v43  ;;  %v4894_v0 = vsel %vm4019_vm2, %v16032_v10, %v4893_v60  ;;  %v10403_v59 = vor.u32 %v11633_v17, %v10400_v2  ;;  %v11617_v46 = vld [vmem:[%s13583_s28 + $0x64] sm:$0xf]  ;;  %v10336_v53 = vld [vmem:[%s13583_s28 + $0x68] sm:$0xf0]  ;;  %v10382_v26 = vld [vmem:[%s13583_s28 + $0xc0] sm:$0xf] }
 0x8af   : > { %5272 = vmatpush.bf16.msrb.mxu3 %v10411_v22  ;;  %v12227_v62 = vpack.i.bf16 %v4894_v0, %v4840_v32  ;;  %v10391_v52 = vor.u32 %v11632_v38, %v10390_v61  ;;  %v10343_v41 = vor.u32 %v11620_v16, %v10342_v24  ;;  %v10395_v1 = vor.u32 %v11631_v3, %v10392_v12  ;;  %v11630_v14 = vld [vmem:[%s13583_s28 + $0xc4] sm:$0xf0]  ;;  %v11629_v37 = vld [vmem:[%s13583_s28 + $0xc4] sm:$0xf]  ;;  %v10384_v17 = vld [vmem:[%s13583_s28 + $0xc8] sm:$0xf0] }
 0x8b0   : > { %12233 = vrot.lane.b32.xlu2 %v12232_v50, %s13193_s20  ;;  %v10347_v56 = vor.u32 %v11619_v7, %v10344_v23  ;;  %v4733_v43 = vrot.slane %v15915_v44, 4  ;;  %v10335_v2 = vor.u32 %v11618_v15, %v10334_v40  ;;  %v10339_v60 = vor.u32 %v11617_v46, %v10336_v53  ;;  %v10326_v22 = vld [vmem:[%s13583_s28 + $0x50] sm:$0xf]  ;;  %v11616_v51 = vld [vmem:[%s13583_s28 + $0x54] sm:$0xf0] }
 0x8b1   : > { %12228 = vrot.lane.b32.xlu1 %v12227_v62, %s13193_s20  ;;  %5215 = vmatpush.bf16.msrb.mxu1 %v10399_v49  ;;  %v10383_v20 = vor.u32 %v11630_v14, %v10382_v26  ;;  %v10374_v49 = vld [vmem:[%s13583_s28 + $0xb0] sm:$0xf]  ;;  %v11615_v61 = vld [vmem:[%s13583_s28 + $0x54] sm:$0xf]  ;;  %v10328_v38 = vld [vmem:[%s13583_s28 + $0x58] sm:$0xf0]  ;;  %v10387_v44 = vor.u32 %v11629_v37, %v10384_v17  ;;  %v10327_v16 = vor.u32 %v11616_v51, %v10326_v22 }
 0x8b2   : > { %5185 = vmatpush.bf16.msrb.mxu0 %v10343_v41  ;;  %5243 = vmatpush.bf16.msrb.mxu2 %v10347_v56  ;;  %v11628_v50 = vld [vmem:[%s13583_s28 + $0xb4] sm:$0xf0]  ;;  %v4625_v32 = vrot.slane %v15789_v58, 4  ;;  %v4679_v0 = vrot.slane %v15811_v18, 4  ;;  %v11627_v3 = vld [vmem:[%s13583_s28 + $0xb4] sm:$0xf]  ;;  %v16076_v12 = vsel %vm4019_vm2, %v4733_v43, %v15898_v47  ;;  %v10331_v58 = vor.u32 %v11615_v61, %v10328_v38 }
 0x8b3   : > { %5273 = vmatpush.bf16.msrb.mxu3 %v10403_v59  ;;  %v4621_v59 = vrot.slane %v15822_v21, 4  ;;  %v10376_v24 = vld [vmem:[%s13583_s28 + $0xb8] sm:$0xf0]  ;;  %v4675_v62 = vrot.slane %v15825_v13, 4  ;;  %v4729_v7 = vrot.slane %v15931_v35, 4  ;;  %v4787_v35 = vrot.slane %v15935_v36, 4 }
 0x8b4   : > { %v10318_v18 = vld [vmem:[%s13583_s28 + $0x40] sm:$0xf]  ;;  %v11614_v21 = vld [vmem:[%s13583_s28 + $0x44] sm:$0xf0]  ;;  %v16083_v23 = vsel %vm4019_vm2, %v4625_v32, %v15783_v48  ;;  %v16087_v13 = vsel %vm4019_vm2, %v4679_v0, %v15800_v11  ;;  %v10375_v40 = vor.u32 %v11628_v50, %v10374_v49  ;;  %v11613_v15 = vld [vmem:[%s13583_s28 + $0x44] sm:$0xf] }
 0x8b5   : > { %5216 = vmatpush.bf16.msrb.mxu1 %v10391_v52  ;;  %v16091_v47 = vsel %vm4019_vm2, %v4621_v59, %v15804_v4  ;;  %v10320_v52 = vld [vmem:[%s13583_s28 + $0x48] sm:$0xf0]  ;;  %v16098_v48 = vsel %vm4019_vm2, %v4675_v62, %v15816_v6  ;;  %v16102_v11 = vsel %vm4019_vm2, %v4729_v7, %v15928_v57  ;;  %v10379_v4 = vor.u32 %v11627_v3, %v10376_v24  ;;  %v10366_v41 = vld [vmem:[%s13583_s28 + $0xa0] sm:$0xf]  ;;  %v11626_v36 = vld [vmem:[%s13583_s28 + $0xa4] sm:$0xf0] }
 0x8b6   : > { %5186 = vmatpush.bf16.msrb.mxu0 %v10335_v2  ;;  %5244 = vmatpush.bf16.msrb.mxu2 %v10339_v60  ;;  %v11625_v46 = vld [vmem:[%s13583_s28 + $0xa4] sm:$0xf]  ;;  %v10368_v53 = vld [vmem:[%s13583_s28 + $0xa8] sm:$0xf0]  ;;  %v10323_v6 = vor.u32 %v11613_v15, %v10320_v52  ;;  %v10310_v26 = vld [vmem:[%s13583_s28 + $0x30] sm:$0xf]  ;;  %v10367_v57 = vor.u32 %v11626_v36, %v10366_v41  ;;  %v16114_v37 = vsel %vm4019_vm2, %v4787_v35, %v15923_v31 }
 0x8b7   : > { %5274 = vmatpush.bf16.msrb.mxu3 %v10395_v1  ;;  %v10319_v1 = vor.u32 %v11614_v21, %v10318_v18  ;;  %v11612_v14 = vld [vmem:[%s13583_s28 + $0x34] sm:$0xf0]  ;;  %v11611_v56 = vld [vmem:[%s13583_s28 + $0x34] sm:$0xf]  ;;  %v10312_v43 = vld [vmem:[%s13583_s28 + $0x38] sm:$0xf0]  ;;  %v10371_v2 = vor.u32 %v11625_v46, %v10368_v53 }
 0x8b8   : > { %v4783_v17 = vrot.slane %v15944_v30, 4  ;;  %v10358_v60 = vld [vmem:[%s13583_s28 + $0x90] sm:$0xf]  ;;  %v11624_v22 = vld [vmem:[%s13583_s28 + $0x94] sm:$0xf0]  ;;  %v10311_v49 = vor.u32 %v11612_v14, %v10310_v26  ;;  %v4571_v31 = vrot.slane %v15663_v33, 4  ;;  %v10315_v30 = vor.u32 %v11611_v56, %v10312_v43 }
 0x8b9   : > { %5217 = vmatpush.bf16.msrb.mxu1 %v10383_v20  ;;  %v11623_v51 = vld [vmem:[%s13583_s28 + $0x94] sm:$0xf]  ;;  %v10360_v20 = vld [vmem:[%s13583_s28 + $0x98] sm:$0xf0]  ;;  %v10302_v38 = vld [vmem:[%s13583_s28 + $0x20] sm:$0xf]  ;;  %v10359_v0 = vor.u32 %v11624_v22, %v10358_v60 }
 0x8ba   : > { %5187 = vmatpush.bf16.msrb.mxu0 %v10327_v16  ;;  %5245 = vmatpush.bf16.msrb.mxu2 %v10331_v58  ;;  %v16123_v61 = vsel %vm4019_vm2, %v4783_v17, %v15939_v5  ;;  %v4517_v50 = vrot.slane %v15641_v55, 4  ;;  %v4841_v32 = vrot.slane %v16020_v29, 4  ;;  %v11609_v59 = vld [vmem:[%s13583_s28 + $0x24] sm:$0xf]  ;;  %v10304_v3 = vld [vmem:[%s13583_s28 + $0x28] sm:$0xf0]  ;;  %v10363_v5 = vor.u32 %v11623_v51, %v10360_v20 }
 0x8bb   : > { %5275 = vmatpush.bf16.msrb.mxu3 %v10387_v44  ;;  %v11610_v44 = vld [vmem:[%s13583_s28 + $0x24] sm:$0xf0]  ;;  %v10350_v24 = vld [vmem:[%s13583_s28 + $0x80] sm:$0xf]  ;;  %v11621_v62 = vld [vmem:[%s13583_s28 + $0x84] sm:$0xf]  ;;  %v4572_v55 = vsel %vm4019_vm2, %v4571_v31, %v15647_v45  ;;  %v10307_v21 = vor.u32 %v11609_v59, %v10304_v3 }
 0x8bc   : > { %v11622_v33 = vld [vmem:[%s13583_s28 + $0x84] sm:$0xf0]  ;;  %v10352_v7 = vld [vmem:[%s13583_s28 + $0x88] sm:$0xf0]  ;;  %v10303_v58 = vor.u32 %v11610_v44, %v10302_v38  ;;  %v10294_v35 = vld [vmem:[%s13583_s28 + $0x10] sm:$0xf]  ;;  %v4518_v15 = vsel %vm4019_vm2, %v4517_v50, %v15622_v39  ;;  %v16146_v36 = vsel %vm4019_vm2, %v4841_v32, %v15991_v9 }
 0x8bd   : > { %5218 = vmatpush.bf16.msrb.mxu1 %v10375_v40  ;;  %v11608_v40 = vld [vmem:[%s13583_s28 + $0x14] sm:$0xf0]  ;;  %v10351_v52 = vor.u32 %v11622_v33, %v10350_v24  ;;  %v10296_v41 = vld [vmem:[%s13583_s28 + $0x18] sm:$0xf0]  ;;  %v4837_v45 = vrot.slane %v16029_v19, 4  ;;  %v4895_v19 = vrot.slane %v16023_v27, 4 }
 0x8be   : > { %5188 = vmatpush.bf16.msrb.mxu0 %v10319_v1  ;;  %5246 = vmatpush.bf16.msrb.mxu2 %v10323_v6  ;;  %v10355_v1 = vor.u32 %v11621_v62, %v10352_v7  ;;  %v10295_v6 = vor.u32 %v11608_v40, %v10294_v35  ;;  %v10286_v14 = vld [vmem:[%s13583_s28] sm:$0xf]  ;;  %v11605_v56 = vld [vmem:[%s13583_s28 + $0x4] sm:$0xf]  ;;  %v10288_v43 = vld [vmem:[%s13583_s28 + $0x8] sm:$0xf0] }
 0x8bf   : > { %5276 = vmatpush.bf16.msrb.mxu3 %v10379_v4  ;;  %v11607_v4 = vld [vmem:[%s13583_s28 + $0x14] sm:$0xf]  ;;  %v16153_v26 = vsel %vm4019_vm2, %v4837_v45, %v16005_v63  ;;  %v4896_v63 = vsel %vm4019_vm2, %v4895_v19, %v15998_v28  ;;  %v4891_v60 = vrot.slane %v16032_v10, 4  ;;  %v4513_v27 = vrot.slane %v15651_v34, 4 }
 0x8c0   : > { %v10299_v9 = vor.u32 %v11607_v4, %v10296_v41  ;;  %v4567_v51 = vrot.slane %v15667_v25, 4 }
 0x8c1   : > { %5219 = vmatpush.bf16.msrb.mxu1 %v10367_v57  ;;  %v11606_v57 = vld [vmem:[%s13583_s28 + $0x4] sm:$0xf0]  ;;  %v4892_v22 = vsel %vm4019_vm2, %v4891_v60, %v16014_v54  ;;  %v4514_v28 = vsel %vm4019_vm2, %v4513_v27, %v15656_v8 }
 0x8c2   : > { %5189 = vmatpush.bf16.msrb.mxu0 %v10311_v49  ;;  %5247 = vmatpush.bf16.msrb.mxu2 %v10315_v30  ;;  %v10287_v17 = vor.u32 %v11606_v57, %v10286_v14  ;;  %v4568_v30 = vsel %vm4019_vm2, %v4567_v51, %v15659_v42 }
 0x8c3   : > { %5277 = vmatpush.bf16.msrb.mxu3 %v10371_v2  ;;  %v10291_v2 = vor.u32 %v11605_v56, %v10288_v43  ;;  %v12655_v43 = vld [vmem:[%s13618_s25] sm:$0xff] }
 0x8c5   : > { %5220 = vmatpush.bf16.msrb.mxu1 %v10359_v0 }
 0x8c6   : > { %5190 = vmatpush.bf16.msrb.mxu0 %v10303_v58  ;;  %5248 = vmatpush.bf16.msrb.mxu2 %v10307_v21 }
 0x8c7   : > { %5278 = vmatpush.bf16.msrb.mxu3 %v10363_v5 }
 0x8c8   : > { %v12204_v16 = vpop.permute.xlu2 %12203 }
 0x8c9   : > { %v12206_v29 = vunpack.i.h.bf16 %v12204_v16  ;;  %v12205_v18 = vunpack.i.l.bf16 %v12204_v16  ;;  %5221 = vmatpush.bf16.msrb.mxu1 %v10351_v52 }
 0x8ca   : > { %5191 = vmatpush.bf16.msrb.mxu0 %v10295_v6  ;;  %5249 = vmatpush.bf16.msrb.mxu2 %v10299_v9 }
 0x8cb   : > { %v4972_v46 = vsel %vm2469_vm9, %v4572_v55, %v12206_v29  ;;  %v4971_v53 = vsel %vm2469_vm9, %v4518_v15, %v12205_v18  ;;  %5279 = vmatpush.bf16.msrb.mxu3 %v10355_v1 }
 0x8cc   : > { %v4980_v39 = vpack.c.bf16 %v4972_v46, %v4971_v53 }
 0x8ce   : > { %5222 = vmatmul.bf16.vlgmr.msrb.gmra.mxu1 %v4980_v39  ;;  %5280 = vmatmul.bf16.vlgmr.msrb.gmra.mxu3 %v4980_v39 }
 0x8cf   : > { %5192 = vmatpush.bf16.msrb.mxu0 %v10287_v17  ;;  %5250 = vmatpush.bf16.msrb.mxu2 %v10291_v2  ;;  %v12656_v2 = vld [vmem:[%s13618_s25 + $0x8] sm:$0xff] }
 0x8e1   : > { %v12199_v20 = vpop.permute.xlu1 %12198 }
 0x8e2   : > { %v12201_v49 = vunpack.i.h.bf16 %v12199_v20  ;;  %v12200_v31 = vunpack.i.l.bf16 %v12199_v20 }
 0x8e4   : > { %v4964_v10 = vsel %vm2469_vm9, %v4568_v30, %v12201_v49  ;;  %v4963_v38 = vsel %vm2469_vm9, %v4514_v28, %v12200_v31  ;;  %v12657_v28 = vld [vmem:[%s13618_s25 + $0x10] sm:$0xff] }
 0x8e5   : > { %v4979_v44 = vpack.c.bf16 %v4964_v10, %v4963_v38  ;;  %v12658_v38 = vld [vmem:[%s13618_s25 + $0x18] sm:$0xff] }
 0x8e7   : > { %5193 = vmatmul.bf16.vlgmr.msrb.gmra.mxu0 %v4979_v44  ;;  %5251 = vmatmul.bf16.vlgmr.msrb.gmra.mxu2 %v4979_v44 }
 0x8fd   : > { %v12224_v54 = vpop.permute.xlu2 %12223  ;;  %v12214_v34 = vpop.permute.xlu1 %12213 }
 0x8fe   : > { %v12226_v50 = vunpack.i.h.bf16 %v12224_v54  ;;  %v12225_v25 = vunpack.i.l.bf16 %v12224_v54  ;;  %v12216_v32 = vunpack.i.h.bf16 %v12214_v34  ;;  %v12215_v0 = vunpack.i.l.bf16 %v12214_v34 }
 0x900   : > { %v12209_v59 = vpop.permute.xlu0 %12208  ;;  %v4973_v42 = vsel %vm2469_vm9, %v16083_v23, %v12215_v0  ;;  %v4974_v8 = vsel %vm2469_vm9, %v16087_v13, %v12216_v32  ;;  %v4975_v33 = vsel %vm2469_vm9, %v16076_v12, %v12225_v25  ;;  %v4976_v16 = vsel %vm2469_vm9, %v16114_v37, %v12226_v50 }
 0x901   : > { %v12211_v3 = vunpack.i.h.bf16 %v12209_v59  ;;  %v12210_v5 = vunpack.i.l.bf16 %v12209_v59  ;;  %v4982_v24 = vpack.c.bf16 %v4974_v8, %v4973_v42  ;;  %v4984_v58 = vpack.c.bf16 %v4976_v16, %v4975_v33  ;;  %v12659_v8 = vld [vmem:[%s13618_s25 + $0x20] sm:$0xff]  ;;  %v12660_v33 = vld [vmem:[%s13618_s25 + $0x28] sm:$0xff] }
 0x903   : > { %v4965_v62 = vsel %vm2469_vm9, %v16091_v47, %v12210_v5  ;;  %v4966_v7 = vsel %vm2469_vm9, %v16098_v48, %v12211_v3  ;;  %5227 = vmatmul.bf16.gmra.mxu1 %v4982_v24  ;;  %5285 = vmatmul.bf16.gmra.mxu3 %v4982_v24 }
 0x904   : > { %v4981_v23 = vpack.c.bf16 %v4966_v7, %v4965_v62 }
 0x906   : > { %5198 = vmatmul.bf16.gmra.mxu0 %v4981_v23  ;;  %5256 = vmatmul.bf16.gmra.mxu2 %v4981_v23 }
 0x90a   : > { %v12234_v13 = vpop.permute.xlu2 %12233 }
 0x90b   : > { %v12236_v55 = vunpack.i.h.bf16 %v12234_v13  ;;  %v12235_v29 = vunpack.i.l.bf16 %v12234_v13 }
 0x90d   : > { %v4977_v12 = vsel %vm2469_vm9, %v16146_v36, %v12235_v29  ;;  %v4978_v37 = vsel %vm2469_vm9, %v4896_v63, %v12236_v55 }
 0x90e   : > { %v4986_v18 = vpack.c.bf16 %v4978_v37, %v4977_v12  ;;  %v12661_v37 = vld [vmem:[%s13618_s25 + $0x30] sm:$0xff] }
 0x913   : > { %5232 = vmatmul.bf16.gmra.mxu1 %v4984_v58  ;;  %5290 = vmatmul.bf16.gmra.mxu3 %v4984_v58 }
 0x916   : > { %v12219_v47 = vpop.permute.xlu1 %12218 }
 0x917   : > { %v12221_v21 = vunpack.i.h.bf16 %v12219_v47  ;;  %v12220_v48 = vunpack.i.l.bf16 %v12219_v47  ;;  %v12662_v47 = vld [vmem:[%s13618_s25 + $0x38] sm:$0xff] }
 0x919   : > { %v4967_v35 = vsel %vm2469_vm9, %v16102_v11, %v12220_v48  ;;  %v4968_v40 = vsel %vm2469_vm9, %v16123_v61, %v12221_v21  ;;  %v5019_v11 = vld [vmem:[%s771_s4] sm:$0x3]  ;;  %s9478_s4 = sshll.u32 %s13618_s25, 4  ;;  %s9479_s4 = int_to_ptr.vmem [resolvable:$true] %s9478_s4 }
 0x91a   : > { %v4983_v15 = vpack.c.bf16 %v4968_v40, %v4967_v35  ;;  %v16197_v61 = vperm.slane %v5019_v11, 0  ;;  %v16200_v39 = vperm.slane %v5019_v11, 1 }
 0x91c   : > { %5203 = vmatmul.bf16.gmra.mxu0 %v4983_v15  ;;  %5261 = vmatmul.bf16.gmra.mxu2 %v4983_v15 }
 0x923   : > { %5237 = vmatmul.bf16.gmra.mxu1 %v4986_v18  ;;  %5295 = vmatmul.bf16.gmra.mxu3 %v4986_v18  ;;  %v12229_v52 = vpop.permute.xlu1 %12228 }
 0x924   : > { %v12231_v4 = vunpack.i.h.bf16 %v12229_v52  ;;  %v12230_v41 = vunpack.i.l.bf16 %v12229_v52 }
 0x926   : > { %v4969_v36 = vsel %vm2469_vm9, %v16153_v26, %v12230_v41  ;;  %v4970_v45 = vsel %vm2469_vm9, %v4892_v22, %v12231_v4 }
 0x927   : > { %v4985_v46 = vpack.c.bf16 %v4970_v45, %v4969_v36 }
 0x92c   : > { %5208 = vmatmul.bf16.gmra.mxu0 %v4985_v46  ;;  %5266 = vmatmul.bf16.gmra.mxu2 %v4985_v46 }
 0x94b   : > { %v5223_v6 = vpop.f32.mrf.mxu1 }
 0x951   : > { %v5281_v9 = vpop.f32.mrf.mxu3 }
 0x953   : > { %v5225_v27 = vpop.f32.mrf.mxu1 }
 0x959   : > { %v5283_v31 = vpop.f32.mrf.mxu3 }
 0x964   : > { %v5194_v53 = vpop.f32.mrf.mxu0 }
 0x965   : > { %v5195_v1 = vadd.f32 %v5194_v53, %v16197_v61  ;;  %v12663_v53 = vld [vmem:[%s13618_s25 + $0x40] sm:$0xff] }
 0x967   : > { %v5224_v26 = vadd.f32 %v5223_v6, %v5195_v1  ;;  %v12664_v6 = vld [vmem:[%s13618_s25 + $0x48] sm:$0xff] }
 0x969   : > { %v16204_v17 = vadd.f32 %v12655_v43, %v5224_v26 }
 0x96a   : > { %v5252_v14 = vpop.f32.mrf.mxu2 }
 0x96b   : > { %v5253_v57 = vadd.f32 %v5252_v14, %v16200_v39  ;;  %20244 = vst [vmem:[#allocation52_spill] sm:$0xff] %v16204_v17 }
 0x96c   : > { %v5196_v19 = vpop.f32.mrf.mxu0 }
 0x96d   : > { %v5282_v56 = vadd.f32 %v5281_v9, %v5253_v57  ;;  %v5197_v60 = vadd.f32 %v5196_v19, %v16197_v61 }
 0x96f   : > { %v16207_v63 = vadd.f32 %v12656_v2, %v5282_v56  ;;  %v5226_v20 = vadd.f32 %v5225_v27, %v5197_v60 }
 0x971   : > { %20245 = vst [vmem:[#allocation58_spill] sm:$0xff] %v16207_v63  ;;  %v5319_v22 = vadd.f32 %v16207_v63, %v16204_v17  ;;  %v16214_v10 = vadd.f32 %v12657_v28, %v5226_v20 }
 0x972   : > { %v5254_v51 = vpop.f32.mrf.mxu2 }
 0x973   : > { %v5255_v49 = vadd.f32 %v5254_v51, %v16200_v39  ;;  %5320 = vadd.xlane.f32.xlu1 %v5319_v22  ;;  %20246 = vst [vmem:[#allocation61_spill] sm:$0xff] %v16214_v10  ;;  %v12665_v22 = vld [vmem:[%s13618_s25 + $0x50] sm:$0xff]  ;;  %v12666_v51 = vld [vmem:[%s13618_s25 + $0x58] sm:$0xff] }
 0x975   : > { %v5284_v30 = vadd.f32 %v5283_v31, %v5255_v49 }
 0x977   : > { %v16217_v44 = vadd.f32 %v12658_v38, %v5284_v30 }
 0x979   : > { %20247 = vst [vmem:[#allocation60_spill] sm:$0xff] %v16217_v44  ;;  %v5322_v54 = vadd.f32 %v16217_v44, %v16214_v10 }
 0x97b   : > { %5323 = vadd.xlane.f32.xlu2 %v5322_v54 }
 0x980   : > { %v5228_v25 = vpop.f32.mrf.mxu1 }
 0x983   : > { %v5199_v34 = vpop.f32.mrf.mxu0 }
 0x984   : > { %v5200_v50 = vadd.f32 %v5199_v34, %v16197_v61 }
 0x986   : > { %v5286_v32 = vpop.f32.mrf.mxu3  ;;  %v5229_v59 = vadd.f32 %v5228_v25, %v5200_v50 }
 0x988   : > { %v16224_v24 = vadd.f32 %v12659_v8, %v5229_v59  ;;  %v5230_v58 = vpop.f32.mrf.mxu1  ;;  %v12668_v59 = vld [vmem:[%s13618_s25 + $0x68] sm:$0xff] }
 0x989   : > { %v5257_v0 = vpop.f32.mrf.mxu2 }
 0x98a   : > { %v5258_v3 = vadd.f32 %v5257_v0, %v16200_v39  ;;  %20248 = vst [vmem:[#allocation50_spill] sm:$0xff] %v16224_v24 }
 0x98b   : > { %v5201_v5 = vpop.f32.mrf.mxu0 }
 0x98c   : > { %v5287_v42 = vadd.f32 %v5286_v32, %v5258_v3  ;;  %v5202_v62 = vadd.f32 %v5201_v5, %v16197_v61  ;;  %v12667_v32 = vld [vmem:[%s13618_s25 + $0x60] sm:$0xff] }
 0x98e   : > { %v16227_v16 = vadd.f32 %v12660_v33, %v5287_v42  ;;  %v5231_v13 = vadd.f32 %v5230_v58, %v5202_v62  ;;  %v5288_v29 = vpop.f32.mrf.mxu3 }
 0x990   : > { %20249 = vst [vmem:[#allocation54_spill] sm:$0xff] %v16227_v16  ;;  %v5325_v7 = vadd.f32 %v16227_v16, %v16224_v24  ;;  %v16234_v18 = vadd.f32 %v12661_v37, %v5231_v13  ;;  %v5233_v35 = vpop.f32.mrf.mxu1  ;;  %v12669_v13 = vld [vmem:[%s13618_s25 + $0x70] sm:$0xff] }
 0x991   : > { %v5259_v23 = vpop.f32.mrf.mxu2 }
 0x992   : > { %v5260_v55 = vadd.f32 %v5259_v23, %v16200_v39  ;;  %5326 = vadd.xlane.f32.xlu0 %v5325_v7  ;;  %20250 = vst [vmem:[#allocation49_spill] sm:$0xff] %v16234_v18 }
 0x994   : > { %v5289_v12 = vadd.f32 %v5288_v29, %v5260_v55  ;;  %v12670_v29 = vld [vmem:[%s13618_s25 + $0x78] sm:$0xff] }
 0x996   : > { %v16237_v21 = vadd.f32 %v12662_v47, %v5289_v12  ;;  %v5291_v15 = vpop.f32.mrf.mxu3  ;;  %v20260_v47 = vld [vmem:[#allocation48_spill] sm:$0xff] }
 0x998   : > { %20251 = vst [vmem:[#allocation55_spill] sm:$0xff] %v16237_v21  ;;  %v5328_v48 = vadd.f32 %v16237_v21, %v16234_v18  ;;  %v5235_v11 = vpop.f32.mrf.mxu1 }
 0x999   : > { %v5204_v40 = vpop.f32.mrf.mxu0 }
 0x99a   : > { %5329 = vadd.xlane.f32.xlu1 %v5328_v48  ;;  %v5205_v52 = vadd.f32 %v5204_v40, %v16197_v61 }
 0x99c   : > { %v5234_v41 = vadd.f32 %v5233_v35, %v5205_v52 }
 0x99e   : > { %v16244_v1 = vadd.f32 %v12663_v53, %v5234_v41  ;;  %v5293_v26 = vpop.f32.mrf.mxu3 }
 0x99f   : > { %v5262_v4 = vpop.f32.mrf.mxu2 }
 0x9a0   : > { %v5263_v36 = vadd.f32 %v5262_v4, %v16200_v39  ;;  %20252 = vst [vmem:[#allocation57_spill] sm:$0xff] %v16244_v1  ;;  %v5238_v31 = vpop.f32.mrf.mxu1 }
 0x9a1   : > { %v5206_v45 = vpop.f32.mrf.mxu0 }
 0x9a2   : > { %v5292_v46 = vadd.f32 %v5291_v15, %v5263_v36  ;;  %v5207_v14 = vadd.f32 %v5206_v45, %v16197_v61 }
 0x9a4   : > { %v16247_v9 = vadd.f32 %v12664_v6, %v5292_v46  ;;  %v5236_v56 = vadd.f32 %v5235_v11, %v5207_v14 }
 0x9a6   : > { %20253 = vst [vmem:[#allocation53_spill] sm:$0xff] %v16247_v9  ;;  %v5331_v57 = vadd.f32 %v16247_v9, %v16244_v1  ;;  %v16254_v27 = vadd.f32 %v12665_v22, %v5236_v56  ;;  %v5296_v28 = vpop.f32.mrf.mxu3 }
 0x9a7   : > { %v5264_v19 = vpop.f32.mrf.mxu2 }
 0x9a8   : > { %v5265_v43 = vadd.f32 %v5264_v19, %v16200_v39  ;;  %5332 = vadd.xlane.f32.xlu2 %v5331_v57  ;;  %20254 = vst [vmem:[#allocation62_spill] sm:$0xff] %v16254_v27  ;;  %v5240_v8 = vpop.f32.mrf.mxu1 }
 0x9a9   : > { %v5209_v2 = vpop.f32.mrf.mxu0 }
 0x9aa   : > { %v5294_v60 = vadd.f32 %v5293_v26, %v5265_v43  ;;  %v5210_v49 = vadd.f32 %v5209_v2, %v16197_v61 }
 0x9ac   : > { %v16257_v20 = vadd.f32 %v12666_v51, %v5294_v60  ;;  %v5239_v54 = vadd.f32 %v5238_v31, %v5210_v49 }
 0x9ae   : > { %20255 = vst [vmem:[#allocation63_spill] sm:$0xff] %v16257_v20  ;;  %v5334_v30 = vadd.f32 %v16257_v20, %v16254_v27  ;;  %v16264_v0 = vadd.f32 %v12667_v32, %v5239_v54  ;;  %v5298_v58 = vpop.f32.mrf.mxu3 }
 0x9af   : > { %v5267_v38 = vpop.f32.mrf.mxu2 }
 0x9b0   : > { %v5268_v34 = vadd.f32 %v5267_v38, %v16200_v39  ;;  %5335 = vadd.xlane.f32.xlu1 %v5334_v30  ;;  %20256 = vst [vmem:[#allocation64_spill] sm:$0xff] %v16264_v0 }
 0x9b1   : > { %v5211_v50 = vpop.f32.mrf.mxu0 }
 0x9b2   : > { %v5297_v25 = vadd.f32 %v5296_v28, %v5268_v34  ;;  %v5212_v5 = vadd.f32 %v5211_v50, %v16197_v61 }
 0x9b4   : > { %v16267_v3 = vadd.f32 %v12668_v59, %v5297_v25  ;;  %v5241_v62 = vadd.f32 %v5240_v8, %v5212_v5 }
 0x9b6   : > { %20257 = vst [vmem:[#allocation51_spill] sm:$0xff] %v16267_v3  ;;  %v5337_v42 = vadd.f32 %v16267_v3, %v16264_v0  ;;  %v16274_v55 = vadd.f32 %v12669_v13, %v5241_v62 }
 0x9b7   : > { %v5269_v33 = vpop.f32.mrf.mxu2 }
 0x9b8   : > { %v5270_v7 = vadd.f32 %v5269_v33, %v16200_v39  ;;  %5338 = vadd.xlane.f32.xlu2 %v5337_v42  ;;  %20258 = vst [vmem:[#allocation56_spill] sm:$0xff] %v16274_v55 }
 0x9ba   : > { %v5299_v23 = vadd.f32 %v5298_v58, %v5270_v7 }
 0x9bc   : > { %v16277_v12 = vadd.f32 %v12670_v29, %v5299_v23 }
 0x9be   : > { %20259 = vst [vmem:[#allocation59_spill] sm:$0xff] %v16277_v12  ;;  %v5340_v61 = vadd.f32 %v16277_v12, %v16274_v55 }
 0x9c0   : > { %5341 = vadd.xlane.f32.xlu1 %v5340_v61 }
 0x9e6   : > { %v5321_v37 = vpop.xlane.xlu1 %5320 }
 0x9e7   : > { %v5343_v48 = vmul.f32 %v5321_v37, %v20260_v47 }
 0x9e9   : > { %v16283_v35 = vsub.f32 %v16204_v17, %v5343_v48  ;;  %v16286_v39 = vsub.f32 %v16207_v63, %v5343_v48 }
 0x9eb   : > { %v5367_v40 = vmul.f32 %v16283_v35, %v16283_v35  ;;  %v5368_v15 = vmul.f32 %v16286_v39, %v16286_v39 }
 0x9ed   : > { %v5383_v52 = vadd.f32 %v5368_v15, %v5367_v40 }
 0x9ee   : > { %v5324_v4 = vpop.xlane.xlu2 %5323 }
 0x9ef   : > { %v5344_v41 = vmul.f32 %v5324_v4, %v20260_v47  ;;  %5384 = vadd.xlane.f32.xlu2 %v5383_v52 }
 0x9f1   : > { %v16294_v36 = vsub.f32 %v16214_v10, %v5344_v41  ;;  %v16297_v45 = vsub.f32 %v16217_v44, %v5344_v41  ;;  %v10504_v10 = vld [vmem:[%s13599_s6 + $0xb8] sm:$0xf0] }
 0x9f3   : > { %v5369_v46 = vmul.f32 %v16294_v36, %v16294_v36  ;;  %v5370_v11 = vmul.f32 %v16297_v45, %v16297_v45 }
 0x9f5   : > { %v5386_v53 = vadd.f32 %v5370_v11, %v5369_v46 }
 0x9f7   : > { %5387 = vadd.xlane.f32.xlu1 %v5386_v53  ;;  %v10638_v53 = vld [vmem:[%s13599_s6 + $0x1c0] sm:$0xf] }
 0xa05   : > { %v5327_v6 = vpop.xlane.xlu0 %5326 }
 0xa06   : > { %v5345_v14 = vmul.f32 %v5327_v6, %v20260_v47  ;;  %v11697_v6 = vld [vmem:[%s13599_s6 + $0x1dc] sm:$0xf0] }
 0xa08   : > { %v16305_v26 = vsub.f32 %v16224_v24, %v5345_v14  ;;  %v16308_v57 = vsub.f32 %v16227_v16, %v5345_v14  ;;  %v10894_v14 = vld [vmem:[%s13599_s6 + $0x3c0] sm:$0xf]  ;;  %v11656_v24 = vld [vmem:[%s13599_s6 + $0x9c] sm:$0xf] }
 0xa09   : > { %v10507_v17 = vor.u32 %v11656_v24, %v10504_v10 }
 0xa0a   : > { %v5371_v19 = vmul.f32 %v16305_v26, %v16305_v26  ;;  %v5372_v56 = vmul.f32 %v16308_v57, %v16308_v57 }
 0xa0c   : > { %v5389_v43 = vadd.f32 %v5372_v56, %v5371_v19  ;;  %v10639_v19 = vor.u32 %v11697_v6, %v10638_v53  ;;  %v11761_v56 = vld [vmem:[%s13599_s6 + $0x3dc] sm:$0xf0] }
 0xa0d   : > { %v5330_v2 = vpop.xlane.xlu1 %5329  ;;  %v11745_v53 = vld [vmem:[%s13599_s6 + $0x35c] sm:$0xf0] }
 0xa0e   : > { %v5346_v60 = vmul.f32 %v5330_v2, %v20260_v47  ;;  %5390 = vadd.xlane.f32.xlu2 %v5389_v43  ;;  %v11693_v43 = vld [vmem:[%s13599_s6 + $0x1c4] sm:$0xf]  ;;  %6355 = vmatpush.bf16.msra.mxu0 %v10639_v19 }
 0xa0f   : > { %v10640_v2 = vld [vmem:[%s13599_s6 + $0x1e0] sm:$0xf0] }
 0xa10   : > { %v16316_v22 = vsub.f32 %v16234_v18, %v5346_v60  ;;  %v16319_v51 = vsub.f32 %v16237_v21, %v5346_v60  ;;  %v10895_v60 = vor.u32 %v11761_v56, %v10894_v14  ;;  %v11677_v56 = vld [vmem:[%s13599_s6 + $0x144] sm:$0xf] }
 0xa12   : > { %v5373_v49 = vmul.f32 %v16316_v22, %v16316_v22  ;;  %v5374_v31 = vmul.f32 %v16319_v51, %v16319_v51  ;;  %6384 = vmatpush.bf16.msra.mxu1 %v10895_v60 }
 0xa14   : > { %v5392_v30 = vadd.f32 %v5374_v31, %v5373_v49  ;;  %v10643_v49 = vor.u32 %v11693_v43, %v10640_v2  ;;  %v11757_v31 = vld [vmem:[%s13599_s6 + $0x3c4] sm:$0xf] }
 0xa15   : > { %v10576_v43 = vld [vmem:[%s13599_s6 + $0x160] sm:$0xf0] }
 0xa16   : > { %5393 = vadd.xlane.f32.xlu1 %v5392_v30  ;;  %v10896_v30 = vld [vmem:[%s13599_s6 + $0x3e0] sm:$0xf0]  ;;  %6413 = vmatpush.bf16.msra.mxu2 %v10643_v49  ;;  %v10579_v60 = vor.u32 %v11677_v56, %v10576_v43  ;;  %v10766_v56 = vld [vmem:[%s13599_s6 + $0x2c0] sm:$0xf] }
 0xa17   : > { %v11741_v2 = vld [vmem:[%s13599_s6 + $0x344] sm:$0xf]  ;;  %v11729_v43 = vld [vmem:[%s13599_s6 + $0x2dc] sm:$0xf0] }
 0xa18   : > { %v10832_v49 = vld [vmem:[%s13599_s6 + $0x360] sm:$0xf0] }
 0xa1b   : > { %v5333_v28 = vpop.xlane.xlu2 %5332 }
 0xa1c   : > { %v5347_v38 = vmul.f32 %v5333_v28, %v20260_v47  ;;  %v10899_v28 = vor.u32 %v11757_v31, %v10896_v30  ;;  %v10835_v30 = vor.u32 %v11741_v2, %v10832_v49  ;;  %v11661_v49 = vld [vmem:[%s13599_s6 + $0xc4] sm:$0xf] }
 0xa1e   : > { %v16327_v54 = vsub.f32 %v16244_v1, %v5347_v38  ;;  %v16330_v34 = vsub.f32 %v16247_v9, %v5347_v38  ;;  %6442 = vmatpush.bf16.msra.mxu3 %v10899_v28 }
 0xa20   : > { %v5375_v50 = vmul.f32 %v16327_v54, %v16327_v54  ;;  %v5376_v25 = vmul.f32 %v16330_v34, %v16330_v34 }
 0xa22   : > { %v5395_v32 = vadd.f32 %v5376_v25, %v5375_v50 }
 0xa23   : > { %v5336_v59 = vpop.xlane.xlu1 %5335 }
 0xa24   : > { %v5348_v5 = vmul.f32 %v5336_v59, %v20260_v47  ;;  %5396 = vadd.xlane.f32.xlu0 %v5395_v32  ;;  %v10606_v32 = vld [vmem:[%s13599_s6 + $0x180] sm:$0xf] }
 0xa25   : > { %v11689_v59 = vld [vmem:[%s13599_s6 + $0x19c] sm:$0xf0] }
 0xa26   : > { %v16338_v42 = vsub.f32 %v16254_v27, %v5348_v5  ;;  %v16341_v8 = vsub.f32 %v16257_v20, %v5348_v5  ;;  %v10862_v5 = vld [vmem:[%s13599_s6 + $0x380] sm:$0xf]  ;;  %v10534_v20 = vld [vmem:[%s13599_s6 + $0xd8] sm:$0xf] }
 0xa28   : > { %v5377_v33 = vmul.f32 %v16338_v42, %v16338_v42  ;;  %v5378_v62 = vmul.f32 %v16341_v8, %v16341_v8 }
 0xa2a   : > { %v5398_v7 = vadd.f32 %v5378_v62, %v5377_v33  ;;  %v10607_v33 = vor.u32 %v11689_v59, %v10606_v32  ;;  %v11753_v62 = vld [vmem:[%s13599_s6 + $0x39c] sm:$0xf0] }
 0xa2b   : > { %v5339_v58 = vpop.xlane.xlu2 %5338 }
 0xa2c   : > { %v5349_v23 = vmul.f32 %v5339_v58, %v20260_v47  ;;  %5399 = vadd.xlane.f32.xlu2 %v5398_v7  ;;  %v11685_v7 = vld [vmem:[%s13599_s6 + $0x184] sm:$0xf]  ;;  %6356 = vmatpush.bf16.msra.mxu0 %v10607_v33 }
 0xa2d   : > { %v10608_v58 = vld [vmem:[%s13599_s6 + $0x1a0] sm:$0xf0] }
 0xa2e   : > { %v16349_v13 = vsub.f32 %v16264_v0, %v5349_v23  ;;  %v16352_v29 = vsub.f32 %v16267_v3, %v5349_v23  ;;  %v10863_v23 = vor.u32 %v11753_v62, %v10862_v5 }
 0xa30   : > { %v5379_v61 = vmul.f32 %v16349_v13, %v16349_v13  ;;  %v5380_v37 = vmul.f32 %v16352_v29, %v16352_v29  ;;  %6385 = vmatpush.bf16.msra.mxu1 %v10863_v23  ;;  %v11673_v23 = vld [vmem:[%s13599_s6 + $0x11c] sm:$0xf0] }
 0xa32   : > { %v5401_v48 = vadd.f32 %v5380_v37, %v5379_v61  ;;  %v10611_v61 = vor.u32 %v11685_v7, %v10608_v58  ;;  %v11749_v37 = vld [vmem:[%s13599_s6 + $0x384] sm:$0xf]  ;;  %v10542_v58 = vld [vmem:[%s13599_s6 + $0x100] sm:$0xf] }
 0xa33   : > { %v5342_v40 = vpop.xlane.xlu1 %5341 }
 0xa34   : > { %v5350_v15 = vmul.f32 %v5342_v40, %v20260_v47  ;;  %5402 = vadd.xlane.f32.xlu1 %v5401_v48  ;;  %v10864_v48 = vld [vmem:[%s13599_s6 + $0x3a0] sm:$0xf0]  ;;  %v10574_v40 = vld [vmem:[%s13599_s6 + $0x140] sm:$0xf]  ;;  %6414 = vmatpush.bf16.msra.mxu2 %v10611_v61 }
 0xa35   : > { %v10798_v61 = vld [vmem:[%s13599_s6 + $0x300] sm:$0xf] }
 0xa36   : > { %v16360_v52 = vsub.f32 %v16274_v55, %v5350_v15  ;;  %v16363_v4 = vsub.f32 %v16277_v12, %v5350_v15  ;;  %v10824_v12 = vld [vmem:[%s13599_s6 + $0x338] sm:$0xf0] }
 0xa37   : > { %v10792_v55 = vld [vmem:[%s13599_s6 + $0x2f8] sm:$0xf0] }
 0xa38   : > { %v5381_v41 = vmul.f32 %v16360_v52, %v16360_v52  ;;  %v5382_v46 = vmul.f32 %v16363_v4, %v16363_v4  ;;  %6415 = vmatpush.bf16.msra.mxu2 %v10579_v60  ;;  %v10767_v60 = vor.u32 %v11729_v43, %v10766_v56  ;;  %v10736_v56 = vld [vmem:[%s13599_s6 + $0x2a0] sm:$0xf0]  ;;  %v10446_v43 = vld [vmem:[%s13599_s6 + $0x40] sm:$0xf] }
 0xa3a   : > { %v5404_v11 = vadd.f32 %v5382_v46, %v5381_v41  ;;  %v10867_v41 = vor.u32 %v11749_v37, %v10864_v48  ;;  %v11681_v46 = vld [vmem:[%s13599_s6 + $0x15c] sm:$0xf0]  ;;  %v10543_v37 = vor.u32 %v11673_v23, %v10542_v58 }
 0xa3b   : > { %v10575_v14 = vor.u32 %v11681_v46, %v10574_v40  ;;  %v11737_v48 = vld [vmem:[%s13599_s6 + $0x31c] sm:$0xf0]  ;;  %v11669_v40 = vld [vmem:[%s13599_s6 + $0x104] sm:$0xf] }
 0xa3c   : > { %5405 = vadd.xlane.f32.xlu0 %v5404_v11  ;;  %v10830_v11 = vld [vmem:[%s13599_s6 + $0x340] sm:$0xf]  ;;  %6443 = vmatpush.bf16.msra.mxu3 %v10867_v41  ;;  %v10799_v41 = vor.u32 %v11737_v48, %v10798_v61 }
 0xa3d   : > { %v10831_v19 = vor.u32 %v11745_v53, %v10830_v11  ;;  %6357 = vmatpush.bf16.msra.mxu0 %v10575_v14  ;;  %v11733_v11 = vld [vmem:[%s13599_s6 + $0x304] sm:$0xf] }
 0xa3e   : > { %v10800_v53 = vld [vmem:[%s13599_s6 + $0x320] sm:$0xf0] }
 0xa3f   : > { %6386 = vmatpush.bf16.msra.mxu1 %v10831_v19  ;;  %v10803_v14 = vor.u32 %v11733_v11, %v10800_v53  ;;  %v11665_v19 = vld [vmem:[%s13599_s6 + $0xdc] sm:$0xf0]  ;;  %v11653_v11 = vld [vmem:[%s13599_s6 + $0x84] sm:$0xf] }
 0xa40   : > { %6444 = vmatpush.bf16.msra.mxu3 %v10835_v30  ;;  %v10512_v30 = vld [vmem:[%s13599_s6 + $0xe0] sm:$0xf0] }
 0xa41   : > { %6358 = vmatpush.bf16.msra.mxu0 %v10543_v37  ;;  %v10480_v53 = vld [vmem:[%s13599_s6 + $0xa0] sm:$0xf0] }
 0xa43   : > { %6387 = vmatpush.bf16.msra.mxu1 %v10799_v41 }
 0xa44   : > { %6445 = vmatpush.bf16.msra.mxu3 %v10803_v14  ;;  %v10483_v14 = vor.u32 %v11653_v11, %v10480_v53  ;;  %v5318_v53 = vld [vmem:[%s20264_s18] sm:$0x3] }
 0xa47   : > { %6388 = vmatpush.bf16.msra.mxu1 %v10767_v60 }
 0xa62   : > { %v5385_v38 = vpop.xlane.xlu2 %5384 }
 0xa63   : > { %v5407_v50 = vmul.f32 %v5385_v38, %v20260_v47 }
 0xa65   : > { %v16378_v25 = vadd.f32 1e-05, %v5407_v50 }
 0xa67   : > { %12383 = vrsqrt.f32 %v16378_v25  ;;  %vm5429_vm4 = vweird.f32 %v16378_v25 }
 0xa6a   : > { %v5388_v15 = vpop.xlane.xlu1 %5387 }
 0xa6b   : > { %v5408_v6 = vmul.f32 %v5388_v15, %v20260_v47  ;;  %v10544_v15 = vld [vmem:[%s13599_s6 + $0x120] sm:$0xf0] }
 0xa6c   : > { %v10547_v46 = vor.u32 %v11669_v40, %v10544_v15  ;;  %v10478_v40 = vld [vmem:[%s13599_s6 + $0x80] sm:$0xf] }
 0xa6d   : > { %v5416_v31 = vadd.f32 1e-05, %v5408_v6  ;;  %v16398_v28 = vpop.eup %12383  ;;  %v10510_v6 = vld [vmem:[%s13599_s6 + $0xc0] sm:$0xf] }
 0xa6e   : > { %v5424_v50 = vmul.f32 %v16398_v28, %v16378_v25  ;;  %6416 = vmatpush.bf16.msra.mxu2 %v10547_v46  ;;  %v10511_v2 = vor.u32 %v11665_v19, %v10510_v6  ;;  %vm5430_vm9 = vweird.f32 %v16398_v28  ;;  %v5317_v25 = vld [vmem:[%s20263_s8] sm:$0x3]  ;;  %v11657_v15 = vld [vmem:[%s13599_s6 + $0x9c] sm:$0xf0]  ;;  %v11717_v19 = vld [vmem:[%s13599_s6 + $0x284] sm:$0xf] }
 0xa6f   : > { %12385 = vrsqrt.f32 %v5416_v31  ;;  %vm16422_vm5 = vmor %vm5429_vm4, %vm5430_vm9  ;;  %vm5439_vm6 = vweird.f32 %v5416_v31  ;;  %v10479_v41 = vor.u32 %v11657_v15, %v10478_v40  ;;  %v11721_v46 = vld [vmem:[%s13599_s6 + $0x29c] sm:$0xf0]  ;;  %v10704_v40 = vld [vmem:[%s13599_s6 + $0x260] sm:$0xf0] }
 0xa70   : > { %v5425_v5 = vmul.f32 %v16398_v28, %v5424_v50  ;;  %v11725_v50 = vld [vmem:[%s13599_s6 + $0x2c4] sm:$0xf]  ;;  %6359 = vmatpush.bf16.msra.mxu0 %v10511_v2 }
 0xa72   : > { %v5426_v62 = vmul.f32 0.5, %v5425_v5  ;;  %v10515_v5 = vor.u32 %v11661_v49, %v10512_v30  ;;  %v10739_v49 = vor.u32 %v11717_v19, %v10736_v56  ;;  %v11649_v30 = vld [vmem:[%s13599_s6 + $0x5c] sm:$0xf0] }
 0xa74   : > { %6417 = vmatpush.bf16.msra.mxu2 %v10515_v5  ;;  %6360 = vmatpush.bf16.msra.mxu0 %v10479_v41  ;;  %v10447_v5 = vor.u32 %v11649_v30, %v10446_v43 }
 0xa75   : > { %v12386_v38 = vpop.eup %12385 }
 0xa76   : > { %v5434_v32 = vmul.f32 %v12386_v38, %v5416_v31  ;;  %vm5440_vm3 = vweird.f32 %v12386_v38  ;;  %v10734_v31 = vld [vmem:[%s13599_s6 + $0x280] sm:$0xf] }
 0xa77   : > { %vm5441_vm7 = vmor %vm5439_vm6, %vm5440_vm3  ;;  %v10735_v6 = vor.u32 %v11721_v46, %v10734_v31 }
 0xa78   : > { %v5435_v59 = vmul.f32 %v12386_v38, %v5434_v32  ;;  %v5427_v32 = vsub.f32 1.5, %v5426_v62  ;;  %6418 = vmatpush.bf16.msra.mxu2 %v10483_v14  ;;  %6361 = vmatpush.bf16.msra.mxu0 %v10447_v5 }
 0xa79   : > { %6389 = vmatpush.bf16.msra.mxu1 %v10735_v6 }
 0xa7a   : > { %v5436_v33 = vmul.f32 0.5, %v5435_v59 }
 0xa7c   : > { %v5437_v7 = vsub.f32 1.5, %v5436_v33  ;;  %v10768_v33 = vld [vmem:[%s13599_s6 + $0x2e0] sm:$0xf0] }
 0xa7d   : > { %v10771_v61 = vor.u32 %v11725_v50, %v10768_v33  ;;  %v10702_v50 = vld [vmem:[%s13599_s6 + $0x240] sm:$0xf] }
 0xa7e   : > { %v5438_v58 = vmul.f32 %v12386_v38, %v5437_v7  ;;  %v5428_v7 = vmul.f32 %v16398_v28, %v5427_v32  ;;  %v11713_v32 = vld [vmem:[%s13599_s6 + $0x25c] sm:$0xf0] }
 0xa7f   : > { %6446 = vmatpush.bf16.msra.mxu3 %v10771_v61  ;;  %v10703_v33 = vor.u32 %v11713_v32, %v10702_v50  ;;  %v11709_v61 = vld [vmem:[%s13599_s6 + $0x244] sm:$0xf]  ;;  %v10414_v50 = vld [vmem:[%s13599_s6] sm:$0xf] }
 0xa80   : > { %v5442_v48 = vsel %vm5441_vm7, %v12386_v38, %v5438_v58  ;;  %v5432_v38 = vsel %vm16422_vm5, %v16398_v28, %v5428_v7  ;;  %v11645_v58 = vld [vmem:[%s13599_s6 + $0x44] sm:$0xf]  ;;  %v16452_v28 = vperm.slane %v5317_v25, 0  ;;  %v10707_v11 = vor.u32 %v11709_v61, %v10704_v40  ;;  %v11641_v32 = vld [vmem:[%s13599_s6 + $0x1c] sm:$0xf0] }
 0xa81   : > { %v5391_v59 = vpop.xlane.xlu2 %5390  ;;  %v5505_v2 = vmul.f32 %v5442_v48, %v16294_v36  ;;  %v16454_v36 = vperm.slane %v5317_v25, 1  ;;  %v5506_v62 = vmul.f32 %v5442_v48, %v16297_v45  ;;  %v5503_v31 = vmul.f32 %v5432_v38, %v16283_v35  ;;  %6390 = vmatpush.bf16.msra.mxu1 %v10703_v33  ;;  %v11637_v61 = vld [vmem:[%s13599_s6 + $0x4] sm:$0xf] }
 0xa82   : > { %v5409_v23 = vmul.f32 %v5391_v59, %v20260_v47  ;;  %v5504_v41 = vmul.f32 %v5432_v38, %v16286_v39  ;;  %v16465_v39 = vperm.slane %v5318_v53, 0  ;;  %v16467_v48 = vperm.slane %v5318_v53, 1 }
 0xa83   : > { %6447 = vmatpush.bf16.msra.mxu3 %v10739_v49  ;;  %v5526_v25 = vmul.f32 %v16452_v28, %v5505_v2  ;;  %v5527_v45 = vmul.f32 %v16454_v36, %v5506_v62  ;;  %v5524_v14 = vmul.f32 %v16452_v28, %v5503_v31  ;;  %v10416_v62 = vld [vmem:[%s13599_s6 + $0x20] sm:$0xf0] }
 0xa84   : > { %v16426_v37 = vadd.f32 1e-05, %v5409_v23  ;;  %v10448_v23 = vld [vmem:[%s13599_s6 + $0x60] sm:$0xf0]  ;;  %v5525_v19 = vmul.f32 %v16454_v36, %v5504_v41  ;;  %v10419_v31 = vor.u32 %v11637_v61, %v10416_v62 }
 0xa85   : > { %v10451_v7 = vor.u32 %v11645_v58, %v10448_v23  ;;  %v5547_v43 = vadd.f32 %v16465_v39, %v5526_v25  ;;  %v5548_v38 = vadd.f32 %v16467_v48, %v5527_v45  ;;  %v5545_v49 = vadd.f32 %v16465_v39, %v5524_v14  ;;  %v11705_v23 = vld [vmem:[%s13599_s6 + $0x21c] sm:$0xf0]  ;;  %v11701_v41 = vld [vmem:[%s13599_s6 + $0x204] sm:$0xf] }
 0xa86   : > { %12387 = vrsqrt.f32 %v16426_v37  ;;  %v5546_v30 = vadd.f32 %v16467_v48, %v5525_v19  ;;  %v10415_v58 = vor.u32 %v11641_v32, %v10414_v50  ;;  %vm5449_vm10 = vweird.f32 %v16426_v37 }
 0xa87   : > { %6419 = vmatpush.bf16.msra.mxu2 %v10451_v7  ;;  %6448 = vmatpush.bf16.msra.mxu3 %v10707_v11  ;;  %v16481_v7 = vpack.c.bf16 %v5547_v43, %v5545_v49  ;;  %v10672_v11 = vld [vmem:[%s13599_s6 + $0x220] sm:$0xf0] }
 0xa88   : > { %v16485_v53 = vpack.c.bf16 %v5548_v38, %v5546_v30  ;;  %6362 = vmatpush.bf16.msra.mxu0 %v10415_v58  ;;  %v10675_v25 = vor.u32 %v11701_v41, %v10672_v11 }
 0xa89   : > { %v5394_v60 = vpop.xlane.xlu1 %5393 }
 0xa8a   : > { %v5410_v59 = vmul.f32 %v5394_v60, %v20260_v47 }
 0xa8b   : > { %6420 = vmatpush.bf16.msra.mxu2 %v10419_v31  ;;  %6449 = vmatpush.bf16.msra.mxu3 %v10675_v25 }
 0xa8c   : > { %v12388_v15 = vpop.eup %12387  ;;  %v5418_v46 = vadd.f32 1e-05, %v5410_v59  ;;  %v10670_v59 = vld [vmem:[%s13599_s6 + $0x200] sm:$0xf]  ;;  %6363 = vmatmul.bf16.vlgmr.msra.gmra.mxu0 %v16481_v7 }
 0xa8d   : > { %v5444_v6 = vmul.f32 %v12388_v15, %v16426_v37  ;;  %vm5450_vm8 = vweird.f32 %v12388_v15  ;;  %v10671_v40 = vor.u32 %v11705_v23, %v10670_v59 }
 0xa8e   : > { %12389 = vrsqrt.f32 %v5418_v46  ;;  %vm5451_vm11 = vmor %vm5449_vm10, %vm5450_vm8  ;;  %6421 = vmatmul.bf16.vlgmr.msra.gmra.mxu2 %v16481_v7  ;;  %6450 = vmatmul.bf16.vlgmr.msra.gmra.mxu3 %v16485_v53  ;;  %vm5459_vm13 = vweird.f32 %v5418_v46 }
 0xa8f   : > { %v5445_v35 = vmul.f32 %v12388_v15, %v5444_v6  ;;  %6391 = vmatpush.bf16.msra.mxu1 %v10671_v40 }
 0xa91   : > { %v5446_v56 = vmul.f32 0.5, %v5445_v35 }
 0xa92   : > { %6392 = vmatmul.bf16.vlgmr.msra.gmra.mxu1 %v16485_v53 }
 0xa93   : > { %v5447_v2 = vsub.f32 1.5, %v5446_v56 }
 0xa94   : > { %v12390_v60 = vpop.eup %12389 }
 0xa95   : > { %v5448_v5 = vmul.f32 %v12388_v15, %v5447_v2  ;;  %v5454_v33 = vmul.f32 %v12390_v60, %v5418_v46  ;;  %vm5460_vm12 = vweird.f32 %v12390_v60 }
 0xa96   : > { %vm5461_vm14 = vmor %vm5459_vm13, %vm5460_vm12 }
 0xa97   : > { %v5455_v6 = vmul.f32 %v12390_v60, %v5454_v33  ;;  %v5452_v45 = vsel %vm5451_vm11, %v12388_v15, %v5448_v5  ;;  %v5397_v14 = vpop.xlane.xlu0 %5396 }
 0xa98   : > { %v5411_v19 = vmul.f32 %v5397_v14, %v20260_v47  ;;  %v5507_v37 = vmul.f32 %v5452_v45, %v16305_v26  ;;  %v5508_v15 = vmul.f32 %v5452_v45, %v16308_v57 }
 0xa99   : > { %v5456_v35 = vmul.f32 0.5, %v5455_v6 }
 0xa9a   : > { %v5419_v43 = vadd.f32 1e-05, %v5411_v19  ;;  %v5528_v49 = vmul.f32 %v16452_v28, %v5507_v37  ;;  %v5529_v32 = vmul.f32 %v16454_v36, %v5508_v15  ;;  %v10646_v19 = vld [vmem:[%s13599_s6 + $0x1c8] sm:$0xf] }
 0xa9b   : > { %v5457_v56 = vsub.f32 1.5, %v5456_v35 }
 0xa9c   : > { %12391 = vrsqrt.f32 %v5419_v43  ;;  %v5549_v46 = vadd.f32 %v16465_v39, %v5528_v49  ;;  %vm5469_vm0 = vweird.f32 %v5419_v43  ;;  %v11762_v49 = vld [vmem:[%s13599_s6 + $0x3e4] sm:$0xf0] }
 0xa9d   : > { %v5458_v38 = vmul.f32 %v12390_v60, %v5457_v56  ;;  %v11698_v56 = vld [vmem:[%s13599_s6 + $0x1e4] sm:$0xf0] }
 0xa9f   : > { %v5462_v2 = vsel %vm5461_vm14, %v12390_v60, %v5458_v38  ;;  %v5400_v59 = vpop.xlane.xlu2 %5399  ;;  %v10647_v38 = vor.u32 %v11698_v56, %v10646_v19 }
 0xaa0   : > { %v5509_v30 = vmul.f32 %v5462_v2, %v16316_v22  ;;  %v5510_v50 = vmul.f32 %v5462_v2, %v16319_v51  ;;  %v5412_v57 = vmul.f32 %v5400_v59, %v20260_v47  ;;  %v5550_v22 = vadd.f32 %v16467_v48, %v5529_v32  ;;  %v10902_v2 = vld [vmem:[%s13599_s6 + $0x3c8] sm:$0xf]  ;;  %v11758_v32 = vld [vmem:[%s13599_s6 + $0x3cc] sm:$0xf] }
 0xaa1   : > { %v10904_v59 = vld [vmem:[%s13599_s6 + $0x3e8] sm:$0xf0]  ;;  %6471 = vmatpush.bf16.msrb.mxu0 %v10647_v38  ;;  %v10582_v38 = vld [vmem:[%s13599_s6 + $0x148] sm:$0xf] }
 0xaa2   : > { %v5530_v26 = vmul.f32 %v16452_v28, %v5509_v30  ;;  %v5531_v5 = vmul.f32 %v16454_v36, %v5510_v50  ;;  %v12392_v33 = vpop.eup %12391  ;;  %v16506_v23 = vadd.f32 1e-05, %v5412_v57  ;;  %v11694_v30 = vld [vmem:[%s13599_s6 + $0x1cc] sm:$0xf]  ;;  %v10903_v50 = vor.u32 %v11762_v49, %v10902_v2 }
 0xaa3   : > { %v5464_v51 = vmul.f32 %v12392_v33, %v5419_v43  ;;  %vm5470_vm15 = vweird.f32 %v12392_v33  ;;  %v10648_v43 = vld [vmem:[%s13599_s6 + $0x1e8] sm:$0xf0] }
 0xaa4   : > { %v5551_v60 = vadd.f32 %v16465_v39, %v5530_v26  ;;  %v5552_v58 = vadd.f32 %v16467_v48, %v5531_v5  ;;  %12393 = vrsqrt.f32 %v16506_v23  ;;  %vm5471_vm1 = vmor %vm5469_vm0, %vm5470_vm15  ;;  %v10651_v57 = vor.u32 %v11694_v30, %v10648_v43  ;;  %6500 = vmatpush.bf16.msrb.mxu1 %v10903_v50  ;;  %v11682_v50 = vld [vmem:[%s13599_s6 + $0x164] sm:$0xf0] }
 0xaa5   : > { %v5465_v40 = vmul.f32 %v12392_v33, %v5464_v51  ;;  %vm5479_vm9 = vweird.f32 %v16506_v23  ;;  %v10838_v43 = vld [vmem:[%s13599_s6 + $0x348] sm:$0xf] }
 0xaa6   : > { %v16509_v61 = vpack.c.bf16 %v5551_v60, %v5549_v46  ;;  %v16512_v62 = vpack.c.bf16 %v5552_v58, %v5550_v22  ;;  %v10614_v46 = vld [vmem:[%s13599_s6 + $0x188] sm:$0xf]  ;;  %6529 = vmatpush.bf16.msrb.mxu2 %v10651_v57 }
 0xaa7   : > { %v5466_v31 = vmul.f32 0.5, %v5465_v40  ;;  %v5403_v41 = vpop.xlane.xlu1 %5402  ;;  %v11690_v60 = vld [vmem:[%s13599_s6 + $0x1a4] sm:$0xf0] }
 0xaa8   : > { %v5413_v11 = vmul.f32 %v5403_v41, %v20260_v47  ;;  %6368 = vmatmul.bf16.gmra.mxu0 %v16509_v61  ;;  %6397 = vmatmul.bf16.gmra.mxu1 %v16512_v62  ;;  %v10615_v51 = vor.u32 %v11690_v60, %v10614_v46  ;;  %v10870_v40 = vld [vmem:[%s13599_s6 + $0x388] sm:$0xf]  ;;  %v11686_v41 = vld [vmem:[%s13599_s6 + $0x18c] sm:$0xf] }
 0xaa9   : > { %v5467_v6 = vsub.f32 1.5, %v5466_v31  ;;  %6426 = vmatmul.bf16.gmra.mxu2 %v16509_v61  ;;  %6455 = vmatmul.bf16.gmra.mxu3 %v16512_v62  ;;  %v11754_v31 = vld [vmem:[%s13599_s6 + $0x3a4] sm:$0xf0]  ;;  %v11742_v46 = vld [vmem:[%s13599_s6 + $0x34c] sm:$0xf] }
 0xaaa   : > { %v16518_v25 = vpop.eup %12393  ;;  %v16520_v45 = vadd.f32 1e-05, %v5413_v11  ;;  %6472 = vmatpush.bf16.msrb.mxu0 %v10615_v51  ;;  %v10840_v60 = vld [vmem:[%s13599_s6 + $0x368] sm:$0xf0] }
 0xaab   : > { %v5468_v35 = vmul.f32 %v12392_v33, %v5467_v6  ;;  %v5474_v14 = vmul.f32 %v16518_v25, %v16506_v23  ;;  %vm5480_vm2 = vweird.f32 %v16518_v25  ;;  %v10871_v6 = vor.u32 %v11754_v31, %v10870_v40  ;;  %v11674_v31 = vld [vmem:[%s13599_s6 + $0x124] sm:$0xf0] }
 0xaac   : > { %12395 = vrsqrt.f32 %v16520_v45  ;;  %vm5481_vm3 = vmor %vm5479_vm9, %vm5480_vm2  ;;  %v10583_v23 = vor.u32 %v11682_v50, %v10582_v38  ;;  %v11734_v38 = vld [vmem:[%s13599_s6 + $0x30c] sm:$0xf]  ;;  %vm5489_vm5 = vweird.f32 %v16520_v45 }
 0xaad   : > { %v5472_v37 = vsel %vm5471_vm1, %v12392_v33, %v5468_v35  ;;  %v5475_v15 = vmul.f32 %v16518_v25, %v5474_v14  ;;  %v10907_v33 = vor.u32 %v11758_v32, %v10904_v59  ;;  %v10616_v35 = vld [vmem:[%s13599_s6 + $0x1a8] sm:$0xf0]  ;;  %6501 = vmatpush.bf16.msrb.mxu1 %v10871_v6 }
 0xaae   : > { %v5511_v58 = vmul.f32 %v5472_v37, %v16327_v54  ;;  %v11750_v54 = vld [vmem:[%s13599_s6 + $0x38c] sm:$0xf]  ;;  %v10619_v56 = vor.u32 %v11686_v41, %v10616_v35  ;;  %v10806_v41 = vld [vmem:[%s13599_s6 + $0x308] sm:$0xf]  ;;  %6473 = vmatpush.bf16.msrb.mxu0 %v10583_v23 }
 0xaaf   : > { %v5476_v26 = vmul.f32 0.5, %v5475_v15  ;;  %v5406_v5 = vpop.xlane.xlu0 %5405  ;;  %6558 = vmatpush.bf16.msrb.mxu3 %v10907_v33  ;;  %v10872_v15 = vld [vmem:[%s13599_s6 + $0x3a8] sm:$0xf0] }
 0xab0   : > { %v5414_v22 = vmul.f32 %v5406_v5, %v20260_v47  ;;  %v5512_v47 = vmul.f32 %v5472_v37, %v16330_v34  ;;  %v10875_v30 = vor.u32 %v11750_v54, %v10872_v15  ;;  %v11746_v34 = vld [vmem:[%s13599_s6 + $0x364] sm:$0xf0]  ;;  %v5532_v37 = vmul.f32 %v16452_v28, %v5511_v58  ;;  %v11678_v59 = vld [vmem:[%s13599_s6 + $0x14c] sm:$0xf]  ;;  %6530 = vmatpush.bf16.msrb.mxu2 %v10619_v56 }
 0xab1   : > { %v5477_v11 = vsub.f32 1.5, %v5476_v26  ;;  %v10839_v32 = vor.u32 %v11746_v34, %v10838_v43  ;;  %v10584_v26 = vld [vmem:[%s13599_s6 + $0x168] sm:$0xf0]  ;;  %v10550_v58 = vld [vmem:[%s13599_s6 + $0x108] sm:$0xf] }
 0xab2   : > { %v16545_v14 = vpop.eup %12395  ;;  %v16548_v19 = vadd.f32 1e-05, %v5414_v22  ;;  %v10587_v33 = vor.u32 %v11678_v59, %v10584_v26  ;;  %v5533_v22 = vmul.f32 %v16454_v36, %v5512_v47  ;;  %v10551_v35 = vor.u32 %v11674_v31, %v10550_v58  ;;  %v11670_v54 = vld [vmem:[%s13599_s6 + $0x10c] sm:$0xf]  ;;  %v11666_v43 = vld [vmem:[%s13599_s6 + $0xe4] sm:$0xf0] }
 0xab3   : > { %v5478_v2 = vmul.f32 %v16518_v25, %v5477_v11  ;;  %v5484_v49 = vmul.f32 %v16545_v14, %v16520_v45  ;;  %6559 = vmatpush.bf16.msrb.mxu3 %v10875_v30  ;;  %v11738_v11 = vld [vmem:[%s13599_s6 + $0x324] sm:$0xf0]  ;;  %v10552_v56 = vld [vmem:[%s13599_s6 + $0x128] sm:$0xf0]  ;;  %6502 = vmatpush.bf16.msrb.mxu1 %v10839_v32  ;;  %vm5490_vm4 = vweird.f32 %v16545_v14  ;;  %v5553_v32 = vadd.f32 %v16465_v39, %v5532_v37 }
 0xab4   : > { %12397 = vrsqrt.f32 %v16548_v19  ;;  %6531 = vmatpush.bf16.msrb.mxu2 %v10587_v33  ;;  %v10555_v30 = vor.u32 %v11670_v54, %v10552_v56  ;;  %v10774_v34 = vld [vmem:[%s13599_s6 + $0x2c8] sm:$0xf]  ;;  %v5554_v59 = vadd.f32 %v16467_v48, %v5533_v22  ;;  %v11662_v33 = vld [vmem:[%s13599_s6 + $0xcc] sm:$0xf]  ;;  %6474 = vmatpush.bf16.msrb.mxu0 %v10551_v35  ;;  %vm16607_vm6 = vmor %vm5489_vm5, %vm5490_vm4  ;;  %vm5499_vm8 = vweird.f32 %v16548_v19 }
 0xab5   : > { %v5482_v5 = vsel %vm5481_vm3, %v16518_v25, %v5478_v2  ;;  %v5485_v57 = vmul.f32 %v16545_v14, %v5484_v49  ;;  %v10843_v25 = vor.u32 %v11742_v46, %v10840_v60  ;;  %v10518_v2 = vld [vmem:[%s13599_s6 + $0xc8] sm:$0xf]  ;;  %v10520_v46 = vld [vmem:[%s13599_s6 + $0xe8] sm:$0xf0] }
 0xab6   : > { %v5513_v51 = vmul.f32 %v5482_v5, %v16338_v42  ;;  %v5514_v40 = vmul.f32 %v5482_v5, %v16341_v8  ;;  %v10807_v42 = vor.u32 %v11738_v11, %v10806_v41  ;;  %v10808_v8 = vld [vmem:[%s13599_s6 + $0x328] sm:$0xf0]  ;;  %v10519_v45 = vor.u32 %v11666_v43, %v10518_v2  ;;  %v10486_v41 = vld [vmem:[%s13599_s6 + $0x88] sm:$0xf] }
 0xab7   : > { %v5486_v6 = vmul.f32 0.5, %v5485_v57  ;;  %6560 = vmatpush.bf16.msrb.mxu3 %v10843_v25  ;;  %v10811_v50 = vor.u32 %v11734_v38, %v10808_v8  ;;  %v11730_v57 = vld [vmem:[%s13599_s6 + $0x2e4] sm:$0xf0]  ;;  %v11726_v37 = vld [vmem:[%s13599_s6 + $0x2cc] sm:$0xf]  ;;  %v10523_v35 = vor.u32 %v11662_v33, %v10520_v46 }
 0xab8   : > { %v5534_v47 = vmul.f32 %v16452_v28, %v5513_v51  ;;  %v5535_v15 = vmul.f32 %v16454_v36, %v5514_v40  ;;  %v10776_v22 = vld [vmem:[%s13599_s6 + $0x2e8] sm:$0xf0]  ;;  %6503 = vmatpush.bf16.msrb.mxu1 %v10807_v42  ;;  %v10775_v31 = vor.u32 %v11730_v57, %v10774_v34  ;;  %v11658_v11 = vld [vmem:[%s13599_s6 + $0xa4] sm:$0xf0]  ;;  %6532 = vmatpush.bf16.msrb.mxu2 %v10555_v30 }
 0xab9   : > { %v5487_v49 = vsub.f32 1.5, %v5486_v6  ;;  %v10779_v54 = vor.u32 %v11726_v37, %v10776_v22  ;;  %v10742_v56 = vld [vmem:[%s13599_s6 + $0x288] sm:$0xf]  ;;  %v10488_v42 = vld [vmem:[%s13599_s6 + $0xa8] sm:$0xf0]  ;;  %6475 = vmatpush.bf16.msrb.mxu0 %v10519_v45  ;;  %v10487_v30 = vor.u32 %v11658_v11, %v10486_v41 }
 0xaba   : > { %v16586_v23 = vpop.eup %12397  ;;  %v5555_v26 = vadd.f32 %v16465_v39, %v5534_v47  ;;  %v5556_v5 = vadd.f32 %v16467_v48, %v5535_v15  ;;  %v11722_v47 = vld [vmem:[%s13599_s6 + $0x2a4] sm:$0xf0]  ;;  %v11654_v15 = vld [vmem:[%s13599_s6 + $0x8c] sm:$0xf] }
 0xabb   : > { %v5488_v60 = vmul.f32 %v16545_v14, %v5487_v49  ;;  %v5494_v58 = vmul.f32 %v16586_v23, %v16548_v19  ;;  %6561 = vmatpush.bf16.msrb.mxu3 %v10811_v50  ;;  %v11718_v38 = vld [vmem:[%s13599_s6 + $0x28c] sm:$0xf]  ;;  %v10743_v50 = vor.u32 %v11722_v47, %v10742_v56  ;;  %v10454_v43 = vld [vmem:[%s13599_s6 + $0x48] sm:$0xf]  ;;  %vm5500_vm7 = vweird.f32 %v16586_v23 }
 0xabc   : > { %v16601_v51 = vpack.c.bf16 %v5555_v26, %v5553_v32  ;;  %v16603_v40 = vpack.c.bf16 %v5556_v5, %v5554_v59  ;;  %v10744_v8 = vld [vmem:[%s13599_s6 + $0x2a8] sm:$0xf0]  ;;  %6504 = vmatpush.bf16.msrb.mxu1 %v10775_v31  ;;  %v11650_v34 = vld [vmem:[%s13599_s6 + $0x64] sm:$0xf0]  ;;  %6533 = vmatpush.bf16.msrb.mxu2 %v10523_v35  ;;  %vm5501_vm10 = vmor %vm5499_vm8, %vm5500_vm7 }
 0xabd   : > { %v5495_v6 = vmul.f32 %v16586_v23, %v5494_v58  ;;  %v5492_v2 = vsel %vm16607_vm6, %v16545_v14, %v5488_v60  ;;  %v10710_v32 = vld [vmem:[%s13599_s6 + $0x248] sm:$0xf]  ;;  %v10491_v14 = vor.u32 %v11654_v15, %v10488_v42  ;;  %v10747_v26 = vor.u32 %v11718_v38, %v10744_v8  ;;  %v11646_v57 = vld [vmem:[%s13599_s6 + $0x4c] sm:$0xf]  ;;  %6476 = vmatpush.bf16.msrb.mxu0 %v10487_v30 }
 0xabe   : > { %20265 = vst [vmem:[#allocation67_spill] sm:$0xff] %v16603_v40  ;;  %6373 = vmatmul.bf16.gmra.mxu0 %v16601_v51  ;;  %6402 = vmatmul.bf16.gmra.mxu1 %v16603_v40  ;;  %v11714_v5 = vld [vmem:[%s13599_s6 + $0x264] sm:$0xf0]  ;;  %v5515_v33 = vmul.f32 %v5492_v2, %v16349_v13  ;;  %v5516_v46 = vmul.f32 %v5492_v2, %v16352_v29  ;;  %v10456_v60 = vld [vmem:[%s13599_s6 + $0x68] sm:$0xf0] }
 0xabf   : > { %v5496_v49 = vmul.f32 0.5, %v5495_v6  ;;  %6431 = vmatmul.bf16.gmra.mxu2 %v16601_v51  ;;  %6460 = vmatmul.bf16.gmra.mxu3 %v16603_v40  ;;  %v11710_v58 = vld [vmem:[%s13599_s6 + $0x24c] sm:$0xf]  ;;  %v10455_v25 = vor.u32 %v11650_v34, %v10454_v43  ;;  %v10711_v45 = vor.u32 %v11714_v5, %v10710_v32  ;;  %v10422_v13 = vld [vmem:[%s13599_s6 + $0x8] sm:$0xf]  ;;  %v10459_v41 = vor.u32 %v11646_v57, %v10456_v60 }
 0xac0   : > { %6562 = vmatpush.bf16.msrb.mxu3 %v10779_v54  ;;  %v10712_v37 = vld [vmem:[%s13599_s6 + $0x268] sm:$0xf0]  ;;  %6505 = vmatpush.bf16.msrb.mxu1 %v10743_v50  ;;  %v11642_v29 = vld [vmem:[%s13599_s6 + $0x24] sm:$0xf0]  ;;  %v5536_v19 = vmul.f32 %v16452_v28, %v5515_v33  ;;  %v5537_v56 = vmul.f32 %v16454_v36, %v5516_v46  ;;  %v11695_v5 = vld [vmem:[%s13599_s6 + $0x1d4] sm:$0xf] }
 0xac1   : > { %v5497_v59 = vsub.f32 1.5, %v5496_v49  ;;  %6534 = vmatpush.bf16.msrb.mxu2 %v10491_v14  ;;  %v10715_v11 = vor.u32 %v11710_v58, %v10712_v37  ;;  %v10678_v6 = vld [vmem:[%s13599_s6 + $0x208] sm:$0xf]  ;;  %v11638_v54 = vld [vmem:[%s13599_s6 + $0xc] sm:$0xf]  ;;  %v10423_v2 = vor.u32 %v11642_v29, %v10422_v13  ;;  %6477 = vmatpush.bf16.msrb.mxu0 %v10455_v25 }
 0xac2   : > { %v11706_v35 = vld [vmem:[%s13599_s6 + $0x224] sm:$0xf0]  ;;  %v10424_v42 = vld [vmem:[%s13599_s6 + $0x28] sm:$0xf0]  ;;  %v5557_v34 = vadd.f32 %v16465_v39, %v5536_v19  ;;  %v10656_v57 = vld [vmem:[%s13599_s6 + $0x1f0] sm:$0xf0] }
 0xac3   : > { %v5498_v22 = vmul.f32 %v16586_v23, %v5497_v59  ;;  %v11702_v38 = vld [vmem:[%s13599_s6 + $0x20c] sm:$0xf]  ;;  %v10679_v30 = vor.u32 %v11706_v35, %v10678_v6  ;;  %v10427_v50 = vor.u32 %v11638_v54, %v10424_v42  ;;  %v10910_v59 = vld [vmem:[%s13599_s6 + $0x3d0] sm:$0xf]  ;;  %v10659_v46 = vor.u32 %v11695_v5, %v10656_v57  ;;  %v11759_v60 = vld [vmem:[%s13599_s6 + $0x3d4] sm:$0xf] }
 0xac4   : > { %6563 = vmatpush.bf16.msrb.mxu3 %v10747_v26  ;;  %v10680_v8 = vld [vmem:[%s13599_s6 + $0x228] sm:$0xf0]  ;;  %6506 = vmatpush.bf16.msrb.mxu1 %v10711_v45  ;;  %v11763_v26 = vld [vmem:[%s13599_s6 + $0x3ec] sm:$0xf0]  ;;  %v10912_v58 = vld [vmem:[%s13599_s6 + $0x3f0] sm:$0xf0] }
 0xac5   : > { %v5502_v31 = vsel %vm5501_vm10, %v16586_v23, %v5498_v22  ;;  %6535 = vmatpush.bf16.msrb.mxu2 %v10459_v41  ;;  %v10683_v43 = vor.u32 %v11702_v38, %v10680_v8  ;;  %6478 = vmatpush.bf16.msrb.mxu0 %v10423_v2  ;;  %v10911_v33 = vor.u32 %v11763_v26, %v10910_v59  ;;  %v10622_v37 = vld [vmem:[%s13599_s6 + $0x190] sm:$0xf]  ;;  %v11687_v41 = vld [vmem:[%s13599_s6 + $0x194] sm:$0xf] }
 0xac6   : > { %v5517_v47 = vmul.f32 %v5502_v31, %v16360_v52  ;;  %v5518_v15 = vmul.f32 %v5502_v31, %v16363_v4  ;;  %v5558_v52 = vadd.f32 %v16467_v48, %v5537_v56  ;;  %v10915_v22 = vor.u32 %v11759_v60, %v10912_v58  ;;  %v11691_v25 = vld [vmem:[%s13599_s6 + $0x1ac] sm:$0xf0]  ;;  %v11751_v6 = vld [vmem:[%s13599_s6 + $0x394] sm:$0xf] }
 0xac7   : > { %v10878_v45 = vld [vmem:[%s13599_s6 + $0x390] sm:$0xf]  ;;  %v10623_v29 = vor.u32 %v11691_v25, %v10622_v37  ;;  %v10880_v54 = vld [vmem:[%s13599_s6 + $0x3b0] sm:$0xf0] }
 0xac8   : > { %v5538_v23 = vmul.f32 %v16452_v28, %v5517_v47  ;;  %v5539_v49 = vmul.f32 %v16454_v36, %v5518_v15  ;;  %6564 = vmatpush.bf16.msrb.mxu3 %v10715_v11  ;;  %6507 = vmatpush.bf16.msrb.mxu1 %v10679_v30  ;;  %v11755_v13 = vld [vmem:[%s13599_s6 + $0x3ac] sm:$0xf0]  ;;  %v10624_v11 = vld [vmem:[%s13599_s6 + $0x1b0] sm:$0xf0]  ;;  %v10883_v47 = vor.u32 %v11751_v6, %v10880_v54 }
 0xac9   : > { %6536 = vmatpush.bf16.msrb.mxu2 %v10427_v50  ;;  %v10879_v31 = vor.u32 %v11755_v13, %v10878_v45  ;;  %v10627_v35 = vor.u32 %v11687_v41, %v10624_v11  ;;  %v10590_v19 = vld [vmem:[%s13599_s6 + $0x150] sm:$0xf]  ;;  %v11679_v38 = vld [vmem:[%s13599_s6 + $0x154] sm:$0xf] }
 0xaca   : > { %v5559_v4 = vadd.f32 %v16465_v39, %v5538_v23  ;;  %v5560_v32 = vadd.f32 %v16467_v48, %v5539_v49  ;;  %v10654_v39 = vld [vmem:[%s13599_s6 + $0x1d0] sm:$0xf]  ;;  %v10592_v2 = vld [vmem:[%s13599_s6 + $0x170] sm:$0xf0] }
 0xacb   : > { %v11699_v48 = vld [vmem:[%s13599_s6 + $0x1ec] sm:$0xf0]  ;;  %v11743_v23 = vld [vmem:[%s13599_s6 + $0x354] sm:$0xf]  ;;  %v10595_v50 = vor.u32 %v11679_v38, %v10592_v2 }
 0xacc   : > { %v16659_v28 = vpack.c.bf16 %v5559_v4, %v5557_v34  ;;  %v16661_v36 = vpack.c.bf16 %v5560_v32, %v5558_v52  ;;  %6565 = vmatpush.bf16.msrb.mxu3 %v10683_v43  ;;  %v10655_v14 = vor.u32 %v11699_v48, %v10654_v39  ;;  %6616 = vmatpush.bf16.msra.mxu1 %v10911_v33  ;;  %v11683_v56 = vld [vmem:[%s13599_s6 + $0x16c] sm:$0xf0]  ;;  %v10848_v49 = vld [vmem:[%s13599_s6 + $0x370] sm:$0xf0] }
 0xacd   : > { %6645 = vmatpush.bf16.msra.mxu2 %v10659_v46  ;;  %v10846_v15 = vld [vmem:[%s13599_s6 + $0x350] sm:$0xf]  ;;  %v10591_v8 = vor.u32 %v11683_v56, %v10590_v19  ;;  %v10851_v43 = vor.u32 %v11743_v23, %v10848_v49  ;;  %v11671_v39 = vld [vmem:[%s13599_s6 + $0x114] sm:$0xf] }
 0xace   : > { %20268 = vst [vmem:[#allocation66_spill] sm:$0xff] %v16659_v28  ;;  %6378 = vmatmul.bf16.gmra.mxu0 %v16659_v28  ;;  %6407 = vmatmul.bf16.gmra.mxu1 %v16661_v36  ;;  %v11747_v42 = vld [vmem:[%s13599_s6 + $0x36c] sm:$0xf0]  ;;  %v10560_v48 = vld [vmem:[%s13599_s6 + $0x130] sm:$0xf0] }
 0xacf   : > { %20269 = vst [vmem:[#allocation65_spill] sm:$0xff] %v16661_v36  ;;  %6436 = vmatmul.bf16.gmra.mxu2 %v16659_v28  ;;  %6465 = vmatmul.bf16.gmra.mxu3 %v16661_v36  ;;  %v10847_v30 = vor.u32 %v11747_v42, %v10846_v15  ;;  %v10558_v34 = vld [vmem:[%s13599_s6 + $0x110] sm:$0xf]  ;;  %v11735_v59 = vld [vmem:[%s13599_s6 + $0x314] sm:$0xf]  ;;  %v10563_v57 = vor.u32 %v11671_v39, %v10560_v48 }
 0xad0   : > { %6587 = vmatpush.bf16.msra.mxu0 %v10655_v14  ;;  %6674 = vmatpush.bf16.msra.mxu3 %v10915_v22  ;;  %v11675_v52 = vld [vmem:[%s13599_s6 + $0x12c] sm:$0xf0]  ;;  %v10816_v14 = vld [vmem:[%s13599_s6 + $0x330] sm:$0xf0] }
 0xad1   : > { %6617 = vmatpush.bf16.msra.mxu1 %v10879_v31  ;;  %6646 = vmatpush.bf16.msra.mxu2 %v10627_v35  ;;  %v10814_v4 = vld [vmem:[%s13599_s6 + $0x310] sm:$0xf]  ;;  %v10559_v26 = vor.u32 %v11675_v52, %v10558_v34  ;;  %v10819_v33 = vor.u32 %v11735_v59, %v10816_v14  ;;  %v11663_v25 = vld [vmem:[%s13599_s6 + $0xd4] sm:$0xf] }
 0xad2   : > { %v11739_v32 = vld [vmem:[%s13599_s6 + $0x32c] sm:$0xf0]  ;;  %v10528_v45 = vld [vmem:[%s13599_s6 + $0xf0] sm:$0xf0] }
 0xad3   : > { %v10815_v5 = vor.u32 %v11739_v32, %v10814_v4  ;;  %v10526_v46 = vld [vmem:[%s13599_s6 + $0xd0] sm:$0xf]  ;;  %v11727_v31 = vld [vmem:[%s13599_s6 + $0x2d4] sm:$0xf] }
 0xad4   : > { %6588 = vmatpush.bf16.msra.mxu0 %v10623_v29  ;;  %6675 = vmatpush.bf16.msra.mxu3 %v10883_v47  ;;  %v11667_v60 = vld [vmem:[%s13599_s6 + $0xec] sm:$0xf0]  ;;  %v10531_v29 = vor.u32 %v11663_v25, %v10528_v45  ;;  %v10784_v41 = vld [vmem:[%s13599_s6 + $0x2f0] sm:$0xf0] }
 0xad5   : > { %6618 = vmatpush.bf16.msra.mxu1 %v10847_v30  ;;  %6647 = vmatpush.bf16.msra.mxu2 %v10595_v50  ;;  %v10782_v58 = vld [vmem:[%s13599_s6 + $0x2d0] sm:$0xf]  ;;  %v10527_v37 = vor.u32 %v11667_v60, %v10526_v46  ;;  %v10787_v6 = vor.u32 %v11727_v31, %v10784_v41  ;;  %v11655_v56 = vld [vmem:[%s13599_s6 + $0x94] sm:$0xf] }
 0xad6   : > { %v11731_v22 = vld [vmem:[%s13599_s6 + $0x2ec] sm:$0xf0]  ;;  %v10496_v47 = vld [vmem:[%s13599_s6 + $0xb0] sm:$0xf0] }
 0xad7   : > { %v10783_v13 = vor.u32 %v11731_v22, %v10782_v58  ;;  %v10494_v11 = vld [vmem:[%s13599_s6 + $0x90] sm:$0xf]  ;;  %v11719_v15 = vld [vmem:[%s13599_s6 + $0x294] sm:$0xf]  ;;  %v10499_v49 = vor.u32 %v11655_v56, %v10496_v47 }
 0xad8   : > { %6589 = vmatpush.bf16.msra.mxu0 %v10591_v8  ;;  %6676 = vmatpush.bf16.msra.mxu3 %v10851_v43  ;;  %v11659_v35 = vld [vmem:[%s13599_s6 + $0xac] sm:$0xf0]  ;;  %v10752_v8 = vld [vmem:[%s13599_s6 + $0x2b0] sm:$0xf0] }
 0xad9   : > { %6619 = vmatpush.bf16.msra.mxu1 %v10815_v5  ;;  %6648 = vmatpush.bf16.msra.mxu2 %v10563_v57  ;;  %v10750_v54 = vld [vmem:[%s13599_s6 + $0x290] sm:$0xf]  ;;  %v10495_v42 = vor.u32 %v11659_v35, %v10494_v11  ;;  %v10755_v30 = vor.u32 %v11719_v15, %v10752_v8  ;;  %v11647_v34 = vld [vmem:[%s13599_s6 + $0x54] sm:$0xf] }
 0xada   : > { %v11723_v19 = vld [vmem:[%s13599_s6 + $0x2ac] sm:$0xf0]  ;;  %v10464_v52 = vld [vmem:[%s13599_s6 + $0x70] sm:$0xf0] }
 0xadb   : > { %v10751_v38 = vor.u32 %v11723_v19, %v10750_v54  ;;  %v10462_v2 = vld [vmem:[%s13599_s6 + $0x50] sm:$0xf]  ;;  %v11711_v4 = vld [vmem:[%s13599_s6 + $0x254] sm:$0xf]  ;;  %v10467_v59 = vor.u32 %v11647_v34, %v10464_v52 }
 0xadc   : > { %6590 = vmatpush.bf16.msra.mxu0 %v10559_v26  ;;  %6677 = vmatpush.bf16.msra.mxu3 %v10819_v33  ;;  %v11651_v23 = vld [vmem:[%s13599_s6 + $0x6c] sm:$0xf0]  ;;  %v10720_v32 = vld [vmem:[%s13599_s6 + $0x270] sm:$0xf0]  ;;  %v16740_v26 = vld [vmem:[%s13606_s15] sm:$0xff] }
 0xadd   : > { %6620 = vmatpush.bf16.msra.mxu1 %v10783_v13  ;;  %6649 = vmatpush.bf16.msra.mxu2 %v10531_v29  ;;  %v10718_v50 = vld [vmem:[%s13599_s6 + $0x250] sm:$0xf]  ;;  %v10463_v39 = vor.u32 %v11651_v23, %v10462_v2  ;;  %v10723_v14 = vor.u32 %v11711_v4, %v10720_v32  ;;  %v16743_v5 = vperm.slane %v16740_v26, 0  ;;  %v11639_v13 = vld [vmem:[%s13599_s6 + $0x14] sm:$0xf]  ;;  %v16757_v54 = vperm.slane %v16740_v26, 1 }
 0xade   : > { %6479 = vmatmul.bf16.vlgmr.msrb.gmra.mxu0 %v16481_v7  ;;  %6508 = vmatmul.bf16.vlgmr.msrb.gmra.mxu1 %v16485_v53  ;;  %v11715_v43 = vld [vmem:[%s13599_s6 + $0x26c] sm:$0xf0]  ;;  %v10432_v29 = vld [vmem:[%s13599_s6 + $0x30] sm:$0xf0] }
 0xadf   : > { %6537 = vmatmul.bf16.vlgmr.msrb.gmra.mxu2 %v16481_v7  ;;  %6566 = vmatmul.bf16.vlgmr.msrb.gmra.mxu3 %v16485_v53  ;;  %v10719_v48 = vor.u32 %v11715_v43, %v10718_v50  ;;  %v10430_v58 = vld [vmem:[%s13599_s6 + $0x10] sm:$0xf]  ;;  %v10435_v41 = vor.u32 %v11639_v13, %v10432_v29  ;;  %v11703_v11 = vld [vmem:[%s13599_s6 + $0x214] sm:$0xf]  ;;  %v11700_v13 = vld [vmem:[%s13599_s6 + $0x1f4] sm:$0xf0] }
 0xae0   : > { %6591 = vmatpush.bf16.msra.mxu0 %v10527_v37  ;;  %6678 = vmatpush.bf16.msra.mxu3 %v10787_v6  ;;  %v11643_v37 = vld [vmem:[%s13599_s6 + $0x2c] sm:$0xf0]  ;;  %v10688_v6 = vld [vmem:[%s13599_s6 + $0x230] sm:$0xf0] }
 0xae1   : > { %6621 = vmatpush.bf16.msra.mxu1 %v10751_v38  ;;  %6650 = vmatpush.bf16.msra.mxu2 %v10499_v49  ;;  %v10686_v22 = vld [vmem:[%s13599_s6 + $0x210] sm:$0xf]  ;;  %v10431_v25 = vor.u32 %v11643_v37, %v10430_v58  ;;  %v10691_v35 = vor.u32 %v11703_v11, %v10688_v6  ;;  %v11764_v11 = vld [vmem:[%s13599_s6 + $0x3f4] sm:$0xf0] }
 0xae2   : > { %v11707_v45 = vld [vmem:[%s13599_s6 + $0x22c] sm:$0xf0] }
 0xae3   : > { %v10687_v31 = vor.u32 %v11707_v45, %v10686_v22  ;;  %v10662_v45 = vld [vmem:[%s13599_s6 + $0x1d8] sm:$0xf] }
 0xae4   : > { %6592 = vmatpush.bf16.msra.mxu0 %v10495_v42  ;;  %6679 = vmatpush.bf16.msra.mxu3 %v10755_v30  ;;  %v10663_v6 = vor.u32 %v11700_v13, %v10662_v45 }
 0xae5   : > { %6622 = vmatpush.bf16.msra.mxu1 %v10719_v48  ;;  %6651 = vmatpush.bf16.msra.mxu2 %v10467_v59 }
 0xae8   : > { %6593 = vmatpush.bf16.msra.mxu0 %v10463_v39  ;;  %6680 = vmatpush.bf16.msra.mxu3 %v10723_v14 }
 0xae9   : > { %6623 = vmatpush.bf16.msra.mxu1 %v10687_v31  ;;  %6652 = vmatpush.bf16.msra.mxu2 %v10435_v41  ;;  %v10918_v41 = vld [vmem:[%s13599_s6 + $0x3d8] sm:$0xf] }
 0xaec   : > { %6594 = vmatpush.bf16.msra.mxu0 %v10431_v25  ;;  %6681 = vmatpush.bf16.msra.mxu3 %v10691_v35  ;;  %v11696_v35 = vld [vmem:[%s13599_s6 + $0x1dc] sm:$0xf] }
 0xaee   : > { %6484 = vmatmul.bf16.gmra.mxu0 %v16509_v61  ;;  %6513 = vmatmul.bf16.gmra.mxu1 %v16512_v62 }
 0xaef   : > { %6542 = vmatmul.bf16.gmra.mxu2 %v16509_v61  ;;  %6571 = vmatmul.bf16.gmra.mxu3 %v16512_v62 }
 0xaf0   : > { %6703 = vmatpush.bf16.msrb.mxu0 %v10663_v6  ;;  %v10630_v6 = vld [vmem:[%s13599_s6 + $0x198] sm:$0xf] }
 0xafe   : > { %6489 = vmatmul.bf16.gmra.mxu0 %v16601_v51  ;;  %6518 = vmatmul.bf16.gmra.mxu1 %v16603_v40 }
 0xaff   : > { %6547 = vmatmul.bf16.gmra.mxu2 %v16601_v51  ;;  %6576 = vmatmul.bf16.gmra.mxu3 %v16603_v40 }
 0xb09   : > { %v6364_v57 = vpop.f32.mrf.mxu0 }
 0xb0a   : > { %v6365_v33 = vadd.f32 %v6364_v57, %v16743_v5 }
 0xb0e   : > { %6494 = vmatmul.bf16.gmra.mxu0 %v16659_v28  ;;  %6523 = vmatmul.bf16.gmra.mxu1 %v16661_v36 }
 0xb0f   : > { %6552 = vmatmul.bf16.gmra.mxu2 %v16659_v28  ;;  %6581 = vmatmul.bf16.gmra.mxu3 %v16661_v36  ;;  %v6393_v46 = vpop.f32.mrf.mxu1 }
 0xb10   : > { %v16746_v60 = vadd.f32 %v6393_v46, %v6365_v33 }
 0xb11   : > { %v6422_v19 = vpop.f32.mrf.mxu2  ;;  %v6451_v47 = vpop.f32.mrf.mxu3 }
 0xb12   : > { %v6423_v56 = vadd.f32 %v6422_v19, %v16757_v54  ;;  %v6366_v42 = vpop.f32.mrf.mxu0  ;;  %v10924_v57 = vmul.f32 -1.702, %v16746_v60 }
 0xb13   : > { %v6367_v14 = vadd.f32 %v6366_v42, %v16743_v5  ;;  %v10919_v42 = vor.u32 %v11764_v11, %v10918_v41 }
 0xb14   : > { %v16763_v15 = vadd.f32 %v6451_v47, %v6423_v56  ;;  %v6947_v29 = vmul.f32 1.442695, %v10924_v57  ;;  %v10664_v56 = vld [vmem:[%s13599_s6 + $0x1f8] sm:$0xf0] }
 0xb15   : > { %6732 = vmatpush.bf16.msrb.mxu1 %v10919_v42  ;;  %v11756_v42 = vld [vmem:[%s13599_s6 + $0x3b4] sm:$0xf0] }
 0xb16   : > { %v10925_v19 = vmul.f32 -1.702, %v16763_v15  ;;  %12399 = vpow2.f32 %v6947_v29 }
 0xb17   : > { %v6395_v38 = vpop.f32.mrf.mxu1 }
 0xb18   : > { %v16792_v22 = vadd.f32 %v6395_v38, %v6367_v14  ;;  %v10667_v38 = vor.u32 %v11696_v35, %v10664_v56  ;;  %v11692_v35 = vld [vmem:[%s13599_s6 + $0x1b4] sm:$0xf0] }
 0xb19   : > { %v6424_v8 = vpop.f32.mrf.mxu2  ;;  %v6453_v2 = vpop.f32.mrf.mxu3  ;;  %v10631_v56 = vor.u32 %v11692_v35, %v10630_v6 }
 0xb1a   : > { %v6425_v33 = vadd.f32 %v6424_v8, %v16757_v54  ;;  %v10932_v47 = vmul.f32 -1.702, %v16792_v22  ;;  %v11760_v8 = vld [vmem:[%s13599_s6 + $0x3dc] sm:$0xf]  ;;  %6761 = vmatpush.bf16.msrb.mxu2 %v10667_v38 }
 0xb1b   : > { %6704 = vmatpush.bf16.msrb.mxu0 %v10631_v56 }
 0xb1c   : > { %v16798_v31 = vadd.f32 %v6453_v2, %v6425_v33  ;;  %v12400_v57 = vpop.eup %12399 }
 0xb1e   : > { %6595 = vmatmul.bf16.vlgmr.msra.gmra.mxu0 %v16481_v7  ;;  %6624 = vmatmul.bf16.vlgmr.msra.gmra.mxu1 %v16485_v53 }
 0xb1f   : > { %6653 = vmatmul.bf16.vlgmr.msra.gmra.mxu2 %v16481_v7  ;;  %6682 = vmatmul.bf16.vlgmr.msra.gmra.mxu3 %v16485_v53 }
 0xb25   : > { %v6369_v23 = vpop.f32.mrf.mxu0  ;;  %v6398_v30 = vpop.f32.mrf.mxu1 }
 0xb26   : > { %v6370_v49 = vadd.f32 %v6369_v23, %v16743_v5  ;;  %v10920_v23 = vld [vmem:[%s13599_s6 + $0x3f8] sm:$0xf0] }
 0xb27   : > { %v10923_v2 = vor.u32 %v11760_v8, %v10920_v23 }
 0xb28   : > { %v16770_v50 = vadd.f32 %v6398_v30, %v6370_v49  ;;  %v10933_v49 = vmul.f32 -1.702, %v16798_v31 }
 0xb29   : > { %6790 = vmatpush.bf16.msrb.mxu3 %v10923_v2 }
 0xb2a   : > { %v10940_v45 = vmul.f32 -1.702, %v16770_v50 }
 0xb2c   : > { %v6427_v43 = vpop.f32.mrf.mxu2  ;;  %v6456_v52 = vpop.f32.mrf.mxu3  ;;  %v6979_v11 = vmul.f32 1.442695, %v10940_v45 }
 0xb2d   : > { %v6428_v34 = vadd.f32 %v6427_v43, %v16757_v54  ;;  %v16776_v32 = vpop.f32.mrf.mxu0  ;;  %v16778_v39 = vpop.f32.mrf.mxu1  ;;  %v6949_v43 = vmul.f32 1.442695, %v10925_v19 }
 0xb2e   : > { %6600 = vmatmul.bf16.gmra.mxu0 %v16509_v61  ;;  %6629 = vmatmul.bf16.gmra.mxu1 %v16512_v62  ;;  %v6372_v2 = vadd.f32 %v16776_v32, %v16743_v5  ;;  %v10854_v32 = vld [vmem:[%s13599_s6 + $0x358] sm:$0xf] }
 0xb2f   : > { %6658 = vmatmul.bf16.gmra.mxu2 %v16509_v61  ;;  %6687 = vmatmul.bf16.gmra.mxu3 %v16512_v62  ;;  %v16774_v4 = vadd.f32 %v6456_v52, %v6428_v34  ;;  %v6963_v34 = vmul.f32 1.442695, %v10932_v47  ;;  %12401 = vpow2.f32 %v6949_v43  ;;  %v10886_v47 = vld [vmem:[%s13599_s6 + $0x398] sm:$0xf] }
 0xb30   : > { %v10887_v23 = vor.u32 %v11756_v42, %v10886_v47  ;;  %v11680_v42 = vld [vmem:[%s13599_s6 + $0x15c] sm:$0xf] }
 0xb31   : > { %12403 = vpow2.f32 %v6963_v34  ;;  %v11752_v34 = vld [vmem:[%s13599_s6 + $0x39c] sm:$0xf]  ;;  %v10941_v35 = vmul.f32 -1.702, %v16774_v4 }
 0xb32   : > { %6733 = vmatpush.bf16.msrb.mxu1 %v10887_v23  ;;  %v16857_v23 = vadd.f32 %v16778_v39, %v6372_v2  ;;  %v10566_v39 = vld [vmem:[%s13599_s6 + $0x118] sm:$0xf] }
 0xb33   : > { %v11676_v2 = vld [vmem:[%s13599_s6 + $0x134] sm:$0xf0] }
 0xb34   : > { %v16783_v48 = vpop.f32.mrf.mxu2  ;;  %v16794_v25 = vpop.f32.mrf.mxu3 }
 0xb35   : > { %v12402_v29 = vpop.eup %12401  ;;  %v6430_v45 = vadd.f32 %v16783_v48, %v16757_v54 }
 0xb36   : > { %v16830_v8 = vadd.f32 1.0, %v12402_v29  ;;  %v11684_v29 = vld [vmem:[%s13599_s6 + $0x174] sm:$0xf0] }
 0xb37   : > { %v12404_v41 = vpop.eup %12403 }
 0xb38   : > { %vm7159_vm14 = vweird.f32 %v16830_v8 }
 0xb3b   : > { %v6374_v59 = vpop.f32.mrf.mxu0  ;;  %v6403_v58 = vpop.f32.mrf.mxu1 }
 0xb3c   : > { %v6375_v46 = vadd.f32 %v6374_v59, %v16743_v5  ;;  %v6965_v59 = vmul.f32 1.442695, %v10933_v49  ;;  %v11688_v49 = vld [vmem:[%s13599_s6 + $0x19c] sm:$0xf] }
 0xb3e   : > { %6605 = vmatmul.bf16.gmra.mxu0 %v16601_v51  ;;  %6634 = vmatmul.bf16.gmra.mxu1 %v16603_v40  ;;  %v16790_v37 = vadd.f32 %v6403_v58, %v6375_v46  ;;  %12405 = vpow2.f32 %v6965_v59  ;;  %v16818_v58 = vadd.f32 1.0, %v12400_v57  ;;  %v10598_v59 = vld [vmem:[%s13599_s6 + $0x158] sm:$0xf] }
 0xb3f   : > { %6663 = vmatmul.bf16.gmra.mxu2 %v16601_v51  ;;  %6692 = vmatmul.bf16.gmra.mxu3 %v16603_v40  ;;  %v10599_v47 = vor.u32 %v11684_v29, %v10598_v59  ;;  %v16864_v29 = vadd.f32 %v16794_v25, %v6430_v45  ;;  %v11672_v25 = vld [vmem:[%s13599_s6 + $0x11c] sm:$0xf]  ;;  %v11652_v40 = vld [vmem:[%s13599_s6 + $0x74] sm:$0xf0] }
 0xb40   : > { %12407 = vrcp.f32 %v16818_v58  ;;  %vm7144_vm11 = vweird.f32 %v16818_v58 }
 0xb41   : > { %12409 = vpow2.f32 %v6979_v11  ;;  %v11744_v11 = vld [vmem:[%s13599_s6 + $0x35c] sm:$0xf]  ;;  %6705 = vmatpush.bf16.msrb.mxu0 %v10599_v47 }
 0xb42   : > { %v6432_v30 = vpop.f32.mrf.mxu2  ;;  %v6461_v14 = vpop.f32.mrf.mxu3  ;;  %12411 = vrcp.f32 %v16830_v8 }
 0xb43   : > { %v6433_v52 = vadd.f32 %v6432_v30, %v16757_v54  ;;  %v16816_v46 = vpop.f32.mrf.mxu0  ;;  %v16821_v13 = vpop.f32.mrf.mxu1  ;;  %v10632_v30 = vld [vmem:[%s13599_s6 + $0x1b8] sm:$0xf0] }
 0xb44   : > { %v12406_v19 = vpop.eup %12405  ;;  %v10635_v43 = vor.u32 %v11688_v49, %v10632_v30  ;;  %v10600_v30 = vld [vmem:[%s13599_s6 + $0x178] sm:$0xf0] }
 0xb45   : > { %v16813_v33 = vadd.f32 %v6461_v14, %v6433_v52  ;;  %v10888_v52 = vld [vmem:[%s13599_s6 + $0x3b8] sm:$0xf0]  ;;  %v16839_v14 = vadd.f32 1.0, %v12404_v41  ;;  %v16841_v57 = vadd.f32 1.0, %v12406_v19  ;;  %v11748_v41 = vld [vmem:[%s13599_s6 + $0x374] sm:$0xf0] }
 0xb46   : > { %6762 = vmatpush.bf16.msrb.mxu2 %v10635_v43  ;;  %v10891_v56 = vor.u32 %v11752_v34, %v10888_v52  ;;  %v16850_v49 = vpop.eup %12407  ;;  %v10855_v19 = vor.u32 %v11748_v41, %v10854_v32  ;;  %v10603_v43 = vor.u32 %v11680_v42, %v10600_v30  ;;  %v10856_v34 = vld [vmem:[%s13599_s6 + $0x378] sm:$0xf0]  ;;  %v6981_v41 = vmul.f32 1.442695, %v10941_v35  ;;  %v11740_v42 = vld [vmem:[%s13599_s6 + $0x334] sm:$0xf0] }
 0xb47   : > { %20270 = vst [vmem:[#allocation48_spill] sm:$0xff] %v16813_v33  ;;  %12413 = vrcp.f32 %v16839_v14  ;;  %v10859_v32 = vor.u32 %v11744_v11, %v10856_v34  ;;  %v7140_v47 = vmul.f32 %v16850_v49, %v16818_v58  ;;  %v12410_v45 = vpop.eup %12409  ;;  %v10948_v30 = vmul.f32 -1.702, %v16857_v23 }
 0xb48   : > { %6791 = vmatpush.bf16.msrb.mxu3 %v10891_v56  ;;  %6734 = vmatpush.bf16.msrb.mxu1 %v10855_v19  ;;  %v10822_v56 = vld [vmem:[%s13599_s6 + $0x318] sm:$0xf]  ;;  %12415 = vrcp.f32 %v16841_v57  ;;  %v10568_v19 = vld [vmem:[%s13599_s6 + $0x138] sm:$0xf0]  ;;  %v10567_v11 = vor.u32 %v11676_v2, %v10566_v39  ;;  %v10949_v35 = vmul.f32 -1.702, %v16864_v29  ;;  %v16882_v9 = vpop.eup %12411  ;;  %vm7145_vm12 = vweird.f32 %v16850_v49 }
 0xb49   : > { %v10571_v34 = vor.u32 %v11672_v25, %v10568_v19  ;;  %v7141_v21 = vsub.f32 1.0, %v7140_v47  ;;  %v16884_v16 = vadd.f32 1.0, %v12410_v45  ;;  %12417 = vpow2.f32 %v6981_v41  ;;  %v10790_v39 = vld [vmem:[%s13599_s6 + $0x2d8] sm:$0xf]  ;;  %v11664_v25 = vld [vmem:[%s13599_s6 + $0xdc] sm:$0xf]  ;;  %vm16934_vm13 = vmor %vm7144_vm11, %vm7145_vm12 }
 0xb4a   : > { %v16828_v38 = vpop.f32.mrf.mxu2  ;;  %v16860_v52 = vpop.f32.mrf.mxu3  ;;  %6763 = vmatpush.bf16.msrb.mxu2 %v10603_v43  ;;  %6706 = vmatpush.bf16.msrb.mxu0 %v10567_v11  ;;  %v6995_v47 = vmul.f32 1.442695, %v10948_v30  ;;  %v10956_v41 = vmul.f32 -1.702, %v16790_v37  ;;  %v11728_v45 = vld [vmem:[%s13599_s6 + $0x2dc] sm:$0xf]  ;;  %vm7160_vm15 = vweird.f32 %v16882_v9  ;;  %vm7264_vm0 = vweird.f32 %v16839_v14 }
 0xb4b   : > { %v6379_v6 = vpop.f32.mrf.mxu0  ;;  %v6408_v59 = vpop.f32.mrf.mxu1  ;;  %v7150_v11 = vand.u32 2147483648, %v16818_v58  ;;  %12419 = vrcp.f32 %v16884_v16  ;;  %vm17011_vm5 = vmor %vm7159_vm14, %vm7160_vm15  ;;  %vm7279_vm7 = vweird.f32 %v16841_v57  ;;  %v7390_v10 = vand.u32 2147483648, %v16884_v16 }
 0xb4c   : > { %v6380_v48 = vadd.f32 %v6379_v6, %v16743_v5  ;;  %6792 = vmatpush.bf16.msrb.mxu3 %v10859_v32  ;;  %v11668_v32 = vld [vmem:[%s13599_s6 + $0xf4] sm:$0xf0]  ;;  %12421 = vpow2.f32 %v6995_v47  ;;  %vm7384_vm12 = vweird.f32 %v16884_v16 }
 0xb4d   : > { %v16888_v2 = vpop.eup %12413 }
 0xb4e   : > { %6610 = vmatmul.bf16.gmra.mxu0 %v16659_v28  ;;  %6639 = vmatmul.bf16.gmra.mxu1 %v16661_v36  ;;  %v16866_v6 = vadd.f32 %v6408_v59, %v6380_v48  ;;  %v10823_v48 = vor.u32 %v11740_v42, %v10822_v56  ;;  %v11736_v59 = vld [vmem:[%s13599_s6 + $0x31c] sm:$0xf]  ;;  %v10535_v56 = vor.u32 %v11668_v32, %v10534_v20  ;;  %v11732_v42 = vld [vmem:[%s13599_s6 + $0x2f4] sm:$0xf0]  ;;  %vm7265_vm2 = vweird.f32 %v16888_v2 }
 0xb4f   : > { %6668 = vmatmul.bf16.gmra.mxu2 %v16659_v28  ;;  %6697 = vmatmul.bf16.gmra.mxu3 %v16661_v36  ;;  %v10827_v43 = vor.u32 %v11736_v59, %v10824_v12  ;;  %v10536_v12 = vld [vmem:[%s13599_s6 + $0xf8] sm:$0xf0]  ;;  %v16894_v59 = vpop.eup %12415  ;;  %v10791_v44 = vor.u32 %v11732_v42, %v10790_v39  ;;  %v7142_v20 = vmul.f32 %v16850_v49, %v7141_v21  ;;  %v7270_v39 = vand.u32 2147483648, %v16839_v14  ;;  %v10470_v28 = vld [vmem:[%s13599_s6 + $0x58] sm:$0xf]  ;;  %vm17022_vm6 = vmor %vm7264_vm0, %vm7265_vm2 }
 0xb50   : > { %6735 = vmatpush.bf16.msrb.mxu1 %v10823_v48  ;;  %6764 = vmatpush.bf16.msrb.mxu2 %v10571_v34  ;;  %v6997_v48 = vmul.f32 1.442695, %v10949_v35  ;;  %v10539_v63 = vor.u32 %v11664_v25, %v10536_v12  ;;  %v7155_v34 = vmul.f32 %v16882_v9, %v16830_v8  ;;  %v10795_v32 = vor.u32 %v11728_v45, %v10792_v55  ;;  %v12418_v21 = vpop.eup %12417  ;;  %v10760_v36 = vld [vmem:[%s13599_s6 + $0x2b8] sm:$0xf0] }
 0xb51   : > { %6793 = vmatpush.bf16.msrb.mxu3 %v10827_v43  ;;  %6707 = vmatpush.bf16.msrb.mxu0 %v10535_v56  ;;  %v7260_v43 = vmul.f32 %v16888_v2, %v16839_v14  ;;  %v7275_v0 = vmul.f32 %v16894_v59, %v16841_v57  ;;  %v7011_v42 = vmul.f32 1.442695, %v10956_v41  ;;  %v7148_v55 = vand.u32 2147483647, %v16818_v58 }
 0xb52   : > { %v6437_v3 = vpop.f32.mrf.mxu2  ;;  %v6466_v30 = vpop.f32.mrf.mxu3  ;;  %v16914_v56 = vor.u32 1.1754944e-38, %v7150_v11  ;;  %12423 = vpow2.f32 %v6997_v48  ;;  %v16917_v25 = vadd.f32 %v16850_v49, %v7142_v20  ;;  %v7156_v12 = vsub.f32 1.0, %v7155_v34  ;;  %v11640_v34 = vld [vmem:[%s13599_s6 + $0x1c] sm:$0xf] }
 0xb53   : > { %v6438_v19 = vadd.f32 %v6437_v3, %v16757_v54  ;;  %v7165_v3 = vand.u32 2147483648, %v16830_v8  ;;  %v7276_v47 = vsub.f32 1.0, %v7275_v0  ;;  %v16923_v41 = vadd.f32 1.0, %v12418_v21  ;;  %v16930_v20 = vpop.eup %12419  ;;  %v11724_v0 = vld [vmem:[%s13599_s6 + $0x2b4] sm:$0xf0] }
 0xb54   : > { %6736 = vmatpush.bf16.msrb.mxu1 %v10791_v44  ;;  %6765 = vmatpush.bf16.msrb.mxu2 %v10539_v63  ;;  %v7163_v63 = vand.u32 2147483647, %v16830_v8  ;;  %v7268_v45 = vand.u32 2147483647, %v16839_v14  ;;  %v16926_v11 = vor.u32 1.1754944e-38, %v7270_v39  ;;  %12425 = vpow2.f32 %v7011_v42 }
 0xb55   : > { %v16909_v35 = vadd.f32 %v6466_v30, %v6438_v19  ;;  %6794 = vmatpush.bf16.msrb.mxu3 %v10795_v32  ;;  %v16921_v44 = vor.u32 1.1754944e-38, %v7165_v3  ;;  %v7261_v19 = vsub.f32 1.0, %v7260_v43  ;;  %v6377_v48 = vadd.f32 %v16816_v46, %v16743_v5  ;;  %v10502_v3 = vld [vmem:[%s13599_s6 + $0x98] sm:$0xf]  ;;  %v12422_v32 = vpop.eup %12421  ;;  %v10440_v30 = vld [vmem:[%s13599_s6 + $0x38] sm:$0xf0] }
 0xb56   : > { %v11660_v46 = vld [vmem:[%s13599_s6 + $0xb4] sm:$0xf0]  ;;  %vm16948_vm1 = vcmp.eq.f32.partialorder %v7148_v55, 8.507059e+37  ;;  %v10957_v43 = vmul.f32 -1.702, %v16813_v33  ;;  %v6435_v21 = vadd.f32 %v16828_v38, %v16757_v54  ;;  %v7157_v18 = vmul.f32 %v16882_v9, %v7156_v12 }
 0xb57   : > { %20271 = vst [vmem:[#allocation68_spill] sm:$0xff] %v16909_v35  ;;  %v10503_v39 = vor.u32 %v11660_v46, %v10502_v3  ;;  %v10758_v42 = vld [vmem:[%s13599_s6 + $0x298] sm:$0xf]  ;;  %v7262_v58 = vmul.f32 %v16888_v2, %v7261_v19  ;;  %v7277_v55 = vmul.f32 %v16894_v59, %v7276_v47  ;;  %12427 = vrcp.f32 %v16923_v41  ;;  %v11720_v38 = vld [vmem:[%s13599_s6 + $0x29c] sm:$0xf] }
 0xb58   : > { %v12424_v1 = vpop.eup %12423  ;;  %v16965_v3 = vadd.f32 %v16821_v13, %v6377_v48  ;;  %v10759_v46 = vor.u32 %v11724_v0, %v10758_v42  ;;  %v7380_v19 = vmul.f32 %v16930_v20, %v16884_v16  ;;  %v16973_v47 = vadd.f32 1.0, %v12422_v32  ;;  %v10726_v13 = vld [vmem:[%s13599_s6 + $0x258] sm:$0xf]  ;;  %6766 = vmatpush.bf16.msrb.mxu2 %v10507_v17  ;;  %v10472_v17 = vld [vmem:[%s13599_s6 + $0x78] sm:$0xf0] }
 0xb59   : > { %6708 = vmatpush.bf16.msrb.mxu0 %v10503_v39  ;;  %v10763_v33 = vor.u32 %v11720_v38, %v10760_v36  ;;  %vm16977_vm9 = vcmp.eq.f32.partialorder %v7268_v45, 8.507059e+37  ;;  %v16981_v24 = vadd.f32 1.0, %v12424_v1  ;;  %v11716_v0 = vld [vmem:[%s13599_s6 + $0x274] sm:$0xf0]  ;;  %v11648_v36 = vld [vmem:[%s13599_s6 + $0x5c] sm:$0xf]  ;;  %v7158_v42 = vadd.f32 %v16882_v9, %v7157_v18  ;;  %v17001_v38 = vpop.f32.mrf.mxu0 }
 0xb5a   : > { %v6439_v27 = vpop.f32.mrf.mxu2  ;;  %v6468_v48 = vpop.f32.mrf.mxu3  ;;  %6737 = vmatpush.bf16.msrb.mxu1 %v10759_v46  ;;  %vm16991_vm3 = vcmp.eq.f32.partialorder %v7163_v63, 8.507059e+37  ;;  %v7263_v1 = vadd.f32 %v16888_v2, %v7262_v58  ;;  %vm7280_vm4 = vweird.f32 %v16894_v59  ;;  %v10727_v18 = vor.u32 %v11716_v0, %v10726_v13  ;;  %v11712_v63 = vld [vmem:[%s13599_s6 + $0x25c] sm:$0xf] }
 0xb5b   : > { %v6440_v12 = vadd.f32 %v6439_v27, %v16757_v54  ;;  %v12426_v39 = vpop.eup %12425  ;;  %v16984_v27 = vadd.f32 %v16860_v52, %v6435_v21  ;;  %v10471_v54 = vor.u32 %v11652_v40, %v10470_v28  ;;  %v7285_v52 = vand.u32 2147483648, %v16841_v57  ;;  %6795 = vmatpush.bf16.msrb.mxu3 %v10763_v33  ;;  %v10728_v46 = vld [vmem:[%s13599_s6 + $0x278] sm:$0xf0]  ;;  %vm17050_vm8 = vmor %vm7279_vm7, %vm7280_vm4 }
 0xb5c   : > { %v7013_v21 = vmul.f32 1.442695, %v10957_v43  ;;  %v7278_v40 = vadd.f32 %v16894_v59, %v7277_v55  ;;  %v10964_v28 = vmul.f32 -1.702, %v16965_v3  ;;  %v7381_v43 = vsub.f32 1.0, %v7380_v19 }
 0xb5d   : > { %v16988_v32 = vadd.f32 %v6468_v48, %v6440_v12  ;;  %6709 = vmatpush.bf16.msrb.mxu0 %v10471_v54  ;;  %v17005_v58 = vpop.eup %12427  ;;  %12429 = vrcp.f32 %v16973_v47  ;;  %v17016_v55 = vadd.f32 1.0, %v12426_v39  ;;  %v10475_v12 = vor.u32 %v11648_v36, %v10472_v17  ;;  %v10438_v19 = vld [vmem:[%s13599_s6 + $0x18] sm:$0xf] }
 0xb5e   : > { %12431 = vrcp.f32 %v16981_v24  ;;  %v10965_v8 = vmul.f32 -1.702, %v16984_v27  ;;  %6738 = vmatpush.bf16.msrb.mxu1 %v10727_v18  ;;  %v11644_v48 = vld [vmem:[%s13599_s6 + $0x34] sm:$0xf0]  ;;  %v20285_v39 = vsel %vm16934_vm13, %v16850_v49, %v16917_v25  ;;  %v7162_v54 = vsel %vm17011_vm5, %v16882_v9, %v7158_v42 }
 0xb5f   : > { %20278 = vst [vmem:[#allocation69_spill] sm:$0xff] %v16988_v32  ;;  %v7152_v14 = vsel %vm16948_vm1, %v16914_v56, %v20285_v39  ;;  %6767 = vmatpush.bf16.msrb.mxu2 %v10475_v12  ;;  %v10731_v0 = vor.u32 %v11712_v63, %v10728_v46  ;;  %v10694_v36 = vld [vmem:[%s13599_s6 + $0x218] sm:$0xf]  ;;  %v7267_v49 = vsel %vm17022_vm6, %v16888_v2, %v7263_v1  ;;  %12433 = vpow2.f32 %v7013_v21  ;;  %v11704_v63 = vld [vmem:[%s13599_s6 + $0x21c] sm:$0xf]  ;;  %v17064_v12 = vpop.f32.mrf.mxu1 }
 0xb60   : > { %v11708_v17 = vld [vmem:[%s13599_s6 + $0x234] sm:$0xf0]  ;;  %v7027_v9 = vmul.f32 1.442695, %v10964_v28  ;;  %v10972_v25 = vmul.f32 -1.702, %v16866_v6  ;;  %v7282_v42 = vsel %vm17050_vm8, %v16894_v59, %v7278_v40  ;;  %v7382_v18 = vmul.f32 %v16930_v20, %v7381_v43 }
 0xb61   : > { %v7395_v2 = vmul.f32 %v17005_v58, %v16923_v41  ;;  %6796 = vmatpush.bf16.msrb.mxu3 %v10731_v0  ;;  %v10439_v1 = vor.u32 %v11644_v48, %v10438_v19  ;;  %v10696_v46 = vld [vmem:[%s13599_s6 + $0x238] sm:$0xf0]  ;;  %v7029_v33 = vmul.f32 1.442695, %v10965_v8  ;;  %v10695_v21 = vor.u32 %v11708_v17, %v10694_v36  ;;  %v6480_v45 = vpop.f32.mrf.mxu0  ;;  %s13050_s6 = sshra.s32 %s9481_s26, 4  ;;  %s13051_s6 = int_to_ptr.hbm [resolvable:$true] %s13050_s6 }
 0xb62   : > { %v10443_v28 = vor.u32 %v11640_v34, %v10440_v30  ;;  %v10699_v13 = vor.u32 %v11704_v63, %v10696_v46  ;;  %v7272_v59 = vsel %vm16977_vm9, %v16926_v11, %v7267_v49  ;;  %v20288_v40 = vand.u32 2147483647, %v16841_v57  ;;  %s13052_s1 = scalar_lea.hbm %s13051_s6, 128  ;;  %p13057_p13 = scmp.lt.s32.totalorder %s13051_s6, %s20598_s21 }
 0xb63   : > { %v17066_v39 = vpop.eup %12429  ;;  %v7286_v43 = vor.u32 1.1754944e-38, %v7285_v52  ;;  %12435 = vrcp.f32 %v17016_v55  ;;  %6710 = vmatpush.bf16.msrb.mxu0 %v10439_v1  ;;  %v7167_v8 = vsel %vm16991_vm3, %v16921_v44, %v7162_v54  ;;  %v7388_v48 = vand.u32 2147483647, %v16884_v16  ;;  %6739 = vmatpush.bf16.msrb.mxu1 %v10695_v21  ;;  %p13053_p9 = scmp.ne.s32.totalorder %s13051_s6, %s13052_s1 }
 0xb64   : > { %vm7284_vm10 = vcmp.eq.f32.partialorder %v20288_v40, 8.507059e+37  ;;  %v17074_v19 = vpop.eup %12431  ;;  %12437 = vpow2.f32 %v7027_v9  ;;  %v7043_v0 = vmul.f32 1.442695, %v10972_v25  ;;  %6768 = vmatpush.bf16.msrb.mxu2 %v10443_v28  ;;  %v7383_v57 = vadd.f32 %v16930_v20, %v7382_v18 }
 0xb65   : > { %v7287_v11 = vsel %vm7284_vm10, %v7286_v43, %v7282_v42  ;;  %vm7385_vm11 = vweird.f32 %v16930_v20  ;;  %6797 = vmatpush.bf16.msrb.mxu3 %v10699_v13  ;;  %v12434_v52 = vpop.eup %12433  ;;  %v8107_v36 = vmul.f32 %v7272_v59, %v16792_v22  ;;  %v7396_v17 = vsub.f32 1.0, %v7395_v2  ;;  %v6538_v43 = vpop.f32.mrf.mxu2  ;;  %p13054_p11 = pnand %p13053_p9, %p13390_p4 }
 0xb66   : > { %v7500_v44 = vmul.f32 %v17066_v39, %v16973_v47  ;;  %12439 = vpow2.f32 %v7029_v33  ;;  %6711 = vmatmul.bf16.vlgmr.msrb.gmra.mxu0 %v16481_v7  ;;  %v8099_v54 = vmul.f32 %v7152_v14, %v16746_v60  ;;  %v7405_v34 = vand.u32 2147483648, %v16923_v41  ;;  %6740 = vmatmul.bf16.vlgmr.msrb.gmra.mxu1 %v16485_v53  ;;  %vm17098_vm13 = vmor %vm7384_vm12, %vm7385_vm11 }
 0xb67   : > { %v7515_v49 = vmul.f32 %v17074_v19, %v16981_v24  ;;  %6769 = vmatmul.bf16.vlgmr.msrb.gmra.mxu2 %v16481_v7  ;;  %v8100_v22 = vmul.f32 %v7167_v8, %v16763_v15  ;;  %v8108_v56 = vmul.f32 %v7287_v11, %v16798_v31  ;;  %v7403_v16 = vand.u32 2147483647, %v16923_v41  ;;  %v6509_v28 = vpop.f32.mrf.mxu1  ;;  %p13055_p12 = pneg %p13054_p11 }
 0xb68   : > { %12441 = vpow2.f32 %v7043_v0  ;;  %6798 = vmatmul.bf16.vlgmr.msrb.gmra.mxu3 %v16485_v53  ;;  %v7387_v7 = vsel %vm17098_vm13, %v16930_v20, %v7383_v57  ;;  %vm7389_vm14 = vcmp.eq.f32.partialorder %v7388_v48, 8.507059e+37  ;;  %v7391_v15 = vor.u32 1.1754944e-38, %v7390_v10 }
 0xb69   : > { %v17104_v60 = vpop.eup %12435  ;;  %v17109_v31 = vadd.f32 1.0, %v12434_v52  ;;  %v17111_v25 = vpack.c.bf16 %v8107_v36, %v8099_v54  ;;  %v7397_v30 = vmul.f32 %v17005_v58, %v7396_v17  ;;  %v7501_v42 = vsub.f32 1.0, %v7500_v44 }
 0xb6a   : > { %v12438_v14 = vpop.eup %12437  ;;  %v7510_v18 = vand.u32 2147483648, %v16973_v47  ;;  %vm7399_vm15 = vweird.f32 %v16923_v41  ;;  %v7406_v53 = vor.u32 1.1754944e-38, %v7405_v34  ;;  %v7508_v2 = vand.u32 2147483647, %v16973_v47 }
 0xb6b   : > { %v7516_v1 = vsub.f32 1.0, %v7515_v49  ;;  %v17117_v20 = vpack.c.bf16 %v8108_v56, %v8100_v22  ;;  %v7392_v46 = vsel %vm7389_vm14, %v7391_v15, %v7387_v7  ;;  %vm7400_vm0 = vweird.f32 %v17005_v58  ;;  %v6567_v7 = vpop.f32.mrf.mxu3 }
 0xb6c   : > { %v12440_v63 = vpop.eup %12439  ;;  %vm17120_vm1 = vcmp.eq.f32.partialorder %v7403_v16, 8.507059e+37  ;;  %vm7504_vm2 = vweird.f32 %v16973_v47  ;;  %v17126_v21 = vperm.slane %v16740_v26, 2  ;;  %v7620_v13 = vmul.f32 %v17104_v60, %v17016_v55  ;;  %vm17157_vm5 = vmor %vm7399_vm15, %vm7400_vm0 }
 0xb6d   : > { %12443 = vrcp.f32 %v17109_v31  ;;  %v17131_v59 = vadd.f32 1.0, %v12438_v14  ;;  %v6382_v40 = vadd.f32 %v17001_v38, %v16743_v5  ;;  %v7398_v48 = vadd.f32 %v17005_v58, %v7397_v30 }
 0xb6e   : > { %v12442_v8 = vpop.eup %12441  ;;  %v7502_v0 = vmul.f32 %v17066_v39, %v7501_v42  ;;  %v7511_v11 = vor.u32 1.1754944e-38, %v7510_v18  ;;  %v7523_v57 = vand.u32 2147483647, %v16981_v24  ;;  %v17139_v10 = vmul.f32 %v7392_v46, %v16770_v50  ;;  %v6482_v50 = vpop.f32.mrf.mxu0 }
 0xb6f   : > { %v7517_v52 = vmul.f32 %v17074_v19, %v7516_v1  ;;  %vm7519_vm9 = vweird.f32 %v16981_v24  ;;  %v17143_v36 = vadd.f32 1.0, %v12440_v63  ;;  %vm7505_vm3 = vweird.f32 %v17066_v39  ;;  %v6511_v33 = vpop.f32.mrf.mxu1 }
 0xb70   : > { %vm17146_vm4 = vcmp.eq.f32.partialorder %v7508_v2, 8.507059e+37  ;;  %v7525_v38 = vand.u32 2147483648, %v16981_v24  ;;  %v10973_v17 = vmul.f32 -1.702, %v16909_v35  ;;  %v6481_v44 = vadd.f32 %v6480_v45, %v17126_v21  ;;  %vm17193_vm8 = vmor %vm7504_vm2, %vm7505_vm3  ;;  %v11022_v35 = vld [vmem:[%s13609_s23 + $0x40] sm:$0xf] }
 0xb71   : > { %v7621_v34 = vsub.f32 1.0, %v7620_v13  ;;  %12445 = vrcp.f32 %v17131_v59  ;;  %v17162_v49 = vadd.f32 1.0, %v12442_v8  ;;  %v17165_v22 = vadd.f32 %v17064_v12, %v6382_v40  ;;  %v6540_v8 = vpop.f32.mrf.mxu2 }
 0xb72   : > { %v7402_v45 = vsel %vm17157_vm5, %v17005_v58, %v7398_v48  ;;  %v7503_v56 = vadd.f32 %v17066_v39, %v7502_v0  ;;  %vm7520_vm6 = vweird.f32 %v17074_v19  ;;  %vm17172_vm7 = vcmp.eq.f32.partialorder %v7523_v57, 8.507059e+37 }
 0xb73   : > { %20297 = vst [vmem:[#allocation70_spill] sm:$0xff] %v17165_v22  ;;  %v17176_v9 = vpop.eup %12443  ;;  %v7518_v16 = vadd.f32 %v17074_v19, %v7517_v52  ;;  %12447 = vrcp.f32 %v17143_v36  ;;  %v17181_v12 = vperm.slane %v16740_v26, 3  ;;  %v6483_v58 = vadd.f32 %v6482_v50, %v17126_v21  ;;  %vm17207_vm10 = vmor %vm7519_vm9, %vm7520_vm6 }
 0xb74   : > { %v7526_v15 = vor.u32 1.1754944e-38, %v7525_v38  ;;  %v7628_v14 = vand.u32 2147483647, %v17016_v55  ;;  %v7045_v30 = vmul.f32 1.442695, %v10973_v17  ;;  %v17185_v42 = vadd.f32 %v6509_v28, %v6481_v44 }
 0xb75   : > { %v7407_v18 = vsel %vm17120_vm1, %v7406_v53, %v7402_v45  ;;  %v7622_v26 = vmul.f32 %v17104_v60, %v7621_v34  ;;  %12449 = vrcp.f32 %v17162_v49  ;;  %v10980_v1 = vmul.f32 -1.702, %v17165_v22 }
 0xb76   : > { %v7507_v63 = vsel %vm17193_vm8, %v17066_v39, %v7503_v56  ;;  %vm7624_vm11 = vweird.f32 %v17016_v55  ;;  %v7635_v53 = vmul.f32 %v17176_v9, %v17109_v31  ;;  %v10981_v46 = vmul.f32 -1.702, %v16988_v32  ;;  %6716 = vmatmul.bf16.gmra.mxu0 %v16509_v61  ;;  %6745 = vmatmul.bf16.gmra.mxu1 %v16512_v62 }
 0xb77   : > { %v17216_v28 = vpop.eup %12445  ;;  %v7522_v24 = vsel %vm17207_vm10, %v17074_v19, %v7518_v16  ;;  %v7630_v39 = vand.u32 2147483648, %v17016_v55  ;;  %v6539_v13 = vadd.f32 %v6538_v43, %v17181_v12  ;;  %v17223_v40 = vadd.f32 %v6511_v33, %v6483_v58  ;;  %6774 = vmatmul.bf16.gmra.mxu2 %v16509_v61 }
 0xb78   : > { %v17228_v48 = vmul.f32 %v7407_v18, %v16774_v4  ;;  %vm17230_vm12 = vcmp.eq.f32.partialorder %v7628_v14, 8.507059e+37  ;;  %12451 = vpow2.f32 %v7045_v30  ;;  %v10926_v19 = vmul.f32 -1.702, %v17185_v42  ;;  %6803 = vmatmul.bf16.gmra.mxu3 %v16512_v62 }
 0xb79   : > { %v17236_v43 = vpop.eup %12447  ;;  %v7512_v57 = vsel %vm17146_vm4, %v7511_v11, %v7507_v63  ;;  %v7623_v52 = vadd.f32 %v17104_v60, %v7622_v26  ;;  %vm7625_vm13 = vweird.f32 %v17104_v60  ;;  %v7059_v61 = vmul.f32 1.442695, %v10980_v1  ;;  %v6485_v26 = vpop.f32.mrf.mxu0 }
 0xb7a   : > { %v7527_v4 = vsel %vm17172_vm7, %v7526_v15, %v7522_v24  ;;  %v7636_v38 = vsub.f32 1.0, %v7635_v53  ;;  %v7740_v17 = vmul.f32 %v17216_v28, %v17131_v59  ;;  %v7061_v44 = vmul.f32 1.442695, %v10981_v46  ;;  %vm17254_vm14 = vmor %vm7624_vm11, %vm7625_vm13  ;;  %v6569_v15 = vpop.f32.mrf.mxu3 }
 0xb7b   : > { %v17246_v50 = vpop.eup %12449  ;;  %v7631_v62 = vor.u32 1.1754944e-38, %v7630_v39  ;;  %v17248_v54 = vadd.f32 %v6567_v7, %v6539_v13  ;;  %v10934_v11 = vmul.f32 -1.702, %v17223_v40  ;;  %v6541_v5 = vadd.f32 %v6540_v8, %v17181_v12  ;;  %v17289_v39 = vpop.f32.mrf.mxu2 }
 0xb7c   : > { %v7643_v45 = vand.u32 2147483647, %v17109_v31  ;;  %v7645_v56 = vand.u32 2147483648, %v17109_v31  ;;  %v7755_v41 = vmul.f32 %v17236_v43, %v17143_v36  ;;  %v6951_v16 = vmul.f32 1.442695, %v10926_v19 }
 0xb7d   : > { %v17263_v7 = vmul.f32 %v7512_v57, %v16857_v23  ;;  %v17266_v58 = vmul.f32 %v7527_v4, %v16864_v29  ;;  %v7627_v55 = vsel %vm17254_vm14, %v17104_v60, %v7623_v52  ;;  %12453 = vpow2.f32 %v7059_v61 }
 0xb7e   : > { %v12452_v14 = vpop.eup %12451  ;;  %v7637_v30 = vmul.f32 %v17176_v9, %v7636_v38  ;;  %v7741_v18 = vsub.f32 1.0, %v7740_v17  ;;  %v7860_v2 = vmul.f32 %v17246_v50, %v17162_v49  ;;  %12455 = vpow2.f32 %v7061_v44 }
 0xb7f   : > { %vm7639_vm15 = vweird.f32 %v17109_v31  ;;  %v10927_v23 = vmul.f32 -1.702, %v17248_v54  ;;  %v6967_v29 = vmul.f32 1.442695, %v10934_v11  ;;  %v17276_v1 = vadd.f32 %v6569_v15, %v6541_v5  ;;  %v6514_v11 = vpop.f32.mrf.mxu1 }
 0xb80   : > { %vm17278_vm0 = vcmp.eq.f32.partialorder %v7643_v45, 8.507059e+37  ;;  %v7646_v63 = vor.u32 1.1754944e-38, %v7645_v56  ;;  %v7750_v47 = vand.u32 2147483648, %v17131_v59  ;;  %v7756_v53 = vsub.f32 1.0, %v7755_v41 }
 0xb81   : > { %12457 = vpow2.f32 %v6951_v16  ;;  %v7632_v46 = vsel %vm17230_vm12, %v7631_v62, %v7627_v55  ;;  %vm7640_vm1 = vweird.f32 %v17176_v9  ;;  %v7748_v33 = vand.u32 2147483647, %v17131_v59 }
 0xb82   : > { %v17287_v24 = vadd.f32 1.0, %v12452_v14  ;;  %v7638_v13 = vadd.f32 %v17176_v9, %v7637_v30  ;;  %v7742_v8 = vmul.f32 %v17216_v28, %v7741_v18  ;;  %v7763_v19 = vand.u32 2147483647, %v17143_v36  ;;  %vm17307_vm9 = vmor %vm7639_vm15, %vm7640_vm1  ;;  %v17333_v18 = vpop.f32.mrf.mxu3 }
 0xb83   : > { %v7861_v57 = vsub.f32 1.0, %v7860_v2  ;;  %v12454_v52 = vpop.eup %12453  ;;  %v7765_v61 = vand.u32 2147483648, %v17143_v36  ;;  %v6953_v0 = vmul.f32 1.442695, %v10927_v23  ;;  %12459 = vpow2.f32 %v6967_v29  ;;  %v20318_v2 = vld [vmem:[#allocation67_spill] sm:$0xff] }
 0xb84   : > { %20310 = vst [vmem:[#allocation71_spill] sm:$0xff] %v17287_v24  ;;  %v10935_v4 = vmul.f32 -1.702, %v17276_v1  ;;  %v12456_v38 = vpop.eup %12455  ;;  %v17297_v17 = vmul.f32 %v7632_v46, %v16790_v37  ;;  %vm7744_vm2 = vweird.f32 %v17131_v59  ;;  %v17300_v44 = vor.u32 1.1754944e-38, %v7750_v47  ;;  %v11046_v23 = vld [vmem:[%s13609_s23 + $0x70] sm:$0xf] }
 0xb85   : > { %v7757_v62 = vmul.f32 %v17236_v43, %v7756_v53  ;;  %vm7745_vm3 = vweird.f32 %v17216_v28  ;;  %vm17312_vm4 = vcmp.eq.f32.partialorder %v7748_v33, 8.507059e+37  ;;  %v7868_v34 = vand.u32 2147483647, %v17162_v49  ;;  %v6487_v53 = vpop.f32.mrf.mxu0  ;;  %v11780_v46 = vld [vmem:[%s13609_s23 + $0x74] sm:$0xf0] }
 0xb86   : > { %v7870_v45 = vand.u32 2147483648, %v17162_v49  ;;  %12461 = vrcp.f32 %v17287_v24  ;;  %v7642_v31 = vsel %vm17307_vm9, %v17176_v9, %v7638_v13  ;;  %v7743_v41 = vadd.f32 %v17216_v28, %v7742_v8  ;;  %6721 = vmatmul.bf16.gmra.mxu0 %v16601_v51  ;;  %6750 = vmatmul.bf16.gmra.mxu1 %v20318_v2  ;;  %v11110_v33 = vld [vmem:[%s13609_s23 + $0xf0] sm:$0xf]  ;;  %v11796_v13 = vld [vmem:[%s13609_s23 + $0xf4] sm:$0xf0]  ;;  %vm17352_vm8 = vmor %vm7744_vm2, %vm7745_vm3 }
 0xb87   : > { %v12458_v56 = vpop.eup %12457  ;;  %vm17323_vm5 = vcmp.eq.f32.partialorder %v7763_v19, 8.507059e+37  ;;  %v7862_v55 = vmul.f32 %v17246_v50, %v7861_v57  ;;  %v17328_v15 = vadd.f32 1.0, %v12454_v52  ;;  %v7766_v14 = vor.u32 1.1754944e-38, %v7765_v61  ;;  %6779 = vmatmul.bf16.gmra.mxu2 %v16601_v51  ;;  %v11174_v59 = vld [vmem:[%s13609_s23 + $0x170] sm:$0xf] }
 0xb88   : > { %v17331_v30 = vadd.f32 1.0, %v12456_v38  ;;  %12463 = vpow2.f32 %v6953_v0  ;;  %v6969_v9 = vmul.f32 1.442695, %v10935_v4  ;;  %v7758_v29 = vadd.f32 %v17236_v43, %v7757_v62  ;;  %6808 = vmatmul.bf16.gmra.mxu3 %v20318_v2  ;;  %v11812_v61 = vld [vmem:[%s13609_s23 + $0x174] sm:$0xf0]  ;;  %v6545_v38 = vpop.f32.mrf.mxu2 }
 0xb89   : > { %vm7759_vm6 = vweird.f32 %v17143_v36  ;;  %vm7760_vm7 = vweird.f32 %v17236_v43  ;;  %v6486_v47 = vadd.f32 %v6485_v26, %v17126_v21  ;;  %v12460_v8 = vpop.eup %12459  ;;  %v7647_v51 = vsel %vm17278_vm0, %v7646_v63, %v7642_v31  ;;  %v11238_v2 = vld [vmem:[%s13609_s23 + $0x1f0] sm:$0xf] }
 0xb8a   : > { %20317 = vst [vmem:[#allocation72_spill] sm:$0xff] %v17331_v30  ;;  %vm7864_vm10 = vweird.f32 %v17162_v49  ;;  %v7871_v26 = vor.u32 1.1754944e-38, %v7870_v45  ;;  %v17357_v57 = vadd.f32 1.0, %v12458_v56  ;;  %v7747_v52 = vsel %vm17352_vm8, %v17216_v28, %v7743_v41  ;;  %vm17377_vm13 = vmor %vm7759_vm6, %vm7760_vm7  ;;  %v11792_v49 = vld [vmem:[%s13609_s23 + $0xd4] sm:$0xf0] }
 0xb8b   : > { %v7863_v60 = vadd.f32 %v17246_v50, %v7862_v55  ;;  %vm7865_vm11 = vweird.f32 %v17246_v50  ;;  %vm17364_vm12 = vcmp.eq.f32.partialorder %v7868_v34, 8.507059e+37  ;;  %12465 = vrcp.f32 %v17328_v15 }
 0xb8c   : > { %v17371_v0 = vpop.eup %12461  ;;  %12467 = vrcp.f32 %v17331_v30  ;;  %v6488_v4 = vadd.f32 %v6487_v53, %v17126_v21  ;;  %v11047_v62 = vor.u32 %v11780_v46, %v11046_v23  ;;  %v11111_v5 = vor.u32 %v11796_v13, %v11110_v33  ;;  %v11828_v23 = vld [vmem:[%s13609_s23 + $0x1f4] sm:$0xf0]  ;;  %v20327_v53 = vld [vmem:[#allocation48_spill] sm:$0xff]  ;;  %vm17406_vm14 = vmor %vm7864_vm10, %vm7865_vm11 }
 0xb8d   : > { %20323 = vst [vmem:[#allocation67_spill] sm:$0xff] %v17371_v0  ;;  %v7762_v34 = vsel %vm17377_vm13, %v17236_v43, %v7758_v29  ;;  %v17386_v45 = vadd.f32 1.0, %v12460_v8  ;;  %12469 = vpow2.f32 %v6969_v9  ;;  %v17388_v36 = vadd.f32 %v6514_v11, %v6486_v47  ;;  %v6516_v29 = vpop.f32.mrf.mxu1 }
 0xb8e   : > { %v12464_v56 = vpop.eup %12463  ;;  %v7885_v31 = vand.u32 2147483648, %v17287_v24  ;;  %12471 = vrcp.f32 %v17357_v57  ;;  %v6544_v41 = vadd.f32 %v17289_v39, %v17181_v12  ;;  %8969 = vmatpush.bf16.msra.mxu0 %v11047_v62  ;;  %8998 = vmatpush.bf16.msra.mxu1 %v11111_v5  ;;  %v11175_v55 = vor.u32 %v11812_v61, %v11174_v59  ;;  %v11038_v59 = vld [vmem:[%s13609_s23 + $0x60] sm:$0xf]  ;;  %v11778_v61 = vld [vmem:[%s13609_s23 + $0x64] sm:$0xf0] }
 0xb8f   : > { %20326 = vst [vmem:[#allocation73_spill] sm:$0xff] %v17388_v36  ;;  %v17397_v43 = vmul.f32 %v7647_v51, %v20327_v53  ;;  %v7752_v11 = vsel %vm17312_vm4, %v17300_v44, %v7747_v52  ;;  %v7875_v39 = vmul.f32 %v17371_v0, %v17287_v24  ;;  %v6546_v47 = vadd.f32 %v6545_v38, %v17181_v12  ;;  %v11810_v53 = vld [vmem:[%s13609_s23 + $0x164] sm:$0xf0] }
 0xb90   : > { %v7767_v46 = vsel %vm17323_vm5, %v7766_v14, %v7762_v34  ;;  %v7867_v44 = vsel %vm17406_vm14, %v17246_v50, %v7863_v60  ;;  %v17419_v37 = vadd.f32 %v6516_v29, %v6488_v4  ;;  %9027 = vmatpush.bf16.msra.mxu2 %v11175_v55  ;;  %v17423_v13 = vadd.f32 1.0, %v12464_v56  ;;  %v6574_v60 = vpop.f32.mrf.mxu3  ;;  %v6490_v56 = vpop.f32.mrf.mxu0 }
 0xb91   : > { %v17421_v33 = vpop.eup %12465  ;;  %12473 = vrcp.f32 %v17386_v45  ;;  %v10942_v16 = vmul.f32 -1.702, %v17388_v36  ;;  %v11239_v14 = vor.u32 %v11828_v23, %v11238_v2  ;;  %v17430_v51 = vmul.f32 %v7752_v11, %v16965_v3  ;;  %v11166_v23 = vld [vmem:[%s13609_s23 + $0x160] sm:$0xf] }
 0xb92   : > { %v17427_v8 = vpop.eup %12467  ;;  %v17432_v50 = vor.u32 1.1754944e-38, %v7885_v31  ;;  %v7990_v19 = vand.u32 2147483648, %v17328_v15  ;;  %v17436_v52 = vadd.f32 %v17333_v18, %v6544_v41  ;;  %v17441_v4 = vmul.f32 %v7767_v46, %v16984_v27  ;;  %v11102_v31 = vld [vmem:[%s13609_s23 + $0xe0] sm:$0xf]  ;;  %v11794_v41 = vld [vmem:[%s13609_s23 + $0xe4] sm:$0xf0] }
 0xb93   : > { %v12470_v28 = vpop.eup %12469  ;;  %v7876_v38 = vsub.f32 1.0, %v7875_v39  ;;  %v17444_v62 = vadd.f32 %v6574_v60, %v6546_v47  ;;  %9056 = vmatpush.bf16.msra.mxu3 %v11239_v14  ;;  %v7872_v18 = vsel %vm17364_vm12, %v7871_v26, %v7867_v44  ;;  %v10950_v34 = vmul.f32 -1.702, %v17419_v37  ;;  %v17483_v47 = vpop.f32.mrf.mxu2  ;;  %v20336_v60 = vld [vmem:[#allocation66_spill] sm:$0xff]  ;;  %v11030_v44 = vld [vmem:[%s13609_s23 + $0x50] sm:$0xf] }
 0xb94   : > { %20330 = vst [vmem:[#allocation48_spill] sm:$0xff] %v17432_v50  ;;  %v17446_v5 = vpop.eup %12471  ;;  %v17455_v27 = vpack.c.bf16 %v17263_v7, %v17139_v10  ;;  %v17459_v55 = vpack.c.bf16 %v17266_v58, %v17228_v48  ;;  %v7980_v2 = vmul.f32 %v17421_v33, %v17328_v15  ;;  %12475 = vrcp.f32 %v17423_v13  ;;  %v11086_v50 = vld [vmem:[%s13609_s23 + $0xc0] sm:$0xf] }
 0xb95   : > { %20331 = vst [vmem:[#allocation74_spill] sm:$0xff] %v17436_v52  ;;  %v6983_v63 = vmul.f32 1.442695, %v10942_v16  ;;  %v11039_v26 = vor.u32 %v11778_v61, %v11038_v59  ;;  %v17466_v11 = vor.u32 1.1754944e-38, %v7990_v19  ;;  %v17469_v39 = vadd.f32 1.0, %v12470_v28  ;;  %v20337_v59 = vld [vmem:[#allocation65_spill] sm:$0xff] }
 0xb96   : > { %20332 = vst [vmem:[#allocation75_spill] sm:$0xff] %v17444_v62  ;;  %v10943_v10 = vmul.f32 -1.702, %v17436_v52  ;;  %v17476_v48 = vmul.f32 %v17427_v8, %v17331_v30  ;;  %v17480_v58 = vmul.f32 %v17446_v5, %v17357_v57  ;;  %v10951_v29 = vmul.f32 -1.702, %v17444_v62  ;;  %6726 = vmatmul.bf16.gmra.mxu0 %v20336_v60  ;;  %6755 = vmatmul.bf16.gmra.mxu1 %v20337_v59 }
 0xb97   : > { %20333 = vst [vmem:[#allocation76_spill] sm:$0xff] %v17455_v27  ;;  %v17472_v7 = vpop.eup %12473  ;;  %8970 = vmatpush.bf16.msra.mxu0 %v11039_v26  ;;  %v11103_v46 = vor.u32 %v11794_v41, %v11102_v31  ;;  %v6999_v14 = vmul.f32 1.442695, %v10950_v34  ;;  %v11167_v19 = vor.u32 %v11810_v53, %v11166_v23  ;;  %v7877_v61 = vmul.f32 %v17371_v0, %v7876_v38  ;;  %v11230_v26 = vld [vmem:[%s13609_s23 + $0x1e0] sm:$0xf] }
 0xb98   : > { %20334 = vst [vmem:[#allocation77_spill] sm:$0xff] %v17459_v55  ;;  %v7981_v28 = vsub.f32 1.0, %v7980_v2  ;;  %v7180_v9 = vand.u32 2147483648, %v17357_v57  ;;  %12477 = vpow2.f32 %v6983_v63  ;;  %v11826_v31 = vld [vmem:[%s13609_s23 + $0x1e4] sm:$0xf0]  ;;  %6784 = vmatmul.bf16.gmra.mxu2 %v20336_v60  ;;  %v7290_v34 = vmul.f32 %v17472_v7, %v17386_v45  ;;  %v6519_v2 = vpop.f32.mrf.mxu1  ;;  %6813 = vmatmul.bf16.gmra.mxu3 %v20337_v59 }
 0xb99   : > { %20335 = vst [vmem:[#allocation78_spill] sm:$0xff] %v17466_v11  ;;  %8999 = vmatpush.bf16.msra.mxu1 %v11103_v46  ;;  %12479 = vrcp.f32 %v17469_v39  ;;  %v6985_v38 = vmul.f32 1.442695, %v10943_v10  ;;  %9028 = vmatpush.bf16.msra.mxu2 %v11167_v19  ;;  %v7171_v53 = vsub.f32 1.0, %v17480_v58  ;;  %v7001_v46 = vmul.f32 1.442695, %v10951_v29 }
 0xb9a   : > { %v17499_v63 = vpop.eup %12475  ;;  %v6491_v60 = vadd.f32 %v6490_v56, %v17126_v21  ;;  %v17506_v3 = vmul.f32 %v7872_v18, %v16866_v6  ;;  %vm7880_vm15 = vweird.f32 %v17371_v0  ;;  %12481 = vpow2.f32 %v6999_v14  ;;  %v11776_v19 = vld [vmem:[%s13609_s23 + $0x54] sm:$0xf0]  ;;  %v11094_v59 = vld [vmem:[%s13609_s23 + $0xd0] sm:$0xf]  ;;  %v6577_v18 = vpop.f32.mrf.mxu3  ;;  %v11790_v30 = vld [vmem:[%s13609_s23 + $0xc4] sm:$0xf0] }
 0xb9b   : > { %v11231_v10 = vor.u32 %v11826_v31, %v11230_v26  ;;  %v17513_v58 = vadd.f32 %v17371_v0, %v7877_v61  ;;  %v17516_v29 = vmul.f32 %v17421_v33, %v7981_v28  ;;  %v17518_v56 = vor.u32 1.1754944e-38, %v7180_v9  ;;  %v11158_v23 = vld [vmem:[%s13609_s23 + $0x150] sm:$0xf]  ;;  %v11808_v14 = vld [vmem:[%s13609_s23 + $0x154] sm:$0xf0]  ;;  %v6492_v28 = vpop.f32.mrf.mxu0 }
 0xb9c   : > { %20338 = vst [vmem:[#allocation66_spill] sm:$0xff] %v17506_v3  ;;  %v7195_v6 = vand.u32 2147483648, %v17423_v13  ;;  %vm7879_vm0 = vweird.f32 %v17287_v24  ;;  %v7185_v26 = vmul.f32 %v17499_v63, %v17423_v13  ;;  %v7291_v31 = vsub.f32 1.0, %v7290_v34  ;;  %v11222_v9 = vld [vmem:[%s13609_s23 + $0x1d0] sm:$0xf] }
 0xb9d   : > { %20339 = vst [vmem:[#allocation65_spill] sm:$0xff] %v17513_v58  ;;  %v7300_v61 = vand.u32 2147483648, %v17386_v45  ;;  %12483 = vpow2.f32 %v6985_v38  ;;  %9057 = vmatpush.bf16.msra.mxu3 %v11231_v10  ;;  %v11824_v41 = vld [vmem:[%s13609_s23 + $0x1d4] sm:$0xf0]  ;;  %v17529_v3 = vadd.f32 %v6519_v2, %v6491_v60  ;;  %v11031_v32 = vor.u32 %v11776_v19, %v11030_v44  ;;  %v11774_v10 = vld [vmem:[%s13609_s23 + $0x44] sm:$0xf0]  ;;  %vm17587_vm6 = vmor %vm7879_vm0, %vm7880_vm15 }
 0xb9e   : > { %v12478_v16 = vpop.eup %12477  ;;  %12485 = vpow2.f32 %v7001_v46  ;;  %v11095_v22 = vor.u32 %v11792_v49, %v11094_v59  ;;  %v7172_v34 = vmul.f32 %v17446_v5, %v7171_v53  ;;  %vm7174_vm1 = vweird.f32 %v17357_v57  ;;  %v6550_v53 = vpop.f32.mrf.mxu2  ;;  %v11820_v58 = vld [vmem:[%s13609_s23 + $0x1b4] sm:$0xf0]  ;;  %v11070_v24 = vld [vmem:[%s13609_s23 + $0xa0] sm:$0xf]  ;;  %v11786_v27 = vld [vmem:[%s13609_s23 + $0xa4] sm:$0xf0] }
 0xb9f   : > { %20340 = vst [vmem:[#allocation79_spill] sm:$0xff] %v17529_v3  ;;  %v17532_v11 = vpop.eup %12479  ;;  %vm7175_vm2 = vweird.f32 %v17446_v5  ;;  %v11159_v38 = vor.u32 %v11808_v14, %v11158_v23  ;;  %v17540_v55 = vor.u32 1.1754944e-38, %v7195_v6  ;;  %v6549_v2 = vadd.f32 %v17483_v47, %v17181_v12  ;;  %8971 = vmatpush.bf16.msra.mxu0 %v11031_v32  ;;  %v11126_v62 = vld [vmem:[%s13609_s23 + $0x110] sm:$0xf] }
 0xba0   : > { %v6493_v49 = vadd.f32 %v6492_v28, %v17126_v21  ;;  %9000 = vmatpush.bf16.msra.mxu1 %v11095_v22  ;;  %v11223_v44 = vor.u32 %v11824_v41, %v11222_v9  ;;  %v12482_v46 = vpop.eup %12481  ;;  %v7186_v60 = vsub.f32 1.0, %v7185_v26  ;;  %v7292_v23 = vmul.f32 %v17472_v7, %v7291_v31  ;;  %v11150_v22 = vld [vmem:[%s13609_s23 + $0x140] sm:$0xf]  ;;  %v11806_v41 = vld [vmem:[%s13609_s23 + $0x144] sm:$0xf0]  ;;  %vm17602_vm7 = vmor %vm7174_vm1, %vm7175_vm2 }
 0xba1   : > { %v7298_v19 = vand.u32 2147483647, %v17386_v45  ;;  %v17547_v59 = vadd.f32 1.0, %v12478_v16  ;;  %9029 = vmatpush.bf16.msra.mxu2 %v11159_v38  ;;  %v7305_v47 = vmul.f32 %v17532_v11, %v17469_v39  ;;  %v10958_v6 = vmul.f32 -1.702, %v17529_v3  ;;  %v6521_v16 = vpop.f32.mrf.mxu1 }
 0xba2   : > { %9058 = vmatpush.bf16.msra.mxu3 %v11223_v44  ;;  %v11023_v32 = vor.u32 %v11774_v10, %v11022_v35  ;;  %v11087_v14 = vor.u32 %v11790_v30, %v11086_v50  ;;  %v17555_v26 = vadd.f32 %v17446_v5, %v7172_v34  ;;  %vm7294_vm9 = vweird.f32 %v17386_v45  ;;  %v10998_v35 = vld [vmem:[%s13609_s23 + $0x10] sm:$0xf] }
 0xba3   : > { %v12484_v28 = vpop.eup %12483  ;;  %v17558_v31 = vor.u32 1.1754944e-38, %v7300_v61  ;;  %v6551_v9 = vadd.f32 %v6550_v53, %v17181_v12  ;;  %v20341_v44 = vand.u32 2147483647, %v17357_v57  ;;  %v17568_v50 = vadd.f32 1.0, %v12482_v46  ;;  %v11214_v46 = vld [vmem:[%s13609_s23 + $0x1c0] sm:$0xf] }
 0xba4   : > { %v12486_v38 = vpop.eup %12485  ;;  %v17570_v34 = vadd.f32 %v6577_v18, %v6549_v2  ;;  %v17572_v61 = vadd.f32 %v6521_v16, %v6493_v49  ;;  %8972 = vmatpush.bf16.msra.mxu0 %v11023_v32  ;;  %9001 = vmatpush.bf16.msra.mxu1 %v11087_v14  ;;  %v7187_v10 = vmul.f32 %v17499_v63, %v7186_v60  ;;  %vm7295_vm4 = vweird.f32 %v17472_v7  ;;  %v11822_v18 = vld [vmem:[%s13609_s23 + $0x1c4] sm:$0xf0]  ;;  %v6579_v14 = vpop.f32.mrf.mxu3  ;;  %v11772_v16 = vld [vmem:[%s13609_s23 + $0x34] sm:$0xf0] }
 0xba5   : > { %vm17563_vm3 = vcmp.eq.f32.partialorder %v20341_v44, 8.507059e+37  ;;  %vm17576_vm5 = vcmp.eq.f32.partialorder %v7298_v19, 8.507059e+37  ;;  %v11151_v30 = vor.u32 %v11806_v41, %v11150_v22  ;;  %v20348_v2 = vmov 0  ;;  %v11014_v22 = vld [vmem:[%s13609_s23 + $0x30] sm:$0xf]  ;;  %vm17619_vm8 = vmor %vm7294_vm9, %vm7295_vm4 }
 0xba6   : > { %20344 = vst [vmem:[#allocation80_spill] sm:$0xff] %v17570_v34  ;;  %v20349_v2 = vsel %vm17587_vm6, 4294967295, %v20348_v2  ;;  %v17592_v49 = vadd.f32 %v17472_v7, %v7292_v23  ;;  %v7306_v60 = vsub.f32 1.0, %v7305_v47  ;;  %v17595_v32 = vmul.f32 1.442695, %v10958_v6 }
 0xba7   : > { %20345 = vst [vmem:[#allocation81_spill] sm:$0xff] %v17572_v61  ;;  %12487 = vrcp.f32 %v17547_v59  ;;  %v17607_v23 = vadd.f32 1.0, %v12484_v28  ;;  %v17609_v47 = vadd.f32 1.0, %v12486_v38  ;;  %v17611_v6 = vadd.f32 %v6579_v14, %v6551_v9  ;;  %9030 = vmatpush.bf16.msra.mxu2 %v11151_v30  ;;  %v11078_v19 = vld [vmem:[%s13609_s23 + $0xb0] sm:$0xf] }
 0xba8   : > { %20350 = vst [vmem:[#allocation82_spill] sm:$0xff] %v20349_v2  ;;  %12489 = vrcp.f32 %v17568_v50  ;;  %v17625_v28 = vmul.f32 -1.702, %v17570_v34  ;;  %v10966_v9 = vmul.f32 -1.702, %v17572_v61  ;;  %v11215_v38 = vor.u32 %v11822_v18, %v11214_v46 }
 0xba9   : > { %20353 = vst [vmem:[#allocation83_spill] sm:$0xff] %v17611_v6  ;;  %v11788_v30 = vld [vmem:[%s13609_s23 + $0xb4] sm:$0xf0]  ;;  %v17635_v14 = vadd.f32 %v17421_v33, %v17516_v29  ;;  %v17638_v44 = vadd.f32 %v17499_v63, %v7187_v10  ;;  %vm7190_vm10 = vweird.f32 %v17499_v63  ;;  %v11142_v34 = vld [vmem:[%s13609_s23 + $0x130] sm:$0xf]  ;;  %vm7985_vm11 = vweird.f32 %v17421_v33 }
 0xbaa   : > { %v11804_v46 = vld [vmem:[%s13609_s23 + $0x134] sm:$0xf0]  ;;  %v11206_v18 = vld [vmem:[%s13609_s23 + $0x1b0] sm:$0xf]  ;;  %v7177_v45 = vsel %vm17602_vm7, %v17446_v5, %v17555_v26  ;;  %vm7189_vm12 = vweird.f32 %v17423_v13  ;;  %v20356_v29 = vand.u32 2147483647, %v17423_v13  ;;  %v7297_v3 = vsel %vm17619_vm8, %v17472_v7, %v17592_v49  ;;  %9059 = vmatpush.bf16.msra.mxu3 %v11215_v38 }
 0xbab   : > { %v7307_v61 = vmul.f32 %v17532_v11, %v7306_v60  ;;  %v11006_v41 = vld [vmem:[%s13609_s23 + $0x20] sm:$0xf]  ;;  %v11770_v5 = vld [vmem:[%s13609_s23 + $0x24] sm:$0xf0]  ;;  %12491 = vrcp.f32 %v17609_v47  ;;  %v10967_v26 = vmul.f32 -1.702, %v17611_v6  ;;  %v11015_v0 = vor.u32 %v11772_v16, %v11014_v22  ;;  %vm17678_vm15 = vmor %vm7189_vm12, %vm7190_vm10 }
 0xbac   : > { %vm17652_vm13 = vcmp.eq.f32.partialorder %v20356_v29, 8.507059e+37  ;;  %v6495_v29 = vpop.f32.mrf.mxu0  ;;  %v11079_v2 = vor.u32 %v11788_v30, %v11078_v19  ;;  %vm7984_vm14 = vweird.f32 %v17328_v15  ;;  %v20359_v7 = vsub.f32 1.0, %v17476_v48  ;;  %v11134_v16 = vld [vmem:[%s13609_s23 + $0x120] sm:$0xf]  ;;  %v11802_v57 = vld [vmem:[%s13609_s23 + $0x124] sm:$0xf0] }
 0xbad   : > { %12493 = vrcp.f32 %v17607_v23  ;;  %v7031_v19 = vmul.f32 1.442695, %v10966_v9  ;;  %v11143_v22 = vor.u32 %v11804_v46, %v11142_v34  ;;  %v17685_v48 = vpop.eup %12487  ;;  %v17690_v38 = vsel %vm17563_vm3, %v17518_v56, %v7177_v45  ;;  %8973 = vmatpush.bf16.msra.mxu0 %v11015_v0  ;;  %v11198_v34 = vld [vmem:[%s13609_s23 + $0x1a0] sm:$0xf]  ;;  %v11818_v9 = vld [vmem:[%s13609_s23 + $0x1a4] sm:$0xf0]  ;;  %v17708_v46 = vpop.f32.mrf.mxu2  ;;  %vm17765_vm3 = vmor %vm7984_vm14, %vm7985_vm11 }
 0xbae   : > { %v17672_v49 = vmul.f32 %v17427_v8, %v20359_v7  ;;  %v7192_v13 = vsel %vm17678_vm15, %v17499_v63, %v17638_v44  ;;  %vm7309_vm0 = vweird.f32 %v17469_v39  ;;  %vm7310_vm1 = vweird.f32 %v17532_v11  ;;  %9002 = vmatpush.bf16.msra.mxu1 %v11079_v2  ;;  %v17701_v56 = vpop.eup %12489  ;;  %v11768_v0 = vld [vmem:[%s13609_s23 + $0x14] sm:$0xf0]  ;;  %v11062_v2 = vld [vmem:[%s13609_s23 + $0x90] sm:$0xf] }
 0xbaf   : > { %v7302_v30 = vsel %vm17576_vm5, %v17558_v31, %v7297_v3  ;;  %v7308_v63 = vadd.f32 %v17532_v11, %v7307_v61  ;;  %v6496_v44 = vadd.f32 %v6495_v29, %v17126_v21  ;;  %9031 = vmatpush.bf16.msra.mxu2 %v11143_v22  ;;  %v11207_v45 = vor.u32 %v11820_v58, %v11206_v18  ;;  %v11784_v7 = vld [vmem:[%s13609_s23 + $0x94] sm:$0xf0]  ;;  %vm17735_vm2 = vmor %vm7309_vm0, %vm7310_vm1  ;;  %v6524_v22 = vpop.f32.mrf.mxu1  ;;  %v11814_v29 = vld [vmem:[%s13609_s23 + $0x184] sm:$0xf0] }
 0xbb0   : > { %v7033_v60 = vmul.f32 1.442695, %v10967_v26  ;;  %v11007_v6 = vor.u32 %v11770_v5, %v11006_v41  ;;  %v11071_v52 = vor.u32 %v11786_v27, %v11070_v24  ;;  %v11135_v36 = vor.u32 %v11802_v57, %v11134_v16  ;;  %v11800_v53 = vld [vmem:[%s13609_s23 + $0x114] sm:$0xf0]  ;;  %v11190_v41 = vld [vmem:[%s13609_s23 + $0x190] sm:$0xf] }
 0xbb1   : > { %v17717_v3 = vmul.f32 %v17685_v48, %v17547_v59  ;;  %12495 = vpow2.f32 %v17595_v32  ;;  %v7017_v58 = vmul.f32 1.442695, %v17625_v28  ;;  %9060 = vmatpush.bf16.msra.mxu3 %v11207_v45  ;;  %v11199_v31 = vor.u32 %v11818_v9, %v11198_v34  ;;  %v17721_v61 = vpop.eup %12491  ;;  %v11816_v5 = vld [vmem:[%s13609_s23 + $0x194] sm:$0xf0] }
 0xbb2   : > { %v17725_v24 = vmul.f32 %v17701_v56, %v17568_v50  ;;  %12497 = vpow2.f32 %v7031_v19  ;;  %8974 = vmatpush.bf16.msra.mxu0 %v11007_v6  ;;  %9003 = vmatpush.bf16.msra.mxu1 %v11071_v52  ;;  %v10999_v27 = vor.u32 %v11768_v0, %v10998_v35  ;;  %v11063_v18 = vor.u32 %v11784_v7, %v11062_v2 }
 0xbb3   : > { %v17729_v26 = vpop.eup %12493  ;;  %v20364_v28 = vand.u32 2147483647, %v17469_v39  ;;  %v20367_v52 = vand.u32 2147483648, %v17469_v39  ;;  %v7418_v19 = vand.u32 2147483647, %v17547_v59  ;;  %9032 = vmatpush.bf16.msra.mxu2 %v11135_v36  ;;  %v11127_v16 = vor.u32 %v11800_v53, %v11126_v62  ;;  %v17759_v36 = vpop.f32.mrf.mxu3 }
 0xbb4   : > { %v7197_v57 = vsel %vm17652_vm13, %v17540_v55, %v7192_v13  ;;  %v7312_v34 = vsel %vm17735_vm2, %v17532_v11, %v7308_v63  ;;  %12499 = vpow2.f32 %v7033_v60  ;;  %v17754_v9 = vadd.f32 %v6524_v22, %v6496_v44  ;;  %v10990_v63 = vld [vmem:[%s13609_s23] sm:$0xf]  ;;  %v6497_v60 = vpop.f32.mrf.mxu0  ;;  %v11766_v53 = vld [vmem:[%s13609_s23 + $0x4] sm:$0xf0] }
 0xbb5   : > { %vm17741_vm9 = vcmp.eq.f32.partialorder %v20364_v28, 8.507059e+37  ;;  %v7316_v6 = vor.u32 1.1754944e-38, %v20367_v52  ;;  %v8109_v39 = vmul.f32 %v7302_v30, %v17223_v40  ;;  %v7545_v35 = vmul.f32 %v17721_v61, %v17609_v47  ;;  %9061 = vmatpush.bf16.msra.mxu3 %v11199_v31  ;;  %v17810_v32 = vpop.f32.mrf.mxu2  ;;  %v11182_v28 = vld [vmem:[%s13609_s23 + $0x180] sm:$0xf] }
 0xbb6   : > { %12501 = vpow2.f32 %v7017_v58  ;;  %v11191_v62 = vor.u32 %v11816_v5, %v11190_v41  ;;  %v7411_v40 = vsub.f32 1.0, %v17717_v3  ;;  %v20370_v11 = vand.u32 2147483648, %v17547_v59  ;;  %8975 = vmatpush.bf16.msra.mxu0 %v10999_v27  ;;  %9004 = vmatpush.bf16.msra.mxu1 %v11063_v18  ;;  %v11054_v3 = vld [vmem:[%s13609_s23 + $0x80] sm:$0xf]  ;;  %v11782_v58 = vld [vmem:[%s13609_s23 + $0x84] sm:$0xf0] }
 0xbb7   : > { %v7425_v13 = vmul.f32 %v17729_v26, %v17607_v23  ;;  %v7531_v30 = vsub.f32 1.0, %v17725_v24  ;;  %v12496_v44 = vpop.eup %12495  ;;  %v17784_v0 = vadd.f32 %v17427_v8, %v17672_v49  ;;  %v8101_v2 = vmul.f32 %v17690_v38, %v17185_v42  ;;  %9033 = vmatpush.bf16.msra.mxu2 %v11127_v16  ;;  %v11118_v49 = vld [vmem:[%s13609_s23 + $0x100] sm:$0xf]  ;;  %v11798_v18 = vld [vmem:[%s13609_s23 + $0x104] sm:$0xf0] }
 0xbb8   : > { %v17772_v10 = vor.u32 1.1754944e-38, %v20370_v11  ;;  %v7317_v7 = vsel %vm17741_vm9, %v7316_v6, %v7312_v34  ;;  %v12498_v31 = vpop.eup %12497  ;;  %v8102_v24 = vmul.f32 %v7197_v57, %v17248_v54  ;;  %v10974_v27 = vmul.f32 -1.702, %v17754_v9 }
 0xbb9   : > { %v17799_v42 = vpack.c.bf16 %v17430_v51, %v17297_v17  ;;  %v17803_v38 = vpack.c.bf16 %v17441_v4, %v17397_v43  ;;  %v17805_v41 = vpack.c.bf16 %v8109_v39, %v8101_v2  ;;  %vm7414_vm4 = vweird.f32 %v17547_v59  ;;  %9062 = vmatpush.bf16.msra.mxu3 %v11191_v62 }
 0xbba   : > { %vm7415_vm5 = vweird.f32 %v17685_v48  ;;  %v7435_v54 = vand.u32 2147483648, %v17607_v23  ;;  %v7546_v5 = vsub.f32 1.0, %v7545_v35  ;;  %v12500_v17 = vpop.eup %12499  ;;  %v8110_v51 = vmul.f32 %v7317_v7, %v17276_v1 }
 0xbbb   : > { %20371 = vst [vmem:[#allocation84_spill] sm:$0xff] %v17799_v42  ;;  %v7426_v52 = vsub.f32 1.0, %v7425_v13  ;;  %v17815_v43 = vadd.f32 1.0, %v12496_v44  ;;  %v10991_v4 = vor.u32 %v11766_v53, %v10990_v63  ;;  %v17817_v22 = vadd.f32 1.0, %v12498_v31  ;;  %v6526_v44 = vpop.f32.mrf.mxu1  ;;  %v6584_v53 = vpop.f32.mrf.mxu3  ;;  %vm17862_vm12 = vmor %vm7414_vm4, %vm7415_vm5 }
 0xbbc   : > { %20372 = vst [vmem:[#allocation85_spill] sm:$0xff] %v17803_v38  ;;  %v12502_v6 = vpop.eup %12501  ;;  %v6554_v16 = vadd.f32 %v17708_v46, %v17181_v12  ;;  %v11055_v57 = vor.u32 %v11782_v58, %v11054_v3  ;;  %v11119_v34 = vor.u32 %v11798_v18, %v11118_v49  ;;  %v7532_v39 = vmul.f32 %v17701_v56, %v7531_v30 }
 0xbbd   : > { %20373 = vst [vmem:[#allocation86_spill] sm:$0xff] %v17805_v41  ;;  %v7047_v35 = vmul.f32 1.442695, %v10974_v27  ;;  %v6498_v62 = vadd.f32 %v6497_v60, %v17126_v21  ;;  %8976 = vmatpush.bf16.msra.mxu0 %v10991_v4  ;;  %v11183_v11 = vor.u32 %v11814_v29, %v11182_v28  ;;  %v7412_v1 = vmul.f32 %v17685_v48, %v7411_v40  ;;  %v6654_v28 = vpop.f32.mrf.mxu2 }
 0xbbe   : > { %vm7534_vm7 = vweird.f32 %v17568_v50  ;;  %v7547_v13 = vmul.f32 %v17721_v61, %v7546_v5  ;;  %v17826_v63 = vadd.f32 1.0, %v12500_v17  ;;  %9005 = vmatpush.bf16.msra.mxu1 %v11055_v57  ;;  %9034 = vmatpush.bf16.msra.mxu2 %v11119_v34  ;;  %v7427_v46 = vmul.f32 %v17729_v26, %v7426_v52 }
 0xbbf   : > { %v7538_v30 = vand.u32 2147483647, %v17568_v50  ;;  %12503 = vrcp.f32 %v17815_v43  ;;  %v17831_v21 = vadd.f32 1.0, %v12502_v6  ;;  %9063 = vmatpush.bf16.msra.mxu3 %v11183_v11  ;;  %v17833_v2 = vpack.c.bf16 %v8110_v51, %v8102_v24 }
 0xbc0   : > { %vm17837_vm8 = vcmp.eq.f32.partialorder %v7418_v19, 8.507059e+37  ;;  %v7540_v7 = vand.u32 2147483648, %v17568_v50  ;;  %12505 = vrcp.f32 %v17817_v22  ;;  %v17844_v60 = vadd.f32 %v17759_v36, %v6554_v16  ;;  %8977 = vmatmul.bf16.vlgmr.msra.gmra.mxu0 %v17111_v25  ;;  %v6596_v36 = vpop.f32.mrf.mxu0 }
 0xbc1   : > { %20374 = vst [vmem:[#allocation87_spill] sm:$0xff] %v17833_v2  ;;  %v7533_v3 = vadd.f32 %v17701_v56, %v7532_v39  ;;  %vm7535_vm10 = vweird.f32 %v17701_v56  ;;  %12507 = vpow2.f32 %v7047_v35  ;;  %v17849_v58 = vadd.f32 %v6526_v44, %v6498_v62  ;;  %9006 = vmatmul.bf16.vlgmr.msra.gmra.mxu1 %v17117_v20  ;;  %9035 = vmatmul.bf16.vlgmr.msra.gmra.mxu2 %v17805_v41  ;;  %v17917_v39 = vld [vmem:[%s13606_s15] sm:$0xff] }
 0xbc2   : > { %v7413_v19 = vadd.f32 %v17685_v48, %v7412_v1  ;;  %v7548_v31 = vadd.f32 %v17721_v61, %v7547_v13  ;;  %vm7550_vm11 = vweird.f32 %v17721_v61  ;;  %12509 = vrcp.f32 %v17826_v63  ;;  %9064 = vmatmul.bf16.vlgmr.msra.gmra.mxu3 %v17833_v2  ;;  %vm17875_vm15 = vmor %vm7534_vm7, %vm7535_vm10 }
 0xbc3   : > { %v7428_v27 = vadd.f32 %v17729_v26, %v7427_v46  ;;  %vm7430_vm13 = vweird.f32 %v17729_v26  ;;  %v7555_v49 = vand.u32 2147483648, %v17609_v47  ;;  %12511 = vrcp.f32 %v17831_v21 }
 0xbc4   : > { %vm7429_vm14 = vweird.f32 %v17607_v23  ;;  %vm7549_vm0 = vweird.f32 %v17609_v47  ;;  %v7553_v18 = vand.u32 2147483647, %v17609_v47  ;;  %v10975_v5 = vmul.f32 -1.702, %v17844_v60 }
 0xbc5   : > { %v17882_v29 = vpop.eup %12503  ;;  %v7433_v17 = vand.u32 2147483647, %v17607_v23  ;;  %v7436_v51 = vor.u32 1.1754944e-38, %v7435_v54  ;;  %v7537_v50 = vsel %vm17875_vm15, %v17701_v56, %v7533_v3  ;;  %vm17892_vm1 = vmor %vm7549_vm0, %vm7550_vm11  ;;  %v10982_v47 = vmul.f32 -1.702, %v17849_v58 }
 0xbc6   : > { %v17897_v4 = vpop.eup %12505  ;;  %v7417_v6 = vsel %vm17862_vm12, %v17685_v48, %v7413_v19  ;;  %vm17904_vm2 = vmor %vm7429_vm14, %vm7430_vm13  ;;  %v7541_v56 = vor.u32 1.1754944e-38, %v7540_v7  ;;  %v7552_v54 = vsel %vm17892_vm1, %v17721_v61, %v7548_v31  ;;  %v6556_v16 = vadd.f32 %v17810_v32, %v17181_v12  ;;  %v6625_v32 = vpop.f32.mrf.mxu1 }
 0xbc7   : > { %v12508_v57 = vpop.eup %12507  ;;  %v7432_v34 = vsel %vm17904_vm2, %v17729_v26, %v7428_v27  ;;  %vm7539_vm9 = vcmp.eq.f32.partialorder %v7538_v30, 8.507059e+37  ;;  %v7556_v48 = vor.u32 1.1754944e-38, %v7555_v49  ;;  %v17920_v35 = vperm.slane %v17917_v39, 4  ;;  %v6683_v19 = vpop.f32.mrf.mxu3  ;;  %v20385_v27 = vld [vmem:[#allocation75_spill] sm:$0xff] }
 0xbc8   : > { %v17922_v62 = vpop.eup %12509  ;;  %v7542_v11 = vsel %vm7539_vm9, %v7541_v56, %v7537_v50  ;;  %vm7554_vm4 = vcmp.eq.f32.partialorder %v7553_v18, 8.507059e+37  ;;  %v7650_v61 = vmul.f32 %v17882_v29, %v17815_v43  ;;  %v7049_v12 = vmul.f32 1.442695, %v10975_v5  ;;  %v20386_v5 = vld [vmem:[#allocation73_spill] sm:$0xff]  ;;  %v20387_v50 = vld [vmem:[#allocation74_spill] sm:$0xff] }
 0xbc9   : > { %v17926_v1 = vpop.eup %12511  ;;  %v7422_v26 = vsel %vm17837_vm8, %v17772_v10, %v7417_v6  ;;  %vm7434_vm5 = vcmp.eq.f32.partialorder %v7433_v17, 8.507059e+37  ;;  %v7557_v13 = vsel %vm7554_vm4, %v7556_v48, %v7552_v54  ;;  %v7063_v44 = vmul.f32 1.442695, %v10982_v47  ;;  %v6656_v6 = vpop.f32.mrf.mxu2 }
 0xbca   : > { %v7437_v46 = vsel %vm7434_vm5, %v7436_v51, %v7432_v34  ;;  %v7770_v30 = vmul.f32 %v17897_v4, %v17817_v22  ;;  %v17933_v7 = vadd.f32 1.0, %v12508_v57  ;;  %v17935_v3 = vadd.f32 %v6584_v53, %v6556_v16  ;;  %v6598_v53 = vpop.f32.mrf.mxu0 }
 0xbcb   : > { %v8125_v31 = vmul.f32 %v7542_v11, %v17419_v37  ;;  %v7785_v24 = vmul.f32 %v17922_v62, %v17826_v63  ;;  %v6597_v40 = vadd.f32 %v6596_v36, %v17920_v35  ;;  %v17942_v10 = vperm.slane %v17917_v39, 5  ;;  %v20389_v11 = vld [vmem:[#allocation76_spill] sm:$0xff] }
 0xbcc   : > { %v8126_v49 = vmul.f32 %v7557_v13, %v20385_v27  ;;  %v7651_v59 = vsub.f32 1.0, %v7650_v61  ;;  %v7665_v18 = vmul.f32 %v17926_v1, %v17831_v21  ;;  %12513 = vpow2.f32 %v7049_v12 }
 0xbcd   : > { %v8117_v17 = vmul.f32 %v7422_v26, %v20386_v5  ;;  %v7658_v37 = vand.u32 2147483647, %v17815_v43  ;;  %v7660_v51 = vand.u32 2147483648, %v17815_v43  ;;  %12515 = vpow2.f32 %v7063_v44 }
 0xbce   : > { %v8118_v36 = vmul.f32 %v7437_v46, %v20387_v50  ;;  %v7771_v52 = vsub.f32 1.0, %v7770_v30  ;;  %12517 = vrcp.f32 %v17933_v7  ;;  %v10983_v47 = vmul.f32 -1.702, %v17935_v3 }
 0xbcf   : > { %vm7654_vm7 = vweird.f32 %v17815_v43  ;;  %v7786_v23 = vsub.f32 1.0, %v7785_v24  ;;  %v17954_v56 = vadd.f32 %v6625_v32, %v6597_v40  ;;  %v6655_v54 = vadd.f32 %v6654_v28, %v17942_v10  ;;  %v20391_v28 = vld [vmem:[#allocation77_spill] sm:$0xff]  ;;  %v6685_v50 = vpop.f32.mrf.mxu3 }
 0xbd0   : > { %v17957_v16 = vpack.c.bf16 %v8125_v31, %v8117_v17  ;;  %v7652_v57 = vmul.f32 %v17882_v29, %v7651_v59  ;;  %v7666_v34 = vsub.f32 1.0, %v7665_v18  ;;  %v6599_v48 = vadd.f32 %v6598_v53, %v17920_v35  ;;  %8982 = vmatmul.bf16.gmra.mxu0 %v20389_v11  ;;  %v6627_v31 = vpop.f32.mrf.mxu1 }
 0xbd1   : > { %v17962_v61 = vpack.c.bf16 %v8126_v49, %v8118_v36  ;;  %vm7655_vm8 = vweird.f32 %v17882_v29  ;;  %v17965_v12 = vor.u32 1.1754944e-38, %v7660_v51  ;;  %v6657_v26 = vadd.f32 %v6656_v6, %v17942_v10  ;;  %9011 = vmatmul.bf16.gmra.mxu1 %v20391_v28 }
 0xbd2   : > { %20388 = vst [vmem:[#allocation75_spill] sm:$0xff] %v17957_v16  ;;  %9040 = vmatmul.bf16.gmra.mxu2 %v17957_v16  ;;  %v12514_v13 = vpop.eup %12513  ;;  %vm7669_vm10 = vweird.f32 %v17831_v21  ;;  %v7675_v44 = vand.u32 2147483648, %v17831_v21  ;;  %v7772_v46 = vmul.f32 %v17897_v4, %v7771_v52  ;;  %vm7774_vm11 = vweird.f32 %v17817_v22  ;;  %vm18024_vm4 = vmor %vm7654_vm7, %vm7655_vm8 }
 0xbd3   : > { %20390 = vst [vmem:[#allocation73_spill] sm:$0xff] %v17962_v61  ;;  %v7065_v30 = vmul.f32 1.442695, %v10983_v47  ;;  %9069 = vmatmul.bf16.gmra.mxu3 %v17962_v61  ;;  %v12516_v24 = vpop.eup %12515  ;;  %v7778_v40 = vand.u32 2147483647, %v17817_v22  ;;  %v7787_v27 = vmul.f32 %v17922_v62, %v7786_v23  ;;  %v17979_v59 = vadd.f32 %v6683_v19, %v6655_v54  ;;  %v20394_v47 = vld [vmem:[#allocation72_spill] sm:$0xff] }
 0xbd4   : > { %v10928_v49 = vmul.f32 -1.702, %v17954_v56  ;;  %v17981_v18 = vpop.eup %12517  ;;  %vm8000_vm12 = vweird.f32 %v17427_v8  ;;  %v7653_v53 = vadd.f32 %v17882_v29, %v7652_v57  ;;  %v7667_v5 = vmul.f32 %v17926_v1, %v7666_v34  ;;  %v20395_v54 = vld [vmem:[#allocation71_spill] sm:$0xff]  ;;  %v20421_v34 = vld [vmem:[#allocation81_spill] sm:$0xff] }
 0xbd5   : > { %v7780_v17 = vand.u32 2147483648, %v17817_v22  ;;  %v17987_v51 = vadd.f32 %v6627_v31, %v6599_v48  ;;  %vm17989_vm13 = vcmp.eq.f32.partialorder %v7658_v37, 8.507059e+37  ;;  %vm7670_vm14 = vweird.f32 %v17926_v1  ;;  %v6601_v37 = vpop.f32.mrf.mxu0 }
 0xbd6   : > { %vm7775_vm15 = vweird.f32 %v17897_v4  ;;  %v17995_v19 = vadd.f32 1.0, %v12514_v13  ;;  %v17997_v52 = vadd.f32 %v6685_v50, %v6657_v26  ;;  %v7773_v6 = vadd.f32 %v17897_v4, %v7772_v46  ;;  %vm18061_vm8 = vmor %vm7669_vm10, %vm7670_vm14 }
 0xbd7   : > { %vm7790_vm1 = vweird.f32 %v17922_v62  ;;  %v18002_v23 = vadd.f32 1.0, %v12516_v24  ;;  %12519 = vpow2.f32 %v7065_v30  ;;  %v20396_v57 = vand.u32 2147483647, %v20395_v54  ;;  %vm18036_vm0 = vmor %vm7774_vm11, %vm7775_vm15 }
 0xbd8   : > { %v20399_v48 = vand.u32 2147483647, %v17328_v15  ;;  %v7788_v13 = vadd.f32 %v17922_v62, %v7787_v27  ;;  %v7890_v46 = vmul.f32 %v17981_v18, %v17933_v7  ;;  %v6955_v31 = vmul.f32 1.442695, %v10928_v49  ;;  %v6630_v32 = vpop.f32.mrf.mxu1 }
 0xbd9   : > { %vm18006_vm2 = vcmp.eq.f32.partialorder %v20396_v57, 8.507059e+37  ;;  %v10929_v30 = vmul.f32 -1.702, %v17979_v59  ;;  %v7668_v15 = vadd.f32 %v17926_v1, %v7667_v5  ;;  %vm7789_vm5 = vweird.f32 %v17826_v63 }
 0xbda   : > { %vm18012_vm9 = vcmp.eq.f32.partialorder %v20399_v48, 8.507059e+37  ;;  %v7795_v27 = vand.u32 2147483648, %v17826_v63  ;;  %v10936_v50 = vmul.f32 -1.702, %v17987_v51  ;;  %v7793_v43 = vand.u32 2147483647, %v17826_v63  ;;  %vm18052_vm7 = vmor %vm7789_vm5, %vm7790_vm1 }
 0xbdb   : > { %12521 = vrcp.f32 %v17995_v19  ;;  %v10937_v5 = vmul.f32 -1.702, %v17997_v52  ;;  %v6602_v54 = vadd.f32 %v6601_v37, %v17920_v35  ;;  %v7657_v57 = vsel %vm18024_vm4, %v17882_v29, %v7653_v53 }
 0xbdc   : > { %v7676_v48 = vor.u32 1.1754944e-38, %v7675_v44  ;;  %v7777_v22 = vsel %vm18036_vm0, %v17897_v4, %v7773_v6  ;;  %12523 = vrcp.f32 %v18002_v23  ;;  %v7792_v29 = vsel %vm18052_vm7, %v17922_v62, %v7788_v13 }
 0xbdd   : > { %v7891_v4 = vsub.f32 1.0, %v7890_v46  ;;  %12525 = vpow2.f32 %v6955_v31  ;;  %v6957_v44 = vmul.f32 1.442695, %v10929_v30  ;;  %v12520_v53 = vpop.eup %12519  ;;  %v7672_v6 = vsel %vm18061_vm8, %v17926_v1, %v7668_v15  ;;  %v20415_v30 = vld [vmem:[#allocation67_spill] sm:$0xff]  ;;  %v20416_v15 = vld [vmem:[#allocation65_spill] sm:$0xff] }
 0xbde   : > { %v7781_v37 = vor.u32 1.1754944e-38, %v7780_v17  ;;  %v7796_v24 = vor.u32 1.1754944e-38, %v7795_v27  ;;  %v6971_v49 = vmul.f32 1.442695, %v10936_v50  ;;  %vm7779_vm10 = vcmp.eq.f32.partialorder %v7778_v40, 8.507059e+37  ;;  %v20418_v50 = vld [vmem:[#allocation48_spill] sm:$0xff] }
 0xbdf   : > { %vm7794_vm11 = vcmp.eq.f32.partialorder %v7793_v43, 8.507059e+37  ;;  %v6973_v61 = vmul.f32 1.442695, %v10937_v5  ;;  %v18071_v16 = vadd.f32 %v6630_v32, %v6602_v54  ;;  %v7662_v45 = vsel %vm17989_vm13, %v17965_v12, %v7657_v57  ;;  %v20420_v54 = vld [vmem:[#allocation78_spill] sm:$0xff] }
 0xbe0   : > { %v20410_v62 = vand.u32 2147483647, %v17831_v21  ;;  %v7782_v13 = vsel %vm7779_vm10, %v7781_v37, %v7777_v22  ;;  %v7797_v46 = vsel %vm7794_vm11, %v7796_v24, %v7792_v29  ;;  %vm20411_vm15 = vweird.f32 %v20394_v47  ;;  %v18091_v21 = vpop.f32.mrf.mxu2  ;;  %8987 = vmatmul.bf16.gmra.mxu0 %v17799_v42  ;;  %v20422_v29 = vld [vmem:[#allocation83_spill] sm:$0xff] }
 0xbe1   : > { %v18078_v31 = vpop.eup %12521  ;;  %vm18084_vm0 = vmor %vm20411_vm15, %vm8000_vm12  ;;  %v7892_v40 = vmul.f32 %v17981_v18, %v7891_v4  ;;  %v18089_v17 = vadd.f32 1.0, %v12520_v53  ;;  %12527 = vpow2.f32 %v6957_v44  ;;  %v20417_v27 = vsel %vm17587_vm6, %v20415_v30, %v20416_v15  ;;  %9016 = vmatmul.bf16.gmra.mxu1 %v17803_v38  ;;  %v20424_v4 = vld [vmem:[#allocation80_spill] sm:$0xff]  ;;  %v11844_v30 = vld [vmem:[%s13609_s23 + $0x274] sm:$0xf0] }
 0xbe2   : > { %vm7674_vm14 = vcmp.eq.f32.partialorder %v20410_v62, 8.507059e+37  ;;  %v18093_v12 = vpop.eup %12523  ;;  %v7887_v43 = vsel %vm18006_vm2, %v20418_v50, %v20417_v27  ;;  %v20419_v5 = vsel %vm17765_vm3, %v17421_v33, %v17635_v14  ;;  %12529 = vpow2.f32 %v6971_v49  ;;  %v20423_v14 = vld [vmem:[#allocation79_spill] sm:$0xff]  ;;  %v20431_v27 = vld [vmem:[#allocation68_spill] sm:$0xff] }
 0xbe3   : > { %v7677_v32 = vsel %vm7674_vm14, %v7676_v48, %v7672_v6  ;;  %v7992_v57 = vsel %vm18012_vm9, %v20420_v54, %v20419_v5  ;;  %v8002_v48 = vsel %vm18084_vm0, %v17427_v8, %v17784_v0  ;;  %v12526_v22 = vpop.eup %12525  ;;  %v8141_v63 = vmul.f32 %v7782_v13, %v20421_v34  ;;  %v18141_v13 = vpop.f32.mrf.mxu3  ;;  %v20432_v5 = vld [vmem:[#allocation70_spill] sm:$0xff] }
 0xbe4   : > { %v8142_v55 = vmul.f32 %v7797_v46, %v20422_v29  ;;  %12531 = vpow2.f32 %v6973_v61  ;;  %v10944_v33 = vmul.f32 -1.702, %v18071_v16  ;;  %v8133_v26 = vmul.f32 %v7662_v45, %v20423_v14  ;;  %v6603_v46 = vpop.f32.mrf.mxu0  ;;  %v11860_v29 = vld [vmem:[%s13609_s23 + $0x2f4] sm:$0xf0] }
 0xbe5   : > { %v8134_v44 = vmul.f32 %v7677_v32, %v20424_v4  ;;  %v7898_v53 = vand.u32 2147483647, %v17933_v7  ;;  %v7900_v8 = vand.u32 2147483648, %v17933_v7  ;;  %v7893_v0 = vadd.f32 %v17981_v18, %v7892_v40 }
 0xbe6   : > { %vm7895_vm6 = vweird.f32 %v17981_v18  ;;  %v7905_v61 = vmul.f32 %v18078_v31, %v17995_v19  ;;  %12533 = vrcp.f32 %v18089_v17  ;;  %v20425_v6 = vand.u32 2147483647, %v20394_v47 }
 0xbe7   : > { %v20428_v24 = vand.u32 2147483648, %v20394_v47  ;;  %v8010_v45 = vmul.f32 %v18093_v12, %v18002_v23  ;;  %v18139_v62 = vadd.f32 1.0, %v12526_v22  ;;  %v12528_v1 = vpop.eup %12527  ;;  %vm7894_vm12 = vweird.f32 %v17933_v7  ;;  %v11302_v47 = vld [vmem:[%s13609_s23 + $0x270] sm:$0xf] }
 0xbe8   : > { %vm18131_vm3 = vcmp.eq.f32.partialorder %v20425_v6, 8.507059e+37  ;;  %v6987_v32 = vmul.f32 1.442695, %v10944_v33  ;;  %v18144_v40 = vpack.c.bf16 %v8141_v63, %v8133_v26  ;;  %v18146_v36 = vpack.c.bf16 %v8142_v55, %v8134_v44  ;;  %v12530_v15 = vpop.eup %12529  ;;  %vm18160_vm13 = vmor %vm7894_vm12, %vm7895_vm6  ;;  %v11366_v63 = vld [vmem:[%s13609_s23 + $0x2f0] sm:$0xf] }
 0xbe9   : > { %v8006_v49 = vor.u32 1.1754944e-38, %v20428_v24  ;;  %v18151_v50 = vmul.f32 %v7887_v43, %v20431_v27  ;;  %v18154_v54 = vmul.f32 %v7992_v57, %v20432_v5  ;;  %vm18164_vm1 = vcmp.eq.f32.partialorder %v7898_v53, 8.507059e+37 }
 0xbea   : > { %20429 = vst [vmem:[#allocation74_spill] sm:$0xff] %v18144_v40  ;;  %v12532_v43 = vpop.eup %12531  ;;  %v7897_v57 = vsel %vm18160_vm13, %v17981_v18, %v7893_v0  ;;  %v7901_v55 = vor.u32 1.1754944e-38, %v7900_v8  ;;  %v7906_v33 = vsub.f32 1.0, %v7905_v61  ;;  %9045 = vmatmul.bf16.gmra.mxu2 %v18144_v40  ;;  %9074 = vmatmul.bf16.gmra.mxu3 %v18146_v36  ;;  %v8011_v14 = vsub.f32 1.0, %v8010_v45  ;;  %v6661_v8 = vpop.f32.mrf.mxu2  ;;  %v20437_v61 = vld [vmem:[#allocation69_spill] sm:$0xff] }
 0xbeb   : > { %20430 = vst [vmem:[#allocation72_spill] sm:$0xff] %v18146_v36  ;;  %v8007_v22 = vsel %vm18131_vm3, %v8006_v49, %v8002_v48  ;;  %v7915_v48 = vand.u32 2147483648, %v17995_v19  ;;  %12535 = vrcp.f32 %v18139_v62  ;;  %v18177_v26 = vadd.f32 1.0, %v12528_v1  ;;  %v6632_v45 = vpop.f32.mrf.mxu1 }
 0xbec   : > { %v11303_v4 = vor.u32 %v11844_v30, %v11302_v47  ;;  %v18179_v44 = vpop.eup %12533  ;;  %v8020_v53 = vand.u32 2147483648, %v18002_v23  ;;  %v18182_v18 = vadd.f32 1.0, %v12530_v15  ;;  %12537 = vpow2.f32 %v6987_v32  ;;  %v11294_v47 = vld [vmem:[%s13609_s23 + $0x260] sm:$0xf]  ;;  %v11842_v30 = vld [vmem:[%s13609_s23 + $0x264] sm:$0xf0] }
 0xbed   : > { %v11367_v0 = vor.u32 %v11860_v29, %v11366_v63  ;;  %v18185_v6 = vmul.f32 %v8007_v22, %v20437_v61  ;;  %v7902_v37 = vsel %vm18164_vm1, %v7901_v55, %v7897_v57  ;;  %v7913_v24 = vand.u32 2147483647, %v17995_v19  ;;  %v11358_v63 = vld [vmem:[%s13609_s23 + $0x2e0] sm:$0xf]  ;;  %v11858_v29 = vld [vmem:[%s13609_s23 + $0x2e4] sm:$0xf0]  ;;  %v6690_v55 = vpop.f32.mrf.mxu3 }
 0xbee   : > { %v18190_v49 = vadd.f32 1.0, %v12532_v43  ;;  %9085 = vmatpush.bf16.msrb.mxu0 %v11303_v4  ;;  %v7907_v1 = vmul.f32 %v18078_v31, %v7906_v33  ;;  %vm7909_vm2 = vweird.f32 %v17995_v19  ;;  %vm8014_vm9 = vweird.f32 %v18002_v23  ;;  %v6606_v33 = vpop.f32.mrf.mxu0  ;;  %v11840_v4 = vld [vmem:[%s13609_s23 + $0x254] sm:$0xf0] }
 0xbef   : > { %v8018_v32 = vand.u32 2147483647, %v18002_v23  ;;  %9114 = vmatpush.bf16.msrb.mxu1 %v11367_v0  ;;  %v8012_v15 = vmul.f32 %v18093_v12, %v8011_v14  ;;  %v8025_v27 = vmul.f32 %v18179_v44, %v18089_v17  ;;  %12539 = vrcp.f32 %v18177_v26  ;;  %v11286_v14 = vld [vmem:[%s13609_s23 + $0x250] sm:$0xf] }
 0xbf0   : > { %v6660_v5 = vadd.f32 %v18091_v21, %v17942_v10  ;;  %v18205_v22 = vmul.f32 %v7902_v37, %v17754_v9  ;;  %v18207_v7 = vor.u32 1.1754944e-38, %v7915_v48  ;;  %v18209_v34 = vor.u32 1.1754944e-38, %v8020_v53 }
 0xbf1   : > { %12541 = vrcp.f32 %v18182_v18  ;;  %v18214_v43 = vpop.eup %12535  ;;  %vm18216_vm4 = vcmp.eq.f32.partialorder %v7913_v24, 8.507059e+37  ;;  %v8035_v21 = vand.u32 2147483648, %v18089_v17  ;;  %v6604_v9 = vadd.f32 %v6603_v46, %v17920_v35  ;;  %v11350_v24 = vld [vmem:[%s13609_s23 + $0x2d0] sm:$0xf]  ;;  %v11856_v46 = vld [vmem:[%s13609_s23 + $0x2d4] sm:$0xf0] }
 0xbf2   : > { %12543 = vrcp.f32 %v18190_v49  ;;  %v11295_v48 = vor.u32 %v11842_v30, %v11294_v47  ;;  %v12538_v53 = vpop.eup %12537  ;;  %v7908_v0 = vadd.f32 %v18078_v31, %v7907_v1  ;;  %vm7910_vm5 = vweird.f32 %v18078_v31 }
 0xbf3   : > { %vm8015_vm7 = vweird.f32 %v18093_v12  ;;  %vm18228_vm8 = vcmp.eq.f32.partialorder %v8018_v32, 8.507059e+37  ;;  %v6662_v37 = vadd.f32 %v6661_v8, %v17942_v10  ;;  %v8013_v36 = vadd.f32 %v18093_v12, %v8012_v15  ;;  %vm18249_vm10 = vmor %vm7909_vm2, %vm7910_vm5 }
 0xbf4   : > { %v8026_v47 = vsub.f32 1.0, %v8025_v27  ;;  %v18237_v30 = vadd.f32 %v18141_v13, %v6660_v5  ;;  %9086 = vmatpush.bf16.msrb.mxu0 %v11295_v48  ;;  %v11359_v1 = vor.u32 %v11858_v29, %v11358_v63  ;;  %v8033_v40 = vand.u32 2147483647, %v18089_v17  ;;  %vm18269_vm14 = vmor %vm8014_vm9, %vm8015_vm7 }
 0xbf5   : > { %v7200_v32 = vmul.f32 %v18214_v43, %v18139_v62  ;;  %v6607_v2 = vadd.f32 %v6606_v33, %v17920_v35  ;;  %v11287_v41 = vor.u32 %v11840_v4, %v11286_v14  ;;  %v18243_v38 = vpop.eup %12539  ;;  %vm8029_vm11 = vweird.f32 %v18089_v17  ;;  %v6664_v33 = vpop.f32.mrf.mxu2  ;;  %v11838_v17 = vld [vmem:[%s13609_s23 + $0x244] sm:$0xf0] }
 0xbf6   : > { %v18254_v13 = vor.u32 1.1754944e-38, %v8035_v21  ;;  %v18256_v15 = vadd.f32 1.0, %v12538_v53  ;;  %v18258_v27 = vadd.f32 %v6632_v45, %v6604_v9  ;;  %9115 = vmatpush.bf16.msrb.mxu1 %v11359_v1  ;;  %v11351_v5 = vor.u32 %v11856_v46, %v11350_v24  ;;  %v6635_v4 = vpop.f32.mrf.mxu1 }
 0xbf7   : > { %v18260_v63 = vpop.eup %12541  ;;  %v7912_v19 = vsel %vm18249_vm10, %v18078_v31, %v7908_v0  ;;  %v7208_v21 = vand.u32 2147483647, %v18139_v62  ;;  %v7210_v45 = vand.u32 2147483648, %v18139_v62  ;;  %v18275_v9 = vadd.f32 %v6690_v55, %v6662_v37 }
 0xbf8   : > { %v18277_v48 = vpop.eup %12543  ;;  %v8017_v31 = vsel %vm18269_vm14, %v18093_v12, %v8013_v36  ;;  %v8027_v14 = vmul.f32 %v18179_v44, %v8026_v47  ;;  %vm8030_vm15 = vweird.f32 %v18179_v44  ;;  %v10945_v23 = vmul.f32 -1.702, %v18237_v30  ;;  %9087 = vmatpush.bf16.msrb.mxu0 %v11287_v41 }
 0xbf9   : > { %v7201_v53 = vsub.f32 1.0, %v7200_v32  ;;  %v7215_v55 = vmul.f32 %v18243_v38, %v18177_v26  ;;  %v7225_v0 = vand.u32 2147483648, %v18177_v26  ;;  %v18288_v37 = vadd.f32 %v6635_v4, %v6607_v2  ;;  %vm18327_vm3 = vmor %vm8029_vm11, %vm8030_vm15 }
 0xbfa   : > { %v7320_v24 = vmul.f32 %v18260_v63, %v18182_v18  ;;  %12545 = vrcp.f32 %v18256_v15  ;;  %v10952_v12 = vmul.f32 -1.702, %v18258_v27  ;;  %v6665_v36 = vadd.f32 %v6664_v33, %v17942_v10  ;;  %9116 = vmatpush.bf16.msrb.mxu1 %v11351_v5  ;;  %v6693_v5 = vpop.f32.mrf.mxu3 }
 0xbfb   : > { %v7917_v41 = vsel %vm18216_vm4, %v18207_v7, %v7912_v19  ;;  %v18298_v46 = vor.u32 1.1754944e-38, %v7210_v45  ;;  %v7335_v2 = vmul.f32 %v18277_v48, %v18190_v49  ;;  %v10953_v47 = vmul.f32 -1.702, %v18275_v9 }
 0xbfc   : > { %v8022_v1 = vsel %vm18228_vm8, %v18209_v34, %v8017_v31  ;;  %v8028_v32 = vadd.f32 %v18179_v44, %v8027_v14  ;;  %vm18307_vm0 = vcmp.eq.f32.partialorder %v8033_v40, 8.507059e+37  ;;  %vm7204_vm6 = vweird.f32 %v18139_v62  ;;  %v6608_v14 = vpop.f32.mrf.mxu0 }
 0xbfd   : > { %v6989_v57 = vmul.f32 1.442695, %v10945_v23  ;;  %v7202_v19 = vmul.f32 %v18214_v43, %v7201_v53  ;;  %v18314_v29 = vor.u32 1.1754944e-38, %v7225_v0  ;;  %v7328_v61 = vand.u32 2147483647, %v18182_v18 }
 0xbfe   : > { %v10960_v34 = vmul.f32 -1.702, %v18288_v37  ;;  %v7216_v45 = vsub.f32 1.0, %v7215_v55  ;;  %v7321_v40 = vsub.f32 1.0, %v7320_v24  ;;  %v7003_v33 = vmul.f32 1.442695, %v10952_v12 }
 0xbff   : > { %v18318_v31 = vadd.f32 %v6693_v5, %v6665_v36  ;;  %v18321_v23 = vmul.f32 %v7917_v41, %v17844_v60  ;;  %v7330_v53 = vand.u32 2147483648, %v18182_v18  ;;  %v7336_v55 = vsub.f32 1.0, %v7335_v2  ;;  %v11278_v24 = vld [vmem:[%s13609_s23 + $0x240] sm:$0xf]  ;;  %v11854_v5 = vld [vmem:[%s13609_s23 + $0x2c4] sm:$0xf0] }
 0xc00   : > { %v7005_v0 = vmul.f32 1.442695, %v10953_v47  ;;  %v18333_v12 = vpop.eup %12545  ;;  %v8157_v36 = vmul.f32 %v8022_v1, %v17849_v58  ;;  %v8032_v60 = vsel %vm18327_vm3, %v18179_v44, %v8028_v32  ;;  %vm7205_vm12 = vweird.f32 %v18214_v43  ;;  %v11342_v41 = vld [vmem:[%s13609_s23 + $0x2c0] sm:$0xf]  ;;  %v6666_v1 = vpop.f32.mrf.mxu2 }
 0xc01   : > { %vm7219_vm13 = vweird.f32 %v18177_v26  ;;  %12547 = vpow2.f32 %v6989_v57  ;;  %v7203_v2 = vadd.f32 %v18214_v43, %v7202_v19  ;;  %vm18345_vm1 = vcmp.eq.f32.partialorder %v7208_v21, 8.507059e+37  ;;  %v6637_v19 = vpop.f32.mrf.mxu1  ;;  %vm18374_vm4 = vmor %vm7204_vm6, %vm7205_vm12 }
 0xc02   : > { %vm7220_vm2 = vweird.f32 %v18243_v38  ;;  %vm7324_vm9 = vweird.f32 %v18182_v18  ;;  %v7019_v58 = vmul.f32 1.442695, %v10960_v34  ;;  %v6609_v44 = vadd.f32 %v6608_v14, %v17920_v35  ;;  %v20452_v14 = vld [vmem:[#allocation66_spill] sm:$0xff]  ;;  %v11262_v18 = vld [vmem:[%s13609_s23 + $0x220] sm:$0xf] }
 0xc03   : > { %v7217_v32 = vmul.f32 %v18243_v38, %v7216_v45  ;;  %v7322_v57 = vmul.f32 %v18260_v63, %v7321_v40  ;;  %12549 = vpow2.f32 %v7003_v33  ;;  %v10961_v4 = vmul.f32 -1.702, %v18318_v31  ;;  %vm18406_vm10 = vmor %vm7219_vm13, %vm7220_vm2 }
 0xc04   : > { %v7440_v21 = vmul.f32 %v18333_v12, %v18256_v15  ;;  %12551 = vpow2.f32 %v7005_v0  ;;  %v11279_v7 = vor.u32 %v11838_v17, %v11278_v24  ;;  %v11343_v42 = vor.u32 %v11854_v5, %v11342_v41  ;;  %v6611_v41 = vpop.f32.mrf.mxu0 }
 0xc05   : > { %v7337_v28 = vmul.f32 %v18277_v48, %v7336_v55  ;;  %v6667_v34 = vadd.f32 %v6666_v1, %v17942_v10  ;;  %v18361_v11 = vpack.c.bf16 %v18154_v54, %v20452_v14  ;;  %v18365_v45 = vpack.c.bf16 %v18185_v6, %v18151_v50  ;;  %v11852_v14 = vld [vmem:[%s13609_s23 + $0x2b4] sm:$0xf0] }
 0xc06   : > { %v8037_v40 = vsel %vm18307_vm0, %v18254_v13, %v8032_v60  ;;  %vm18378_vm5 = vcmp.eq.f32.partialorder %v7328_v61, 8.507059e+37  ;;  %v7331_v54 = vor.u32 1.1754944e-38, %v7330_v53  ;;  %12553 = vpow2.f32 %v7019_v58  ;;  %9088 = vmatpush.bf16.msrb.mxu0 %v11279_v7  ;;  %9117 = vmatpush.bf16.msrb.mxu1 %v11343_v42  ;;  %v6695_v61 = vpop.f32.mrf.mxu3 }
 0xc07   : > { %v18382_v50 = vadd.f32 %v6637_v19, %v6609_v44  ;;  %v12548_v6 = vpop.eup %12547  ;;  %v7207_v13 = vsel %vm18374_vm4, %v18214_v43, %v7203_v2  ;;  %v7343_v62 = vand.u32 2147483647, %v18190_v49  ;;  %v7345_v8 = vand.u32 2147483648, %v18190_v49  ;;  %8992 = vmatmul.bf16.gmra.mxu0 %v18361_v11  ;;  %9021 = vmatmul.bf16.gmra.mxu1 %v18365_v45 }
 0xc08   : > { %v7021_v0 = vmul.f32 1.442695, %v10961_v4  ;;  %v7323_v53 = vadd.f32 %v18260_v63, %v7322_v57  ;;  %vm7325_vm7 = vweird.f32 %v18260_v63  ;;  %v7441_v42 = vsub.f32 1.0, %v7440_v21  ;;  %v11836_v57 = vld [vmem:[%s13609_s23 + $0x234] sm:$0xf0] }
 0xc09   : > { %v18394_v7 = vpack.c.bf16 %v8157_v36, %v18205_v22  ;;  %v12550_v24 = vpop.eup %12549  ;;  %v7218_v43 = vadd.f32 %v18243_v38, %v7217_v32  ;;  %v7338_v60 = vadd.f32 %v18277_v48, %v7337_v28  ;;  %vm7340_vm8 = vweird.f32 %v18277_v48  ;;  %vm18428_vm15 = vmor %vm7324_vm9, %vm7325_vm7  ;;  %v11270_v32 = vld [vmem:[%s13609_s23 + $0x230] sm:$0xf] }
 0xc0a   : > { %v18399_v17 = vadd.f32 %v6695_v61, %v6667_v34  ;;  %v12552_v5 = vpop.eup %12551  ;;  %v8158_v2 = vmul.f32 %v8037_v40, %v17935_v3  ;;  %v20459_v28 = vand.u32 2147483647, %v18177_v26  ;;  %vm7339_vm14 = vweird.f32 %v18190_v49  ;;  %v11334_v34 = vld [vmem:[%s13609_s23 + $0x2b0] sm:$0xf] }
 0xc0b   : > { %v18417_v58 = vadd.f32 1.0, %v12548_v6  ;;  %v10968_v3 = vmul.f32 -1.702, %v18382_v50  ;;  %9050 = vmatmul.bf16.gmra.mxu2 %v18394_v7  ;;  %v7212_v44 = vsel %vm18345_vm1, %v18298_v46, %v7207_v13  ;;  %vm18432_vm0 = vcmp.eq.f32.partialorder %v7343_v62, 8.507059e+37  ;;  %vm18443_vm6 = vmor %vm7339_vm14, %vm7340_vm8  ;;  %v6640_v13 = vpop.f32.mrf.mxu1  ;;  %v6669_v62 = vpop.f32.mrf.mxu2 }
 0xc0c   : > { %vm18412_vm11 = vcmp.eq.f32.partialorder %v20459_v28, 8.507059e+37  ;;  %v7346_v1 = vor.u32 1.1754944e-38, %v7345_v8  ;;  %12555 = vpow2.f32 %v7021_v0  ;;  %v12554_v4 = vpop.eup %12553  ;;  %v7327_v46 = vsel %vm18428_vm15, %v18260_v63, %v7323_v53  ;;  %v6613_v26 = vpop.f32.mrf.mxu0 }
 0xc0d   : > { %v7442_v47 = vmul.f32 %v18333_v12, %v7441_v42  ;;  %v18448_v19 = vadd.f32 1.0, %v12550_v24  ;;  %v6612_v21 = vadd.f32 %v6611_v41, %v17920_v35  ;;  %v7222_v40 = vsel %vm18406_vm10, %v18243_v38, %v7218_v43 }
 0xc0e   : > { %v7342_v63 = vsel %vm18443_vm6, %v18277_v48, %v7338_v60  ;;  %v18459_v33 = vadd.f32 1.0, %v12552_v5  ;;  %v10969_v6 = vmul.f32 -1.702, %v18399_v17  ;;  %12557 = vrcp.f32 %v18417_v58  ;;  %v6698_v41 = vpop.f32.mrf.mxu3 }
 0xc0f   : > { %v7035_v8 = vmul.f32 1.442695, %v10968_v3  ;;  %v18464_v0 = vpack.c.bf16 %v8158_v2, %v18321_v23  ;;  %v11271_v61 = vor.u32 %v11836_v57, %v11270_v32  ;;  %v7332_v38 = vsel %vm18378_vm5, %v7331_v54, %v7327_v46 }
 0xc10   : > { %vm7445_vm3 = vweird.f32 %v18333_v12  ;;  %v18469_v53 = vadd.f32 1.0, %v12554_v4  ;;  %v11335_v48 = vor.u32 %v11852_v14, %v11334_v34  ;;  %v7443_v42 = vadd.f32 %v18333_v12, %v7442_v47 }
 0xc11   : > { %20468 = vst [vmem:[#allocation71_spill] sm:$0xff] %v18464_v0  ;;  %12559 = vrcp.f32 %v18448_v19  ;;  %v18473_v24 = vadd.f32 %v6640_v13, %v6612_v21  ;;  %9079 = vmatmul.bf16.gmra.mxu3 %v18464_v0  ;;  %9089 = vmatpush.bf16.msrb.mxu0 %v11271_v61  ;;  %v6670_v23 = vadd.f32 %v6669_v62, %v17942_v10  ;;  %v7450_v54 = vand.u32 2147483648, %v18256_v15  ;;  %v11850_v13 = vld [vmem:[%s13609_s23 + $0x2a4] sm:$0xf0] }
 0xc12   : > { %v12556_v43 = vpop.eup %12555  ;;  %v7347_v55 = vsel %vm18432_vm0, %v7346_v1, %v7342_v63  ;;  %12561 = vrcp.f32 %v18459_v33  ;;  %v7037_v60 = vmul.f32 1.442695, %v10969_v6  ;;  %9118 = vmatpush.bf16.msrb.mxu1 %v11335_v48  ;;  %vm7444_vm12 = vweird.f32 %v18256_v15  ;;  %v11326_v6 = vld [vmem:[%s13609_s23 + $0x2a0] sm:$0xf] }
 0xc13   : > { %v7448_v5 = vand.u32 2147483647, %v18256_v15  ;;  %12563 = vpow2.f32 %v7035_v8  ;;  %v18483_v2 = vadd.f32 %v6698_v41, %v6670_v23  ;;  %v7227_v22 = vsel %vm18412_vm11, %v18314_v29, %v7222_v40  ;;  %vm18491_vm13 = vmor %vm7444_vm12, %vm7445_vm3  ;;  %v6642_v34 = vpop.f32.mrf.mxu1  ;;  %v11832_v23 = vld [vmem:[%s13609_s23 + $0x214] sm:$0xf0] }
 0xc14   : > { %v8111_v28 = vmul.f32 %v7332_v38, %v17987_v51  ;;  %12565 = vrcp.f32 %v18469_v53  ;;  %v18496_v15 = vpop.eup %12557  ;;  %v8112_v49 = vmul.f32 %v7347_v55, %v17997_v52  ;;  %v7447_v29 = vsel %vm18491_vm13, %v18333_v12, %v7443_v42  ;;  %v11254_v42 = vld [vmem:[%s13609_s23 + $0x210] sm:$0xf] }
 0xc15   : > { %v18502_v36 = vadd.f32 1.0, %v12556_v43  ;;  %v10976_v51 = vmul.f32 -1.702, %v18473_v24  ;;  %v8103_v1 = vmul.f32 %v7212_v44, %v17954_v56  ;;  %v7451_v32 = vor.u32 1.1754944e-38, %v7450_v54  ;;  %v6671_v43 = vpop.f32.mrf.mxu2 }
 0xc16   : > { %v7465_v57 = vand.u32 2147483648, %v18417_v58  ;;  %12567 = vpow2.f32 %v7037_v60  ;;  %v8104_v46 = vmul.f32 %v7227_v22, %v17979_v59  ;;  %vm7449_vm1 = vcmp.eq.f32.partialorder %v7448_v5, 8.507059e+37  ;;  %v11834_v59 = vld [vmem:[%s13609_s23 + $0x224] sm:$0xf0]  ;;  %v11318_v5 = vld [vmem:[%s13609_s23 + $0x290] sm:$0xf] }
 0xc17   : > { %v18507_v4 = vpop.eup %12559  ;;  %v10977_v52 = vmul.f32 -1.702, %v18483_v2  ;;  %v6614_v12 = vadd.f32 %v6613_v26, %v17920_v35  ;;  %v7452_v21 = vsel %vm7449_vm1, %v7451_v32, %v7447_v29  ;;  %v7455_v56 = vmul.f32 %v18496_v15, %v18417_v58  ;;  %v11848_v22 = vld [vmem:[%s13609_s23 + $0x294] sm:$0xf0] }
 0xc18   : > { %v18513_v47 = vpop.eup %12561  ;;  %v7463_v44 = vand.u32 2147483647, %v18417_v58  ;;  %v18519_v40 = vpack.c.bf16 %v8111_v28, %v8103_v1  ;;  %v18521_v63 = vpack.c.bf16 %v8112_v49, %v8104_v46  ;;  %12569 = vrcp.f32 %v18502_v36 }
 0xc19   : > { %v12564_v14 = vpop.eup %12563  ;;  %v7051_v35 = vmul.f32 1.442695, %v10976_v51  ;;  %v18528_v8 = vor.u32 1.1754944e-38, %v7465_v57  ;;  %v7560_v61 = vmul.f32 %v18507_v4, %v18448_v19  ;;  %v7570_v38 = vand.u32 2147483648, %v18448_v19 }
 0xc1a   : > { %v18526_v62 = vpop.eup %12565  ;;  %v11263_v48 = vor.u32 %v11834_v59, %v11262_v18  ;;  %v18536_v55 = vmul.f32 %v7452_v21, %v18071_v16  ;;  %v7053_v54 = vmul.f32 1.442695, %v10977_v52  ;;  %v18538_v60 = vadd.f32 %v6642_v34, %v6614_v12  ;;  %v6700_v21 = vpop.f32.mrf.mxu3 }
 0xc1b   : > { %v11327_v41 = vor.u32 %v11850_v13, %v11326_v6  ;;  %v7456_v3 = vsub.f32 1.0, %v7455_v56  ;;  %v7575_v26 = vmul.f32 %v18513_v47, %v18459_v33  ;;  %v18544_v49 = vadd.f32 1.0, %v12564_v14 }
 0xc1c   : > { %v12568_v28 = vpop.eup %12567  ;;  %9090 = vmatpush.bf16.msrb.mxu0 %v11263_v48  ;;  %v11255_v29 = vor.u32 %v11832_v23, %v11254_v42  ;;  %v7680_v51 = vmul.f32 %v18526_v62, %v18469_v53  ;;  %12571 = vpow2.f32 %v7051_v35  ;;  %v11319_v16 = vor.u32 %v11848_v22, %v11318_v5  ;;  %v11246_v22 = vld [vmem:[%s13609_s23 + $0x200] sm:$0xf] }
 0xc1d   : > { %9119 = vmatpush.bf16.msrb.mxu1 %v11327_v41  ;;  %v6672_v1 = vadd.f32 %v6671_v43, %v17942_v10  ;;  %vm7459_vm2 = vweird.f32 %v18417_v58  ;;  %vm7460_vm9 = vweird.f32 %v18496_v15  ;;  %v7561_v32 = vsub.f32 1.0, %v7560_v61  ;;  %v6712_v10 = vpop.f32.mrf.mxu0 }
 0xc1e   : > { %v7568_v57 = vand.u32 2147483647, %v18448_v19  ;;  %v18552_v46 = vor.u32 1.1754944e-38, %v7570_v38  ;;  %v18554_v52 = vpop.eup %12569  ;;  %v18556_v12 = vadd.f32 1.0, %v12568_v28  ;;  %12573 = vpow2.f32 %v7053_v54  ;;  %v6741_v54 = vpop.f32.mrf.mxu1  ;;  %v11830_v28 = vld [vmem:[%s13609_s23 + $0x204] sm:$0xf0]  ;;  %vm18615_vm15 = vmor %vm7459_vm2, %vm7460_vm9 }
 0xc1f   : > { %v10984_v18 = vmul.f32 -1.702, %v18538_v60  ;;  %v18560_v56 = vperm.slane %v17917_v39, 6  ;;  %v7457_v34 = vmul.f32 %v18496_v15, %v7456_v3  ;;  %v7576_v59 = vsub.f32 1.0, %v7575_v26 }
 0xc20   : > { %v7585_v14 = vand.u32 2147483648, %v18459_v33  ;;  %12575 = vrcp.f32 %v18544_v49  ;;  %9091 = vmatpush.bf16.msrb.mxu0 %v11255_v29  ;;  %vm7564_vm4 = vweird.f32 %v18448_v19  ;;  %v7583_v35 = vand.u32 2147483647, %v18459_v33 }
 0xc21   : > { %v7681_v6 = vsub.f32 1.0, %v7680_v51  ;;  %9120 = vmatpush.bf16.msrb.mxu1 %v11319_v16  ;;  %v18567_v13 = vadd.f32 %v6700_v21, %v6672_v1  ;;  %v6713_v61 = vadd.f32 %v6712_v10, %v18560_v56  ;;  %vm18570_vm5 = vcmp.eq.f32.partialorder %v7463_v44, 8.507059e+37  ;;  %v11310_v16 = vld [vmem:[%s13609_s23 + $0x280] sm:$0xf]  ;;  %v6770_v1 = vpop.f32.mrf.mxu2 }
 0xc22   : > { %v7562_v48 = vmul.f32 %v18507_v4, %v7561_v32  ;;  %vm7579_vm7 = vweird.f32 %v18459_v33  ;;  %v7688_v42 = vand.u32 2147483647, %v18469_v53  ;;  %v7690_v23 = vand.u32 2147483648, %v18469_v53  ;;  %v12572_v41 = vpop.eup %12571 }
 0xc23   : > { %v7695_v43 = vmul.f32 %v18554_v52, %v18502_v36  ;;  %vm7684_vm8 = vweird.f32 %v18469_v53  ;;  %12577 = vrcp.f32 %v18556_v12  ;;  %v7067_v44 = vmul.f32 1.442695, %v10984_v18 }
 0xc24   : > { %v18582_v5 = vadd.f32 %v6741_v54, %v6713_v61  ;;  %v7458_v3 = vadd.f32 %v18496_v15, %v7457_v34  ;;  %v7577_v26 = vmul.f32 %v18513_v47, %v7576_v59  ;;  %v18588_v29 = vor.u32 1.1754944e-38, %v7585_v14  ;;  %v12574_v32 = vpop.eup %12573  ;;  %v11846_v61 = vld [vmem:[%s13609_s23 + $0x284] sm:$0xf0] }
 0xc25   : > { %v11247_v51 = vor.u32 %v11830_v28, %v11246_v22  ;;  %vm7565_vm10 = vweird.f32 %v18507_v4  ;;  %vm18592_vm11 = vcmp.eq.f32.partialorder %v7568_v57, 8.507059e+37  ;;  %v7682_v18 = vmul.f32 %v18526_v62, %v7681_v6 }
 0xc26   : > { %v10985_v10 = vmul.f32 -1.702, %v18567_v13  ;;  %v18600_v34 = vperm.slane %v17917_v39, 7  ;;  %v18602_v59 = vpop.eup %12575  ;;  %v7563_v14 = vadd.f32 %v18507_v4, %v7562_v48  ;;  %vm18605_vm14 = vcmp.eq.f32.partialorder %v7583_v35, 8.507059e+37  ;;  %vm18644_vm13 = vmor %vm7564_vm4, %vm7565_vm10 }
 0xc27   : > { %v7691_v57 = vor.u32 1.1754944e-38, %v7690_v23  ;;  %v7696_v22 = vsub.f32 1.0, %v7695_v43  ;;  %v18609_v28 = vadd.f32 1.0, %v12572_v41  ;;  %9092 = vmatpush.bf16.msrb.mxu0 %v11247_v51  ;;  %vm18619_vm0 = vcmp.eq.f32.partialorder %v7688_v42, 8.507059e+37 }
 0xc28   : > { %12579 = vpow2.f32 %v7067_v44  ;;  %v10930_v35 = vmul.f32 -1.702, %v18582_v5  ;;  %v11311_v48 = vor.u32 %v11846_v61, %v11310_v16  ;;  %v6771_v23 = vadd.f32 %v6770_v1, %v18600_v34 }
 0xc29   : > { %v7462_v43 = vsel %vm18615_vm15, %v18496_v15, %v7458_v3  ;;  %v7578_v58 = vadd.f32 %v18513_v47, %v7577_v26  ;;  %vm7580_vm6 = vweird.f32 %v18513_v47  ;;  %v18630_v41 = vadd.f32 1.0, %v12574_v32  ;;  %v18632_v42 = vpop.eup %12577  ;;  %v6799_v15 = vpop.f32.mrf.mxu3 }
 0xc2a   : > { %v7683_v51 = vadd.f32 %v18526_v62, %v7682_v18  ;;  %vm7685_vm3 = vweird.f32 %v18526_v62  ;;  %vm7699_vm12 = vweird.f32 %v18502_v36  ;;  %v7800_v44 = vmul.f32 %v18602_v59, %v18544_v49  ;;  %9121 = vmatpush.bf16.msrb.mxu1 %v11311_v48  ;;  %9093 = vmatmul.bf16.vlgmr.msrb.gmra.mxu0 %v18519_v40  ;;  %vm18663_vm1 = vmor %vm7579_vm7, %vm7580_vm6  ;;  %v6714_v48 = vpop.f32.mrf.mxu0 }
 0xc2b   : > { %v7069_v16 = vmul.f32 1.442695, %v10985_v10  ;;  %v7703_v26 = vand.u32 2147483647, %v18502_v36  ;;  %v7705_v1 = vand.u32 2147483648, %v18502_v36  ;;  %12581 = vrcp.f32 %v18609_v28  ;;  %vm18675_vm2 = vmor %vm7684_vm8, %vm7685_vm3 }
 0xc2c   : > { %v18651_v32 = vadd.f32 %v6799_v15, %v6771_v23  ;;  %v7467_v18 = vsel %vm18570_vm5, %v18528_v8, %v7462_v43  ;;  %v7567_v19 = vsel %vm18644_vm13, %v18507_v4, %v7563_v14  ;;  %v7697_v61 = vmul.f32 %v18554_v52, %v7696_v22 }
 0xc2d   : > { %v6959_v39 = vmul.f32 1.442695, %v10930_v35  ;;  %v7582_v8 = vsel %vm18663_vm1, %v18513_v47, %v7578_v58  ;;  %v7815_v33 = vmul.f32 %v18632_v42, %v18556_v12  ;;  %12583 = vrcp.f32 %v18630_v41  ;;  %9122 = vmatmul.bf16.vlgmr.msrb.gmra.mxu1 %v18521_v63  ;;  %v6743_v58 = vpop.f32.mrf.mxu1 }
 0xc2e   : > { %v6715_v38 = vadd.f32 %v6714_v48, %v18560_v56  ;;  %v12580_v14 = vpop.eup %12579  ;;  %v7687_v47 = vsel %vm18675_vm2, %v18526_v62, %v7683_v51  ;;  %v7801_v22 = vsub.f32 1.0, %v7800_v44  ;;  %12585 = vpow2.f32 %v7069_v16 }
 0xc2f   : > { %v10931_v53 = vmul.f32 -1.702, %v18651_v32  ;;  %v7572_v35 = vsel %vm18592_vm11, %v18552_v46, %v7567_v19  ;;  %vm7700_vm9 = vweird.f32 %v18554_v52  ;;  %vm18692_vm4 = vcmp.eq.f32.partialorder %v7703_v26, 8.507059e+37 }
 0xc30   : > { %v7808_v43 = vand.u32 2147483647, %v18544_v49  ;;  %v7587_v62 = vsel %vm18605_vm14, %v18588_v29, %v7582_v8  ;;  %v7698_v51 = vadd.f32 %v18554_v52, %v7697_v61  ;;  %12587 = vpow2.f32 %v6959_v39  ;;  %vm18726_vm5 = vmor %vm7699_vm12, %vm7700_vm9 }
 0xc31   : > { %v18701_v44 = vadd.f32 %v6743_v58, %v6715_v38  ;;  %v18703_v21 = vpop.eup %12581  ;;  %v18706_v46 = vmul.f32 %v7467_v18, %v18237_v30  ;;  %v7692_v16 = vsel %vm18619_vm0, %v7691_v57, %v7687_v47  ;;  %v7816_v15 = vsub.f32 1.0, %v7815_v33  ;;  %v6801_v38 = vpop.f32.mrf.mxu3 }
 0xc32   : > { %v18710_v3 = vadd.f32 1.0, %v12580_v14  ;;  %v7706_v26 = vor.u32 1.1754944e-38, %v7705_v1  ;;  %v7802_v54 = vmul.f32 %v18602_v59, %v7801_v22  ;;  %v6961_v29 = vmul.f32 1.442695, %v10931_v53  ;;  %v6772_v1 = vpop.f32.mrf.mxu2 }
 0xc33   : > { %v10938_v19 = vmul.f32 -1.702, %v18701_v44  ;;  %v18714_v10 = vpop.eup %12583  ;;  %v18717_v61 = vmul.f32 %v7572_v35, %v18258_v27  ;;  %v18720_v30 = vmul.f32 %v7587_v62, %v18275_v9  ;;  %vm7804_vm7 = vweird.f32 %v18544_v49 }
 0xc34   : > { %v7810_v6 = vand.u32 2147483648, %v18544_v49  ;;  %v12586_v18 = vpop.eup %12585  ;;  %v18733_v27 = vmul.f32 %v7692_v16, %v18288_v37  ;;  %v7702_v9 = vsel %vm18726_vm5, %v18554_v52, %v7698_v51  ;;  %vm18738_vm8 = vcmp.eq.f32.partialorder %v7808_v43, 8.507059e+37 }
 0xc35   : > { %v7920_v36 = vmul.f32 %v18703_v21, %v18609_v28  ;;  %v7817_v48 = vmul.f32 %v18632_v42, %v7816_v15  ;;  %12589 = vrcp.f32 %v18710_v3  ;;  %v6975_v8 = vmul.f32 1.442695, %v10938_v19 }
 0xc36   : > { %v6773_v4 = vadd.f32 %v6772_v1, %v18600_v34  ;;  %v12588_v37 = vpop.eup %12587  ;;  %v7803_v33 = vadd.f32 %v18602_v59, %v7802_v54  ;;  %vm7805_vm10 = vweird.f32 %v18602_v59  ;;  %v7935_v52 = vmul.f32 %v18714_v10, %v18630_v41 }
 0xc37   : > { %12591 = vpow2.f32 %v6961_v29  ;;  %v7823_v14 = vand.u32 2147483647, %v18556_v12  ;;  %v7825_v47 = vand.u32 2147483648, %v18556_v12  ;;  %v18753_v22 = vadd.f32 1.0, %v12586_v18  ;;  %vm18762_vm14 = vmor %vm7804_vm7, %vm7805_vm10  ;;  %v6717_v29 = vpop.f32.mrf.mxu0 }
 0xc38   : > { %v18755_v53 = vadd.f32 %v6801_v38, %v6773_v4  ;;  %v7707_v35 = vsel %vm18692_vm4, %v7706_v26, %v7702_v9  ;;  %v7811_v43 = vor.u32 1.1754944e-38, %v7810_v6  ;;  %vm7820_vm11 = vweird.f32 %v18632_v42 }
 0xc39   : > { %v7921_v58 = vsub.f32 1.0, %v7920_v36  ;;  %v7818_v51 = vadd.f32 %v18632_v42, %v7817_v48  ;;  %v18767_v16 = vadd.f32 1.0, %v12588_v37  ;;  %12593 = vpow2.f32 %v6975_v8 }
 0xc3a   : > { %v10939_v15 = vmul.f32 -1.702, %v18755_v53  ;;  %v7807_v23 = vsel %vm18762_vm14, %v18602_v59, %v7803_v33  ;;  %v7928_v26 = vand.u32 2147483647, %v18609_v28  ;;  %v7930_v54 = vand.u32 2147483648, %v18609_v28  ;;  %v6746_v33 = vpop.f32.mrf.mxu1 }
 0xc3b   : > { %v7936_v49 = vsub.f32 1.0, %v7935_v52  ;;  %v18775_v19 = vpop.eup %12589  ;;  %vm7819_vm15 = vweird.f32 %v18556_v12  ;;  %vm18778_vm0 = vcmp.eq.f32.partialorder %v7823_v14, 8.507059e+37  ;;  %v7826_v6 = vor.u32 1.1754944e-38, %v7825_v47  ;;  %v11430_v14 = vld [vmem:[%s13609_s23 + $0x370] sm:$0xf] }
 0xc3c   : > { %12595 = vrcp.f32 %v18753_v22  ;;  %v18784_v59 = vmul.f32 %v7707_v35, %v18318_v31  ;;  %vm18788_vm6 = vmor %vm7819_vm15, %vm7820_vm11  ;;  %v7922_v9 = vmul.f32 %v18703_v21, %v7921_v58  ;;  %v6977_v12 = vmul.f32 1.442695, %v10939_v15  ;;  %v11876_v47 = vld [vmem:[%s13609_s23 + $0x374] sm:$0xf0]  ;;  %v11422_v15 = vld [vmem:[%s13609_s23 + $0x360] sm:$0xf] }
 0xc3d   : > { %v12592_v1 = vpop.eup %12591  ;;  %v6718_v36 = vadd.f32 %v6717_v29, %v18560_v56  ;;  %v7812_v48 = vsel %vm18738_vm8, %v7811_v43, %v7807_v23  ;;  %v7822_v31 = vsel %vm18788_vm6, %v18632_v42, %v7818_v51  ;;  %vm7924_vm3 = vweird.f32 %v18609_v28  ;;  %v11874_v23 = vld [vmem:[%s13609_s23 + $0x364] sm:$0xf0] }
 0xc3e   : > { %12597 = vrcp.f32 %v18767_v16  ;;  %vm18801_vm12 = vcmp.eq.f32.partialorder %v7928_v26, 8.507059e+37  ;;  %v7931_v4 = vor.u32 1.1754944e-38, %v7930_v54  ;;  %v7937_v37 = vmul.f32 %v18714_v10, %v7936_v49 }
 0xc3f   : > { %v8040_v39 = vmul.f32 %v18775_v19, %v18710_v3  ;;  %12599 = vpow2.f32 %v6977_v12  ;;  %v12594_v52 = vpop.eup %12593  ;;  %v18808_v42 = vadd.f32 1.0, %v12592_v1  ;;  %v18810_v38 = vadd.f32 %v6746_v33, %v6718_v36 }
 0xc40   : > { %v18816_v35 = vpack.c.bf16 %v18717_v61, %v18536_v55  ;;  %v18820_v43 = vpack.c.bf16 %v18720_v30, %v18706_v46  ;;  %v18823_v58 = vmul.f32 %v7812_v48, %v18382_v50  ;;  %v7827_v62 = vsel %vm18778_vm0, %v7826_v6, %v7822_v31  ;;  %v6775_v50 = vpop.f32.mrf.mxu2 }
 0xc41   : > { %v7923_v51 = vadd.f32 %v18703_v21, %v7922_v9  ;;  %vm7925_vm13 = vweird.f32 %v18703_v21  ;;  %v7943_v55 = vand.u32 2147483647, %v18630_v41  ;;  %v7945_v61 = vand.u32 2147483648, %v18630_v41 }
 0xc42   : > { %v18831_v26 = vpop.eup %12595  ;;  %v10946_v46 = vmul.f32 -1.702, %v18810_v38  ;;  %v11431_v30 = vor.u32 %v11876_v47, %v11430_v14  ;;  %9098 = vmatmul.bf16.gmra.mxu0 %v18816_v35  ;;  %9127 = vmatmul.bf16.gmra.mxu1 %v18820_v43  ;;  %v8041_v54 = vsub.f32 1.0, %v8040_v39  ;;  %v8048_v49 = vand.u32 2147483647, %v18710_v3  ;;  %vm18848_vm1 = vmor %vm7924_vm3, %vm7925_vm13 }
 0xc43   : > { %v8050_v29 = vand.u32 2147483648, %v18710_v3  ;;  %v18840_v57 = vadd.f32 1.0, %v12594_v52  ;;  %v7938_v18 = vadd.f32 %v18714_v10, %v7937_v37  ;;  %vm7940_vm2 = vweird.f32 %v18714_v10  ;;  %v6804_v52 = vpop.f32.mrf.mxu3 }
 0xc44   : > { %v18842_v6 = vpop.eup %12597  ;;  %12601 = vrcp.f32 %v18808_v42  ;;  %9143 = vmatpush.bf16.msrb.mxu2 %v11431_v30  ;;  %v11423_v9 = vor.u32 %v11874_v23, %v11422_v15  ;;  %v7927_v36 = vsel %vm18848_vm1, %v18703_v21, %v7923_v51  ;;  %v8055_v28 = vmul.f32 %v18831_v26, %v18753_v22  ;;  %v6719_v51 = vpop.f32.mrf.mxu0 }
 0xc45   : > { %v12600_v12 = vpop.eup %12599  ;;  %v6991_v48 = vmul.f32 1.442695, %v10946_v46  ;;  %v6776_v31 = vadd.f32 %v6775_v50, %v18600_v34  ;;  %v18862_v37 = vmul.f32 %v7827_v62, %v18399_v17  ;;  %vm7939_vm9 = vweird.f32 %v18630_v41  ;;  %v11494_v62 = vld [vmem:[%s13609_s23 + $0x3f0] sm:$0xf]  ;;  %v11892_v41 = vld [vmem:[%s13609_s23 + $0x3f4] sm:$0xf0] }
 0xc46   : > { %vm18865_vm4 = vcmp.eq.f32.partialorder %v7943_v55, 8.507059e+37  ;;  %v18869_v33 = vadd.f32 1.0, %v12600_v12  ;;  %vm18871_vm5 = vmor %vm7939_vm9, %vm7940_vm2  ;;  %v7946_v14 = vor.u32 1.1754944e-38, %v7945_v61  ;;  %v8042_v47 = vmul.f32 %v18775_v19, %v8041_v54  ;;  %v6748_v54 = vpop.f32.mrf.mxu1 }
 0xc47   : > { %12603 = vrcp.f32 %v18840_v57  ;;  %v18877_v17 = vadd.f32 %v6804_v52, %v6776_v31  ;;  %v7932_v15 = vsel %vm18801_vm12, %v7931_v4, %v7927_v36  ;;  %v7942_v23 = vsel %vm18871_vm5, %v18714_v10, %v7938_v18  ;;  %v11486_v31 = vld [vmem:[%s13609_s23 + $0x3e0] sm:$0xf] }
 0xc48   : > { %vm8044_vm7 = vweird.f32 %v18710_v3  ;;  %v8051_v55 = vor.u32 1.1754944e-38, %v8050_v29  ;;  %9144 = vmatpush.bf16.msrb.mxu2 %v11423_v9  ;;  %vm18887_vm8 = vcmp.eq.f32.partialorder %v8048_v49, 8.507059e+37  ;;  %v8056_v46 = vsub.f32 1.0, %v8055_v28  ;;  %v11414_v28 = vld [vmem:[%s13609_s23 + $0x350] sm:$0xf]  ;;  %v6777_v52 = vpop.f32.mrf.mxu2 }
 0xc49   : > { %v7230_v30 = vmul.f32 %v18842_v6, %v18767_v16  ;;  %12605 = vpow2.f32 %v6991_v48  ;;  %v10947_v8 = vmul.f32 -1.702, %v18877_v17  ;;  %vm8045_vm10 = vweird.f32 %v18775_v19  ;;  %v11872_v48 = vld [vmem:[%s13609_s23 + $0x354] sm:$0xf0] }
 0xc4a   : > { %v18894_v4 = vpop.eup %12601  ;;  %12607 = vrcp.f32 %v18869_v33  ;;  %v11495_v10 = vor.u32 %v11892_v41, %v11494_v62  ;;  %v6720_v50 = vadd.f32 %v6719_v51, %v18560_v56  ;;  %v8043_v49 = vadd.f32 %v18775_v19, %v8042_v47  ;;  %v11890_v62 = vld [vmem:[%s13609_s23 + $0x3e4] sm:$0xf0]  ;;  %vm18923_vm14 = vmor %vm8044_vm7, %vm8045_vm10 }
 0xc4b   : > { %v8063_v29 = vand.u32 2147483647, %v18753_v22  ;;  %v8065_v1 = vand.u32 2147483648, %v18753_v22  ;;  %v6993_v18 = vmul.f32 1.442695, %v10947_v8  ;;  %v18903_v9 = vmul.f32 %v7932_v15, %v18473_v24 }
 0xc4c   : > { %v7947_v12 = vsel %vm18865_vm4, %v7946_v14, %v7942_v23  ;;  %vm8059_vm11 = vweird.f32 %v18753_v22  ;;  %9172 = vmatpush.bf16.msrb.mxu3 %v11495_v10  ;;  %v18908_v36 = vadd.f32 %v6748_v54, %v6720_v50  ;;  %v8057_v47 = vmul.f32 %v18831_v26, %v8056_v46  ;;  %v11406_v23 = vld [vmem:[%s13609_s23 + $0x340] sm:$0xf]  ;;  %v11870_v46 = vld [vmem:[%s13609_s23 + $0x344] sm:$0xf0] }
 0xc4d   : > { %v18913_v21 = vpop.eup %12603  ;;  %v7231_v24 = vsub.f32 1.0, %v7230_v30  ;;  %v7245_v39 = vmul.f32 %v18894_v4, %v18808_v42  ;;  %v11415_v14 = vor.u32 %v11872_v48, %v11414_v28  ;;  %12609 = vpow2.f32 %v6993_v18 }
 0xc4e   : > { %v10954_v51 = vmul.f32 -1.702, %v18908_v36  ;;  %v11487_v15 = vor.u32 %v11890_v62, %v11486_v31  ;;  %v6778_v30 = vadd.f32 %v6777_v52, %v18600_v34  ;;  %v8047_v10 = vsel %vm18923_vm14, %v18775_v19, %v8043_v49 }
 0xc4f   : > { %v12606_v8 = vpop.eup %12605  ;;  %vm18934_vm15 = vcmp.eq.f32.partialorder %v8063_v29, 8.507059e+37  ;;  %v8066_v3 = vor.u32 1.1754944e-38, %v8065_v1  ;;  %v7238_v54 = vand.u32 2147483647, %v18767_v16  ;;  %9145 = vmatpush.bf16.msrb.mxu2 %v11415_v14  ;;  %v18942_v28 = vmul.f32 %v7947_v12, %v18483_v2  ;;  %v6806_v29 = vpop.f32.mrf.mxu3  ;;  %v11478_v14 = vld [vmem:[%s13609_s23 + $0x3d0] sm:$0xf] }
 0xc50   : > { %v18939_v18 = vpop.eup %12607  ;;  %v7240_v48 = vand.u32 2147483648, %v18767_v16  ;;  %v7350_v19 = vmul.f32 %v18913_v21, %v18840_v57  ;;  %v7007_v49 = vmul.f32 1.442695, %v10954_v51  ;;  %9173 = vmatpush.bf16.msrb.mxu3 %v11487_v15  ;;  %v8058_v31 = vadd.f32 %v18831_v26, %v8057_v47  ;;  %v11888_v2 = vld [vmem:[%s13609_s23 + $0x3d4] sm:$0xf0]  ;;  %v6722_v12 = vpop.f32.mrf.mxu0 }
 0xc51   : > { %vm8060_vm0 = vweird.f32 %v18831_v26  ;;  %vm7234_vm6 = vweird.f32 %v18767_v16  ;;  %v11407_v1 = vor.u32 %v11870_v46, %v11406_v23  ;;  %v18950_v52 = vadd.f32 %v6806_v29, %v6778_v30 }
 0xc52   : > { %v8052_v62 = vsel %vm18887_vm8, %v8051_v55, %v8047_v10  ;;  %v7232_v41 = vmul.f32 %v18842_v6, %v7231_v24  ;;  %v7246_v51 = vsub.f32 1.0, %v7245_v39  ;;  %v18957_v15 = vadd.f32 1.0, %v12606_v8  ;;  %vm18967_vm3 = vmor %vm8059_vm11, %vm8060_vm0  ;;  %v6751_v8 = vpop.f32.mrf.mxu1 }
 0xc53   : > { %v7365_v47 = vmul.f32 %v18939_v18, %v18869_v33  ;;  %9146 = vmatpush.bf16.msrb.mxu2 %v11407_v1  ;;  %v10955_v0 = vmul.f32 -1.702, %v18950_v52  ;;  %v11479_v23 = vor.u32 %v11888_v2, %v11478_v14  ;;  %v6723_v46 = vadd.f32 %v6722_v12, %v18560_v56  ;;  %v12610_v30 = vpop.eup %12609  ;;  %v11470_v2 = vld [vmem:[%s13609_s23 + $0x3c0] sm:$0xf]  ;;  %v11886_v12 = vld [vmem:[%s13609_s23 + $0x3c4] sm:$0xf0] }
 0xc54   : > { %v7241_v61 = vor.u32 1.1754944e-38, %v7240_v48  ;;  %v7253_v24 = vand.u32 2147483647, %v18808_v42  ;;  %v7351_v39 = vsub.f32 1.0, %v7350_v19  ;;  %12611 = vpow2.f32 %v7007_v49 }
 0xc55   : > { %v8062_v10 = vsel %vm18967_vm3, %v18831_v26, %v8058_v31  ;;  %vm18975_vm12 = vcmp.eq.f32.partialorder %v7238_v54, 8.507059e+37  ;;  %v7255_v22 = vand.u32 2147483648, %v18808_v42  ;;  %v7009_v1 = vmul.f32 1.442695, %v10955_v0  ;;  %9174 = vmatpush.bf16.msrb.mxu3 %v11479_v23  ;;  %v11398_v26 = vld [vmem:[%s13609_s23 + $0x330] sm:$0xf] }
 0xc56   : > { %v18980_v48 = vadd.f32 %v6751_v8, %v6723_v46  ;;  %v18983_v19 = vmul.f32 %v8052_v62, %v18538_v60  ;;  %vm7235_vm13 = vweird.f32 %v18842_v6  ;;  %v7247_v49 = vmul.f32 %v18894_v4, %v7246_v51  ;;  %v11868_v54 = vld [vmem:[%s13609_s23 + $0x334] sm:$0xf0]  ;;  %v11866_v8 = vld [vmem:[%s13609_s23 + $0x324] sm:$0xf0] }
 0xc57   : > { %vm7249_vm1 = vweird.f32 %v18808_v42  ;;  %v7233_v31 = vadd.f32 %v18842_v6, %v7232_v41  ;;  %v7366_v14 = vsub.f32 1.0, %v7365_v47  ;;  %12613 = vrcp.f32 %v18957_v15  ;;  %vm19009_vm9 = vmor %vm7234_vm6, %vm7235_vm13 }
 0xc58   : > { %v18992_v0 = vadd.f32 1.0, %v12610_v30  ;;  %v8067_v60 = vsel %vm18934_vm15, %v8066_v3, %v8062_v10  ;;  %v7352_v62 = vmul.f32 %v18913_v21, %v7351_v39  ;;  %v10962_v51 = vmul.f32 -1.702, %v18980_v48  ;;  %v11390_v39 = vld [vmem:[%s13609_s23 + $0x320] sm:$0xf] }
 0xc59   : > { %v11399_v23 = vor.u32 %v11868_v54, %v11398_v26  ;;  %vm19000_vm2 = vcmp.eq.f32.partialorder %v7253_v24, 8.507059e+37  ;;  %v7256_v41 = vor.u32 1.1754944e-38, %v7255_v22  ;;  %v7360_v47 = vand.u32 2147483648, %v18840_v57  ;;  %v6780_v54 = vpop.f32.mrf.mxu2 }
 0xc5a   : > { %12615 = vpow2.f32 %v7009_v1  ;;  %v12612_v30 = vpop.eup %12611  ;;  %v7248_v3 = vadd.f32 %v18894_v4, %v7247_v49  ;;  %vm7250_vm4 = vweird.f32 %v18894_v4  ;;  %v11471_v55 = vor.u32 %v11886_v12, %v11470_v2  ;;  %v11779_v1 = vld [vmem:[%s13609_s23 + $0x74] sm:$0xf]  ;;  %v11048_v49 = vld [vmem:[%s13609_s23 + $0x78] sm:$0xf0] }
 0xc5b   : > { %9147 = vmatpush.bf16.msrb.mxu2 %v11399_v23  ;;  %v19017_v24 = vpack.c.bf16 %v18823_v58, %v18733_v27  ;;  %v19022_v16 = vmul.f32 %v8067_v60, %v18567_v13  ;;  %v7237_v10 = vsel %vm19009_vm9, %v18842_v6, %v7233_v31  ;;  %v7367_v22 = vmul.f32 %v18939_v18, %v7366_v14  ;;  %v11795_v58 = vld [vmem:[%s13609_s23 + $0xf4] sm:$0xf]  ;;  %v11112_v6 = vld [vmem:[%s13609_s23 + $0xf8] sm:$0xf0]  ;;  %vm19046_vm7 = vmor %vm7249_vm1, %vm7250_vm4 }
 0xc5c   : > { %12617 = vrcp.f32 %v18992_v0  ;;  %v7353_v26 = vadd.f32 %v18913_v21, %v7352_v62  ;;  %vm7355_vm5 = vweird.f32 %v18913_v21  ;;  %v7023_v27 = vmul.f32 1.442695, %v10962_v51  ;;  %9175 = vmatpush.bf16.msrb.mxu3 %v11471_v55 }
 0xc5d   : > { %9103 = vmatmul.bf16.gmra.mxu0 %v19017_v24  ;;  %v19036_v13 = vpack.c.bf16 %v18862_v37, %v18784_v59  ;;  %v19040_v31 = vpop.eup %12613  ;;  %vm7354_vm8 = vweird.f32 %v18840_v57  ;;  %v7358_v2 = vand.u32 2147483647, %v18840_v57  ;;  %v19052_v12 = vadd.f32 1.0, %v12612_v30  ;;  %v6809_v30 = vpop.f32.mrf.mxu3 }
 0xc5e   : > { %v11391_v59 = vor.u32 %v11866_v8, %v11390_v39  ;;  %v7242_v37 = vsel %vm18975_vm12, %v7241_v61, %v7237_v10  ;;  %v7252_v60 = vsel %vm19046_vm7, %v18894_v4, %v7248_v3  ;;  %v7361_v62 = vor.u32 1.1754944e-38, %v7360_v47  ;;  %vm19062_vm10 = vmor %vm7354_vm8, %vm7355_vm5 }
 0xc5f   : > { %9132 = vmatmul.bf16.gmra.mxu1 %v19036_v13  ;;  %v11051_v42 = vor.u32 %v11779_v1, %v11048_v49  ;;  %v7368_v57 = vadd.f32 %v18939_v18, %v7367_v22  ;;  %vm7370_vm11 = vweird.f32 %v18939_v18  ;;  %v11115_v61 = vor.u32 %v11795_v58, %v11112_v6  ;;  %v11884_v1 = vld [vmem:[%s13609_s23 + $0x3b4] sm:$0xf0]  ;;  %v6724_v49 = vpop.f32.mrf.mxu0 }
 0xc60   : > { %v12616_v51 = vpop.eup %12615  ;;  %9148 = vmatpush.bf16.msrb.mxu2 %v11391_v59  ;;  %v6781_v29 = vadd.f32 %v6780_v54, %v18600_v34  ;;  %v7357_v4 = vsel %vm19062_vm10, %v18913_v21, %v7353_v26  ;;  %vm7369_vm14 = vweird.f32 %v18869_v33  ;;  %v7470_v47 = vmul.f32 %v19040_v31, %v18957_v15 }
 0xc61   : > { %12619 = vpow2.f32 %v7023_v27  ;;  %9201 = vmatpush.bf16.msra.mxu0 %v11051_v42  ;;  %v7373_v3 = vand.u32 2147483647, %v18869_v33  ;;  %v7375_v55 = vand.u32 2147483648, %v18869_v33  ;;  %9230 = vmatpush.bf16.msra.mxu1 %v11115_v61  ;;  %v8105_v39 = vmul.f32 %v7242_v37, %v18582_v5  ;;  %vm19087_vm0 = vmor %vm7369_vm14, %vm7370_vm11  ;;  %v11462_v33 = vld [vmem:[%s13609_s23 + $0x3b0] sm:$0xf]  ;;  %v6753_v37 = vpop.f32.mrf.mxu1 }
 0xc62   : > { %v19075_v50 = vpop.eup %12617  ;;  %12621 = vrcp.f32 %v19052_v12  ;;  %v19080_v21 = vadd.f32 %v6809_v30, %v6781_v29  ;;  %v7257_v8 = vsel %vm19000_vm2, %v7256_v41, %v7252_v60  ;;  %vm7359_vm15 = vcmp.eq.f32.partialorder %v7358_v2, 8.507059e+37  ;;  %v11864_v30 = vld [vmem:[%s13609_s23 + $0x314] sm:$0xf0] }
 0xc63   : > { %v19091_v22 = vadd.f32 1.0, %v12616_v51  ;;  %v7362_v26 = vsel %vm7359_vm15, %v7361_v62, %v7357_v4  ;;  %v7372_v5 = vsel %vm19087_vm0, %v18939_v18, %v7368_v57  ;;  %v7480_v46 = vand.u32 2147483648, %v18957_v15 }
 0xc64   : > { %v10963_v41 = vmul.f32 -1.702, %v19080_v21  ;;  %v7471_v27 = vsub.f32 1.0, %v7470_v47  ;;  %v7485_v58 = vmul.f32 %v19075_v50, %v18992_v0  ;;  %v11463_v6 = vor.u32 %v11884_v1, %v11462_v33  ;;  %v11382_v47 = vld [vmem:[%s13609_s23 + $0x310] sm:$0xf] }
 0xc65   : > { %v6725_v54 = vadd.f32 %v6724_v49, %v18560_v56  ;;  %v19104_v14 = vmul.f32 %v7257_v8, %v18651_v32  ;;  %vm7374_vm6 = vcmp.eq.f32.partialorder %v7373_v3, 8.507059e+37  ;;  %v7376_v2 = vor.u32 1.1754944e-38, %v7375_v55  ;;  %v6782_v3 = vpop.f32.mrf.mxu2  ;;  %v11777_v33 = vld [vmem:[%s13609_s23 + $0x64] sm:$0xf]  ;;  %v11040_v1 = vld [vmem:[%s13609_s23 + $0x68] sm:$0xf0] }
 0xc66   : > { %v7495_v59 = vand.u32 2147483648, %v18992_v0  ;;  %v8113_v60 = vmul.f32 %v7362_v26, %v18701_v44  ;;  %vm7474_vm3 = vweird.f32 %v18957_v15  ;;  %v7478_v62 = vand.u32 2147483647, %v18957_v15  ;;  %9176 = vmatpush.bf16.msrb.mxu3 %v11463_v6  ;;  %v6811_v6 = vpop.f32.mrf.mxu3 }
 0xc67   : > { %v12620_v18 = vpop.eup %12619  ;;  %12623 = vrcp.f32 %v19091_v22  ;;  %v7025_v42 = vmul.f32 1.442695, %v10963_v41  ;;  %v7377_v51 = vsel %vm7374_vm6, %v7376_v2, %v7372_v5  ;;  %v19113_v23 = vor.u32 1.1754944e-38, %v7480_v46  ;;  %v11454_v2 = vld [vmem:[%s13609_s23 + $0x3a0] sm:$0xf] }
 0xc68   : > { %v19111_v32 = vpop.eup %12621  ;;  %v7493_v57 = vand.u32 2147483647, %v18992_v0  ;;  %v7472_v61 = vmul.f32 %v19040_v31, %v7471_v27  ;;  %v7486_v29 = vsub.f32 1.0, %v7485_v58  ;;  %v19118_v4 = vadd.f32 %v6753_v37, %v6725_v54  ;;  %v11793_v27 = vld [vmem:[%s13609_s23 + $0xe4] sm:$0xf] }
 0xc69   : > { %12625 = vpow2.f32 %v7025_v42  ;;  %v19122_v55 = vor.u32 1.1754944e-38, %v7495_v59  ;;  %v19124_v8 = vadd.f32 1.0, %v12620_v18  ;;  %v11383_v10 = vor.u32 %v11864_v30, %v11382_v47  ;;  %v11104_v58 = vld [vmem:[%s13609_s23 + $0xe8] sm:$0xf0]  ;;  %v11882_v59 = vld [vmem:[%s13609_s23 + $0x3a4] sm:$0xf0] }
 0xc6a   : > { %v6783_v49 = vadd.f32 %v6782_v3, %v18600_v34  ;;  %v19129_v26 = vpack.c.bf16 %v8113_v60, %v8105_v39  ;;  %v19133_v5 = vmul.f32 %v19111_v32, %v19052_v12  ;;  %v10970_v46 = vmul.f32 -1.702, %v19118_v4  ;;  %v11374_v37 = vld [vmem:[%s13609_s23 + $0x300] sm:$0xf] }
 0xc6b   : > { %v11043_v41 = vor.u32 %v11777_v33, %v11040_v1  ;;  %vm7475_vm12 = vweird.f32 %v19040_v31  ;;  %vm19139_vm13 = vcmp.eq.f32.partialorder %v7478_v62, 8.507059e+37  ;;  %9149 = vmatpush.bf16.msrb.mxu2 %v11383_v10  ;;  %v11107_v39 = vor.u32 %v11793_v27, %v11104_v58  ;;  %v11862_v10 = vld [vmem:[%s13609_s23 + $0x304] sm:$0xf0]  ;;  %v11775_v33 = vld [vmem:[%s13609_s23 + $0x54] sm:$0xf]  ;;  %v6727_v1 = vpop.f32.mrf.mxu0 }
 0xc6c   : > { %v19146_v18 = vadd.f32 %v6811_v6, %v6783_v49  ;;  %v19150_v60 = vpack.c.bf16 %v18983_v19, %v18903_v9  ;;  %v8114_v62 = vmul.f32 %v7377_v51, %v18755_v53  ;;  %v19156_v47 = vadd.f32 %v19040_v31, %v7472_v61  ;;  %v11032_v49 = vld [vmem:[%s13609_s23 + $0x58] sm:$0xf0]  ;;  %v11791_v27 = vld [vmem:[%s13609_s23 + $0xd4] sm:$0xf]  ;;  %vm19174_vm1 = vmor %vm7474_vm3, %vm7475_vm12 }
 0xc6d   : > { %v19152_v42 = vpop.eup %12623  ;;  %v7487_v30 = vmul.f32 %v19075_v50, %v7486_v29  ;;  %v7039_v3 = vmul.f32 1.442695, %v10970_v46  ;;  %9202 = vmatpush.bf16.msra.mxu0 %v11043_v41  ;;  %12627 = vrcp.f32 %v19124_v8  ;;  %9231 = vmatpush.bf16.msra.mxu1 %v11107_v39  ;;  %v11455_v9 = vor.u32 %v11882_v59, %v11454_v2  ;;  %v11096_v46 = vld [vmem:[%s13609_s23 + $0xd8] sm:$0xf0]  ;;  %v11446_v41 = vld [vmem:[%s13609_s23 + $0x390] sm:$0xf] }
 0xc6e   : > { %v11375_v19 = vor.u32 %v11862_v10, %v11374_v37  ;;  %v10971_v53 = vmul.f32 -1.702, %v19146_v18  ;;  %9108 = vmatmul.bf16.gmra.mxu0 %v19150_v60  ;;  %v7591_v61 = vsub.f32 1.0, %v19133_v5  ;;  %v11035_v29 = vor.u32 %v11775_v33, %v11032_v49  ;;  %v11880_v37 = vld [vmem:[%s13609_s23 + $0x394] sm:$0xf0] }
 0xc6f   : > { %v12626_v51 = vpop.eup %12625  ;;  %12629 = vpow2.f32 %v7039_v3  ;;  %v6728_v58 = vadd.f32 %v6727_v1, %v18560_v56  ;;  %v7605_v5 = vmul.f32 %v19152_v42, %v19091_v22  ;;  %9177 = vmatpush.bf16.msrb.mxu3 %v11455_v9  ;;  %v11099_v2 = vor.u32 %v11791_v27, %v11096_v46  ;;  %v6756_v3 = vpop.f32.mrf.mxu1  ;;  %v11773_v1 = vld [vmem:[%s13609_s23 + $0x44] sm:$0xf]  ;;  %v11024_v49 = vld [vmem:[%s13609_s23 + $0x48] sm:$0xf0] }
 0xc70   : > { %v19180_v39 = vadd.f32 1.0, %v12626_v51  ;;  %9150 = vmatpush.bf16.msrb.mxu2 %v11375_v19  ;;  %v7041_v59 = vmul.f32 1.442695, %v10971_v53  ;;  %v19184_v15 = vpack.c.bf16 %v8114_v62, %v19104_v14  ;;  %vm7489_vm2 = vweird.f32 %v18992_v0  ;;  %v11789_v9 = vld [vmem:[%s13609_s23 + $0xc4] sm:$0xf] }
 0xc71   : > { %9203 = vmatpush.bf16.msra.mxu0 %v11035_v29  ;;  %v11447_v10 = vor.u32 %v11880_v37, %v11446_v41  ;;  %v19187_v33 = vadd.f32 %v6756_v3, %v6728_v58  ;;  %v7477_v19 = vsel %vm19174_vm1, %v19040_v31, %v19156_v47  ;;  %vm7490_vm9 = vweird.f32 %v19075_v50  ;;  %9232 = vmatpush.bf16.msra.mxu1 %v11099_v2  ;;  %v11088_v27 = vld [vmem:[%s13609_s23 + $0xc8] sm:$0xf0]  ;;  %v11438_v53 = vld [vmem:[%s13609_s23 + $0x380] sm:$0xf]  ;;  %v11878_v47 = vld [vmem:[%s13609_s23 + $0x384] sm:$0xf0]  ;;  %v6785_v29 = vpop.f32.mrf.mxu2 }
 0xc72   : > { %vm19199_vm4 = vcmp.eq.f32.partialorder %v7493_v57, 8.507059e+37  ;;  %vm7594_vm5 = vweird.f32 %v19052_v12  ;;  %v7600_v62 = vand.u32 2147483648, %v19052_v12  ;;  %v7488_v51 = vadd.f32 %v19075_v50, %v7487_v30  ;;  %v11771_v37 = vld [vmem:[%s13609_s23 + $0x34] sm:$0xf]  ;;  %v11016_v30 = vld [vmem:[%s13609_s23 + $0x38] sm:$0xf0]  ;;  %vm19234_vm8 = vmor %vm7489_vm2, %vm7490_vm9 }
 0xc73   : > { %v7592_v31 = vmul.f32 %v19111_v32, %v7591_v61  ;;  %12631 = vpow2.f32 %v7041_v59  ;;  %9151 = vmatmul.bf16.vlgmr.msrb.gmra.mxu2 %v19129_v26  ;;  %v10978_v57 = vmul.f32 -1.702, %v19187_v33  ;;  %v19212_v46 = vpop.eup %12627  ;;  %v7606_v41 = vsub.f32 1.0, %v7605_v5  ;;  %9178 = vmatpush.bf16.msrb.mxu3 %v11447_v10  ;;  %v11787_v5 = vld [vmem:[%s13609_s23 + $0xb4] sm:$0xf] }
 0xc74   : > { %v11027_v58 = vor.u32 %v11773_v1, %v11024_v49  ;;  %v11091_v6 = vor.u32 %v11789_v9, %v11088_v27  ;;  %v11439_v2 = vor.u32 %v11878_v47, %v11438_v53  ;;  %v7482_v61 = vsel %vm19139_vm13, %v19113_v23, %v7477_v19  ;;  %v11080_v49 = vld [vmem:[%s13609_s23 + $0xb8] sm:$0xf0] }
 0xc75   : > { %v12630_v3 = vpop.eup %12629  ;;  %12633 = vrcp.f32 %v19180_v39  ;;  %v7055_v59 = vmul.f32 1.442695, %v10978_v57  ;;  %v19222_v44 = vpack.c.bf16 %v19022_v16, %v18942_v28  ;;  %vm7595_vm7 = vweird.f32 %v19111_v32 }
 0xc76   : > { %v19226_v10 = vadd.f32 1.0, %v12630_v3  ;;  %9204 = vmatpush.bf16.msra.mxu0 %v11027_v58  ;;  %9233 = vmatpush.bf16.msra.mxu1 %v11091_v6  ;;  %v11019_v1 = vor.u32 %v11771_v37, %v11016_v30  ;;  %v6786_v9 = vadd.f32 %v6785_v29, %v18600_v34  ;;  %v7593_v28 = vadd.f32 %v19111_v32, %v7592_v31  ;;  %v6814_v31 = vpop.f32.mrf.mxu3  ;;  %vm19264_vm11 = vmor %vm7594_vm5, %vm7595_vm7 }
 0xc77   : > { %v7710_v16 = vmul.f32 %v19212_v46, %v19124_v8  ;;  %12635 = vpow2.f32 %v7055_v59  ;;  %9137 = vmatmul.bf16.gmra.mxu1 %v19222_v44  ;;  %v11083_v54 = vor.u32 %v11787_v5, %v11080_v49  ;;  %v7492_v19 = vsel %vm19234_vm8, %v19075_v50, %v7488_v51  ;;  %9179 = vmatpush.bf16.msrb.mxu3 %v11439_v2  ;;  %v6729_v50 = vpop.f32.mrf.mxu0  ;;  %v6758_v59 = vpop.f32.mrf.mxu1 }
 0xc78   : > { %v20535_v27 = vand.u32 2147483647, %v19052_v12  ;;  %v7607_v53 = vmul.f32 %v19152_v42, %v7606_v41  ;;  %12637 = vrcp.f32 %v19226_v10  ;;  %v7601_v47 = vor.u32 1.1754944e-38, %v7600_v62 }
 0xc79   : > { %v12632_v57 = vpop.eup %12631  ;;  %v7613_v29 = vand.u32 2147483647, %v19091_v22  ;;  %v7615_v58 = vand.u32 2147483648, %v19091_v22  ;;  %v19255_v6 = vadd.f32 %v6814_v31, %v6786_v9  ;;  %v19258_v51 = vmul.f32 %v7482_v61, %v18810_v38  ;;  %v11769_v31 = vld [vmem:[%s13609_s23 + $0x24] sm:$0xf] }
 0xc7a   : > { %vm19247_vm10 = vcmp.eq.f32.partialorder %v20535_v27, 8.507059e+37  ;;  %vm7609_vm14 = vweird.f32 %v19091_v22  ;;  %v19269_v62 = vadd.f32 1.0, %v12632_v57  ;;  %9205 = vmatpush.bf16.msra.mxu0 %v11019_v1  ;;  %9234 = vmatpush.bf16.msra.mxu1 %v11083_v54  ;;  %v6730_v2 = vadd.f32 %v6729_v50, %v18560_v56  ;;  %v6787_v57 = vpop.f32.mrf.mxu2  ;;  %v11008_v50 = vld [vmem:[%s13609_s23 + $0x28] sm:$0xf0] }
 0xc7b   : > { %v19272_v37 = vpop.eup %12633  ;;  %v7497_v38 = vsel %vm19199_vm4, %v19122_v55, %v7492_v19  ;;  %v7597_v12 = vsel %vm19264_vm11, %v19111_v32, %v7593_v28  ;;  %v7711_v30 = vsub.f32 1.0, %v7710_v16  ;;  %9180 = vmatmul.bf16.vlgmr.msrb.gmra.mxu3 %v19184_v15  ;;  %v10979_v3 = vmul.f32 -1.702, %v19255_v6 }
 0xc7c   : > { %v7608_v61 = vadd.f32 %v19152_v42, %v7607_v53  ;;  %vm7610_vm15 = vweird.f32 %v19152_v42  ;;  %v7720_v56 = vand.u32 2147483648, %v19124_v8  ;;  %12639 = vrcp.f32 %v19269_v62 }
 0xc7d   : > { %v12636_v14 = vpop.eup %12635  ;;  %vm19286_vm0 = vcmp.eq.f32.partialorder %v7613_v29, 8.507059e+37  ;;  %v7616_v32 = vor.u32 1.1754944e-38, %v7615_v58  ;;  %v7057_v5 = vmul.f32 1.442695, %v10979_v3  ;;  %v19290_v1 = vadd.f32 %v6758_v59, %v6730_v2  ;;  %vm19308_vm6 = vmor %vm7609_vm14, %vm7610_vm15  ;;  %v11767_v59 = vld [vmem:[%s13609_s23 + $0x14] sm:$0xf] }
 0xc7e   : > { %v19292_v49 = vpop.eup %12637  ;;  %v7602_v9 = vsel %vm19247_vm10, %v7601_v47, %v7597_v12  ;;  %v7718_v23 = vand.u32 2147483647, %v19124_v8  ;;  %v7725_v28 = vmul.f32 %v19272_v37, %v19180_v39  ;;  %v19299_v16 = vadd.f32 1.0, %v12636_v14  ;;  %v11000_v14 = vld [vmem:[%s13609_s23 + $0x18] sm:$0xf0] }
 0xc7f   : > { %v19302_v54 = vmul.f32 %v7497_v38, %v18877_v17  ;;  %v7712_v27 = vmul.f32 %v19212_v46, %v7711_v30  ;;  %vm7714_vm3 = vweird.f32 %v19124_v8  ;;  %v7830_v0 = vmul.f32 %v19292_v49, %v19226_v10  ;;  %v11785_v30 = vld [vmem:[%s13609_s23 + $0xa4] sm:$0xf] }
 0xc80   : > { %12641 = vpow2.f32 %v7057_v5  ;;  %v7612_v17 = vsel %vm19308_vm6, %v19152_v42, %v7608_v61  ;;  %v19319_v53 = vor.u32 1.1754944e-38, %v7720_v56  ;;  %v7838_v22 = vand.u32 2147483647, %v19226_v10  ;;  %v11783_v5 = vld [vmem:[%s13609_s23 + $0x94] sm:$0xf] }
 0xc81   : > { %12643 = vrcp.f32 %v19299_v16  ;;  %v8129_v47 = vmul.f32 %v7602_v9, %v18908_v36  ;;  %v7831_v29 = vsub.f32 1.0, %v7830_v0  ;;  %v10986_v58 = vmul.f32 -1.702, %v19290_v1  ;;  %v11072_v36 = vld [vmem:[%s13609_s23 + $0xa8] sm:$0xf0]  ;;  %v6816_v9 = vpop.f32.mrf.mxu3 }
 0xc82   : > { %v6788_v42 = vadd.f32 %v6787_v57, %v18600_v34  ;;  %v19328_v41 = vpop.eup %12639  ;;  %vm7715_vm12 = vweird.f32 %v19212_v46  ;;  %v7726_v2 = vsub.f32 1.0, %v7725_v28  ;;  %v7840_v38 = vand.u32 2147483648, %v19226_v10 }
 0xc83   : > { %v11011_v12 = vor.u32 %v11769_v31, %v11008_v50  ;;  %v7617_v3 = vsel %vm19286_vm0, %v7616_v32, %v7612_v17  ;;  %v19337_v61 = vadd.f32 %v19212_v46, %v7712_v27  ;;  %v7832_v56 = vmul.f32 %v19292_v49, %v7831_v29  ;;  %v11064_v31 = vld [vmem:[%s13609_s23 + $0x98] sm:$0xf0]  ;;  %vm19376_vm9 = vmor %vm7714_vm3, %vm7715_vm12 }
 0xc84   : > { %v7845_v34 = vmul.f32 %v19328_v41, %v19269_v62  ;;  %v7071_v28 = vmul.f32 1.442695, %v10986_v58  ;;  %v11075_v19 = vor.u32 %v11785_v30, %v11072_v36  ;;  %v11003_v0 = vor.u32 %v11767_v59, %v11000_v14  ;;  %v19364_v30 = vpop.f32.mrf.mxu1  ;;  %v11765_v59 = vld [vmem:[%s13609_s23 + $0x4] sm:$0xf]  ;;  %v10992_v14 = vld [vmem:[%s13609_s23 + $0x8] sm:$0xf0] }
 0xc85   : > { %9206 = vmatpush.bf16.msra.mxu0 %v11011_v12  ;;  %v19346_v57 = vadd.f32 %v6816_v9, %v6788_v42  ;;  %vm19348_vm13 = vcmp.eq.f32.partialorder %v7718_v23, 8.507059e+37  ;;  %v7833_v27 = vadd.f32 %v19292_v49, %v7832_v56  ;;  %vm7835_vm1 = vweird.f32 %v19292_v49  ;;  %v19362_v12 = vpop.f32.mrf.mxu0 }
 0xc86   : > { %v12642_v55 = vpop.eup %12641  ;;  %v7846_v17 = vsub.f32 1.0, %v7845_v34  ;;  %v11067_v29 = vor.u32 %v11783_v5, %v11064_v31  ;;  %12645 = vpow2.f32 %v7071_v28  ;;  %9235 = vmatpush.bf16.msra.mxu1 %v11075_v19  ;;  %v19360_v23 = vpack.c.bf16 %v8129_v47, %v19258_v51  ;;  %v11056_v5 = vld [vmem:[%s13609_s23 + $0x88] sm:$0xf0] }
 0xc87   : > { %v19354_v58 = vpop.eup %12643  ;;  %v19356_v50 = vadd.f32 1.0, %v12642_v55  ;;  %v10987_v42 = vmul.f32 -1.702, %v19346_v57  ;;  %v8130_v36 = vmul.f32 %v7617_v3, %v18950_v52  ;;  %vm7729_vm2 = vweird.f32 %v19180_v39  ;;  %v11781_v3 = vld [vmem:[%s13609_s23 + $0x84] sm:$0xf] }
 0xc88   : > { %v7733_v56 = vand.u32 2147483647, %v19180_v39  ;;  %v7847_v34 = vmul.f32 %v19328_v41, %v7846_v17  ;;  %v7727_v47 = vmul.f32 %v19272_v37, %v7726_v2  ;;  %vm7834_vm4 = vweird.f32 %v19226_v10  ;;  %9156 = vmatmul.bf16.gmra.mxu2 %v19360_v23  ;;  %v11811_v55 = vld [vmem:[%s13609_s23 + $0x174] sm:$0xf] }
 0xc89   : > { %v7950_v52 = vmul.f32 %v19354_v58, %v19299_v16  ;;  %12647 = vrcp.f32 %v19356_v50  ;;  %9207 = vmatpush.bf16.msra.mxu0 %v11003_v0  ;;  %v7717_v8 = vsel %vm19376_vm9, %v19212_v46, %v19337_v61  ;;  %vm7730_vm5 = vweird.f32 %v19272_v37  ;;  %vm19395_vm7 = vmor %vm7834_vm4, %vm7835_vm1  ;;  %v11827_v2 = vld [vmem:[%s13609_s23 + $0x1f4] sm:$0xf] }
 0xc8a   : > { %vm19399_vm8 = vcmp.eq.f32.partialorder %v7838_v22, 8.507059e+37  ;;  %v7841_v9 = vor.u32 1.1754944e-38, %v7840_v38  ;;  %v7837_v28 = vsel %vm19395_vm7, %v19292_v49, %v7833_v27  ;;  %v7853_v19 = vand.u32 2147483647, %v19269_v62  ;;  %9236 = vmatpush.bf16.msra.mxu1 %v11067_v29  ;;  %v11176_v38 = vld [vmem:[%s13609_s23 + $0x178] sm:$0xf0]  ;;  %vm19449_vm0 = vmor %vm7729_vm2, %vm7730_vm5 }
 0xc8b   : > { %v7073_v46 = vmul.f32 1.442695, %v10987_v42  ;;  %v10995_v61 = vor.u32 %v11765_v59, %v10992_v14  ;;  %v7848_v0 = vadd.f32 %v19328_v41, %v7847_v34  ;;  %vm7850_vm10 = vweird.f32 %v19328_v41  ;;  %v11809_v59 = vld [vmem:[%s13609_s23 + $0x164] sm:$0xf]  ;;  %v11168_v14 = vld [vmem:[%s13609_s23 + $0x168] sm:$0xf0] }
 0xc8c   : > { %v7855_v22 = vand.u32 2147483648, %v19269_v62  ;;  %v11059_v31 = vor.u32 %v11781_v3, %v11056_v5  ;;  %v12646_v17 = vpop.eup %12645  ;;  %v7728_v51 = vadd.f32 %v19272_v37, %v7727_v47  ;;  %v7951_v49 = vsub.f32 1.0, %v7950_v52  ;;  %v19443_v32 = vpop.f32.mrf.mxu1 }
 0xc8d   : > { %12649 = vpow2.f32 %v7073_v46  ;;  %9208 = vmatpush.bf16.msra.mxu0 %v10995_v61  ;;  %v19414_v27 = vpack.c.bf16 %v8130_v36, %v19302_v54  ;;  %v7735_v29 = vand.u32 2147483648, %v19180_v39  ;;  %v7842_v42 = vsel %vm19399_vm8, %v7841_v9, %v7837_v28  ;;  %v19441_v52 = vpop.f32.mrf.mxu0  ;;  %v11240_v9 = vld [vmem:[%s13609_s23 + $0x1f8] sm:$0xf0] }
 0xc8e   : > { %vm7849_vm11 = vweird.f32 %v19269_v62  ;;  %v19420_v34 = vadd.f32 1.0, %v12646_v17  ;;  %v7722_v47 = vsel %vm19348_vm13, %v19319_v53, %v7717_v8  ;;  %vm19429_vm14 = vcmp.eq.f32.partialorder %v7733_v56, 8.507059e+37  ;;  %9237 = vmatpush.bf16.msra.mxu1 %v11059_v31  ;;  %v11232_v31 = vld [vmem:[%s13609_s23 + $0x1e8] sm:$0xf0]  ;;  %v11160_v17 = vld [vmem:[%s13609_s23 + $0x158] sm:$0xf0] }
 0xc8f   : > { %v19424_v3 = vpop.eup %12647  ;;  %vm19435_vm15 = vmor %vm7849_vm11, %vm7850_vm10  ;;  %v7958_v36 = vand.u32 2147483647, %v19299_v16  ;;  %9185 = vmatmul.bf16.gmra.mxu3 %v19414_v27  ;;  %v11179_v53 = vor.u32 %v11811_v55, %v11176_v38  ;;  %v7856_v8 = vor.u32 1.1754944e-38, %v7855_v22  ;;  %v7960_v10 = vand.u32 2147483648, %v19299_v16  ;;  %v11825_v22 = vld [vmem:[%s13609_s23 + $0x1e4] sm:$0xf] }
 0xc90   : > { %v7852_v5 = vsel %vm19435_vm15, %v19328_v41, %v7848_v0  ;;  %12651 = vrcp.f32 %v19420_v34  ;;  %9209 = vmatmul.bf16.vlgmr.msra.gmra.mxu0 %v17111_v25  ;;  %v7732_v39 = vsel %vm19449_vm0, %v19272_v37, %v7728_v51  ;;  %v8145_v28 = vmul.f32 %v7842_v42, %v19118_v4  ;;  %v11807_v38 = vld [vmem:[%s13609_s23 + $0x154] sm:$0xf] }
 0xc91   : > { %v7952_v41 = vmul.f32 %v19354_v58, %v7951_v49  ;;  %9259 = vmatpush.bf16.msra.mxu2 %v11179_v53  ;;  %v11171_v46 = vor.u32 %v11809_v59, %v11168_v14  ;;  %v8137_v61 = vmul.f32 %v7722_v47, %v18980_v48  ;;  %v7736_v0 = vor.u32 1.1754944e-38, %v7735_v29  ;;  %9238 = vmatmul.bf16.vlgmr.msra.gmra.mxu1 %v17117_v20  ;;  %v11805_v14 = vld [vmem:[%s13609_s23 + $0x144] sm:$0xf]  ;;  %v11823_v56 = vld [vmem:[%s13609_s23 + $0x1d4] sm:$0xf] }
 0xc92   : > { %vm7854_vm6 = vcmp.eq.f32.partialorder %v7853_v19, 8.507059e+37  ;;  %v7965_v25 = vmul.f32 %v19424_v3, %v19356_v50  ;;  %vm7954_vm3 = vweird.f32 %v19299_v16  ;;  %vm7955_vm12 = vweird.f32 %v19354_v58  ;;  %v11152_v16 = vld [vmem:[%s13609_s23 + $0x148] sm:$0xf0]  ;;  %v19549_v19 = vld [vmem:[%s13609_s23 + $0x124] sm:$0xf] }
 0xc93   : > { %v12650_v37 = vpop.eup %12649  ;;  %v7857_v55 = vsel %vm7854_vm6, %v7856_v8, %v7852_v5  ;;  %v11243_v4 = vor.u32 %v11827_v2, %v11240_v9  ;;  %v7737_v48 = vsel %vm19429_vm14, %v7736_v0, %v7732_v39  ;;  %vm19478_vm13 = vcmp.eq.f32.partialorder %v7958_v36, 8.507059e+37  ;;  %vm19496_vm1 = vmor %vm7954_vm3, %vm7955_vm12  ;;  %v11224_v5 = vld [vmem:[%s13609_s23 + $0x1d8] sm:$0xf0]  ;;  %v19511_v2 = vld [vmem:[%s13609_s23 + $0x1c4] sm:$0xf] }
 0xc94   : > { %v7961_v20 = vor.u32 1.1754944e-38, %v7960_v10  ;;  %v19482_v51 = vadd.f32 1.0, %v12650_v37  ;;  %v7953_v49 = vadd.f32 %v19354_v58, %v7952_v41  ;;  %v7973_v29 = vand.u32 2147483647, %v19356_v50  ;;  %v19507_v10 = vpop.f32.mrf.mxu1  ;;  %v11843_v9 = vld [vmem:[%s13609_s23 + $0x274] sm:$0xf] }
 0xc95   : > { %v19486_v42 = vpack.c.bf16 %v8145_v28, %v8137_v61  ;;  %9260 = vmatpush.bf16.msra.mxu2 %v11171_v46  ;;  %9288 = vmatpush.bf16.msra.mxu3 %v11243_v4  ;;  %v11235_v59 = vor.u32 %v11825_v22, %v11232_v31  ;;  %v8146_v54 = vmul.f32 %v7857_v55, %v19146_v18  ;;  %v7966_v36 = vsub.f32 1.0, %v7965_v25  ;;  %v19505_v18 = vpop.f32.mrf.mxu0  ;;  %v11304_v28 = vld [vmem:[%s13609_s23 + $0x278] sm:$0xf0]  ;;  %v11859_v41 = vld [vmem:[%s13609_s23 + $0x2f4] sm:$0xf] }
 0xc96   : > { %v19489_v47 = vpop.eup %12651  ;;  %12653 = vrcp.f32 %v19482_v51  ;;  %v11163_v53 = vor.u32 %v11807_v38, %v11160_v17  ;;  %v8138_v39 = vmul.f32 %v7737_v48, %v19080_v21  ;;  %vm7969_vm2 = vweird.f32 %v19356_v50  ;;  %v11368_v46 = vld [vmem:[%s13609_s23 + $0x2f8] sm:$0xf0]  ;;  %v11216_v22 = vld [vmem:[%s13609_s23 + $0x1c8] sm:$0xf0]  ;;  %v11841_v4 = vld [vmem:[%s13609_s23 + $0x264] sm:$0xf] }
 0xc97   : > { %v8070_v8 = vmul.f32 %v19489_v47, %v19420_v34  ;;  %v7957_v61 = vsel %vm19496_vm1, %v19354_v58, %v7953_v49  ;;  %v8078_v25 = vand.u32 2147483647, %v19420_v34  ;;  %v11227_v21 = vor.u32 %v11823_v56, %v11224_v5  ;;  %v11296_v38 = vld [vmem:[%s13609_s23 + $0x268] sm:$0xf0]  ;;  %v11803_v48 = vld [vmem:[%s13609_s23 + $0x134] sm:$0xf] }
 0xc98   : > { %9161 = vmatmul.bf16.gmra.mxu2 %v19486_v42  ;;  %v7967_v31 = vmul.f32 %v19424_v3, %v7966_v36  ;;  %v8080_v37 = vand.u32 2147483648, %v19420_v34  ;;  %v19527_v55 = vpack.c.bf16 %v8146_v54, %v8138_v39  ;;  %v11155_v58 = vor.u32 %v11805_v14, %v11152_v16  ;;  %v11144_v49 = vld [vmem:[%s13609_s23 + $0x138] sm:$0xf0]  ;;  %v11857_v56 = vld [vmem:[%s13609_s23 + $0x2e4] sm:$0xf] }
 0xc99   : > { %v8071_v0 = vsub.f32 1.0, %v8070_v8  ;;  %9289 = vmatpush.bf16.msra.mxu3 %v11235_v59  ;;  %9261 = vmatpush.bf16.msra.mxu2 %v11163_v53  ;;  %vm8075_vm9 = vweird.f32 %v19489_v47  ;;  %v11307_v59 = vor.u32 %v11843_v9, %v11304_v28  ;;  %v11371_v62 = vor.u32 %v11859_v41, %v11368_v46  ;;  %v11360_v5 = vld [vmem:[%s13609_s23 + $0x2e8] sm:$0xf0]  ;;  %v11208_v9 = vld [vmem:[%s13609_s23 + $0x1b8] sm:$0xf0] }
 0xc9a   : > { %v7962_v54 = vsel %vm19478_vm13, %v7961_v20, %v7957_v61  ;;  %vm7970_vm4 = vweird.f32 %v19424_v3  ;;  %v7975_v14 = vand.u32 2147483648, %v19356_v50  ;;  %v11219_v53 = vor.u32 %v19511_v2, %v11216_v22  ;;  %v11819_v20 = vld [vmem:[%s13609_s23 + $0x1b4] sm:$0xf]  ;;  %v11200_v28 = vld [vmem:[%s13609_s23 + $0x1a8] sm:$0xf0] }
 0xc9b   : > { %v8072_v17 = vmul.f32 %v19489_v47, %v8071_v0  ;;  %vm8074_vm5 = vweird.f32 %v19420_v34  ;;  %9317 = vmatpush.bf16.msrb.mxu0 %v11307_v59  ;;  %v11299_v39 = vor.u32 %v11841_v4, %v11296_v38  ;;  %v7968_v2 = vadd.f32 %v19424_v3, %v7967_v31  ;;  %9346 = vmatpush.bf16.msrb.mxu1 %v11371_v62  ;;  %v11839_v61 = vld [vmem:[%s13609_s23 + $0x254] sm:$0xf]  ;;  %v11288_v0 = vld [vmem:[%s13609_s23 + $0x258] sm:$0xf0]  ;;  %vm19592_vm11 = vmor %vm7969_vm2, %vm7970_vm4 }
 0xc9c   : > { %v19535_v36 = vpop.eup %12653  ;;  %vm19556_vm7 = vmor %vm8074_vm5, %vm8075_vm9  ;;  %vm19560_vm8 = vcmp.eq.f32.partialorder %v8078_v25, 8.507059e+37  ;;  %v8081_v41 = vor.u32 1.1754944e-38, %v8080_v37  ;;  %v11147_v46 = vor.u32 %v11803_v48, %v11144_v49  ;;  %v8093_v31 = vand.u32 2147483647, %v19482_v51  ;;  %v19573_v4 = vpop.f32.mrf.mxu1  ;;  %v11136_v37 = vld [vmem:[%s13609_s23 + $0x128] sm:$0xf0] }
 0xc9d   : > { %v8073_v8 = vadd.f32 %v19489_v47, %v8072_v17  ;;  %v8085_v16 = vmul.f32 %v19535_v36, %v19482_v51  ;;  %9290 = vmatpush.bf16.msra.mxu3 %v11227_v21  ;;  %9262 = vmatpush.bf16.msra.mxu2 %v11155_v58  ;;  %v19571_v25 = vpop.f32.mrf.mxu0  ;;  %v11363_v58 = vor.u32 %v11857_v56, %v11360_v5  ;;  %vm19578_vm10 = vcmp.eq.f32.partialorder %v7973_v29, 8.507059e+37  ;;  %v20568_v48 = vld [vmem:[#allocation76_spill] sm:$0xff]  ;;  %v11855_v59 = vld [vmem:[%s13609_s23 + $0x2d4] sm:$0xf]  ;;  %v11352_v62 = vld [vmem:[%s13609_s23 + $0x2d8] sm:$0xf0] }
 0xc9e   : > { %v8095_v17 = vand.u32 2147483648, %v19482_v51  ;;  %v11211_v49 = vor.u32 %v11819_v20, %v11208_v9  ;;  %vm8090_vm14 = vweird.f32 %v19535_v36  ;;  %v20571_v20 = vld [vmem:[#allocation77_spill] sm:$0xff]  ;;  %v11139_v50 = vor.u32 %v19549_v19, %v11136_v37  ;;  %v11817_v9 = vld [vmem:[%s13609_s23 + $0x1a4] sm:$0xf]  ;;  %v11128_v34 = vld [vmem:[%s13609_s23 + $0x118] sm:$0xf0] }
 0xc9f   : > { %v8077_v21 = vsel %vm19556_vm7, %v19489_v47, %v8073_v8  ;;  %v8086_v22 = vsub.f32 1.0, %v8085_v16  ;;  %9190 = vmatmul.bf16.gmra.mxu3 %v19527_v55  ;;  %9318 = vmatpush.bf16.msrb.mxu0 %v11299_v39  ;;  %v11291_v8 = vor.u32 %v11839_v61, %v11288_v0  ;;  %v8153_v16 = vmul.f32 %v7962_v54, %v19187_v33  ;;  %v11837_v54 = vld [vmem:[%s13609_s23 + $0x244] sm:$0xf]  ;;  %v11344_v0 = vld [vmem:[%s13609_s23 + $0x2c8] sm:$0xf0] }
 0xca0   : > { %v8082_v47 = vsel %vm19560_vm8, %v8081_v41, %v8077_v21  ;;  %9214 = vmatmul.bf16.gmra.mxu0 %v20568_v48  ;;  %vm8089_vm15 = vweird.f32 %v19482_v51  ;;  %9347 = vmatpush.bf16.msrb.mxu1 %v11363_v58  ;;  %v11355_v33 = vor.u32 %v11855_v59, %v11352_v62  ;;  %v11280_v41 = vld [vmem:[%s13609_s23 + $0x248] sm:$0xf0]  ;;  %v8096_v19 = vor.u32 1.1754944e-38, %v8095_v17  ;;  %v11853_v61 = vld [vmem:[%s13609_s23 + $0x2c4] sm:$0xf] }
 0xca1   : > { %v8161_v56 = vmul.f32 %v8082_v47, %v19290_v1  ;;  %v8087_v5 = vmul.f32 %v19535_v36, %v8086_v22  ;;  %9291 = vmatpush.bf16.msra.mxu3 %v11219_v53  ;;  %9243 = vmatmul.bf16.gmra.mxu1 %v20571_v20  ;;  %v11799_v1 = vld [vmem:[%s13609_s23 + $0x114] sm:$0xf]  ;;  %v7972_v53 = vsel %vm19592_vm11, %v19424_v3, %v7968_v2  ;;  %vm8091_vm0 = vmor %vm8089_vm15, %vm8090_vm14  ;;  %vm8094_vm6 = vcmp.eq.f32.partialorder %v8093_v31, 8.507059e+37  ;;  %v11797_v37 = vld [vmem:[%s13609_s23 + $0x104] sm:$0xf] }
 0xca2   : > { %9263 = vmatpush.bf16.msra.mxu2 %v11147_v46  ;;  %v7976_v46 = vor.u32 1.1754944e-38, %v7975_v14  ;;  %v11203_v2 = vor.u32 %v11817_v9, %v11200_v28  ;;  %v11131_v22 = vor.u32 %v11799_v1, %v11128_v34  ;;  %v11815_v58 = vld [vmem:[%s13609_s23 + $0x194] sm:$0xf]  ;;  %v11283_v47 = vor.u32 %v11837_v54, %v11280_v41  ;;  %v11120_v48 = vld [vmem:[%s13609_s23 + $0x108] sm:$0xf0] }
 0xca3   : > { %v8088_v39 = vadd.f32 %v19535_v36, %v8087_v5  ;;  %v19618_v51 = vpack.c.bf16 %v8161_v56, %v8153_v16  ;;  %9319 = vmatpush.bf16.msrb.mxu0 %v11291_v8  ;;  %v11835_v38 = vld [vmem:[%s13609_s23 + $0x234] sm:$0xf]  ;;  %v11272_v59 = vld [vmem:[%s13609_s23 + $0x238] sm:$0xf0]  ;;  %v19637_v8 = vpop.f32.mrf.mxu2  ;;  %v11123_v16 = vor.u32 %v11797_v37, %v11120_v48  ;;  %v11813_v20 = vld [vmem:[%s13609_s23 + $0x184] sm:$0xf] }
 0xca4   : > { %v7977_v14 = vsel %vm19578_vm10, %v7976_v46, %v7972_v53  ;;  %9348 = vmatpush.bf16.msrb.mxu1 %v11355_v33  ;;  %v19631_v62 = vpop.f32.mrf.mxu1  ;;  %v11851_v29 = vld [vmem:[%s13609_s23 + $0x2b4] sm:$0xf]  ;;  %v11336_v56 = vld [vmem:[%s13609_s23 + $0x2b8] sm:$0xf0]  ;;  %v11275_v1 = vor.u32 %v11835_v38, %v11272_v59  ;;  %v11833_v28 = vld [vmem:[%s13609_s23 + $0x224] sm:$0xf] }
 0xca5   : > { %v8092_v3 = vsel %vm8091_vm0, %v19535_v36, %v8088_v39  ;;  %9292 = vmatpush.bf16.msra.mxu3 %v11211_v49  ;;  %v11192_v36 = vld [vmem:[%s13609_s23 + $0x198] sm:$0xf0]  ;;  %v19626_v17 = vpop.f32.mrf.mxu0  ;;  %v11347_v49 = vor.u32 %v11853_v61, %v11344_v0  ;;  %v8154_v5 = vmul.f32 %v7977_v14, %v19255_v6  ;;  %v11339_v6 = vor.u32 %v11851_v29, %v11336_v56  ;;  %v11264_v53 = vld [vmem:[%s13609_s23 + $0x228] sm:$0xf0]  ;;  %v11849_v39 = vld [vmem:[%s13609_s23 + $0x2a4] sm:$0xf]  ;;  %v19655_v14 = vpop.f32.mrf.mxu3 }
 0xca6   : > { %v8097_v21 = vsel %vm8094_vm6, %v8096_v19, %v8092_v3  ;;  %9264 = vmatpush.bf16.msra.mxu2 %v11139_v50  ;;  %v11184_v50 = vld [vmem:[%s13609_s23 + $0x188] sm:$0xf0]  ;;  %v11267_v54 = vor.u32 %v11833_v28, %v11264_v53  ;;  %v11831_v19 = vld [vmem:[%s13609_s23 + $0x214] sm:$0xf]  ;;  %v11256_v61 = vld [vmem:[%s13609_s23 + $0x218] sm:$0xf0] }
 0xca7   : > { %v8162_v31 = vmul.f32 %v8097_v21, %v19346_v57  ;;  %v11195_v57 = vor.u32 %v11815_v58, %v11192_v36  ;;  %9320 = vmatpush.bf16.msrb.mxu0 %v11283_v47  ;;  %v11328_v34 = vld [vmem:[%s13609_s23 + $0x2a8] sm:$0xf0]  ;;  %v11187_v33 = vor.u32 %v11813_v20, %v11184_v50  ;;  %v20572_v0 = vld [vmem:[#allocation84_spill] sm:$0xff]  ;;  %v11847_v3 = vld [vmem:[%s13609_s23 + $0x294] sm:$0xf]  ;;  %v11259_v37 = vor.u32 %v11831_v19, %v11256_v61 }
 0xca8   : > { %9166 = vmatmul.bf16.gmra.mxu2 %v19618_v51  ;;  %9349 = vmatpush.bf16.msrb.mxu1 %v11347_v49  ;;  %v11331_v46 = vor.u32 %v11849_v39, %v11328_v34  ;;  %v20573_v21 = vld [vmem:[#allocation85_spill] sm:$0xff]  ;;  %v11829_v36 = vld [vmem:[%s13609_s23 + $0x204] sm:$0xf]  ;;  %v20574_v56 = vld [vmem:[#allocation86_spill] sm:$0xff] }
 0xca9   : > { %9293 = vmatpush.bf16.msra.mxu3 %v11203_v2  ;;  %v19641_v9 = vpack.c.bf16 %v8162_v31, %v8154_v5  ;;  %v11320_v2 = vld [vmem:[%s13609_s23 + $0x298] sm:$0xf0]  ;;  %v11248_v47 = vld [vmem:[%s13609_s23 + $0x208] sm:$0xf0]  ;;  %v11845_v48 = vld [vmem:[%s13609_s23 + $0x284] sm:$0xf] }
 0xcaa   : > { %9265 = vmatpush.bf16.msra.mxu2 %v11131_v22  ;;  %v11323_v58 = vor.u32 %v11847_v3, %v11320_v2  ;;  %v11312_v49 = vld [vmem:[%s13609_s23 + $0x288] sm:$0xf0]  ;;  %v11251_v38 = vor.u32 %v11829_v36, %v11248_v47  ;;  %v11875_v5 = vld [vmem:[%s13609_s23 + $0x374] sm:$0xf]  ;;  %v11873_v53 = vld [vmem:[%s13609_s23 + $0x364] sm:$0xf] }
 0xcab   : > { %9321 = vmatpush.bf16.msrb.mxu0 %v11275_v1  ;;  %v19662_v31 = vpop.f32.mrf.mxu2  ;;  %v11315_v29 = vor.u32 %v11845_v48, %v11312_v49  ;;  %v11424_v39 = vld [vmem:[%s13609_s23 + $0x368] sm:$0xf0]  ;;  %v11891_v34 = vld [vmem:[%s13609_s23 + $0x3f4] sm:$0xf]  ;;  %v11416_v19 = vld [vmem:[%s13609_s23 + $0x358] sm:$0xf0] }
 0xcac   : > { %9350 = vmatpush.bf16.msrb.mxu1 %v11339_v6  ;;  %v19658_v22 = vpop.f32.mrf.mxu1  ;;  %v20575_v6 = vld [vmem:[#allocation87_spill] sm:$0xff]  ;;  %v11488_v3 = vld [vmem:[%s13609_s23 + $0x3e8] sm:$0xf0]  ;;  %v11887_v36 = vld [vmem:[%s13609_s23 + $0x3d4] sm:$0xf] }
 0xcad   : > { %9294 = vmatpush.bf16.msra.mxu3 %v11195_v57  ;;  %v19648_v41 = vpop.f32.mrf.mxu0  ;;  %v11432_v57 = vld [vmem:[%s13609_s23 + $0x378] sm:$0xf0] }
 0xcae   : > { %9266 = vmatpush.bf16.msra.mxu2 %v11123_v16  ;;  %v19671_v16 = vpop.f32.mrf.mxu3  ;;  %v11435_v20 = vor.u32 %v11875_v5, %v11432_v57  ;;  %v11480_v47 = vld [vmem:[%s13609_s23 + $0x3d8] sm:$0xf0]  ;;  %v11867_v5 = vld [vmem:[%s13609_s23 + $0x334] sm:$0xf] }
 0xcaf   : > { %9195 = vmatmul.bf16.gmra.mxu3 %v19641_v9  ;;  %9322 = vmatpush.bf16.msrb.mxu0 %v11267_v54  ;;  %v11496_v54 = vld [vmem:[%s13609_s23 + $0x3f8] sm:$0xf0] }
 0xcb0   : > { %9219 = vmatmul.bf16.gmra.mxu0 %v20572_v0  ;;  %9351 = vmatpush.bf16.msrb.mxu1 %v11331_v46  ;;  %v11871_v46 = vld [vmem:[%s13609_s23 + $0x354] sm:$0xf]  ;;  %v11499_v61 = vor.u32 %v11891_v34, %v11496_v54  ;;  %v11889_v0 = vld [vmem:[%s13609_s23 + $0x3e4] sm:$0xf]  ;;  %v20576_v49 = vld [vmem:[#allocation75_spill] sm:$0xff] }
 0xcb1   : > { %9295 = vmatpush.bf16.msra.mxu3 %v11187_v33  ;;  %9248 = vmatmul.bf16.gmra.mxu1 %v20573_v21  ;;  %v11427_v33 = vor.u32 %v11873_v53, %v11424_v39  ;;  %v11491_v21 = vor.u32 %v11889_v0, %v11488_v3  ;;  %v11400_v57 = vld [vmem:[%s13609_s23 + $0x338] sm:$0xf0]  ;;  %v20577_v34 = vld [vmem:[#allocation73_spill] sm:$0xff]  ;;  %v11883_v0 = vld [vmem:[%s13609_s23 + $0x3b4] sm:$0xf] }
 0xcb2   : > { %9375 = vmatpush.bf16.msrb.mxu2 %v11435_v20  ;;  %v11885_v20 = vld [vmem:[%s13609_s23 + $0x3c4] sm:$0xf]  ;;  %v11403_v53 = vor.u32 %v11867_v5, %v11400_v57  ;;  %v20578_v57 = vld [vmem:[#allocation74_spill] sm:$0xff] }
 0xcb3   : > { %9323 = vmatpush.bf16.msrb.mxu0 %v11259_v37  ;;  %v19675_v1 = vpop.f32.mrf.mxu2  ;;  %v11869_v37 = vld [vmem:[%s13609_s23 + $0x344] sm:$0xf] }
 0xcb4   : > { %9352 = vmatpush.bf16.msrb.mxu1 %v11323_v58  ;;  %v19673_v50 = vpop.f32.mrf.mxu1  ;;  %v11408_v58 = vld [vmem:[%s13609_s23 + $0x348] sm:$0xf0] }
 0xcb5   : > { %v19666_v59 = vpop.f32.mrf.mxu0  ;;  %9404 = vmatpush.bf16.msrb.mxu3 %v11499_v61  ;;  %v11392_v61 = vld [vmem:[%s13609_s23 + $0x328] sm:$0xf0] }
 0xcb6   : > { %v19690_v2 = vpop.f32.mrf.mxu3  ;;  %9376 = vmatpush.bf16.msrb.mxu2 %v11427_v33 }
 0xcb7   : > { %9324 = vmatpush.bf16.msrb.mxu0 %v11251_v38 }
 0xcb8   : > { %9267 = vmatmul.bf16.vlgmr.msra.gmra.mxu2 %v20574_v56  ;;  %9353 = vmatpush.bf16.msrb.mxu1 %v11315_v29  ;;  %v11411_v29 = vor.u32 %v11869_v37, %v11408_v58  ;;  %v11483_v56 = vor.u32 %v11887_v36, %v11480_v47  ;;  %v11384_v37 = vld [vmem:[%s13609_s23 + $0x318] sm:$0xf0]  ;;  %v11881_v36 = vld [vmem:[%s13609_s23 + $0x3a4] sm:$0xf]  ;;  %v11456_v47 = vld [vmem:[%s13609_s23 + $0x3a8] sm:$0xf0] }
 0xcb9   : > { %9405 = vmatpush.bf16.msrb.mxu3 %v11491_v21  ;;  %v11863_v21 = vld [vmem:[%s13609_s23 + $0x314] sm:$0xf] }
 0xcbb   : > { %v19698_v48 = vpop.f32.mrf.mxu2 }
 0xcbd   : > { %v19679_v28 = vpop.f32.mrf.mxu0  ;;  %9406 = vmatpush.bf16.msrb.mxu3 %v11483_v56  ;;  %v11376_v56 = vld [vmem:[%s13609_s23 + $0x308] sm:$0xf0] }
 0xcbe   : > { %v19707_v39 = vpop.f32.mrf.mxu3 }
 0xcbf   : > { %9296 = vmatmul.bf16.vlgmr.msra.gmra.mxu3 %v20575_v6  ;;  %v11472_v6 = vld [vmem:[%s13609_s23 + $0x3c8] sm:$0xf0] }
 0xcc0   : > { %9224 = vmatmul.bf16.gmra.mxu0 %v18361_v11  ;;  %v19692_v11 = vpop.f32.mrf.mxu1  ;;  %v11475_v33 = vor.u32 %v11885_v20, %v11472_v6  ;;  %v11879_v20 = vld [vmem:[%s13609_s23 + $0x394] sm:$0xf]  ;;  %v11448_v6 = vld [vmem:[%s13609_s23 + $0x398] sm:$0xf0] }
 0xcc1   : > { %9253 = vmatmul.bf16.gmra.mxu1 %v18365_v45  ;;  %v11419_v45 = vor.u32 %v11871_v46, %v11416_v19  ;;  %v11865_v19 = vld [vmem:[%s13609_s23 + $0x324] sm:$0xf] }
 0xcc2   : > { %9407 = vmatpush.bf16.msrb.mxu3 %v11475_v33  ;;  %v11395_v3 = vor.u32 %v11865_v19, %v11392_v61  ;;  %v11451_v19 = vor.u32 %v11879_v20, %v11448_v6  ;;  %v11877_v61 = vld [vmem:[%s13609_s23 + $0x384] sm:$0xf] }
 0xcc3   : > { %9377 = vmatpush.bf16.msrb.mxu2 %v11419_v45  ;;  %v19713_v46 = vpop.f32.mrf.mxu2  ;;  %v11464_v45 = vld [vmem:[%s13609_s23 + $0x3b8] sm:$0xf0] }
 0xcc5   : > { %v19701_v38 = vpop.f32.mrf.mxu0 }
 0xcc6   : > { %v19728_v5 = vpop.f32.mrf.mxu3 }
 0xcc7   : > { %9378 = vmatpush.bf16.msrb.mxu2 %v11411_v29  ;;  %v11861_v29 = vld [vmem:[%s13609_s23 + $0x304] sm:$0xf] }
 0xcc8   : > { %9272 = vmatmul.bf16.gmra.mxu2 %v20576_v49  ;;  %v19710_v54 = vpop.f32.mrf.mxu1  ;;  %v11459_v49 = vor.u32 %v11881_v36, %v11456_v47  ;;  %v19744_v36 = vld [vmem:[%s831_s14] sm:$0x3]  ;;  %s9466_s14 = scalar_lea.sflag [#allocation4], %s13542_s29 }
 0xccb   : > { %9379 = vmatpush.bf16.msrb.mxu2 %v11403_v53  ;;  %v19733_v33 = vpop.f32.mrf.mxu2 }
 0xccd   : > { %v19722_v58 = vpop.f32.mrf.mxu0 }
 0xccf   : > { %9301 = vmatmul.bf16.gmra.mxu3 %v20577_v34  ;;  %9380 = vmatpush.bf16.msrb.mxu2 %v11395_v3  ;;  %v11379_v34 = vor.u32 %v11861_v29, %v11376_v56  ;;  %v20580_v56 = vld [vmem:[#allocation71_spill] sm:$0xff] }
 0xcd0   : > { %9325 = vmatmul.bf16.vlgmr.msrb.gmra.mxu0 %v18519_v40  ;;  %v11467_v40 = vor.u32 %v11883_v0, %v11464_v45  ;;  %v9125_v53 = vpop.f32.mrf.mxu1  ;;  %v11440_v0 = vld [vmem:[%s13609_s23 + $0x388] sm:$0xf0]  ;;  %v20579_v45 = vld [vmem:[#allocation72_spill] sm:$0xff]  ;;  %s13056_s23 = scalar_lea.hbm %s20598_s21, 256 }
 0xcd1   : > { %9354 = vmatmul.bf16.vlgmr.msrb.gmra.mxu1 %v18521_v63  ;;  %v11387_v63 = vor.u32 %v11863_v21, %v11384_v37  ;;  %v11443_v21 = vor.u32 %v11877_v61, %v11440_v0  ;;  %v19740_v37 = vpop.f32.mrf.mxu3  ;;  %p13058_p0 = scmp.lt.s32.totalorder %s13056_s23, %s13052_s1 }
 0xcd2   : > { %9408 = vmatpush.bf16.msrb.mxu3 %v11467_v40 }
 0xcd3   : > { %9381 = vmatpush.bf16.msrb.mxu2 %v11387_v63  ;;  %v19746_v47 = vpop.f32.mrf.mxu2  ;;  %p13059_p5 = por %p13058_p0, %p13057_p13 }
 0xcd5   : > { %v9099_v3 = vpop.f32.mrf.mxu0  ;;  %p13060_p8 = pnand %p13059_p5, %p13055_p12 }
 0xcd6   : > { %9409 = vmatpush.bf16.msrb.mxu3 %v11459_v49  ;;  %v19749_v49 = vperm.slane %v19744_v36, 0 }
 0xcd7   : > { %9382 = vmatpush.bf16.msrb.mxu2 %v11379_v34 }
 0xcd8   : > { %9277 = vmatmul.bf16.gmra.mxu2 %v20578_v57  ;;  %v9128_v40 = vpop.f32.mrf.mxu1 }
 0xcd9   : > { %v19754_v29 = vpop.f32.mrf.mxu3 }
 0xcda   : > { %9410 = vmatpush.bf16.msrb.mxu3 %v11451_v19 }
 0xcdb   : > { %v19759_v57 = vpop.f32.mrf.mxu2 }
 0xcdd   : > { %v9101_v63 = vpop.f32.mrf.mxu0 }
 0xcde   : > { %9411 = vmatpush.bf16.msrb.mxu3 %v11443_v21 }
 0xcdf   : > { %9306 = vmatmul.bf16.gmra.mxu3 %v20579_v45 }
 0xce0   : > { %9330 = vmatmul.bf16.gmra.mxu0 %v18816_v35  ;;  %v8979_v35 = vadd.f32 %v19362_v12, %v19749_v49  ;;  %v8981_v12 = vadd.f32 %v19441_v52, %v19749_v49 }
 0xce1   : > { %9359 = vmatmul.bf16.gmra.mxu1 %v18820_v43  ;;  %v19756_v43 = vpop.f32.mrf.mxu1  ;;  %v19770_v19 = vpop.f32.mrf.mxu3 }
 0xce2   : > { %v9008_v20 = vadd.f32 %v19364_v30, %v8979_v35 }
 0xce5   : > { %v19763_v6 = vpop.f32.mrf.mxu0 }
 0xce8   : > { %9282 = vmatmul.bf16.gmra.mxu2 %v18394_v7  ;;  %v9037_v7 = vadd.f32 %v19637_v8, %v9008_v20 }
 0xce9   : > { %v19772_v61 = vpop.f32.mrf.mxu1 }
 0xcea   : > { %v9066_v34 = vadd.f32 %v19655_v14, %v9037_v7  ;;  %v8984_v14 = vadd.f32 %v19505_v18, %v19749_v49 }
 0xcec   : > { %v9095_v30 = vadd.f32 %v19701_v38, %v9066_v34  ;;  %v9013_v35 = vadd.f32 %v19507_v10, %v8984_v14 }
 0xced   : > { %v19778_v45 = vpop.f32.mrf.mxu0 }
 0xcee   : > { %v9124_v8 = vadd.f32 %v19710_v54, %v9095_v30  ;;  %v9042_v18 = vadd.f32 %v19675_v1, %v9013_v35 }
 0xcef   : > { %9311 = vmatmul.bf16.gmra.mxu3 %v20580_v56 }
 0xcf0   : > { %9335 = vmatmul.bf16.gmra.mxu0 %v19017_v24  ;;  %v9010_v24 = vadd.f32 %v19443_v32, %v8981_v12  ;;  %v9071_v12 = vadd.f32 %v19690_v2, %v9042_v18 }
 0xcf1   : > { %9364 = vmatmul.bf16.gmra.mxu1 %v19036_v13 }
 0xcf2   : > { %v9039_v13 = vadd.f32 %v19662_v31, %v9010_v24  ;;  %v19787_v31 = vpop.f32.mrf.mxu1  ;;  %v9100_v34 = vadd.f32 %v9099_v3, %v9071_v12  ;;  %v20585_v12 = vld [vmem:[#allocation57_spill] sm:$0xff] }
 0xcf4   : > { %v9068_v52 = vadd.f32 %v19671_v16, %v9039_v13  ;;  %v20581_v16 = vld [vmem:[#allocation52_spill] sm:$0xff]  ;;  %v9129_v13 = vadd.f32 %v9128_v40, %v9100_v34 }
 0xcf6   : > { %v9152_v0 = vpop.f32.mrf.mxu2 }
 0xcf7   : > { %v9153_v21 = vadd.f32 %v9152_v0, %v9124_v8  ;;  %v20582_v0 = vld [vmem:[#allocation61_spill] sm:$0xff] }
 0xcf8   : > { %9383 = vmatmul.bf16.vlgmr.msrb.gmra.mxu2 %v19129_v26  ;;  %v9097_v26 = vadd.f32 %v19722_v58, %v9068_v52 }
 0xcfa   : > { %v9126_v20 = vadd.f32 %v9125_v53, %v9097_v26  ;;  %v9138_v24 = vpop.f32.mrf.mxu1 }
 0xcfe   : > { %v9181_v32 = vpop.f32.mrf.mxu3  ;;  %v9154_v54 = vpop.f32.mrf.mxu2 }
 0xcff   : > { %9412 = vmatmul.bf16.vlgmr.msrb.gmra.mxu3 %v19184_v15  ;;  %v9182_v38 = vadd.f32 %v9181_v32, %v9153_v21  ;;  %v19794_v15 = vpop.f32.mrf.mxu0  ;;  %v9155_v58 = vadd.f32 %v9154_v54, %v9126_v20  ;;  %v20583_v32 = vld [vmem:[#allocation50_spill] sm:$0xff] }
 0xd00   : > { %9340 = vmatmul.bf16.gmra.mxu0 %v19150_v60  ;;  %v8986_v60 = vadd.f32 %v19571_v25, %v19749_v49  ;;  %v8989_v25 = vadd.f32 %v19626_v17, %v19749_v49  ;;  %v8991_v17 = vadd.f32 %v19648_v41, %v19749_v49 }
 0xd01   : > { %9369 = vmatmul.bf16.gmra.mxu1 %v19222_v44  ;;  %v9433_v56 = vadd.f32 %v9182_v38, %v20581_v16 }
 0xd02   : > { %v9015_v10 = vadd.f32 %v19573_v4, %v8986_v60  ;;  %v9018_v3 = vadd.f32 %v19631_v62, %v8989_v25  ;;  %v9140_v38 = vpop.f32.mrf.mxu1 }
 0xd03   : > { %9449 = vst [vmem:[%s13618_s25] sm:$0xff] %v9433_v56  ;;  %v20584_v56 = vld [vmem:[#allocation49_spill] sm:$0xff] }
 0xd04   : > { %v9044_v30 = vadd.f32 %v19698_v48, %v9015_v10  ;;  %v9047_v48 = vadd.f32 %v19713_v46, %v9018_v3  ;;  %v9020_v46 = vadd.f32 %v19658_v22, %v8991_v17 }
 0xd06   : > { %v9183_v7 = vpop.f32.mrf.mxu3  ;;  %v9049_v41 = vadd.f32 %v19733_v33, %v9020_v46 }
 0xd07   : > { %v9184_v44 = vadd.f32 %v9183_v7, %v9155_v58  ;;  %v9111_v2 = vpop.f32.mrf.mxu0 }
 0xd08   : > { %9388 = vmatmul.bf16.gmra.mxu2 %v19360_v23  ;;  %v9073_v23 = vadd.f32 %v19707_v39, %v9044_v30  ;;  %v9076_v39 = vadd.f32 %v19728_v5, %v9047_v48  ;;  %v9078_v22 = vadd.f32 %v19740_v37, %v9049_v41 }
 0xd09   : > { %v9435_v1 = vadd.f32 %v9184_v44, %v20582_v0 }
 0xd0a   : > { %v9102_v52 = vadd.f32 %v9101_v63, %v9073_v23  ;;  %v9105_v54 = vadd.f32 %v19763_v6, %v9076_v39  ;;  %v9107_v33 = vadd.f32 %v19778_v45, %v9078_v22 }
 0xd0b   : > { %v9157_v53 = vpop.f32.mrf.mxu2  ;;  %9451 = vst [vmem:[%s13618_s25 + $0x10] sm:$0xff] %v9435_v1 }
 0xd0c   : > { %v9158_v8 = vadd.f32 %v9157_v53, %v9129_v13  ;;  %v9134_v5 = vadd.f32 %v19772_v61, %v9105_v54  ;;  %v9136_v37 = vadd.f32 %v19787_v31, %v9107_v33  ;;  %v19883_v33 = vperm.slane %v19744_v36, 1 }
 0xd0f   : > { %9417 = vmatmul.bf16.gmra.mxu3 %v19414_v27  ;;  %v9131_v27 = vadd.f32 %v19756_v43, %v9102_v52  ;;  %v19817_v62 = vpop.f32.mrf.mxu0  ;;  %v8994_v43 = vadd.f32 %v19666_v59, %v19749_v49 }
 0xd11   : > { %v9023_v60 = vadd.f32 %v19673_v50, %v8994_v43 }
 0xd12   : > { %v9186_v4 = vpop.f32.mrf.mxu3 }
 0xd13   : > { %v9187_v14 = vadd.f32 %v9186_v4, %v9158_v8  ;;  %v9159_v21 = vpop.f32.mrf.mxu2  ;;  %v9052_v61 = vadd.f32 %v19746_v47, %v9023_v60  ;;  %v20587_v4 = vld [vmem:[#allocation64_spill] sm:$0xff] }
 0xd14   : > { %v9160_v40 = vadd.f32 %v9159_v21, %v9131_v27 }
 0xd15   : > { %v9437_v26 = vadd.f32 %v9187_v14, %v20583_v32  ;;  %v9081_v10 = vadd.f32 %v19754_v29, %v9052_v61  ;;  %v20588_v32 = vld [vmem:[#allocation56_spill] sm:$0xff] }
 0xd17   : > { %9453 = vst [vmem:[%s13618_s25 + $0x20] sm:$0xff] %v9437_v26  ;;  %v19833_v7 = vpop.f32.mrf.mxu0  ;;  %v9110_v47 = vadd.f32 %v19794_v15, %v9081_v10 }
 0xd18   : > { %9393 = vmatmul.bf16.gmra.mxu2 %v19486_v42  ;;  %v19828_v42 = vpop.f32.mrf.mxu1  ;;  %v9213_v10 = vadd.f32 %v19833_v7, %v19883_v33 }
 0xd19   : > { %v9139_v25 = vadd.f32 %v9138_v24, %v9110_v47 }
 0xd1a   : > { %v9188_v63 = vpop.f32.mrf.mxu3 }
 0xd1b   : > { %v9189_v35 = vadd.f32 %v9188_v63, %v9160_v40  ;;  %v9162_v16 = vpop.f32.mrf.mxu2 }
 0xd1c   : > { %v9163_v6 = vadd.f32 %v9162_v16, %v9134_v5 }
 0xd1d   : > { %v9439_v18 = vadd.f32 %v9189_v35, %v20584_v56 }
 0xd1f   : > { %9455 = vst [vmem:[%s13618_s25 + $0x30] sm:$0xff] %v9439_v18  ;;  %9422 = vmatmul.bf16.gmra.mxu3 %v19527_v55  ;;  %v8996_v55 = vadd.f32 %v19679_v28, %v19749_v49  ;;  %v20586_v49 = vld [vmem:[#allocation62_spill] sm:$0xff]  ;;  %v9215_v30 = vpop.f32.mrf.mxu0 }
 0xd20   : > { %v19843_v45 = vpop.f32.mrf.mxu1 }
 0xd21   : > { %v9025_v0 = vadd.f32 %v19692_v11, %v8996_v55 }
 0xd22   : > { %v9191_v20 = vpop.f32.mrf.mxu3 }
 0xd23   : > { %v9192_v58 = vadd.f32 %v9191_v20, %v9163_v6  ;;  %v9164_v59 = vpop.f32.mrf.mxu2  ;;  %v9054_v28 = vadd.f32 %v19759_v57, %v9025_v0 }
 0xd24   : > { %v9165_v50 = vadd.f32 %v9164_v59, %v9136_v37  ;;  %v9211_v59 = vadd.f32 %v19817_v62, %v19883_v33 }
 0xd25   : > { %v9441_v44 = vadd.f32 %v9192_v58, %v20585_v12 }
 0xd26   : > { %v9240_v55 = vadd.f32 %v19828_v42, %v9211_v59 }
 0xd27   : > { %9457 = vst [vmem:[%s13618_s25 + $0x40] sm:$0xff] %v9441_v44  ;;  %v9217_v57 = vpop.f32.mrf.mxu0 }
 0xd28   : > { %9398 = vmatmul.bf16.gmra.mxu2 %v19618_v51  ;;  %v9083_v51 = vadd.f32 %v19770_v19, %v9054_v28  ;;  %v9244_v15 = vpop.f32.mrf.mxu1 }
 0xd2a   : > { %v9193_v34 = vpop.f32.mrf.mxu3  ;;  %v9112_v11 = vadd.f32 %v9111_v2, %v9083_v51 }
 0xd2b   : > { %v9194_v1 = vadd.f32 %v9193_v34, %v9165_v50  ;;  %v9167_v53 = vpop.f32.mrf.mxu2 }
 0xd2c   : > { %v9168_v29 = vadd.f32 %v9167_v53, %v9139_v25  ;;  %v9141_v52 = vadd.f32 %v9140_v38, %v9112_v11 }
 0xd2d   : > { %v9443_v31 = vadd.f32 %v9194_v1, %v20586_v49  ;;  %v9242_v1 = vadd.f32 %v19843_v45, %v9213_v10  ;;  %v9216_v49 = vadd.f32 %v9215_v30, %v19883_v33 }
 0xd2f   : > { %9459 = vst [vmem:[%s13618_s25 + $0x50] sm:$0xff] %v9443_v31  ;;  %9427 = vmatmul.bf16.gmra.mxu3 %v19641_v9  ;;  %v19856_v19 = vpop.f32.mrf.mxu0  ;;  %v9245_v11 = vadd.f32 %v9244_v15, %v9216_v49 }
 0xd30   : > { %v9246_v26 = vpop.f32.mrf.mxu1 }
 0xd32   : > { %v9196_v13 = vpop.f32.mrf.mxu3 }
 0xd33   : > { %v9197_v23 = vadd.f32 %v9196_v13, %v9168_v29  ;;  %v9169_v8 = vpop.f32.mrf.mxu2 }
 0xd34   : > { %v9170_v14 = vadd.f32 %v9169_v8, %v9141_v52  ;;  %v9218_v52 = vadd.f32 %v9217_v57, %v19883_v33 }
 0xd35   : > { %v9445_v3 = vadd.f32 %v9197_v23, %v20587_v4  ;;  %v20589_v23 = vld [vmem:[#allocation58_spill] sm:$0xff] }
 0xd37   : > { %9461 = vst [vmem:[%s13618_s25 + $0x60] sm:$0xff] %v9445_v3  ;;  %v19860_v40 = vpop.f32.mrf.mxu0 }
 0xd38   : > { %v19858_v27 = vpop.f32.mrf.mxu1 }
 0xd3a   : > { %v9198_v21 = vpop.f32.mrf.mxu3 }
 0xd3b   : > { %v9199_v24 = vadd.f32 %v9198_v21, %v9170_v14  ;;  %v9268_v48 = vpop.f32.mrf.mxu2 }
 0xd3c   : > { %v9269_v37 = vadd.f32 %v9268_v48, %v9240_v55 }
 0xd3d   : > { %v9447_v9 = vadd.f32 %v9199_v24, %v20588_v32 }
 0xd3f   : > { %9463 = vst [vmem:[%s13618_s25 + $0x70] sm:$0xff] %v9447_v9  ;;  %v19864_v35 = vpop.f32.mrf.mxu0  ;;  %v9247_v9 = vadd.f32 %v9246_v26, %v9218_v52  ;;  %v20591_v26 = vld [vmem:[#allocation54_spill] sm:$0xff] }
 0xd40   : > { %v19862_v63 = vpop.f32.mrf.mxu1 }
 0xd42   : > { %v9297_v17 = vpop.f32.mrf.mxu3 }
 0xd43   : > { %v9270_v2 = vpop.f32.mrf.mxu2  ;;  %v9298_v50 = vadd.f32 %v9297_v17, %v9269_v37  ;;  %v20590_v17 = vld [vmem:[#allocation60_spill] sm:$0xff] }
 0xd44   : > { %v9271_v53 = vadd.f32 %v9270_v2, %v9242_v1 }
 0xd47   : > { %v19870_v18 = vpop.f32.mrf.mxu0 }
 0xd48   : > { %v19866_v41 = vpop.f32.mrf.mxu1 }
 0xd4a   : > { %v9299_v39 = vpop.f32.mrf.mxu3 }
 0xd4b   : > { %v9273_v38 = vpop.f32.mrf.mxu2  ;;  %v9300_v31 = vadd.f32 %v9299_v39, %v9271_v53 }
 0xd4c   : > { %v9274_v4 = vadd.f32 %v9273_v38, %v9245_v11  ;;  %v9221_v38 = vadd.f32 %v19856_v19, %v19883_v33  ;;  %v9223_v19 = vadd.f32 %v19860_v40, %v19883_v33  ;;  %v9226_v40 = vadd.f32 %v19864_v35, %v19883_v33 }
 0xd4d   : > { %v9228_v35 = vadd.f32 %v19870_v18, %v19883_v33 }
 0xd4e   : > { %v9250_v10 = vadd.f32 %v19858_v27, %v9221_v38  ;;  %v9252_v27 = vadd.f32 %v19862_v63, %v9223_v19  ;;  %v9255_v63 = vadd.f32 %v19866_v41, %v9226_v40 }
 0xd4f   : > { %v9326_v6 = vpop.f32.mrf.mxu0 }
 0xd50   : > { %v19876_v22 = vpop.f32.mrf.mxu1  ;;  %v9327_v36 = vadd.f32 %v9326_v6, %v9298_v50 }
 0xd52   : > { %v9302_v46 = vpop.f32.mrf.mxu3 }
 0xd53   : > { %v9275_v54 = vpop.f32.mrf.mxu2  ;;  %v9303_v14 = vadd.f32 %v9302_v46, %v9274_v4 }
 0xd54   : > { %v9276_v15 = vadd.f32 %v9275_v54, %v9247_v9 }
 0xd57   : > { %v9328_v12 = vpop.f32.mrf.mxu0 }
 0xd58   : > { %v9355_v58 = vpop.f32.mrf.mxu1  ;;  %v9329_v51 = vadd.f32 %v9328_v12, %v9300_v31  ;;  %v20592_v31 = vld [vmem:[#allocation55_spill] sm:$0xff] }
 0xd59   : > { %v9356_v28 = vadd.f32 %v9355_v58, %v9327_v36 }
 0xd5a   : > { %v9304_v16 = vpop.f32.mrf.mxu3 }
 0xd5b   : > { %v19868_v56 = vpop.f32.mrf.mxu2  ;;  %v9305_v58 = vadd.f32 %v9304_v16, %v9276_v15 }
 0xd5f   : > { %v9331_v62 = vpop.f32.mrf.mxu0 }
 0xd60   : > { %v9357_v34 = vpop.f32.mrf.mxu1  ;;  %v9332_v24 = vadd.f32 %v9331_v62, %v9303_v14 }
 0xd61   : > { %v9358_v3 = vadd.f32 %v9357_v34, %v9329_v51  ;;  %v9279_v34 = vadd.f32 %v19868_v56, %v9250_v10 }
 0xd62   : > { %v19872_v43 = vpop.f32.mrf.mxu3 }
 0xd63   : > { %v19874_v5 = vpop.f32.mrf.mxu2  ;;  %v9308_v16 = vadd.f32 %v19872_v43, %v9279_v34 }
 0xd64   : > { %v9281_v56 = vadd.f32 %v19874_v5, %v9252_v27 }
 0xd67   : > { %v9333_v45 = vpop.f32.mrf.mxu0 }
 0xd68   : > { %v9360_v7 = vpop.f32.mrf.mxu1  ;;  %v9334_v12 = vadd.f32 %v9333_v45, %v9305_v58 }
 0xd69   : > { %v9361_v6 = vadd.f32 %v9360_v7, %v9332_v24 }
 0xd6a   : > { %v19878_v20 = vpop.f32.mrf.mxu3 }
 0xd6b   : > { %v19880_v60 = vpop.f32.mrf.mxu2  ;;  %v9310_v43 = vadd.f32 %v19878_v20, %v9281_v56 }
 0xd6c   : > { %v9284_v5 = vadd.f32 %v19880_v60, %v9255_v63 }
 0xd6f   : > { %v9336_v57 = vpop.f32.mrf.mxu0 }
 0xd70   : > { %v9362_v39 = vpop.f32.mrf.mxu1  ;;  %v9337_v62 = vadd.f32 %v9336_v57, %v9308_v16 }
 0xd71   : > { %v9363_v54 = vadd.f32 %v9362_v39, %v9334_v12 }
 0xd72   : > { %v19887_v61 = vpop.f32.mrf.mxu3 }
 0xd73   : > { %v19889_v44 = vpop.f32.mrf.mxu2  ;;  %v9313_v20 = vadd.f32 %v19887_v61, %v9284_v5 }
 0xd78   : > { %v9365_v36 = vpop.f32.mrf.mxu1 }
 0xd7a   : > { %v19894_v0 = vpop.f32.mrf.mxu3 }
 0xd7b   : > { %v9384_v47 = vpop.f32.mrf.mxu2 }
 0xd7c   : > { %v9385_v42 = vadd.f32 %v9384_v47, %v9356_v28  ;;  %v9338_v28 = vpop.f32.mrf.mxu0 }
 0xd82   : > { %v9413_v25 = vpop.f32.mrf.mxu3 }
 0xd83   : > { %v9414_v29 = vadd.f32 %v9413_v25, %v9385_v42  ;;  %v9386_v13 = vpop.f32.mrf.mxu2  ;;  %v9366_v25 = vadd.f32 %v9365_v36, %v9337_v62 }
 0xd84   : > { %v9387_v21 = vadd.f32 %v9386_v13, %v9358_v3  ;;  %v9339_v13 = vadd.f32 %v9338_v28, %v9310_v43  ;;  %v9341_v3 = vpop.f32.mrf.mxu0 }
 0xd85   : > { %v9434_v8 = vadd.f32 %v9414_v29, %v20589_v23  ;;  %v9367_v29 = vpop.f32.mrf.mxu1 }
 0xd86   : > { %v9368_v45 = vadd.f32 %v9367_v29, %v9339_v13 }
 0xd87   : > { %9450 = vst [vmem:[%s13618_s25 + $0x8] sm:$0xff] %v9434_v8  ;;  %v20593_v8 = vld [vmem:[#allocation53_spill] sm:$0xff] }
 0xd8a   : > { %v9415_v30 = vpop.f32.mrf.mxu3 }
 0xd8b   : > { %v9416_v48 = vadd.f32 %v9415_v30, %v9387_v21  ;;  %v9389_v32 = vpop.f32.mrf.mxu2  ;;  %v9342_v21 = vadd.f32 %v9341_v3, %v9313_v20 }
 0xd8c   : > { %v9390_v59 = vadd.f32 %v9389_v32, %v9361_v6  ;;  %v20595_v32 = vld [vmem:[#allocation63_spill] sm:$0xff]  ;;  %v9343_v18 = vpop.f32.mrf.mxu0 }
 0xd8d   : > { %v9436_v2 = vadd.f32 %v9416_v48, %v20590_v17  ;;  %v9370_v24 = vpop.f32.mrf.mxu1  ;;  %v9257_v48 = vadd.f32 %v19876_v22, %v9228_v35  ;;  %v20596_v6 = vld [vmem:[#allocation51_spill] sm:$0xff] }
 0xd8e   : > { %v9371_v17 = vadd.f32 %v9370_v24, %v9342_v21 }
 0xd8f   : > { %9452 = vst [vmem:[%s13618_s25 + $0x18] sm:$0xff] %v9436_v2  ;;  %v9286_v60 = vadd.f32 %v19889_v44, %v9257_v48 }
 0xd91   : > { %v9315_v33 = vadd.f32 %v19894_v0, %v9286_v60 }
 0xd92   : > { %v9418_v46 = vpop.f32.mrf.mxu3 }
 0xd93   : > { %v9419_v55 = vadd.f32 %v9418_v46, %v9390_v59  ;;  %v9391_v37 = vpop.f32.mrf.mxu2  ;;  %v9344_v39 = vadd.f32 %v9343_v18, %v9315_v33  ;;  %v20600_v46 = vld [vmem:[#allocation59_spill] sm:$0xff] }
 0xd94   : > { %v9392_v47 = vadd.f32 %v9391_v37, %v9363_v54 }
 0xd95   : > { %v9438_v50 = vadd.f32 %v9419_v55, %v20591_v26  ;;  %v9372_v38 = vpop.f32.mrf.mxu1 }
 0xd96   : > { %v9373_v44 = vadd.f32 %v9372_v38, %v9344_v39 }
 0xd97   : > { %9454 = vst [vmem:[%s13618_s25 + $0x28] sm:$0xff] %v9438_v50 }
 0xd9a   : > { %v9420_v1 = vpop.f32.mrf.mxu3 }
 0xd9b   : > { %v9421_v53 = vadd.f32 %v9420_v1, %v9392_v47  ;;  %v9394_v49 = vpop.f32.mrf.mxu2 }
 0xd9c   : > { %v9395_v51 = vadd.f32 %v9394_v49, %v9366_v25 }
 0xd9d   : > { %v9440_v42 = vadd.f32 %v9421_v53, %v20592_v31 }
 0xd9f   : > { %9456 = vst [vmem:[%s13618_s25 + $0x38] sm:$0xff] %v9440_v42 }
 0xda2   : > { %v9423_v7 = vpop.f32.mrf.mxu3 }
 0xda3   : > { %v9424_v11 = vadd.f32 %v9423_v7, %v9395_v51  ;;  %v9396_v23 = vpop.f32.mrf.mxu2 }
 0xda4   : > { %v9397_v52 = vadd.f32 %v9396_v23, %v9368_v45 }
 0xda5   : > { %v9442_v4 = vadd.f32 %v9424_v11, %v20593_v8 }
 0xda7   : > { %9458 = vst [vmem:[%s13618_s25 + $0x48] sm:$0xff] %v9442_v4 }
 0xdaa   : > { %v9425_v14 = vpop.f32.mrf.mxu3 }
 0xdab   : > { %v9426_v30 = vadd.f32 %v9425_v14, %v9397_v52  ;;  %v9399_v41 = vpop.f32.mrf.mxu2 }
 0xdac   : > { %v9400_v61 = vadd.f32 %v9399_v41, %v9371_v17 }
 0xdad   : > { %v9444_v9 = vadd.f32 %v9426_v30, %v20595_v32 }
 0xdaf   : > { %9460 = vst [vmem:[%s13618_s25 + $0x58] sm:$0xff] %v9444_v9 }
 0xdb2   : > { %v9428_v2 = vpop.f32.mrf.mxu3 }
 0xdb3   : > { %v9429_v15 = vadd.f32 %v9428_v2, %v9400_v61  ;;  %v9401_v58 = vpop.f32.mrf.mxu2 }
 0xdb4   : > { %v9402_v59 = vadd.f32 %v9401_v58, %v9373_v44 }
 0xdb5   : > { %v9446_v22 = vadd.f32 %v9429_v15, %v20596_v6 }
 0xdb7   : > { %9462 = vst [vmem:[%s13618_s25 + $0x68] sm:$0xff] %v9446_v22 }
 0xdba   : > { %v9430_v0 = vpop.f32.mrf.mxu3 }
 0xdbb   : > { %v9431_v57 = vadd.f32 %v9430_v0, %v9402_v59 }
 0xdbd   : > { %v9448_v12 = vadd.f32 %v9431_v57, %v20600_v46 }
 0xdbf   : > { %9464 = vst [vmem:[%s13618_s25 + $0x78] sm:$0xff] %v9448_v12 }
 0xdc0   : > { %13063 = shalt.err (!%p13060_p8)
}
 0xdc1   : > { %s13196_s29 = smov 256   ;;  %s13197_s25 = smov 16  }
 0xdc2   : > { %11926 = dma.vmem_to_hbm [thread:$0]  (%p13390_p4), %s9479_s4, 2048, %s9481_s26, %s9466_s14, %s13196_s29, %s13196_s29, %s13197_s25  }
 0xdc3 PF: > { %s20601_s8 = sld [smem:[#allocation38_spill]] }
 0xdc4   : > { %s20602_s18 = sld [smem:[#allocation34_spill]] }
 0xdc9   : > { %p11932_p2 = scmp.ge.s32.totalorder %s20601_s8, 2 }
 0xdca   : > { %s9495_s12 = sand.u32 1, %s20602_s18  }
 0xdcb   : > { %p11929_p1 = pnand %p11932_p2, %p13397_p10  ;;  %s9496_s3 = scalar_lea.sflag [#allocation4], %s9495_s12 }
 0xdcd   : > { %p11930_p3 = pneg %p11929_p1 }
 0xdcf   : > { %13137 = dma.done.wait (%p11930_p3), %s9496_s3, 2048  }
 0xdd0   : > { %13139 = vsyncadd (%p11930_p3), %s9496_s3, 4294965248  ;;  %s47_s18 = sadd.s32 1, %s20601_s8   ;;  %s20604_s25 = sld [smem:[#allocation32_spill]] }
 0xdd1   : > { %p44_p6 = scmp.ge.s32.totalorder %s47_s18, 26   ;;  %s20605_s26 = sld [smem:[#allocation33_spill]] }
 0xdd2   : > { %s20606_s27 = sld [smem:[#allocation43_spill]]  ;;  %s20611_s29 = smov %s13162_s30 }
 0xdd3   : > { %s20607_s28 = sld [smem:[#allocation35_spill]]  ;;  %s20613_s14 = smov %s13174_s16 }
 0xdd4   : > { %s20608_s19 = sld [smem:[#allocation44_spill]]  ;;  %s20614_s15 = smov %s13178_s17 }
 0xdd5   : > { %s20609_s22 = sld [smem:[#allocation40_spill]] }
 0xdd6   : > { %s20610_s4 = sld [smem:[#allocation41_spill]] }
 0xdd8   :  { %46 = sbr.rel (!%p44_p6) target bundleno = 30 (0x1e), region = 265 }
 0xdda   : > { %s20612_s30 = smov %s20608_s19 }
 0xddb   : > { %s20615_s16 = smov %s20609_s22 }
 0xddc   : > { %s20616_s17 = smov %s20610_s4 }
 0xddd   :  { %9502 = vsyncpa [#allocation3], 1 }
 0xdde   :  { %9504 = vsyncpa [#allocation3 + $0x1], 1 }
 0xddf   :  { %9505 = vsyncpa [#allocation6], 1 }
 0xde0   :  { %9507 = vsyncpa [#allocation6 + $0x1], 1 }
 0xde1   :  { %9508 = vsyncpa [#allocation9], 1 }
 0xde2   :  { %9510 = vsyncpa [#allocation9 + $0x1], 1 }
 0xde3   :  { %9511 = vsyncpa [#allocation12], 1 }
 0xde4   :  { %9513 = vsyncpa [#allocation12 + $0x1], 1 }
 0xde5   :  { %9514 = vsyncpa [#allocation15], 1 }
 0xde6   :  { %9516 = vsyncpa [#allocation15 + $0x1], 1 }
 0xde7   :  { %9517 = vsyncpa [#allocation18], 1 }
 0xde8   :  { %9519 = vsyncpa [#allocation18 + $0x1], 1 }
 0xde9   :  { %9520 = vsyncpa [#allocation21], 1 }
 0xdea   :  { %9522 = vsyncpa [#allocation21 + $0x1], 1 }
 0xdeb   :  { %9523 = vsyncpa [#allocation4], 1 }
 0xdec   :  { %9525 = vsyncpa [#allocation4 + $0x1], 1 }

</bundles_post_ra>
